<compile_context>
chip_gen: v6e
topology: v6e:2x2x1
jax: 0.10.0
libtpu: 0.0.40
codegen_flags: <defaults>
</compile_context>

<pallas_src>
import functools
import math

import jax
import jax.numpy as jnp
from jax import lax
from jax.experimental import pallas as pl
from jax.experimental.pallas import tpu as pltpu


# ---------------------------------------------------------------------------
# helpers
# ---------------------------------------------------------------------------

def _round_up(x, m):
    return ((x + m - 1) // m) * m


def _cparams(n_parallel, n_arbitrary=0):
    return pltpu.CompilerParams(
        dimension_semantics=("parallel",) * n_parallel
                            + ("arbitrary",) * n_arbitrary,
        vmem_limit_bytes=32 * 1024 * 1024)


# ---------------------------------------------------------------------------
# Pallas kernels
# ---------------------------------------------------------------------------

# ---- tiled matmul (bf16 MXU operands, f32 accumulation) --------------------

def _matmul_kernel(x_ref, w_ref, o_ref):
    o_ref[...] = jnp.dot(x_ref[...], w_ref[...],
                         preferred_element_type=jnp.float32)


def pl_matmul(x, w, tm=256):
    """(M, K) @ (K, N) -> (M, N) f32.  M-tiled, bf16 operands, N padded to a
    lane-dense multiple of 128 (sliced back afterwards)."""
    M, K = x.shape
    N = w.shape[1]
    Np = _round_up(N, 128)
    if Np != N:
        w = jnp.pad(w, ((0, 0), (0, Np - N)))
    tm_eff = min(tm, _round_up(M, 8))
    Mp = _round_up(M, tm_eff)
    if Mp != M:
        x = jnp.pad(x, ((0, Mp - M), (0, 0)))
    out = pl.pallas_call(
        _matmul_kernel,
        out_shape=jax.ShapeDtypeStruct((Mp, Np), jnp.float32),
        grid=(Mp // tm_eff,),
        in_specs=[pl.BlockSpec((tm_eff, K), lambda i: (i, 0)),
                  pl.BlockSpec((K, Np), lambda i: (0, 0))],
        out_specs=pl.BlockSpec((tm_eff, Np), lambda i: (i, 0)),
        compiler_params=_cparams(1),
    )(x.astype(jnp.bfloat16), w.astype(jnp.bfloat16))
    return out[:M, :N]


def pl_bmm(x, w, tm=256):
    """Batched matmul (G, M, K) @ (G, K, N) -> (G, M, N) f32 in one pallas_call
    (replaces the K separate per-direction projection launches)."""
    G, M, K = x.shape
    N = w.shape[2]
    Np = _round_up(N, 128)
    if Np != N:
        w = jnp.pad(w, ((0, 0), (0, 0), (0, Np - N)))
    tm_eff = min(tm, _round_up(M, 8))
    Mp = _round_up(M, tm_eff)
    if Mp != M:
        x = jnp.pad(x, ((0, 0), (0, Mp - M), (0, 0)))
    out = pl.pallas_call(
        _matmul_kernel,
        out_shape=jax.ShapeDtypeStruct((G, Mp, Np), jnp.float32),
        grid=(G, Mp // tm_eff),
        in_specs=[pl.BlockSpec((None, tm_eff, K), lambda g, i: (g, i, 0)),
                  pl.BlockSpec((None, K, Np), lambda g, i: (g, 0, 0))],
        out_specs=pl.BlockSpec((None, tm_eff, Np), lambda g, i: (g, i, 0)),
        compiler_params=_cparams(2),
    )(x.astype(jnp.bfloat16), w.astype(jnp.bfloat16))
    return out[:, :M, :N]


# ---- LayerNorm over the channel axis of a (M, C) token slab ----------------

def _layernorm_kernel(x_ref, w_ref, b_ref, o_ref, *, eps):
    x = x_ref[...]
    mu = jnp.mean(x, axis=-1, keepdims=True)
    xc = x - mu
    var = jnp.mean(xc * xc, axis=-1, keepdims=True)
    o_ref[...] = xc * lax.rsqrt(var + eps) * w_ref[...] + b_ref[...]


def pl_layernorm(x, w, b, eps=1e-5, tm=512):
    x = x.astype(jnp.float32)
    M, C = x.shape
    tm_eff = min(tm, _round_up(M, 8))
    Mp = _round_up(M, tm_eff)
    if Mp != M:
        x = jnp.pad(x, ((0, Mp - M), (0, 0)))
    out = pl.pallas_call(
        functools.partial(_layernorm_kernel, eps=eps),
        out_shape=jax.ShapeDtypeStruct((Mp, C), jnp.float32),
        grid=(Mp // tm_eff,),
        in_specs=[pl.BlockSpec((tm_eff, C), lambda i: (i, 0)),
                  pl.BlockSpec((1, C), lambda i: (0, 0)),
                  pl.BlockSpec((1, C), lambda i: (0, 0))],
        out_specs=pl.BlockSpec((tm_eff, C), lambda i: (i, 0)),
        compiler_params=_cparams(1),
    )(x, w.reshape(1, C).astype(jnp.float32), b.reshape(1, C).astype(jnp.float32))
    return out[:M]


# ---- fused out_norm + y*SiLU(z) gate + out_proj -----------------------------

def _norm_gate_proj_kernel(y_ref, z_ref, w_ref, b_ref, wo_ref, o_ref, *, eps):
    y = y_ref[...]
    mu = jnp.mean(y, axis=-1, keepdims=True)
    yc = y - mu
    var = jnp.mean(yc * yc, axis=-1, keepdims=True)
    yn = yc * lax.rsqrt(var + eps) * w_ref[...] + b_ref[...]
    z = z_ref[...]
    g = yn * (z * jax.nn.sigmoid(z))                      # f32 elementwise (v5e-safe)
    o_ref[...] = jnp.dot(g.astype(wo_ref.dtype), wo_ref[...],
                         preferred_element_type=jnp.float32)


def pl_norm_gate_proj(y, z, w, b, wo, eps=1e-5, tm=256):
    """out = LayerNorm(y) * SiLU(z) @ wo  -- one kernel, no HBM round-trips."""
    M, C = y.shape
    N = wo.shape[1]
    Np = _round_up(N, 128)
    if Np != N:
        wo = jnp.pad(wo, ((0, 0), (0, Np - N)))
    tm_eff = min(tm, _round_up(M, 8))
    Mp = _round_up(M, tm_eff)
    if Mp != M:
        y = jnp.pad(y, ((0, Mp - M), (0, 0)))
        z = jnp.pad(z, ((0, Mp - M), (0, 0)))
    out = pl.pallas_call(
        functools.partial(_norm_gate_proj_kernel, eps=eps),
        out_shape=jax.ShapeDtypeStruct((Mp, Np), jnp.float32),
        grid=(Mp // tm_eff,),
        in_specs=[pl.BlockSpec((tm_eff, C), lambda i: (i, 0)),
                  pl.BlockSpec((tm_eff, C), lambda i: (i, 0)),
                  pl.BlockSpec((1, C), lambda i: (0, 0)),
                  pl.BlockSpec((1, C), lambda i: (0, 0)),
                  pl.BlockSpec((C, Np), lambda i: (0, 0))],
        out_specs=pl.BlockSpec((tm_eff, Np), lambda i: (i, 0)),
        compiler_params=_cparams(1),
    )(y.astype(jnp.float32), z.astype(jnp.float32),
      w.reshape(1, C).astype(jnp.float32), b.reshape(1, C).astype(jnp.float32),
      wo.astype(jnp.bfloat16))
    return out[:M, :N]


# ---- depthwise 3x3 conv + bias + SiLU (fused, channels-last) ----------------

def _dwconv3_silu_kernel(xp_ref, w_ref, b_ref, o_ref, *, th):
    # xp_ref: (H+2, W+2, C)  w_ref: (9, C)  b_ref: (1, C)  o_ref: (H, W, C)
    H, W, C = o_ref.shape
    bias = b_ref[0, :][None, None, :]
    taps = [w_ref[i, :][None, None, :] for i in range(9)]
    nh = H // th

    def row_tile(r, carry):
        r0 = pl.multiple_of(r * th, th)
        acc = jnp.zeros((th, W, C), jnp.float32)
        for kh in range(3):
            for kw in range(3):
                acc = acc + xp_ref[pl.ds(r0 + kh, th), kw:kw + W, :] * taps[kh * 3 + kw]
        y = acc + bias
        o_ref[pl.ds(r0, th), :, :] = y * jax.nn.sigmoid(y)   # fused SiLU
        return carry

    lax.fori_loop(0, nh, row_tile, 0)


def pl_dwconv3_silu(x, w33c, bias):
    """Depthwise 3x3 conv (padding=1, groups=C) + bias + SiLU.  x: (B, C, H, W)."""
    B, C, H, W = x.shape
    xh = jnp.transpose(x, (0, 2, 3, 1)).astype(jnp.float32)     # NHWC (C on lanes)
    xp = jnp.pad(xh, ((0, 0), (1, 1), (1, 1), (0, 0)))
    th = 8 if H % 8 == 0 else H                                  # in-kernel row tile
    out = pl.pallas_call(
        functools.partial(_dwconv3_silu_kernel, th=th),
        out_shape=jax.ShapeDtypeStruct((B, H, W, C), jnp.float32),
        grid=(B,),
        in_specs=[pl.BlockSpec((None, H + 2, W + 2, C), lambda b: (b, 0, 0, 0)),
                  pl.BlockSpec((9, C), lambda b: (0, 0)),
                  pl.BlockSpec((1, C), lambda b: (0, 0))],
        out_specs=pl.BlockSpec((None, H, W, C), lambda b: (b, 0, 0, 0)),
        compiler_params=_cparams(1),
    )(xp, w33c.reshape(9, C).astype(jnp.float32),
      bias.reshape(1, C).astype(jnp.float32))
    return jnp.transpose(out, (0, 3, 1, 2))


# ---- selective scan: (B, K, d_inner) packed onto lanes, h carried in vregs --

def _scan_kernel(u_ref, d_ref, dtb_ref, A_ref, D_ref, B_ref, C_ref, y_ref, *,
                 nchunk, ch):
    # u_ref, d_ref, y_ref: (Lp, TN)   dtb_ref, D_ref: (1, TN)   A_ref: (ds, TN)
    # B_ref, C_ref: (Lp, ds, TN)  -- TN lanes pack the parallel (b, k, dn) axes.
    A = A_ref[...]
    dtb = dtb_ref[...]
    Dp = D_ref[...]
    nstate, TN = A.shape

    def chunk_body(c, h):
        t0 = pl.multiple_of(c * ch, ch)
        u_c = u_ref[pl.ds(t0, ch), :]            # contiguous sublane-row chunk loads
        d_c = d_ref[pl.ds(t0, ch), :]
        B_c = B_ref[pl.ds(t0, ch), :, :]
        C_c = C_ref[pl.ds(t0, ch), :, :]
        rows = []
        for i in range(ch):                      # unrolled; h stays in vregs
            u_t = u_c[i:i + 1, :]
            raw = d_c[i:i + 1, :] + dtb
            # numerically safe softplus: max(x,0) + log(1 + exp(-|x|))
            dlt = jnp.maximum(raw, 0.0) + jnp.log(1.0 + jnp.exp(-jnp.abs(raw)))
            h = jnp.exp(dlt * A) * h + B_c[i] * (dlt * u_t)
            rows.append(jnp.sum(h * C_c[i], axis=0, keepdims=True) + Dp * u_t)
        y_ref[pl.ds(t0, ch), :] = jnp.concatenate(rows, axis=0)  # one chunked store
        return h

    h0 = jnp.zeros((nstate, TN), jnp.float32)
    lax.fori_loop(0, nchunk, chunk_body, h0)


def pl_selective_scan(u, delta, dt_bias, A, Bs, Cs, Ds, chunk=8, lane_tile=128):
    """Mamba selective scan.
    u, delta: (B, K, L, dn);  Bs, Cs: (B, K, L, ds) (time-major);
    dt_bias, Ds: (K, dn);  A: (K, ds, dn).  Returns (B, K, L, dn) f32."""
    B, K, L, dn = u.shape
    ds = A.shape[1]
    N = B * K * dn
    Npad = _round_up(N, lane_tile)
    Lp = _round_up(L, chunk)                      # causal: padded tail is inert

    def pack_seq(x):                              # (B,K,L,dn) -> (Lp, Npad)
        x = jnp.transpose(x.astype(jnp.float32), (2, 0, 1, 3)).reshape(L, N)
        return jnp.pad(x, ((0, Lp - L), (0, Npad - N)))

    def pack_chan(x):                             # (K, dn) -> (1, Npad)
        x = jnp.broadcast_to(x.astype(jnp.float32)[None], (B, K, dn)).reshape(1, N)
        return jnp.pad(x, ((0, 0), (0, Npad - N)))

    def pack_state(x):                            # (B,K,L,ds) -> (Lp, ds, Npad)
        x = jnp.broadcast_to(x.astype(jnp.float32)[..., None], (B, K, L, ds, dn))
        x = jnp.transpose(x, (2, 3, 0, 1, 4)).reshape(L, ds, N)
        return jnp.pad(x, ((0, Lp - L), (0, 0), (0, Npad - N)))

    A_p = jnp.broadcast_to(A.astype(jnp.float32)[None], (B, K, ds, dn))
    A_p = jnp.transpose(A_p, (2, 0, 1, 3)).reshape(ds, N)
    A_p = jnp.pad(A_p, ((0, 0), (0, Npad - N)))

    out = pl.pallas_call(
        functools.partial(_scan_kernel, nchunk=Lp // chunk, ch=chunk),
        out_shape=jax.ShapeDtypeStruct((Lp, Npad), jnp.float32),
        grid=(Npad // lane_tile,),
        in_specs=[
            pl.BlockSpec((Lp, lane_tile), lambda n: (0, n)),
            pl.BlockSpec((Lp, lane_tile), lambda n: (0, n)),
            pl.BlockSpec((1, lane_tile), lambda n: (0, n)),
            pl.BlockSpec((ds, lane_tile), lambda n: (0, n)),
            pl.BlockSpec((1, lane_tile), lambda n: (0, n)),
            pl.BlockSpec((Lp, ds, lane_tile), lambda n: (0, 0, n)),
            pl.BlockSpec((Lp, ds, lane_tile), lambda n: (0, 0, n)),
        ],
        out_specs=pl.BlockSpec((Lp, lane_tile), lambda n: (0, n)),
        compiler_params=_cparams(1),
    )(pack_seq(u), pack_seq(delta), pack_chan(dt_bias), A_p, pack_chan(Ds),
      pack_state(Bs), pack_state(Cs))

    y = out[:L, :N].reshape(L, B, K, dn)
    return jnp.transpose(y, (1, 2, 0, 3))


# ---------------------------------------------------------------------------
# Plain-JAX glue (permutes / flips / resize / residuals)
# ---------------------------------------------------------------------------

def cross_scan(x, K):
    # x: (B, dn, H, W) -> (B, K, L, dn) directional sequences (time-major)
    B, dn, H, W = x.shape
    L = H * W
    x_row = x.reshape(B, dn, L)
    if K == 4:
        x_col = jnp.transpose(x, (0, 1, 3, 2)).reshape(B, dn, L)
        dirs = [x_row, x_col, x_row[..., ::-1], x_col[..., ::-1]]
    elif K == 2:
        dirs = [x_row, x_row[..., ::-1]]
    else:
        dirs = [x_row]
    xs = jnp.stack(dirs, axis=1)                 # (B, K, dn, L)
    return jnp.transpose(xs, (0, 1, 3, 2))       # (B, K, L, dn)


def cross_merge(ys, H, W):
    # ys: (B, K, L, dn) -> (B, L, dn) (row-major token order), summed over K
    B, K, L, dn = ys.shape
    ys = jnp.transpose(ys, (0, 1, 3, 2))         # (B, K, dn, L)

    def uncol(y):                                # column-major -> row-major
        return jnp.transpose(y.reshape(B, dn, W, H), (0, 1, 3, 2)).reshape(B, dn, L)

    if K == 4:
        y = (ys[:, 0] + uncol(ys[:, 1])
             + ys[:, 2, :, ::-1] + uncol(ys[:, 3, :, ::-1]))
    elif K == 2:
        y = ys[:, 0] + ys[:, 1, :, ::-1]
    else:
        y = ys[:, 0]
    return jnp.transpose(y, (0, 2, 1))           # (B, L, dn)


def bilinear_resize(x, out_h, out_w):
    # TODO(synk): bilinear interpolation (F.interpolate, align_corners=False)
    # kept in plain JAX (gather + lerp), not a Pallas hot path.
    B, C, H, W = x.shape
    if (H, W) == (out_h, out_w):
        return x

    def idx(out_size, in_size):
        i = jnp.arange(out_size, dtype=jnp.float32)
        src = (i + 0.5) * (in_size / out_size) - 0.5
        src = jnp.clip(src, 0.0, in_size - 1.0)
        lo = jnp.floor(src).astype(jnp.int32)
        hi = jnp.minimum(lo + 1, in_size - 1)
        frac = src - lo.astype(jnp.float32)
        return lo, hi, frac

    h0, h1, fh = idx(out_h, H)
    w0, w1, fw = idx(out_w, W)
    top = (x[:, :, h0, :] * (1.0 - fh)[None, None, :, None]
           + x[:, :, h1, :] * fh[None, None, :, None])
    out = (top[:, :, :, w0] * (1.0 - fw)[None, None, None, :]
           + top[:, :, :, w1] * fw[None, None, None, :])
    return out


def layernorm2d(x, w, b):
    # channel-first LayerNorm (over C at each spatial position)
    B, C, H, W = x.shape
    tok = jnp.transpose(x, (0, 2, 3, 1)).reshape(B * H * W, C)
    y = pl_layernorm(tok, w, b)
    return jnp.transpose(y.reshape(B, H, W, C), (0, 3, 1, 2))


# ---------------------------------------------------------------------------
# SS2D / Twister / VSSBlock / VSSLayer forward
# ---------------------------------------------------------------------------

def ss2d_forward(p, x):
    """SS2D forward (channel_first).  x: (B, Cin, H, W) -> (B, d_model, H, W)."""
    B, Cin, H, W = x.shape
    dn, ds, K = p['d_inner'], p['d_state'], p['K']
    L = H * W

    # in_proj (Linear2d == 1x1 conv == per-token matmul), split into x / z
    tok = jnp.transpose(x, (0, 2, 3, 1)).reshape(B * L, Cin)
    xz = pl_matmul(tok, p['in_proj_w_t'])                       # (B*L, 2*dn)
    xx, z = xz[:, :dn], xz[:, dn:]

    # depthwise 3x3 conv + SiLU
    xx = jnp.transpose(xx.reshape(B, H, W, dn), (0, 3, 1, 2))
    xx = pl_dwconv3_silu(xx, p['conv_w'], p['conv_b'])          # (B, dn, H, W)

    # cross-scan into K directions
    xs = cross_scan(xx, K)                                      # (B, K, L, dn)

    # one batched matmul gives [delta | B | C] per direction
    # (dt_proj o x_proj_dt composed into a single weight -> same math)
    xs_k = jnp.transpose(xs, (1, 0, 2, 3)).reshape(K, B * L, dn)
    dbl = pl_bmm(xs_k, p['proj_comb_w'])                        # (K, B*L, dn+2*ds)
    dbl = dbl.reshape(K, B, L, dn + 2 * ds)
    delta = jnp.transpose(dbl[..., :dn], (1, 0, 2, 3))          # (B, K, L, dn)
    Bs = jnp.transpose(dbl[..., dn:dn + ds], (1, 0, 2, 3))      # (B, K, L, ds)
    Cs = jnp.transpose(dbl[..., dn + ds:], (1, 0, 2, 3))        # (B, K, L, ds)

    A = -jnp.exp(p['A_log'])                                    # (K, ds, dn)
    ys = pl_selective_scan(xs, delta, p['dt_proj_b'], A, Bs, Cs, p['D'])

    y = cross_merge(ys, H, W).reshape(B * L, dn)                # (B*L, dn)
    out = pl_norm_gate_proj(y, z, p['out_norm_w'], p['out_norm_b'],
                            p['out_proj_w_t'])                  # (B*L, d_out)
    d_out = p['d_out']
    return jnp.transpose(out.reshape(B, H, W, d_out), (0, 3, 1, 2))


def twister_forward(p, xs):
    img, gcond, lcond = xs
    B, C, H, W = img.shape
    x = jnp.concatenate([img, gcond, lcond], axis=1)            # (B, 3C, H, W)
    x_prep = x
    r = p['input_res']
    x_mix = bilinear_resize(x, r, r)                            # (B, 3C, r, r)
    x_mix = x_mix.reshape(B, 3 * C, r * r)
    x_mix = jnp.transpose(x_mix, (0, 2, 1))[:, :, None, :]      # (B, r*r, 1, 3C)
    # TODO(synk): SS2D source is not provided; VMamba's 'v052d' variant is
    # approximated as the generic SS2D core with a 2-direction (fwd/bwd) scan.
    x_mix = ss2d_forward(p['ss1d'], x_mix)                      # (B, r*r, 1, 3C)
    x_mix = jnp.transpose(x_mix[:, :, 0, :], (0, 2, 1)).reshape(B, 3 * C, r, r)
    x_mix = bilinear_resize(x_mix, H, W)
    x = x_mix + x_prep
    out = ss2d_forward(p['ss2d'], x)                            # (B, C, H, W)
    return [out, gcond, lcond]


def vss_block_forward(p, xs):
    normed = [layernorm2d(t, p['ln_w'], p['ln_b']) for t in xs]
    outs = twister_forward(p['twister'], normed)
    # drop_path rate = 0.0  -> identity
    return [i + o for i, o in zip(xs, outs)]


def vss_layer_forward(params, xs, l_feat=None, l_mask=None):
    x = xs
    for bp in params['blocks']:
        x = vss_block_forward(bp, x)
    inner = x
    # downsample is None in this configuration
    return x, inner


# ---------------------------------------------------------------------------
# Deterministic parameter initialisation (kernel-ready layout)
# ---------------------------------------------------------------------------

def init_ss2d(key, d_model, in_dim, d_state, ssm_ratio, K):
    d_inner = int(ssm_ratio * d_model)
    dt_rank = max(1, math.ceil(d_model / 16))
    keys = jax.random.split(key, 6)
    lim = dt_rank ** -0.5
    u = jax.random.uniform(keys[4], (K, d_inner), jnp.float32)
    dt = jnp.exp(u * (math.log(0.1) - math.log(1e-3)) + math.log(1e-3))
    dt = jnp.maximum(dt, 1e-4)
    inv_dt = dt + jnp.log(-jnp.expm1(-dt))            # inverse softplus

    in_proj_w = jax.random.normal(keys[0], (2 * d_inner, in_dim), jnp.float32) * 0.02
    x_proj_w = jax.random.normal(keys[2], (K, dt_rank + 2 * d_state, d_inner),
                                 jnp.float32) * 0.02
    dt_proj_w = jax.random.uniform(keys[3], (K, d_inner, dt_rank), jnp.float32,
                                   -lim, lim)
    out_proj_w = jax.random.normal(keys[5], (d_model, d_inner), jnp.float32) * 0.02

    # Fused per-direction projection [delta | B | C]:
    #   delta = x @ (dt_proj_w @ x_proj_w[:dt_rank]).T   (mathematically identical)
    comb_dt = jnp.einsum('kor,krd->kdo', dt_proj_w, x_proj_w[:, :dt_rank, :])
    bc_t = jnp.transpose(x_proj_w[:, dt_rank:, :], (0, 2, 1))      # (K, dn, 2*ds)
    proj_comb_w = jnp.concatenate([comb_dt, bc_t], axis=-1)        # (K, dn, dn+2*ds)

    return {
        'd_inner': d_inner, 'd_state': d_state, 'dt_rank': dt_rank, 'K': K,
        'd_out': d_model,
        'in_proj_w_t': in_proj_w.T.astype(jnp.bfloat16),           # (in_dim, 2*dn)
        'conv_w': jax.random.normal(keys[1], (3, 3, d_inner), jnp.float32) * 0.1,
        'conv_b': jnp.zeros((d_inner,), jnp.float32),
        'proj_comb_w': proj_comb_w.astype(jnp.bfloat16),           # (K, dn, dn+2*ds)
        'dt_proj_b': inv_dt,
        'A_log': jnp.log(jnp.broadcast_to(
            jnp.arange(1, d_state + 1, dtype=jnp.float32)[None, :, None],
            (K, d_state, d_inner))),
        'D': jnp.ones((K, d_inner), jnp.float32),
        'out_norm_w': jnp.ones((d_inner,), jnp.float32),
        'out_norm_b': jnp.zeros((d_inner,), jnp.float32),
        'out_proj_w_t': out_proj_w.T.astype(jnp.bfloat16),         # (dn, d_model)
    }


def init_vss_layer(key, depth, dim, d_state, ssm_ratio=2.0, input_res=32):
    r = min(input_res, 16)
    blocks = []
    for _ in range(depth):
        key, k1, k2 = jax.random.split(key, 3)
        blocks.append({
            'ln_w': jnp.ones((dim,), jnp.float32),
            'ln_b': jnp.zeros((dim,), jnp.float32),
            'twister': {
                'input_res': r,
                # ss2d: in_proj replaced with Linear2d(3*dim -> 2*d_inner), 4-dir scan
                'ss2d': init_ss2d(k1, d_model=dim, in_dim=3 * dim,
                                  d_state=d_state, ssm_ratio=ssm_ratio, K=4),
                # ss1d: d_model = r*r, 2-direction scan ('v052d' approximation)
                'ss1d': init_ss2d(k2, d_model=r * r, in_dim=r * r,
                                  d_state=d_state, ssm_ratio=ssm_ratio, K=2),
            },
        })
    return {'blocks': blocks}


# ---------------------------------------------------------------------------
# Demo
# ---------------------------------------------------------------------------

if __name__ == "__main__":
    B, C, H, W = 2, 4, 16, 16        # small shapes; H=W=16 so interpolate is identity
    depth = 1
    d_state = 8

    params = init_vss_layer(jax.random.PRNGKey(1), depth=depth, dim=C,
                            d_state=d_state)

    key = jax.random.PRNGKey(0)
    k1, k2, k3 = jax.random.split(key, 3)
    img = jax.random.normal(k1, (B, C, H, W), jnp.float32)
    global_cond = jax.random.normal(k2, (B, C, H, W), jnp.float32)
    local_cond = jax.random.normal(k3, (B, C, H, W), jnp.float32)

    @jax.jit
    def run(i, g, l):
        return vss_layer_forward(params, [i, g, l], None, None)

    (x_out, inner) = run(img, global_cond, local_cond)
    jax.block_until_ready(x_out[0])
    assert all(o.shape == (B, C, H, W) for o in x_out)
    assert all(bool(jnp.all(jnp.isfinite(o))) for o in x_out)
    print("KERNEL_OK")
</pallas_src>

<mosaic_0001>
module attributes {stable_mosaic.version = 11 : i64} {
  func.func @_layernorm_kernel(%arg0: i32, %arg1: memref<512x4xf32, #tpu.memory_space<vmem>>, %arg2: memref<1x4xf32, #tpu.memory_space<vmem>>, %arg3: memref<1x4xf32, #tpu.memory_space<vmem>>, %arg4: memref<512x4xf32, #tpu.memory_space<vmem>>) attributes {dimension_semantics = [#tpu.dimension_semantics<parallel>], iteration_bounds = array<i64: 1>, scalar_prefetch = 0 : i64, scratch_operands = 0 : i64, tpu.core_type = #tpu.core_type<tc>, window_params = [{transform_indices = @transform_0, window_bounds = array<i64: 512, 4>}, {pipeline_mode = #tpu.pipeline_mode<synchronous>, transform_indices = @transform_1, window_bounds = array<i64: 1, 4>}, {pipeline_mode = #tpu.pipeline_mode<synchronous>, transform_indices = @transform_2, window_bounds = array<i64: 1, 4>}, {transform_indices = @transform_3, window_bounds = array<i64: 512, 4>}]} {
    %c0 = arith.constant 0 : index
    %c0_0 = arith.constant 0 : index
    %0 = vector.load %arg1[%c0, %c0_0] : memref<512x4xf32, #tpu.memory_space<vmem>>, vector<512x4xf32>
    %cst = arith.constant dense<0.000000e+00> : vector<512xf32>
    %1 = vector.multi_reduction <add>, %0, %cst [1] : vector<512x4xf32> to vector<512xf32>
    %2 = vector.shape_cast %1 : vector<512xf32> to vector<512x1xf32>
    %cst_1 = arith.constant 4.000000e+00 : f32
    %3 = vector.broadcast %cst_1 : f32 to vector<512x1xf32>
    %4 = arith.divf %2, %3 : vector<512x1xf32>
    %5 = vector.broadcast %4 : vector<512x1xf32> to vector<512x4xf32>
    %6 = arith.subf %0, %5 : vector<512x4xf32>
    %7 = arith.mulf %6, %6 : vector<512x4xf32>
    %cst_2 = arith.constant dense<0.000000e+00> : vector<512xf32>
    %8 = vector.multi_reduction <add>, %7, %cst_2 [1] : vector<512x4xf32> to vector<512xf32>
    %9 = vector.shape_cast %8 : vector<512xf32> to vector<512x1xf32>
    %cst_3 = arith.constant 4.000000e+00 : f32
    %10 = vector.broadcast %cst_3 : f32 to vector<512x1xf32>
    %11 = arith.divf %9, %10 : vector<512x1xf32>
    %cst_4 = arith.constant 9.99999974E-6 : f32
    %12 = vector.broadcast %cst_4 : f32 to vector<512x1xf32>
    %13 = arith.addf %11, %12 : vector<512x1xf32>
    %14 = math.rsqrt %13 : vector<512x1xf32>
    %15 = vector.broadcast %14 : vector<512x1xf32> to vector<512x4xf32>
    %16 = arith.mulf %6, %15 : vector<512x4xf32>
    %c0_5 = arith.constant 0 : index
    %c0_6 = arith.constant 0 : index
    %17 = vector.load %arg2[%c0_5, %c0_6] : memref<1x4xf32, #tpu.memory_space<vmem>>, vector<1x4xf32>
    %18 = vector.broadcast %17 : vector<1x4xf32> to vector<512x4xf32>
    %19 = arith.mulf %16, %18 : vector<512x4xf32>
    %c0_7 = arith.constant 0 : index
    %c0_8 = arith.constant 0 : index
    %20 = vector.load %arg3[%c0_7, %c0_8] : memref<1x4xf32, #tpu.memory_space<vmem>>, vector<1x4xf32>
    %21 = vector.broadcast %20 : vector<1x4xf32> to vector<512x4xf32>
    %22 = arith.addf %19, %21 : vector<512x4xf32>
    %c0_9 = arith.constant 0 : index
    %c0_10 = arith.constant 0 : index
    %23 = vector.load %arg4[%c0_9, %c0_10] : memref<512x4xf32, #tpu.memory_space<vmem>>, vector<512x4xf32>
    tpu.vector_store %arg4[%c0_9, %c0_10], %22 {strides = array<i32>} : memref<512x4xf32, #tpu.memory_space<vmem>>, vector<512x4xf32>,
    return
  }
  func.func @transform_0(%arg0: i32) -> (i32, i32) {
    %c0_i32 = arith.constant 0 : i32
    %c0_i32_0 = arith.constant 0 : i32
    return %arg0, %c0_i32 : i32, i32
  }
  func.func @transform_1(%arg0: i32) -> (i32, i32) {
    %c0_i32 = arith.constant 0 : i32
    %c0_i32_0 = arith.constant 0 : i32
    %c0_i32_1 = arith.constant 0 : i32
    return %c0_i32, %c0_i32_0 : i32, i32
  }
  func.func @transform_2(%arg0: i32) -> (i32, i32) {
    %c0_i32 = arith.constant 0 : i32
    %c0_i32_0 = arith.constant 0 : i32
    %c0_i32_1 = arith.constant 0 : i32
    return %c0_i32, %c0_i32_0 : i32, i32
  }
  func.func @transform_3(%arg0: i32) -> (i32, i32) {
    %c0_i32 = arith.constant 0 : i32
    %c0_i32_0 = arith.constant 0 : i32
    return %arg0, %c0_i32 : i32, i32
  }
}

module attributes {stable_mosaic.version = 11 : i64} {
  func.func @_matmul_kernel(%arg0: i32, %arg1: memref<24x256xbf16, #tpu.memory_space<vmem>>, %arg2: memref<256x1024xbf16, #tpu.memory_space<vmem>>, %arg3: memref<24x1024xf32, #tpu.memory_space<vmem>>) attributes {dimension_semantics = [#tpu.dimension_semantics<parallel>], iteration_bounds = array<i64: 1>, scalar_prefetch = 0 : i64, scratch_operands = 0 : i64, tpu.core_type = #tpu.core_type<tc>, window_params = [{transform_indices = @transform_0, window_bounds = array<i64: 24, 256>}, {pipeline_mode = #tpu.pipeline_mode<synchronous>, transform_indices = @transform_1, window_bounds = array<i64: 256, 1024>}, {transform_indices = @transform_2, window_bounds = array<i64: 24, 1024>}]} {
    %c0 = arith.constant 0 : index
    %c0_0 = arith.constant 0 : index
    %0 = vector.load %arg1[%c0, %c0_0] : memref<24x256xbf16, #tpu.memory_space<vmem>>, vector<24x256xbf16>
    %c0_1 = arith.constant 0 : index
    %c0_2 = arith.constant 0 : index
    %1 = vector.load %arg2[%c0_1, %c0_2] : memref<256x1024xbf16, #tpu.memory_space<vmem>>, vector<256x1024xbf16>
    %cst = arith.constant dense<0.000000e+00> : vector<24x1024xf32>
    %2 = tpu.matmul %0, %1, %cst {dimension_numbers = #tpu.dot_dimension_numbers<[1], [0], [0], [1], [0, 0, 1, 1], [], []>} : vector<24x256xbf16>, vector<256x1024xbf16>, vector<24x1024xf32> -> vector<24x1024xf32>
    %c0_3 = arith.constant 0 : index
    %c0_4 = arith.constant 0 : index
    %3 = vector.load %arg3[%c0_3, %c0_4] : memref<24x1024xf32, #tpu.memory_space<vmem>>, vector<24x1024xf32>
    tpu.vector_store %arg3[%c0_3, %c0_4], %2 {strides = array<i32>} : memref<24x1024xf32, #tpu.memory_space<vmem>>, vector<24x1024xf32>,
    return
  }
  func.func @transform_0(%arg0: i32) -> (i32, i32) {
    %c0_i32 = arith.constant 0 : i32
    %c0_i32_0 = arith.constant 0 : i32
    return %arg0, %c0_i32 : i32, i32
  }
  func.func @transform_1(%arg0: i32) -> (i32, i32) {
    %c0_i32 = arith.constant 0 : i32
    %c0_i32_0 = arith.constant 0 : i32
    %c0_i32_1 = arith.constant 0 : i32
    return %c0_i32, %c0_i32_0 : i32, i32
  }
  func.func @transform_2(%arg0: i32) -> (i32, i32) {
    %c0_i32 = arith.constant 0 : i32
    %c0_i32_0 = arith.constant 0 : i32
    return %arg0, %c0_i32 : i32, i32
  }
}

module attributes {stable_mosaic.version = 11 : i64} {
  func.func @_dwconv3_silu_kernel(%arg0: i32, %arg1: memref<1x3x14x512xf32, #tpu.memory_space<vmem>>, %arg2: memref<9x512xf32, #tpu.memory_space<vmem>>, %arg3: memref<1x512xf32, #tpu.memory_space<vmem>>, %arg4: memref<1x1x12x512xf32, #tpu.memory_space<vmem>>) attributes {dimension_semantics = [#tpu.dimension_semantics<parallel>], iteration_bounds = array<i64: 2>, scalar_prefetch = 0 : i64, scratch_operands = 0 : i64, tpu.core_type = #tpu.core_type<tc>, window_params = [{transform_indices = @transform_0, window_bounds = array<i64: 1, 3, 14, 512>}, {pipeline_mode = #tpu.pipeline_mode<synchronous>, transform_indices = @transform_1, window_bounds = array<i64: 9, 512>}, {pipeline_mode = #tpu.pipeline_mode<synchronous>, transform_indices = @transform_2, window_bounds = array<i64: 1, 512>}, {transform_indices = @transform_3, window_bounds = array<i64: 1, 1, 12, 512>}]} {
    %c0 = arith.constant 0 : index
    %c0_0 = arith.constant 0 : index
    %0 = vector.load %arg3[%c0, %c0_0] : memref<1x512xf32, #tpu.memory_space<vmem>>, vector<1x512xf32>
    %1 = vector.shape_cast %0 : vector<1x512xf32> to vector<512xf32>
    %2 = vector.shape_cast %1 : vector<512xf32> to vector<1x1x512xf32>
    %c0_1 = arith.constant 0 : index
    %c0_2 = arith.constant 0 : index
    %3 = vector.load %arg2[%c0_1, %c0_2] : memref<9x512xf32, #tpu.memory_space<vmem>>, vector<1x512xf32>
    %4 = vector.shape_cast %3 : vector<1x512xf32> to vector<512xf32>
    %5 = vector.shape_cast %4 : vector<512xf32> to vector<1x1x512xf32>
    %c1 = arith.constant 1 : index
    %c0_3 = arith.constant 0 : index
    %6 = vector.load %arg2[%c1, %c0_3] : memref<9x512xf32, #tpu.memory_space<vmem>>, vector<1x512xf32>
    %7 = vector.shape_cast %6 : vector<1x512xf32> to vector<512xf32>
    %8 = vector.shape_cast %7 : vector<512xf32> to vector<1x1x512xf32>
    %c2 = arith.constant 2 : index
    %c0_4 = arith.constant 0 : index
    %9 = vector.load %arg2[%c2, %c0_4] : memref<9x512xf32, #tpu.memory_space<vmem>>, vector<1x512xf32>
    %10 = vector.shape_cast %9 : vector<1x512xf32> to vector<512xf32>
    %11 = vector.shape_cast %10 : vector<512xf32> to vector<1x1x512xf32>
    %c3 = arith.constant 3 : index
    %c0_5 = arith.constant 0 : index
    %12 = vector.load %arg2[%c3, %c0_5] : memref<9x512xf32, #tpu.memory_space<vmem>>, vector<1x512xf32>
    %13 = vector.shape_cast %12 : vector<1x512xf32> to vector<512xf32>
    %14 = vector.shape_cast %13 : vector<512xf32> to vector<1x1x512xf32>
    %c4 = arith.constant 4 : index
    %c0_6 = arith.constant 0 : index
    %15 = vector.load %arg2[%c4, %c0_6] : memref<9x512xf32, #tpu.memory_space<vmem>>, vector<1x512xf32>
    %16 = vector.shape_cast %15 : vector<1x512xf32> to vector<512xf32>
    %17 = vector.shape_cast %16 : vector<512xf32> to vector<1x1x512xf32>
    %c5 = arith.constant 5 : index
    %c0_7 = arith.constant 0 : index
    %18 = vector.load %arg2[%c5, %c0_7] : memref<9x512xf32, #tpu.memory_space<vmem>>, vector<1x512xf32>
    %19 = vector.shape_cast %18 : vector<1x512xf32> to vector<512xf32>
    %20 = vector.shape_cast %19 : vector<512xf32> to vector<1x1x512xf32>
    %c6 = arith.constant 6 : index
    %c0_8 = arith.constant 0 : index
    %21 = vector.load %arg2[%c6, %c0_8] : memref<9x512xf32, #tpu.memory_space<vmem>>, vector<1x512xf32>
    %22 = vector.shape_cast %21 : vector<1x512xf32> to vector<512xf32>
    %23 = vector.shape_cast %22 : vector<512xf32> to vector<1x1x512xf32>
    %c7 = arith.constant 7 : index
    %c0_9 = arith.constant 0 : index
    %24 = vector.load %arg2[%c7, %c0_9] : memref<9x512xf32, #tpu.memory_space<vmem>>, vector<1x512xf32>
    %25 = vector.shape_cast %24 : vector<1x512xf32> to vector<512xf32>
    %26 = vector.shape_cast %25 : vector<512xf32> to vector<1x1x512xf32>
    %c8 = arith.constant 8 : index
    %c0_10 = arith.constant 0 : index
    %27 = vector.load %arg2[%c8, %c0_10] : memref<9x512xf32, #tpu.memory_space<vmem>>, vector<1x512xf32>
    %28 = vector.shape_cast %27 : vector<1x512xf32> to vector<512xf32>
    %29 = vector.shape_cast %28 : vector<512xf32> to vector<1x1x512xf32>
    %c0_i32 = arith.constant 0 : i32
    %c1_i32 = arith.constant 1 : i32
    %30 = arith.muli %c0_i32, %c1_i32 : i32
    %31 = tpu.assume_multiple %30, 1 : i32
    %cst = arith.constant 0.000000e+00 : f32
    %32 = vector.broadcast %cst : f32 to vector<1x12x512xf32>
    %c0_i32_11 = arith.constant 0 : i32
    %33 = arith.addi %31, %c0_i32_11 : i32
    %c0_12 = arith.constant 0 : index
    %34 = arith.index_cast %33 : i32 to index
    %c0_13 = arith.constant 0 : index
    %c0_14 = arith.constant 0 : index
    %35 = vector.load %arg1[%c0_12, %34, %c0_13, %c0_14] : memref<1x3x14x512xf32, #tpu.memory_space<vmem>>, vector<1x1x12x512xf32>
    %36 = vector.shape_cast %35 : vector<1x1x12x512xf32> to vector<1x12x512xf32>
    %37 = vector.broadcast %5 : vector<1x1x512xf32> to vector<1x12x512xf32>
    %38 = arith.mulf %36, %37 : vector<1x12x512xf32>
    %39 = arith.addf %32, %38 : vector<1x12x512xf32>
    %c0_i32_15 = arith.constant 0 : i32
    %40 = arith.addi %31, %c0_i32_15 : i32
    %c0_16 = arith.constant 0 : index
    %41 = arith.index_cast %40 : i32 to index
    %c1_17 = arith.constant 1 : index
    %c0_18 = arith.constant 0 : index
    %42 = vector.load %arg1[%c0_16, %41, %c1_17, %c0_18] : memref<1x3x14x512xf32, #tpu.memory_space<vmem>>, vector<1x1x12x512xf32>
    %43 = vector.shape_cast %42 : vector<1x1x12x512xf32> to vector<1x12x512xf32>
    %44 = vector.broadcast %8 : vector<1x1x512xf32> to vector<1x12x512xf32>
    %45 = arith.mulf %43, %44 : vector<1x12x512xf32>
    %46 = arith.addf %39, %45 : vector<1x12x512xf32>
    %c0_i32_19 = arith.constant 0 : i32
    %47 = arith.addi %31, %c0_i32_19 : i32
    %c0_20 = arith.constant 0 : index
    %48 = arith.index_cast %47 : i32 to index
    %c2_21 = arith.constant 2 : index
    %c0_22 = arith.constant 0 : index
    %49 = vector.load %arg1[%c0_20, %48, %c2_21, %c0_22] : memref<1x3x14x512xf32, #tpu.memory_space<vmem>>, vector<1x1x12x512xf32>
    %50 = vector.shape_cast %49 : vector<1x1x12x512xf32> to vector<1x12x512xf32>
    %51 = vector.broadcast %11 : vector<1x1x512xf32> to vector<1x12x512xf32>
    %52 = arith.mulf %50, %51 : vector<1x12x512xf32>
    %53 = arith.addf %46, %52 : vector<1x12x512xf32>
    %c1_i32_23 = arith.constant 1 : i32
    %54 = arith.addi %31, %c1_i32_23 : i32
    %c0_24 = arith.constant 0 : index
    %55 = arith.index_cast %54 : i32 to index
    %c0_25 = arith.constant 0 : index
    %c0_26 = arith.constant 0 : index
    %56 = vector.load %arg1[%c0_24, %55, %c0_25, %c0_26] : memref<1x3x14x512xf32, #tpu.memory_space<vmem>>, vector<1x1x12x512xf32>
    %57 = vector.shape_cast %56 : vector<1x1x12x512xf32> to vector<1x12x512xf32>
    %58 = vector.broadcast %14 : vector<1x1x512xf32> to vector<1x12x512xf32>
    %59 = arith.mulf %57, %58 : vector<1x12x512xf32>
    %60 = arith.addf %53, %59 : vector<1x12x512xf32>
    %c1_i32_27 = arith.constant 1 : i32
    %61 = arith.addi %31, %c1_i32_27 : i32
    %c0_28 = arith.constant 0 : index
    %62 = arith.index_cast %61 : i32 to index
    %c1_29 = arith.constant 1 : index
    %c0_30 = arith.constant 0 : index
    %63 = vector.load %arg1[%c0_28, %62, %c1_29, %c0_30] : memref<1x3x14x512xf32, #tpu.memory_space<vmem>>, vector<1x1x12x512xf32>
    %64 = vector.shape_cast %63 : vector<1x1x12x512xf32> to vector<1x12x512xf32>
    %65 = vector.broadcast %17 : vector<1x1x512xf32> to vector<1x12x512xf32>
    %66 = arith.mulf %64, %65 : vector<1x12x512xf32>
    %67 = arith.addf %60, %66 : vector<1x12x512xf32>
    %c1_i32_31 = arith.constant 1 : i32
    %68 = arith.addi %31, %c1_i32_31 : i32
    %c0_32 = arith.constant 0 : index
    %69 = arith.index_cast %68 : i32 to index
    %c2_33 = arith.constant 2 : index
    %c0_34 = arith.constant 0 : index
    %70 = vector.load %arg1[%c0_32, %69, %c2_33, %c0_34] : memref<1x3x14x512xf32, #tpu.memory_space<vmem>>, vector<1x1x12x512xf32>
    %71 = vector.shape_cast %70 : vector<1x1x12x512xf32> to vector<1x12x512xf32>
    %72 = vector.broadcast %20 : vector<1x1x512xf32> to vector<1x12x512xf32>
    %73 = arith.mulf %71, %72 : vector<1x12x512xf32>
    %74 = arith.addf %67, %73 : vector<1x12x512xf32>
    %c2_i32 = arith.constant 2 : i32
    %75 = arith.addi %31, %c2_i32 : i32
    %c0_35 = arith.constant 0 : index
    %76 = arith.index_cast %75 : i32 to index
    %c0_36 = arith.constant 0 : index
    %c0_37 = arith.constant 0 : index
    %77 = vector.load %arg1[%c0_35, %76, %c0_36, %c0_37] : memref<1x3x14x512xf32, #tpu.memory_space<vmem>>, vector<1x1x12x512xf32>
    %78 = vector.shape_cast %77 : vector<1x1x12x512xf32> to vector<1x12x512xf32>
    %79 = vector.broadcast %23 : vector<1x1x512xf32> to vector<1x12x512xf32>
    %80 = arith.mulf %78, %79 : vector<1x12x512xf32>
    %81 = arith.addf %74, %80 : vector<1x12x512xf32>
    %c2_i32_38 = arith.constant 2 : i32
    %82 = arith.addi %31, %c2_i32_38 : i32
    %c0_39 = arith.constant 0 : index
    %83 = arith.index_cast %82 : i32 to index
    %c1_40 = arith.constant 1 : index
    %c0_41 = arith.constant 0 : index
    %84 = vector.load %arg1[%c0_39, %83, %c1_40, %c0_41] : memref<1x3x14x512xf32, #tpu.memory_space<vmem>>, vector<1x1x12x512xf32>
    %85 = vector.shape_cast %84 : vector<1x1x12x512xf32> to vector<1x12x512xf32>
    %86 = vector.broadcast %26 : vector<1x1x512xf32> to vector<1x12x512xf32>
    %87 = arith.mulf %85, %86 : vector<1x12x512xf32>
    %88 = arith.addf %81, %87 : vector<1x12x512xf32>
    %c2_i32_42 = arith.constant 2 : i32
    %89 = arith.addi %31, %c2_i32_42 : i32
    %c0_43 = arith.constant 0 : index
    %90 = arith.index_cast %89 : i32 to index
    %c2_44 = arith.constant 2 : index
    %c0_45 = arith.constant 0 : index
    %91 = vector.load %arg1[%c0_43, %90, %c2_44, %c0_45] : memref<1x3x14x512xf32, #tpu.memory_space<vmem>>, vector<1x1x12x512xf32>
    %92 = vector.shape_cast %91 : vector<1x1x12x512xf32> to vector<1x12x512xf32>
    %93 = vector.broadcast %29 : vector<1x1x512xf32> to vector<1x12x512xf32>
    %94 = arith.mulf %92, %93 : vector<1x12x512xf32>
    %95 = arith.addf %88, %94 : vector<1x12x512xf32>
    %96 = vector.broadcast %2 : vector<1x1x512xf32> to vector<1x12x512xf32>
    %97 = arith.addf %95, %96 : vector<1x12x512xf32>
    %98 = arith.negf %97 : vector<1x12x512xf32>
    %99 = math.exp %98 : vector<1x12x512xf32>
    %cst_46 = arith.constant 1.000000e+00 : f32
    %100 = vector.broadcast %cst_46 : f32 to vector<1x12x512xf32>
    %101 = arith.addf %100, %99 : vector<1x12x512xf32>
    %102 = arith.divf %100, %101 : vector<1x12x512xf32>
    %103 = arith.mulf %97, %102 : vector<1x12x512xf32>
    %c0_47 = arith.constant 0 : index
    %104 = arith.index_cast %31 : i32 to index
    %c0_48 = arith.constant 0 : index
    %c0_49 = arith.constant 0 : index
    %105 = vector.load %arg4[%c0_47, %104, %c0_48, %c0_49] : memref<1x1x12x512xf32, #tpu.memory_space<vmem>>, vector<1x1x12x512xf32>
    %106 = vector.shape_cast %105 : vector<1x1x12x512xf32> to vector<1x12x512xf32>
    %107 = vector.shape_cast %103 : vector<1x12x512xf32> to vector<1x1x12x512xf32>
    tpu.vector_store %arg4[%c0_47, %104, %c0_48, %c0_49], %107 {strides = array<i32>} : memref<1x1x12x512xf32, #tpu.memory_space<vmem>>, vector<1x1x12x512xf32>,
    %c1_i32_50 = arith.constant 1 : i32
    return
  }
  func.func @transform_0(%arg0: i32) -> (i32, i32, i32, i32) {
    %c0_i32 = arith.constant 0 : i32
    %c0_i32_0 = arith.constant 0 : i32
    %c0_i32_1 = arith.constant 0 : i32
    %c0_i32_2 = arith.constant 0 : i32
    return %arg0, %c0_i32, %c0_i32_0, %c0_i32_1 : i32, i32, i32, i32
  }
  func.func @transform_1(%arg0: i32) -> (i32, i32) {
    %c0_i32 = arith.constant 0 : i32
    %c0_i32_0 = arith.constant 0 : i32
    %c0_i32_1 = arith.constant 0 : i32
    return %c0_i32, %c0_i32_0 : i32, i32
  }
  func.func @transform_2(%arg0: i32) -> (i32, i32) {
    %c0_i32 = arith.constant 0 : i32
    %c0_i32_0 = arith.constant 0 : i32
    %c0_i32_1 = arith.constant 0 : i32
    return %c0_i32, %c0_i32_0 : i32, i32
  }
  func.func @transform_3(%arg0: i32) -> (i32, i32, i32, i32) {
    %c0_i32 = arith.constant 0 : i32
    %c0_i32_0 = arith.constant 0 : i32
    %c0_i32_1 = arith.constant 0 : i32
    %c0_i32_2 = arith.constant 0 : i32
    return %arg0, %c0_i32, %c0_i32_0, %c0_i32_1 : i32, i32, i32, i32
  }
}

module attributes {stable_mosaic.version = 11 : i64} {
  func.func @_matmul_kernel(%arg0: i32, %arg1: i32, %arg2: memref<1x24x512xbf16, #tpu.memory_space<vmem>>, %arg3: memref<1x512x640xbf16, #tpu.memory_space<vmem>>, %arg4: memref<1x24x640xf32, #tpu.memory_space<vmem>>) attributes {dimension_semantics = [#tpu.dimension_semantics<parallel>, #tpu.dimension_semantics<parallel>], iteration_bounds = array<i64: 2, 1>, scalar_prefetch = 0 : i64, scratch_operands = 0 : i64, tpu.core_type = #tpu.core_type<tc>, window_params = [{transform_indices = @transform_0, window_bounds = array<i64: 1, 24, 512>}, {transform_indices = @transform_1, window_bounds = array<i64: 1, 512, 640>}, {transform_indices = @transform_2, window_bounds = array<i64: 1, 24, 640>}]} {
    %c0 = arith.constant 0 : index
    %c0_0 = arith.constant 0 : index
    %c0_1 = arith.constant 0 : index
    %0 = vector.load %arg2[%c0, %c0_0, %c0_1] : memref<1x24x512xbf16, #tpu.memory_space<vmem>>, vector<1x24x512xbf16>
    %1 = vector.shape_cast %0 : vector<1x24x512xbf16> to vector<24x512xbf16>
    %c0_2 = arith.constant 0 : index
    %c0_3 = arith.constant 0 : index
    %c0_4 = arith.constant 0 : index
    %2 = vector.load %arg3[%c0_2, %c0_3, %c0_4] : memref<1x512x640xbf16, #tpu.memory_space<vmem>>, vector<1x512x640xbf16>
    %3 = vector.shape_cast %2 : vector<1x512x640xbf16> to vector<512x640xbf16>
    %cst = arith.constant dense<0.000000e+00> : vector<24x640xf32>
    %4 = tpu.matmul %1, %3, %cst {dimension_numbers = #tpu.dot_dimension_numbers<[1], [0], [0], [1], [0, 0, 1, 1], [], []>} : vector<24x512xbf16>, vector<512x640xbf16>, vector<24x640xf32> -> vector<24x640xf32>
    %c0_5 = arith.constant 0 : index
    %c0_6 = arith.constant 0 : index
    %c0_7 = arith.constant 0 : index
    %5 = vector.load %arg4[%c0_5, %c0_6, %c0_7] : memref<1x24x640xf32, #tpu.memory_space<vmem>>, vector<1x24x640xf32>
    %6 = vector.shape_cast %5 : vector<1x24x640xf32> to vector<24x640xf32>
    %7 = vector.shape_cast %4 : vector<24x640xf32> to vector<1x24x640xf32>
    tpu.vector_store %arg4[%c0_5, %c0_6, %c0_7], %7 {strides = array<i32>} : memref<1x24x640xf32, #tpu.memory_space<vmem>>, vector<1x24x640xf32>,
    return
  }
  func.func @transform_0(%arg0: i32, %arg1: i32) -> (i32, i32, i32) {
    %c0_i32 = arith.constant 0 : i32
    %c0_i32_0 = arith.constant 0 : i32
    return %arg0, %arg1, %c0_i32 : i32, i32, i32
  }
  func.func @transform_1(%arg0: i32, %arg1: i32) -> (i32, i32, i32) {
    %c0_i32 = arith.constant 0 : i32
    %c0_i32_0 = arith.constant 0 : i32
    %c0_i32_1 = arith.constant 0 : i32
    return %arg0, %c0_i32, %c0_i32_0 : i32, i32, i32
  }
  func.func @transform_2(%arg0: i32, %arg1: i32) -> (i32, i32, i32) {
    %c0_i32 = arith.constant 0 : i32
    %c0_i32_0 = arith.constant 0 : i32
    return %arg0, %arg1, %c0_i32 : i32, i32, i32
  }
}

module attributes {stable_mosaic.version = 11 : i64} {
  func.func @_scan_kernel(%arg0: i32, %arg1: memref<16x128xf32, #tpu.memory_space<vmem>>, %arg2: memref<16x128xf32, #tpu.memory_space<vmem>>, %arg3: memref<1x128xf32, #tpu.memory_space<vmem>>, %arg4: memref<8x128xf32, #tpu.memory_space<vmem>>, %arg5: memref<1x128xf32, #tpu.memory_space<vmem>>, %arg6: memref<16x8x128xf32, #tpu.memory_space<vmem>>, %arg7: memref<16x8x128xf32, #tpu.memory_space<vmem>>, %arg8: memref<16x128xf32, #tpu.memory_space<vmem>>) attributes {dimension_semantics = [#tpu.dimension_semantics<parallel>], iteration_bounds = array<i64: 16>, scalar_prefetch = 0 : i64, scratch_operands = 0 : i64, tpu.core_type = #tpu.core_type<tc>, window_params = [{transform_indices = @transform_0, window_bounds = array<i64: 16, 128>}, {transform_indices = @transform_1, window_bounds = array<i64: 16, 128>}, {transform_indices = @transform_2, window_bounds = array<i64: 1, 128>}, {transform_indices = @transform_3, window_bounds = array<i64: 8, 128>}, {transform_indices = @transform_4, window_bounds = array<i64: 1, 128>}, {transform_indices = @transform_5, window_bounds = array<i64: 16, 8, 128>}, {transform_indices = @transform_6, window_bounds = array<i64: 16, 8, 128>}, {transform_indices = @transform_7, window_bounds = array<i64: 16, 128>}]} {
    %c0 = arith.constant 0 : index
    %c0_0 = arith.constant 0 : index
    %0 = vector.load %arg4[%c0, %c0_0] : memref<8x128xf32, #tpu.memory_space<vmem>>, vector<8x128xf32>
    %c0_1 = arith.constant 0 : index
    %c0_2 = arith.constant 0 : index
    %1 = vector.load %arg3[%c0_1, %c0_2] : memref<1x128xf32, #tpu.memory_space<vmem>>, vector<1x128xf32>
    %c0_3 = arith.constant 0 : index
    %c0_4 = arith.constant 0 : index
    %2 = vector.load %arg5[%c0_3, %c0_4] : memref<1x128xf32, #tpu.memory_space<vmem>>, vector<1x128xf32>
    %cst = arith.constant 0.000000e+00 : f32
    %3 = vector.broadcast %cst : f32 to vector<8x128xf32>
    %c0_i32 = arith.constant 0 : i32
    %c2_i32 = arith.constant 2 : i32
    %4 = arith.addi %c0_i32, %c2_i32 : i32
    %c1_i32 = arith.constant 1 : i32
    %5 = scf.for %arg9 = %c0_i32 to %4 step %c1_i32 iter_args(%arg10 = %3) -> (vector<8x128xf32>)  : i32 {
      %c8_i32 = arith.constant 8 : i32
      %6 = arith.muli %arg9, %c8_i32 : i32
      %7 = tpu.assume_multiple %6, 8 : i32
      %8 = arith.index_cast %7 : i32 to index
      %c0_6 = arith.constant 0 : index
      %9 = vector.load %arg1[%8, %c0_6] : memref<16x128xf32, #tpu.memory_space<vmem>>, vector<8x128xf32>
      %10 = arith.index_cast %7 : i32 to index
      %c0_7 = arith.constant 0 : index
      %11 = vector.load %arg2[%10, %c0_7] : memref<16x128xf32, #tpu.memory_space<vmem>>, vector<8x128xf32>
      %12 = arith.index_cast %7 : i32 to index
      %c0_8 = arith.constant 0 : index
      %c0_9 = arith.constant 0 : index
      %13 = vector.load %arg6[%12, %c0_8, %c0_9] : memref<16x8x128xf32, #tpu.memory_space<vmem>>, vector<8x8x128xf32>
      %14 = arith.index_cast %7 : i32 to index
      %c0_10 = arith.constant 0 : index
      %c0_11 = arith.constant 0 : index
      %15 = vector.load %arg7[%14, %c0_10, %c0_11] : memref<16x8x128xf32, #tpu.memory_space<vmem>>, vector<8x8x128xf32>
      %16 = vector.extract_strided_slice %9 {offsets = [0, 0], sizes = [1, 128], strides = [1, 1]} : vector<8x128xf32> to vector<1x128xf32>
      %17 = vector.extract_strided_slice %11 {offsets = [0, 0], sizes = [1, 128], strides = [1, 1]} : vector<8x128xf32> to vector<1x128xf32>
      %18 = arith.addf %17, %1 : vector<1x128xf32>
      %cst_12 = arith.constant 0.000000e+00 : f32
      %19 = vector.broadcast %cst_12 : f32 to vector<1x128xf32>
      %20 = arith.maximumf %18, %19 : vector<1x128xf32>
      %21 = math.absf %18 : vector<1x128xf32>
      %cst_13 = arith.constant 0.000000e+00 : f32
      %22 = vector.broadcast %cst_13 : f32 to vector<1x128xf32>
      %23 = arith.subf %22, %21 : vector<1x128xf32>
      %24 = math.exp %23 : vector<1x128xf32>
      %cst_14 = arith.constant 1.000000e+00 : f32
      %25 = vector.broadcast %cst_14 : f32 to vector<1x128xf32>
      %26 = arith.addf %25, %24 : vector<1x128xf32>
      %27 = math.log %26 : vector<1x128xf32>
      %28 = arith.addf %20, %27 : vector<1x128xf32>
      %29 = vector.broadcast %28 : vector<1x128xf32> to vector<8x128xf32>
      %30 = arith.mulf %29, %0 : vector<8x128xf32>
      %31 = math.exp %30 : vector<8x128xf32>
      %32 = arith.mulf %31, %arg10 : vector<8x128xf32>
      %33 = vector.extract_strided_slice %13 {offsets = [0, 0, 0], sizes = [1, 8, 128], strides = [1, 1, 1]} : vector<8x8x128xf32> to vector<1x8x128xf32>
      %34 = vector.shape_cast %33 : vector<1x8x128xf32> to vector<8x128xf32>
      %35 = arith.mulf %28, %16 : vector<1x128xf32>
      %36 = vector.broadcast %35 : vector<1x128xf32> to vector<8x128xf32>
      %37 = arith.mulf %34, %36 : vector<8x128xf32>
      %38 = arith.addf %32, %37 : vector<8x128xf32>
      %39 = vector.extract_strided_slice %15 {offsets = [0, 0, 0], sizes = [1, 8, 128], strides = [1, 1, 1]} : vector<8x8x128xf32> to vector<1x8x128xf32>
      %40 = vector.shape_cast %39 : vector<1x8x128xf32> to vector<8x128xf32>
      %41 = arith.mulf %38, %40 : vector<8x128xf32>
      %cst_15 = arith.constant dense<0.000000e+00> : vector<128xf32>
      %42 = vector.multi_reduction <add>, %41, %cst_15 [0] : vector<8x128xf32> to vector<128xf32>
      %43 = vector.shape_cast %42 : vector<128xf32> to vector<1x128xf32>
      %44 = arith.mulf %2, %16 : vector<1x128xf32>
      %45 = arith.addf %43, %44 : vector<1x128xf32>
      %46 = vector.extract_strided_slice %9 {offsets = [1, 0], sizes = [1, 128], strides = [1, 1]} : vector<8x128xf32> to vector<1x128xf32>
      %47 = vector.extract_strided_slice %11 {offsets = [1, 0], sizes = [1, 128], strides = [1, 1]} : vector<8x128xf32> to vector<1x128xf32>
      %48 = arith.addf %47, %1 : vector<1x128xf32>
      %cst_16 = arith.constant 0.000000e+00 : f32
      %49 = vector.broadcast %cst_16 : f32 to vector<1x128xf32>
      %50 = arith.maximumf %48, %49 : vector<1x128xf32>
      %51 = math.absf %48 : vector<1x128xf32>
      %cst_17 = arith.constant 0.000000e+00 : f32
      %52 = vector.broadcast %cst_17 : f32 to vector<1x128xf32>
      %53 = arith.subf %52, %51 : vector<1x128xf32>
      %54 = math.exp %53 : vector<1x128xf32>
      %cst_18 = arith.constant 1.000000e+00 : f32
      %55 = vector.broadcast %cst_18 : f32 to vector<1x128xf32>
      %56 = arith.addf %55, %54 : vector<1x128xf32>
      %57 = math.log %56 : vector<1x128xf32>
      %58 = arith.addf %50, %57 : vector<1x128xf32>
      %59 = vector.broadcast %58 : vector<1x128xf32> to vector<8x128xf32>
      %60 = arith.mulf %59, %0 : vector<8x128xf32>
      %61 = math.exp %60 : vector<8x128xf32>
      %62 = arith.mulf %61, %38 : vector<8x128xf32>
      %63 = vector.extract_strided_slice %13 {offsets = [1, 0, 0], sizes = [1, 8, 128], strides = [1, 1, 1]} : vector<8x8x128xf32> to vector<1x8x128xf32>
      %64 = vector.shape_cast %63 : vector<1x8x128xf32> to vector<8x128xf32>
      %65 = arith.mulf %58, %46 : vector<1x128xf32>
      %66 = vector.broadcast %65 : vector<1x128xf32> to vector<8x128xf32>
      %67 = arith.mulf %64, %66 : vector<8x128xf32>
      %68 = arith.addf %62, %67 : vector<8x128xf32>
      %69 = vector.extract_strided_slice %15 {offsets = [1, 0, 0], sizes = [1, 8, 128], strides = [1, 1, 1]} : vector<8x8x128xf32> to vector<1x8x128xf32>
      %70 = vector.shape_cast %69 : vector<1x8x128xf32> to vector<8x128xf32>
      %71 = arith.mulf %68, %70 : vector<8x128xf32>
      %cst_19 = arith.constant dense<0.000000e+00> : vector<128xf32>
      %72 = vector.multi_reduction <add>, %71, %cst_19 [0] : vector<8x128xf32> to vector<128xf32>
      %73 = vector.shape_cast %72 : vector<128xf32> to vector<1x128xf32>
      %74 = arith.mulf %2, %46 : vector<1x128xf32>
      %75 = arith.addf %73, %74 : vector<1x128xf32>
      %76 = vector.extract_strided_slice %9 {offsets = [2, 0], sizes = [1, 128], strides = [1, 1]} : vector<8x128xf32> to vector<1x128xf32>
      %77 = vector.extract_strided_slice %11 {offsets = [2, 0], sizes = [1, 128], strides = [1, 1]} : vector<8x128xf32> to vector<1x128xf32>
      %78 = arith.addf %77, %1 : vector<1x128xf32>
      %cst_20 = arith.constant 0.000000e+00 : f32
      %79 = vector.broadcast %cst_20 : f32 to vector<1x128xf32>
      %80 = arith.maximumf %78, %79 : vector<1x128xf32>
      %81 = math.absf %78 : vector<1x128xf32>
      %cst_21 = arith.constant 0.000000e+00 : f32
      %82 = vector.broadcast %cst_21 : f32 to vector<1x128xf32>
      %83 = arith.subf %82, %81 : vector<1x128xf32>
      %84 = math.exp %83 : vector<1x128xf32>
      %cst_22 = arith.constant 1.000000e+00 : f32
      %85 = vector.broadcast %cst_22 : f32 to vector<1x128xf32>
      %86 = arith.addf %85, %84 : vector<1x128xf32>
      %87 = math.log %86 : vector<1x128xf32>
      %88 = arith.addf %80, %87 : vector<1x128xf32>
      %89 = vector.broadcast %88 : vector<1x128xf32> to vector<8x128xf32>
      %90 = arith.mulf %89, %0 : vector<8x128xf32>
      %91 = math.exp %90 : vector<8x128xf32>
      %92 = arith.mulf %91, %68 : vector<8x128xf32>
      %93 = vector.extract_strided_slice %13 {offsets = [2, 0, 0], sizes = [1, 8, 128], strides = [1, 1, 1]} : vector<8x8x128xf32> to vector<1x8x128xf32>
      %94 = vector.shape_cast %93 : vector<1x8x128xf32> to vector<8x128xf32>
      %95 = arith.mulf %88, %76 : vector<1x128xf32>
      %96 = vector.broadcast %95 : vector<1x128xf32> to vector<8x128xf32>
      %97 = arith.mulf %94, %96 : vector<8x128xf32>
      %98 = arith.addf %92, %97 : vector<8x128xf32>
      %99 = vector.extract_strided_slice %15 {offsets = [2, 0, 0], sizes = [1, 8, 128], strides = [1, 1, 1]} : vector<8x8x128xf32> to vector<1x8x128xf32>
      %100 = vector.shape_cast %99 : vector<1x8x128xf32> to vector<8x128xf32>
      %101 = arith.mulf %98, %100 : vector<8x128xf32>
      %cst_23 = arith.constant dense<0.000000e+00> : vector<128xf32>
      %102 = vector.multi_reduction <add>, %101, %cst_23 [0] : vector<8x128xf32> to vector<128xf32>
      %103 = vector.shape_cast %102 : vector<128xf32> to vector<1x128xf32>
      %104 = arith.mulf %2, %76 : vector<1x128xf32>
      %105 = arith.addf %103, %104 : vector<1x128xf32>
      %106 = vector.extract_strided_slice %9 {offsets = [3, 0], sizes = [1, 128], strides = [1, 1]} : vector<8x128xf32> to vector<1x128xf32>
      %107 = vector.extract_strided_slice %11 {offsets = [3, 0], sizes = [1, 128], strides = [1, 1]} : vector<8x128xf32> to vector<1x128xf32>
      %108 = arith.addf %107, %1 : vector<1x128xf32>
      %cst_24 = arith.constant 0.000000e+00 : f32
      %109 = vector.broadcast %cst_24 : f32 to vector<1x128xf32>
      %110 = arith.maximumf %108, %109 : vector<1x128xf32>
      %111 = math.absf %108 : vector<1x128xf32>
      %cst_25 = arith.constant 0.000000e+00 : f32
      %112 = vector.broadcast %cst_25 : f32 to vector<1x128xf32>
      %113 = arith.subf %112, %111 : vector<1x128xf32>
      %114 = math.exp %113 : vector<1x128xf32>
      %cst_26 = arith.constant 1.000000e+00 : f32
      %115 = vector.broadcast %cst_26 : f32 to vector<1x128xf32>
      %116 = arith.addf %115, %114 : vector<1x128xf32>
      %117 = math.log %116 : vector<1x128xf32>
      %118 = arith.addf %110, %117 : vector<1x128xf32>
      %119 = vector.broadcast %118 : vector<1x128xf32> to vector<8x128xf32>
      %120 = arith.mulf %119, %0 : vector<8x128xf32>
      %121 = math.exp %120 : vector<8x128xf32>
      %122 = arith.mulf %121, %98 : vector<8x128xf32>
      %123 = vector.extract_strided_slice %13 {offsets = [3, 0, 0], sizes = [1, 8, 128], strides = [1, 1, 1]} : vector<8x8x128xf32> to vector<1x8x128xf32>
      %124 = vector.shape_cast %123 : vector<1x8x128xf32> to vector<8x128xf32>
      %125 = arith.mulf %118, %106 : vector<1x128xf32>
      %126 = vector.broadcast %125 : vector<1x128xf32> to vector<8x128xf32>
      %127 = arith.mulf %124, %126 : vector<8x128xf32>
      %128 = arith.addf %122, %127 : vector<8x128xf32>
      %129 = vector.extract_strided_slice %15 {offsets = [3, 0, 0], sizes = [1, 8, 128], strides = [1, 1, 1]} : vector<8x8x128xf32> to vector<1x8x128xf32>
      %130 = vector.shape_cast %129 : vector<1x8x128xf32> to vector<8x128xf32>
      %131 = arith.mulf %128, %130 : vector<8x128xf32>
      %cst_27 = arith.constant dense<0.000000e+00> : vector<128xf32>
      %132 = vector.multi_reduction <add>, %131, %cst_27 [0] : vector<8x128xf32> to vector<128xf32>
      %133 = vector.shape_cast %132 : vector<128xf32> to vector<1x128xf32>
      %134 = arith.mulf %2, %106 : vector<1x128xf32>
      %135 = arith.addf %133, %134 : vector<1x128xf32>
      %136 = vector.extract_strided_slice %9 {offsets = [4, 0], sizes = [1, 128], strides = [1, 1]} : vector<8x128xf32> to vector<1x128xf32>
      %137 = vector.extract_strided_slice %11 {offsets = [4, 0], sizes = [1, 128], strides = [1, 1]} : vector<8x128xf32> to vector<1x128xf32>
      %138 = arith.addf %137, %1 : vector<1x128xf32>
      %cst_28 = arith.constant 0.000000e+00 : f32
      %139 = vector.broadcast %cst_28 : f32 to vector<1x128xf32>
      %140 = arith.maximumf %138, %139 : vector<1x128xf32>
      %141 = math.absf %138 : vector<1x128xf32>
      %cst_29 = arith.constant 0.000000e+00 : f32
      %142 = vector.broadcast %cst_29 : f32 to vector<1x128xf32>
      %143 = arith.subf %142, %141 : vector<1x128xf32>
      %144 = math.exp %143 : vector<1x128xf32>
      %cst_30 = arith.constant 1.000000e+00 : f32
      %145 = vector.broadcast %cst_30 : f32 to vector<1x128xf32>
      %146 = arith.addf %145, %144 : vector<1x128xf32>
      %147 = math.log %146 : vector<1x128xf32>
      %148 = arith.addf %140, %147 : vector<1x128xf32>
      %149 = vector.broadcast %148 : vector<1x128xf32> to vector<8x128xf32>
      %150 = arith.mulf %149, %0 : vector<8x128xf32>
      %151 = math.exp %150 : vector<8x128xf32>
      %152 = arith.mulf %151, %128 : vector<8x128xf32>
      %153 = vector.extract_strided_slice %13 {offsets = [4, 0, 0], sizes = [1, 8, 128], strides = [1, 1, 1]} : vector<8x8x128xf32> to vector<1x8x128xf32>
      %154 = vector.shape_cast %153 : vector<1x8x128xf32> to vector<8x128xf32>
      %155 = arith.mulf %148, %136 : vector<1x128xf32>
      %156 = vector.broadcast %155 : vector<1x128xf32> to vector<8x128xf32>
      %157 = arith.mulf %154, %156 : vector<8x128xf32>
      %158 = arith.addf %152, %157 : vector<8x128xf32>
      %159 = vector.extract_strided_slice %15 {offsets = [4, 0, 0], sizes = [1, 8, 128], strides = [1, 1, 1]} : vector<8x8x128xf32> to vector<1x8x128xf32>
      %160 = vector.shape_cast %159 : vector<1x8x128xf32> to vector<8x128xf32>
      %161 = arith.mulf %158, %160 : vector<8x128xf32>
      %cst_31 = arith.constant dense<0.000000e+00> : vector<128xf32>
      %162 = vector.multi_reduction <add>, %161, %cst_31 [0] : vector<8x128xf32> to vector<128xf32>
      %163 = vector.shape_cast %162 : vector<128xf32> to vector<1x128xf32>
      %164 = arith.mulf %2, %136 : vector<1x128xf32>
      %165 = arith.addf %163, %164 : vector<1x128xf32>
      %166 = vector.extract_strided_slice %9 {offsets = [5, 0], sizes = [1, 128], strides = [1, 1]} : vector<8x128xf32> to vector<1x128xf32>
      %167 = vector.extract_strided_slice %11 {offsets = [5, 0], sizes = [1, 128], strides = [1, 1]} : vector<8x128xf32> to vector<1x128xf32>
      %168 = arith.addf %167, %1 : vector<1x128xf32>
      %cst_32 = arith.constant 0.000000e+00 : f32
      %169 = vector.broadcast %cst_32 : f32 to vector<1x128xf32>
      %170 = arith.maximumf %168, %169 : vector<1x128xf32>
      %171 = math.absf %168 : vector<1x128xf32>
      %cst_33 = arith.constant 0.000000e+00 : f32
      %172 = vector.broadcast %cst_33 : f32 to vector<1x128xf32>
      %173 = arith.subf %172, %171 : vector<1x128xf32>
      %174 = math.exp %173 : vector<1x128xf32>
      %cst_34 = arith.constant 1.000000e+00 : f32
      %175 = vector.broadcast %cst_34 : f32 to vector<1x128xf32>
      %176 = arith.addf %175, %174 : vector<1x128xf32>
      %177 = math.log %176 : vector<1x128xf32>
      %178 = arith.addf %170, %177 : vector<1x128xf32>
      %179 = vector.broadcast %178 : vector<1x128xf32> to vector<8x128xf32>
      %180 = arith.mulf %179, %0 : vector<8x128xf32>
      %181 = math.exp %180 : vector<8x128xf32>
      %182 = arith.mulf %181, %158 : vector<8x128xf32>
      %183 = vector.extract_strided_slice %13 {offsets = [5, 0, 0], sizes = [1, 8, 128], strides = [1, 1, 1]} : vector<8x8x128xf32> to vector<1x8x128xf32>
      %184 = vector.shape_cast %183 : vector<1x8x128xf32> to vector<8x128xf32>
      %185 = arith.mulf %178, %166 : vector<1x128xf32>
      %186 = vector.broadcast %185 : vector<1x128xf32> to vector<8x128xf32>
      %187 = arith.mulf %184, %186 : vector<8x128xf32>
      %188 = arith.addf %182, %187 : vector<8x128xf32>
      %189 = vector.extract_strided_slice %15 {offsets = [5, 0, 0], sizes = [1, 8, 128], strides = [1, 1, 1]} : vector<8x8x128xf32> to vector<1x8x128xf32>
      %190 = vector.shape_cast %189 : vector<1x8x128xf32> to vector<8x128xf32>
      %191 = arith.mulf %188, %190 : vector<8x128xf32>
      %cst_35 = arith.constant dense<0.000000e+00> : vector<128xf32>
      %192 = vector.multi_reduction <add>, %191, %cst_35 [0] : vector<8x128xf32> to vector<128xf32>
      %193 = vector.shape_cast %192 : vector<128xf32> to vector<1x128xf32>
      %194 = arith.mulf %2, %166 : vector<1x128xf32>
      %195 = arith.addf %193, %194 : vector<1x128xf32>
      %196 = vector.extract_strided_slice %9 {offsets = [6, 0], sizes = [1, 128], strides = [1, 1]} : vector<8x128xf32> to vector<1x128xf32>
      %197 = vector.extract_strided_slice %11 {offsets = [6, 0], sizes = [1, 128], strides = [1, 1]} : vector<8x128xf32> to vector<1x128xf32>
      %198 = arith.addf %197, %1 : vector<1x128xf32>
      %cst_36 = arith.constant 0.000000e+00 : f32
      %199 = vector.broadcast %cst_36 : f32 to vector<1x128xf32>
      %200 = arith.maximumf %198, %199 : vector<1x128xf32>
      %201 = math.absf %198 : vector<1x128xf32>
      %cst_37 = arith.constant 0.000000e+00 : f32
      %202 = vector.broadcast %cst_37 : f32 to vector<1x128xf32>
      %203 = arith.subf %202, %201 : vector<1x128xf32>
      %204 = math.exp %203 : vector<1x128xf32>
      %cst_38 = arith.constant 1.000000e+00 : f32
      %205 = vector.broadcast %cst_38 : f32 to vector<1x128xf32>
      %206 = arith.addf %205, %204 : vector<1x128xf32>
      %207 = math.log %206 : vector<1x128xf32>
      %208 = arith.addf %200, %207 : vector<1x128xf32>
      %209 = vector.broadcast %208 : vector<1x128xf32> to vector<8x128xf32>
      %210 = arith.mulf %209, %0 : vector<8x128xf32>
      %211 = math.exp %210 : vector<8x128xf32>
      %212 = arith.mulf %211, %188 : vector<8x128xf32>
      %213 = vector.extract_strided_slice %13 {offsets = [6, 0, 0], sizes = [1, 8, 128], strides = [1, 1, 1]} : vector<8x8x128xf32> to vector<1x8x128xf32>
      %214 = vector.shape_cast %213 : vector<1x8x128xf32> to vector<8x128xf32>
      %215 = arith.mulf %208, %196 : vector<1x128xf32>
      %216 = vector.broadcast %215 : vector<1x128xf32> to vector<8x128xf32>
      %217 = arith.mulf %214, %216 : vector<8x128xf32>
      %218 = arith.addf %212, %217 : vector<8x128xf32>
      %219 = vector.extract_strided_slice %15 {offsets = [6, 0, 0], sizes = [1, 8, 128], strides = [1, 1, 1]} : vector<8x8x128xf32> to vector<1x8x128xf32>
      %220 = vector.shape_cast %219 : vector<1x8x128xf32> to vector<8x128xf32>
      %221 = arith.mulf %218, %220 : vector<8x128xf32>
      %cst_39 = arith.constant dense<0.000000e+00> : vector<128xf32>
      %222 = vector.multi_reduction <add>, %221, %cst_39 [0] : vector<8x128xf32> to vector<128xf32>
      %223 = vector.shape_cast %222 : vector<128xf32> to vector<1x128xf32>
      %224 = arith.mulf %2, %196 : vector<1x128xf32>
      %225 = arith.addf %223, %224 : vector<1x128xf32>
      %226 = vector.extract_strided_slice %9 {offsets = [7, 0], sizes = [1, 128], strides = [1, 1]} : vector<8x128xf32> to vector<1x128xf32>
      %227 = vector.extract_strided_slice %11 {offsets = [7, 0], sizes = [1, 128], strides = [1, 1]} : vector<8x128xf32> to vector<1x128xf32>
      %228 = arith.addf %227, %1 : vector<1x128xf32>
      %cst_40 = arith.constant 0.000000e+00 : f32
      %229 = vector.broadcast %cst_40 : f32 to vector<1x128xf32>
      %230 = arith.maximumf %228, %229 : vector<1x128xf32>
      %231 = math.absf %228 : vector<1x128xf32>
      %cst_41 = arith.constant 0.000000e+00 : f32
      %232 = vector.broadcast %cst_41 : f32 to vector<1x128xf32>
      %233 = arith.subf %232, %231 : vector<1x128xf32>
      %234 = math.exp %233 : vector<1x128xf32>
      %cst_42 = arith.constant 1.000000e+00 : f32
      %235 = vector.broadcast %cst_42 : f32 to vector<1x128xf32>
      %236 = arith.addf %235, %234 : vector<1x128xf32>
      %237 = math.log %236 : vector<1x128xf32>
      %238 = arith.addf %230, %237 : vector<1x128xf32>
      %239 = vector.broadcast %238 : vector<1x128xf32> to vector<8x128xf32>
      %240 = arith.mulf %239, %0 : vector<8x128xf32>
      %241 = math.exp %240 : vector<8x128xf32>
      %242 = arith.mulf %241, %218 : vector<8x128xf32>
      %243 = vector.extract_strided_slice %13 {offsets = [7, 0, 0], sizes = [1, 8, 128], strides = [1, 1, 1]} : vector<8x8x128xf32> to vector<1x8x128xf32>
      %244 = vector.shape_cast %243 : vector<1x8x128xf32> to vector<8x128xf32>
      %245 = arith.mulf %238, %226 : vector<1x128xf32>
      %246 = vector.broadcast %245 : vector<1x128xf32> to vector<8x128xf32>
      %247 = arith.mulf %244, %246 : vector<8x128xf32>
      %248 = arith.addf %242, %247 : vector<8x128xf32>
      %249 = vector.extract_strided_slice %15 {offsets = [7, 0, 0], sizes = [1, 8, 128], strides = [1, 1, 1]} : vector<8x8x128xf32> to vector<1x8x128xf32>
      %250 = vector.shape_cast %249 : vector<1x8x128xf32> to vector<8x128xf32>
      %251 = arith.mulf %248, %250 : vector<8x128xf32>
      %cst_43 = arith.constant dense<0.000000e+00> : vector<128xf32>
      %252 = vector.multi_reduction <add>, %251, %cst_43 [0] : vector<8x128xf32> to vector<128xf32>
      %253 = vector.shape_cast %252 : vector<128xf32> to vector<1x128xf32>
      %254 = arith.mulf %2, %226 : vector<1x128xf32>
      %255 = arith.addf %253, %254 : vector<1x128xf32>
      %256 = tpu.concatenate %45, %75, %105, %135, %165, %195, %225, %255 in 0 : vector<1x128xf32>, vector<1x128xf32>, vector<1x128xf32>, vector<1x128xf32>, vector<1x128xf32>, vector<1x128xf32>, vector<1x128xf32>, vector<1x128xf32> -> vector<8x128xf32>
      %257 = arith.index_cast %7 : i32 to index
      %c0_44 = arith.constant 0 : index
      %258 = vector.load %arg8[%257, %c0_44] : memref<16x128xf32, #tpu.memory_space<vmem>>, vector<8x128xf32>
      tpu.vector_store %arg8[%257, %c0_44], %256 {strides = array<i32>} : memref<16x128xf32, #tpu.memory_space<vmem>>, vector<8x128xf32>,
      scf.yield %248 : vector<8x128xf32>
    }
    %c2_i32_5 = arith.constant 2 : i32
    return
  }
  func.func @transform_0(%arg0: i32) -> (i32, i32) {
    %c0_i32 = arith.constant 0 : i32
    %c0_i32_0 = arith.constant 0 : i32
    return %c0_i32, %arg0 : i32, i32
  }
  func.func @transform_1(%arg0: i32) -> (i32, i32) {
    %c0_i32 = arith.constant 0 : i32
    %c0_i32_0 = arith.constant 0 : i32
    return %c0_i32, %arg0 : i32, i32
  }
  func.func @transform_2(%arg0: i32) -> (i32, i32) {
    %c0_i32 = arith.constant 0 : i32
    %c0_i32_0 = arith.constant 0 : i32
    return %c0_i32, %arg0 : i32, i32
  }
  func.func @transform_3(%arg0: i32) -> (i32, i32) {
    %c0_i32 = arith.constant 0 : i32
    %c0_i32_0 = arith.constant 0 : i32
    return %c0_i32, %arg0 : i32, i32
  }
  func.func @transform_4(%arg0: i32) -> (i32, i32) {
    %c0_i32 = arith.constant 0 : i32
    %c0_i32_0 = arith.constant 0 : i32
    return %c0_i32, %arg0 : i32, i32
  }
  func.func @transform_5(%arg0: i32) -> (i32, i32, i32) {
    %c0_i32 = arith.constant 0 : i32
    %c0_i32_0 = arith.constant 0 : i32
    %c0_i32_1 = arith.constant 0 : i32
    return %c0_i32, %c0_i32_0, %arg0 : i32, i32, i32
  }
  func.func @transform_6(%arg0: i32) -> (i32, i32, i32) {
    %c0_i32 = arith.constant 0 : i32
    %c0_i32_0 = arith.constant 0 : i32
    %c0_i32_1 = arith.constant 0 : i32
    return %c0_i32, %c0_i32_0, %arg0 : i32, i32, i32
  }
  func.func @transform_7(%arg0: i32) -> (i32, i32) {
    %c0_i32 = arith.constant 0 : i32
    %c0_i32_0 = arith.constant 0 : i32
    return %c0_i32, %arg0 : i32, i32
  }
}

module attributes {stable_mosaic.version = 11 : i64} {
  func.func @_norm_gate_proj_kernel(%arg0: i32, %arg1: memref<24x512xf32, #tpu.memory_space<vmem>>, %arg2: memref<24x512xf32, #tpu.memory_space<vmem>>, %arg3: memref<1x512xf32, #tpu.memory_space<vmem>>, %arg4: memref<1x512xf32, #tpu.memory_space<vmem>>, %arg5: memref<512x256xbf16, #tpu.memory_space<vmem>>, %arg6: memref<24x256xf32, #tpu.memory_space<vmem>>) attributes {dimension_semantics = [#tpu.dimension_semantics<parallel>], iteration_bounds = array<i64: 1>, scalar_prefetch = 0 : i64, scratch_operands = 0 : i64, tpu.core_type = #tpu.core_type<tc>, window_params = [{transform_indices = @transform_0, window_bounds = array<i64: 24, 512>}, {transform_indices = @transform_1, window_bounds = array<i64: 24, 512>}, {pipeline_mode = #tpu.pipeline_mode<synchronous>, transform_indices = @transform_2, window_bounds = array<i64: 1, 512>}, {pipeline_mode = #tpu.pipeline_mode<synchronous>, transform_indices = @transform_3, window_bounds = array<i64: 1, 512>}, {pipeline_mode = #tpu.pipeline_mode<synchronous>, transform_indices = @transform_4, window_bounds = array<i64: 512, 256>}, {transform_indices = @transform_5, window_bounds = array<i64: 24, 256>}]} {
    %c0 = arith.constant 0 : index
    %c0_0 = arith.constant 0 : index
    %0 = vector.load %arg1[%c0, %c0_0] : memref<24x512xf32, #tpu.memory_space<vmem>>, vector<24x512xf32>
    %cst = arith.constant dense<0.000000e+00> : vector<24xf32>
    %1 = vector.multi_reduction <add>, %0, %cst [1] : vector<24x512xf32> to vector<24xf32>
    %2 = vector.shape_cast %1 : vector<24xf32> to vector<24x1xf32>
    %cst_1 = arith.constant 5.120000e+02 : f32
    %3 = vector.broadcast %cst_1 : f32 to vector<24x1xf32>
    %4 = arith.divf %2, %3 : vector<24x1xf32>
    %5 = vector.broadcast %4 : vector<24x1xf32> to vector<24x512xf32>
    %6 = arith.subf %0, %5 : vector<24x512xf32>
    %7 = arith.mulf %6, %6 : vector<24x512xf32>
    %cst_2 = arith.constant dense<0.000000e+00> : vector<24xf32>
    %8 = vector.multi_reduction <add>, %7, %cst_2 [1] : vector<24x512xf32> to vector<24xf32>
    %9 = vector.shape_cast %8 : vector<24xf32> to vector<24x1xf32>
    %cst_3 = arith.constant 5.120000e+02 : f32
    %10 = vector.broadcast %cst_3 : f32 to vector<24x1xf32>
    %11 = arith.divf %9, %10 : vector<24x1xf32>
    %cst_4 = arith.constant 9.99999974E-6 : f32
    %12 = vector.broadcast %cst_4 : f32 to vector<24x1xf32>
    %13 = arith.addf %11, %12 : vector<24x1xf32>
    %14 = math.rsqrt %13 : vector<24x1xf32>
    %15 = vector.broadcast %14 : vector<24x1xf32> to vector<24x512xf32>
    %16 = arith.mulf %6, %15 : vector<24x512xf32>
    %c0_5 = arith.constant 0 : index
    %c0_6 = arith.constant 0 : index
    %17 = vector.load %arg3[%c0_5, %c0_6] : memref<1x512xf32, #tpu.memory_space<vmem>>, vector<1x512xf32>
    %18 = vector.broadcast %17 : vector<1x512xf32> to vector<24x512xf32>
    %19 = arith.mulf %16, %18 : vector<24x512xf32>
    %c0_7 = arith.constant 0 : index
    %c0_8 = arith.constant 0 : index
    %20 = vector.load %arg4[%c0_7, %c0_8] : memref<1x512xf32, #tpu.memory_space<vmem>>, vector<1x512xf32>
    %21 = vector.broadcast %20 : vector<1x512xf32> to vector<24x512xf32>
    %22 = arith.addf %19, %21 : vector<24x512xf32>
    %c0_9 = arith.constant 0 : index
    %c0_10 = arith.constant 0 : index
    %23 = vector.load %arg2[%c0_9, %c0_10] : memref<24x512xf32, #tpu.memory_space<vmem>>, vector<24x512xf32>
    %24 = arith.negf %23 : vector<24x512xf32>
    %25 = math.exp %24 : vector<24x512xf32>
    %cst_11 = arith.constant 1.000000e+00 : f32
    %26 = vector.broadcast %cst_11 : f32 to vector<24x512xf32>
    %27 = arith.addf %26, %25 : vector<24x512xf32>
    %28 = arith.divf %26, %27 : vector<24x512xf32>
    %29 = arith.mulf %23, %28 : vector<24x512xf32>
    %30 = arith.mulf %22, %29 : vector<24x512xf32>
    %31 = arith.truncf %30 : vector<24x512xf32> to vector<24x512xbf16>
    %c0_12 = arith.constant 0 : index
    %c0_13 = arith.constant 0 : index
    %32 = vector.load %arg5[%c0_12, %c0_13] : memref<512x256xbf16, #tpu.memory_space<vmem>>, vector<512x256xbf16>
    %cst_14 = arith.constant dense<0.000000e+00> : vector<24x256xf32>
    %33 = tpu.matmul %31, %32, %cst_14 {dimension_numbers = #tpu.dot_dimension_numbers<[1], [0], [0], [1], [0, 0, 1, 1], [], []>} : vector<24x512xbf16>, vector<512x256xbf16>, vector<24x256xf32> -> vector<24x256xf32>
    %c0_15 = arith.constant 0 : index
    %c0_16 = arith.constant 0 : index
    %34 = vector.load %arg6[%c0_15, %c0_16] : memref<24x256xf32, #tpu.memory_space<vmem>>, vector<24x256xf32>
    tpu.vector_store %arg6[%c0_15, %c0_16], %33 {strides = array<i32>} : memref<24x256xf32, #tpu.memory_space<vmem>>, vector<24x256xf32>,
    return
  }
  func.func @transform_0(%arg0: i32) -> (i32, i32) {
    %c0_i32 = arith.constant 0 : i32
    %c0_i32_0 = arith.constant 0 : i32
    return %arg0, %c0_i32 : i32, i32
  }
  func.func @transform_1(%arg0: i32) -> (i32, i32) {
    %c0_i32 = arith.constant 0 : i32
    %c0_i32_0 = arith.constant 0 : i32
    return %arg0, %c0_i32 : i32, i32
  }
  func.func @transform_2(%arg0: i32) -> (i32, i32) {
    %c0_i32 = arith.constant 0 : i32
    %c0_i32_0 = arith.constant 0 : i32
    %c0_i32_1 = arith.constant 0 : i32
    return %c0_i32, %c0_i32_0 : i32, i32
  }
  func.func @transform_3(%arg0: i32) -> (i32, i32) {
    %c0_i32 = arith.constant 0 : i32
    %c0_i32_0 = arith.constant 0 : i32
    %c0_i32_1 = arith.constant 0 : i32
    return %c0_i32, %c0_i32_0 : i32, i32
  }
  func.func @transform_4(%arg0: i32) -> (i32, i32) {
    %c0_i32 = arith.constant 0 : i32
    %c0_i32_0 = arith.constant 0 : i32
    %c0_i32_1 = arith.constant 0 : i32
    return %c0_i32, %c0_i32_0 : i32, i32
  }
  func.func @transform_5(%arg0: i32) -> (i32, i32) {
    %c0_i32 = arith.constant 0 : i32
    %c0_i32_0 = arith.constant 0 : i32
    return %arg0, %c0_i32 : i32, i32
  }
}

module attributes {stable_mosaic.version = 11 : i64} {
  func.func @_matmul_kernel(%arg0: i32, %arg1: memref<256x12xbf16, #tpu.memory_space<vmem>>, %arg2: memref<12x128xbf16, #tpu.memory_space<vmem>>, %arg3: memref<256x128xf32, #tpu.memory_space<vmem>>) attributes {dimension_semantics = [#tpu.dimension_semantics<parallel>], iteration_bounds = array<i64: 2>, scalar_prefetch = 0 : i64, scratch_operands = 0 : i64, tpu.core_type = #tpu.core_type<tc>, window_params = [{transform_indices = @transform_0, window_bounds = array<i64: 256, 12>}, {pipeline_mode = #tpu.pipeline_mode<synchronous>, transform_indices = @transform_1, window_bounds = array<i64: 12, 128>}, {transform_indices = @transform_2, window_bounds = array<i64: 256, 128>}]} {
    %c0 = arith.constant 0 : index
    %c0_0 = arith.constant 0 : index
    %0 = vector.load %arg1[%c0, %c0_0] : memref<256x12xbf16, #tpu.memory_space<vmem>>, vector<256x12xbf16>
    %c0_1 = arith.constant 0 : index
    %c0_2 = arith.constant 0 : index
    %1 = vector.load %arg2[%c0_1, %c0_2] : memref<12x128xbf16, #tpu.memory_space<vmem>>, vector<12x128xbf16>
    %cst = arith.constant dense<0.000000e+00> : vector<256x128xf32>
    %2 = tpu.matmul %0, %1, %cst {dimension_numbers = #tpu.dot_dimension_numbers<[1], [0], [0], [1], [0, 0, 1, 1], [], []>} : vector<256x12xbf16>, vector<12x128xbf16>, vector<256x128xf32> -> vector<256x128xf32>
    %c0_3 = arith.constant 0 : index
    %c0_4 = arith.constant 0 : index
    %3 = vector.load %arg3[%c0_3, %c0_4] : memref<256x128xf32, #tpu.memory_space<vmem>>, vector<256x128xf32>
    tpu.vector_store %arg3[%c0_3, %c0_4], %2 {strides = array<i32>} : memref<256x128xf32, #tpu.memory_space<vmem>>, vector<256x128xf32>,
    return
  }
  func.func @transform_0(%arg0: i32) -> (i32, i32) {
    %c0_i32 = arith.constant 0 : i32
    %c0_i32_0 = arith.constant 0 : i32
    return %arg0, %c0_i32 : i32, i32
  }
  func.func @transform_1(%arg0: i32) -> (i32, i32) {
    %c0_i32 = arith.constant 0 : i32
    %c0_i32_0 = arith.constant 0 : i32
    %c0_i32_1 = arith.constant 0 : i32
    return %c0_i32, %c0_i32_0 : i32, i32
  }
  func.func @transform_2(%arg0: i32) -> (i32, i32) {
    %c0_i32 = arith.constant 0 : i32
    %c0_i32_0 = arith.constant 0 : i32
    return %arg0, %c0_i32 : i32, i32
  }
}

module attributes {stable_mosaic.version = 11 : i64} {
  func.func @_dwconv3_silu_kernel(%arg0: i32, %arg1: memref<1x18x18x8xf32, #tpu.memory_space<vmem>>, %arg2: memref<9x8xf32, #tpu.memory_space<vmem>>, %arg3: memref<1x8xf32, #tpu.memory_space<vmem>>, %arg4: memref<1x16x16x8xf32, #tpu.memory_space<vmem>>) attributes {dimension_semantics = [#tpu.dimension_semantics<parallel>], iteration_bounds = array<i64: 2>, scalar_prefetch = 0 : i64, scratch_operands = 0 : i64, tpu.core_type = #tpu.core_type<tc>, window_params = [{transform_indices = @transform_0, window_bounds = array<i64: 1, 18, 18, 8>}, {pipeline_mode = #tpu.pipeline_mode<synchronous>, transform_indices = @transform_1, window_bounds = array<i64: 9, 8>}, {pipeline_mode = #tpu.pipeline_mode<synchronous>, transform_indices = @transform_2, window_bounds = array<i64: 1, 8>}, {transform_indices = @transform_3, window_bounds = array<i64: 1, 16, 16, 8>}]} {
    %c0 = arith.constant 0 : index
    %c0_0 = arith.constant 0 : index
    %0 = vector.load %arg3[%c0, %c0_0] : memref<1x8xf32, #tpu.memory_space<vmem>>, vector<1x8xf32>
    %1 = vector.shape_cast %0 : vector<1x8xf32> to vector<8xf32>
    %2 = vector.shape_cast %1 : vector<8xf32> to vector<1x1x8xf32>
    %c0_1 = arith.constant 0 : index
    %c0_2 = arith.constant 0 : index
    %3 = vector.load %arg2[%c0_1, %c0_2] : memref<9x8xf32, #tpu.memory_space<vmem>>, vector<1x8xf32>
    %4 = vector.shape_cast %3 : vector<1x8xf32> to vector<8xf32>
    %5 = vector.shape_cast %4 : vector<8xf32> to vector<1x1x8xf32>
    %c1 = arith.constant 1 : index
    %c0_3 = arith.constant 0 : index
    %6 = vector.load %arg2[%c1, %c0_3] : memref<9x8xf32, #tpu.memory_space<vmem>>, vector<1x8xf32>
    %7 = vector.shape_cast %6 : vector<1x8xf32> to vector<8xf32>
    %8 = vector.shape_cast %7 : vector<8xf32> to vector<1x1x8xf32>
    %c2 = arith.constant 2 : index
    %c0_4 = arith.constant 0 : index
    %9 = vector.load %arg2[%c2, %c0_4] : memref<9x8xf32, #tpu.memory_space<vmem>>, vector<1x8xf32>
    %10 = vector.shape_cast %9 : vector<1x8xf32> to vector<8xf32>
    %11 = vector.shape_cast %10 : vector<8xf32> to vector<1x1x8xf32>
    %c3 = arith.constant 3 : index
    %c0_5 = arith.constant 0 : index
    %12 = vector.load %arg2[%c3, %c0_5] : memref<9x8xf32, #tpu.memory_space<vmem>>, vector<1x8xf32>
    %13 = vector.shape_cast %12 : vector<1x8xf32> to vector<8xf32>
    %14 = vector.shape_cast %13 : vector<8xf32> to vector<1x1x8xf32>
    %c4 = arith.constant 4 : index
    %c0_6 = arith.constant 0 : index
    %15 = vector.load %arg2[%c4, %c0_6] : memref<9x8xf32, #tpu.memory_space<vmem>>, vector<1x8xf32>
    %16 = vector.shape_cast %15 : vector<1x8xf32> to vector<8xf32>
    %17 = vector.shape_cast %16 : vector<8xf32> to vector<1x1x8xf32>
    %c5 = arith.constant 5 : index
    %c0_7 = arith.constant 0 : index
    %18 = vector.load %arg2[%c5, %c0_7] : memref<9x8xf32, #tpu.memory_space<vmem>>, vector<1x8xf32>
    %19 = vector.shape_cast %18 : vector<1x8xf32> to vector<8xf32>
    %20 = vector.shape_cast %19 : vector<8xf32> to vector<1x1x8xf32>
    %c6 = arith.constant 6 : index
    %c0_8 = arith.constant 0 : index
    %21 = vector.load %arg2[%c6, %c0_8] : memref<9x8xf32, #tpu.memory_space<vmem>>, vector<1x8xf32>
    %22 = vector.shape_cast %21 : vector<1x8xf32> to vector<8xf32>
    %23 = vector.shape_cast %22 : vector<8xf32> to vector<1x1x8xf32>
    %c7 = arith.constant 7 : index
    %c0_9 = arith.constant 0 : index
    %24 = vector.load %arg2[%c7, %c0_9] : memref<9x8xf32, #tpu.memory_space<vmem>>, vector<1x8xf32>
    %25 = vector.shape_cast %24 : vector<1x8xf32> to vector<8xf32>
    %26 = vector.shape_cast %25 : vector<8xf32> to vector<1x1x8xf32>
    %c8 = arith.constant 8 : index
    %c0_10 = arith.constant 0 : index
    %27 = vector.load %arg2[%c8, %c0_10] : memref<9x8xf32, #tpu.memory_space<vmem>>, vector<1x8xf32>
    %28 = vector.shape_cast %27 : vector<1x8xf32> to vector<8xf32>
    %29 = vector.shape_cast %28 : vector<8xf32> to vector<1x1x8xf32>
    %c0_i32 = arith.constant 0 : i32
    %c2_i32 = arith.constant 2 : i32
    %30 = arith.addi %c0_i32, %c2_i32 : i32
    %c1_i32 = arith.constant 1 : i32
    scf.for %arg5 = %c0_i32 to %30 step %c1_i32  : i32 {
      %c8_i32 = arith.constant 8 : i32
      %31 = arith.muli %arg5, %c8_i32 : i32
      %32 = tpu.assume_multiple %31, 8 : i32
      %cst = arith.constant 0.000000e+00 : f32
      %33 = vector.broadcast %cst : f32 to vector<8x16x8xf32>
      %c0_i32_12 = arith.constant 0 : i32
      %34 = arith.addi %32, %c0_i32_12 : i32
      %c0_13 = arith.constant 0 : index
      %35 = arith.index_cast %34 : i32 to index
      %c0_14 = arith.constant 0 : index
      %c0_15 = arith.constant 0 : index
      %36 = vector.load %arg1[%c0_13, %35, %c0_14, %c0_15] : memref<1x18x18x8xf32, #tpu.memory_space<vmem>>, vector<1x8x16x8xf32>
      %37 = vector.shape_cast %36 : vector<1x8x16x8xf32> to vector<8x16x8xf32>
      %38 = vector.broadcast %5 : vector<1x1x8xf32> to vector<8x16x8xf32>
      %39 = arith.mulf %37, %38 : vector<8x16x8xf32>
      %40 = arith.addf %33, %39 : vector<8x16x8xf32>
      %c0_i32_16 = arith.constant 0 : i32
      %41 = arith.addi %32, %c0_i32_16 : i32
      %c0_17 = arith.constant 0 : index
      %42 = arith.index_cast %41 : i32 to index
      %c1_18 = arith.constant 1 : index
      %c0_19 = arith.constant 0 : index
      %43 = vector.load %arg1[%c0_17, %42, %c1_18, %c0_19] : memref<1x18x18x8xf32, #tpu.memory_space<vmem>>, vector<1x8x16x8xf32>
      %44 = vector.shape_cast %43 : vector<1x8x16x8xf32> to vector<8x16x8xf32>
      %45 = vector.broadcast %8 : vector<1x1x8xf32> to vector<8x16x8xf32>
      %46 = arith.mulf %44, %45 : vector<8x16x8xf32>
      %47 = arith.addf %40, %46 : vector<8x16x8xf32>
      %c0_i32_20 = arith.constant 0 : i32
      %48 = arith.addi %32, %c0_i32_20 : i32
      %c0_21 = arith.constant 0 : index
      %49 = arith.index_cast %48 : i32 to index
      %c2_22 = arith.constant 2 : index
      %c0_23 = arith.constant 0 : index
      %50 = vector.load %arg1[%c0_21, %49, %c2_22, %c0_23] : memref<1x18x18x8xf32, #tpu.memory_space<vmem>>, vector<1x8x16x8xf32>
      %51 = vector.shape_cast %50 : vector<1x8x16x8xf32> to vector<8x16x8xf32>
      %52 = vector.broadcast %11 : vector<1x1x8xf32> to vector<8x16x8xf32>
      %53 = arith.mulf %51, %52 : vector<8x16x8xf32>
      %54 = arith.addf %47, %53 : vector<8x16x8xf32>
      %c1_i32_24 = arith.constant 1 : i32
      %55 = arith.addi %32, %c1_i32_24 : i32
      %c0_25 = arith.constant 0 : index
      %56 = arith.index_cast %55 : i32 to index
      %c0_26 = arith.constant 0 : index
      %c0_27 = arith.constant 0 : index
      %57 = vector.load %arg1[%c0_25, %56, %c0_26, %c0_27] : memref<1x18x18x8xf32, #tpu.memory_space<vmem>>, vector<1x8x16x8xf32>
      %58 = vector.shape_cast %57 : vector<1x8x16x8xf32> to vector<8x16x8xf32>
      %59 = vector.broadcast %14 : vector<1x1x8xf32> to vector<8x16x8xf32>
      %60 = arith.mulf %58, %59 : vector<8x16x8xf32>
      %61 = arith.addf %54, %60 : vector<8x16x8xf32>
      %c1_i32_28 = arith.constant 1 : i32
      %62 = arith.addi %32, %c1_i32_28 : i32
      %c0_29 = arith.constant 0 : index
      %63 = arith.index_cast %62 : i32 to index
      %c1_30 = arith.constant 1 : index
      %c0_31 = arith.constant 0 : index
      %64 = vector.load %arg1[%c0_29, %63, %c1_30, %c0_31] : memref<1x18x18x8xf32, #tpu.memory_space<vmem>>, vector<1x8x16x8xf32>
      %65 = vector.shape_cast %64 : vector<1x8x16x8xf32> to vector<8x16x8xf32>
      %66 = vector.broadcast %17 : vector<1x1x8xf32> to vector<8x16x8xf32>
      %67 = arith.mulf %65, %66 : vector<8x16x8xf32>
      %68 = arith.addf %61, %67 : vector<8x16x8xf32>
      %c1_i32_32 = arith.constant 1 : i32
      %69 = arith.addi %32, %c1_i32_32 : i32
      %c0_33 = arith.constant 0 : index
      %70 = arith.index_cast %69 : i32 to index
      %c2_34 = arith.constant 2 : index
      %c0_35 = arith.constant 0 : index
      %71 = vector.load %arg1[%c0_33, %70, %c2_34, %c0_35] : memref<1x18x18x8xf32, #tpu.memory_space<vmem>>, vector<1x8x16x8xf32>
      %72 = vector.shape_cast %71 : vector<1x8x16x8xf32> to vector<8x16x8xf32>
      %73 = vector.broadcast %20 : vector<1x1x8xf32> to vector<8x16x8xf32>
      %74 = arith.mulf %72, %73 : vector<8x16x8xf32>
      %75 = arith.addf %68, %74 : vector<8x16x8xf32>
      %c2_i32_36 = arith.constant 2 : i32
      %76 = arith.addi %32, %c2_i32_36 : i32
      %c0_37 = arith.constant 0 : index
      %77 = arith.index_cast %76 : i32 to index
      %c0_38 = arith.constant 0 : index
      %c0_39 = arith.constant 0 : index
      %78 = vector.load %arg1[%c0_37, %77, %c0_38, %c0_39] : memref<1x18x18x8xf32, #tpu.memory_space<vmem>>, vector<1x8x16x8xf32>
      %79 = vector.shape_cast %78 : vector<1x8x16x8xf32> to vector<8x16x8xf32>
      %80 = vector.broadcast %23 : vector<1x1x8xf32> to vector<8x16x8xf32>
      %81 = arith.mulf %79, %80 : vector<8x16x8xf32>
      %82 = arith.addf %75, %81 : vector<8x16x8xf32>
      %c2_i32_40 = arith.constant 2 : i32
      %83 = arith.addi %32, %c2_i32_40 : i32
      %c0_41 = arith.constant 0 : index
      %84 = arith.index_cast %83 : i32 to index
      %c1_42 = arith.constant 1 : index
      %c0_43 = arith.constant 0 : index
      %85 = vector.load %arg1[%c0_41, %84, %c1_42, %c0_43] : memref<1x18x18x8xf32, #tpu.memory_space<vmem>>, vector<1x8x16x8xf32>
      %86 = vector.shape_cast %85 : vector<1x8x16x8xf32> to vector<8x16x8xf32>
      %87 = vector.broadcast %26 : vector<1x1x8xf32> to vector<8x16x8xf32>
      %88 = arith.mulf %86, %87 : vector<8x16x8xf32>
      %89 = arith.addf %82, %88 : vector<8x16x8xf32>
      %c2_i32_44 = arith.constant 2 : i32
      %90 = arith.addi %32, %c2_i32_44 : i32
      %c0_45 = arith.constant 0 : index
      %91 = arith.index_cast %90 : i32 to index
      %c2_46 = arith.constant 2 : index
      %c0_47 = arith.constant 0 : index
      %92 = vector.load %arg1[%c0_45, %91, %c2_46, %c0_47] : memref<1x18x18x8xf32, #tpu.memory_space<vmem>>, vector<1x8x16x8xf32>
      %93 = vector.shape_cast %92 : vector<1x8x16x8xf32> to vector<8x16x8xf32>
      %94 = vector.broadcast %29 : vector<1x1x8xf32> to vector<8x16x8xf32>
      %95 = arith.mulf %93, %94 : vector<8x16x8xf32>
      %96 = arith.addf %89, %95 : vector<8x16x8xf32>
      %97 = vector.broadcast %2 : vector<1x1x8xf32> to vector<8x16x8xf32>
      %98 = arith.addf %96, %97 : vector<8x16x8xf32>
      %99 = arith.negf %98 : vector<8x16x8xf32>
      %100 = math.exp %99 : vector<8x16x8xf32>
      %cst_48 = arith.constant 1.000000e+00 : f32
      %101 = vector.broadcast %cst_48 : f32 to vector<8x16x8xf32>
      %102 = arith.addf %101, %100 : vector<8x16x8xf32>
      %103 = arith.divf %101, %102 : vector<8x16x8xf32>
      %104 = arith.mulf %98, %103 : vector<8x16x8xf32>
      %c0_49 = arith.constant 0 : index
      %105 = arith.index_cast %32 : i32 to index
      %c0_50 = arith.constant 0 : index
      %c0_51 = arith.constant 0 : index
      %106 = vector.load %arg4[%c0_49, %105, %c0_50, %c0_51] : memref<1x16x16x8xf32, #tpu.memory_space<vmem>>, vector<1x8x16x8xf32>
      %107 = vector.shape_cast %106 : vector<1x8x16x8xf32> to vector<8x16x8xf32>
      %108 = vector.shape_cast %104 : vector<8x16x8xf32> to vector<1x8x16x8xf32>
      tpu.vector_store %arg4[%c0_49, %105, %c0_50, %c0_51], %108 {strides = array<i32>} : memref<1x16x16x8xf32, #tpu.memory_space<vmem>>, vector<1x8x16x8xf32>,
    }
    %c2_i32_11 = arith.constant 2 : i32
    return
  }
  func.func @transform_0(%arg0: i32) -> (i32, i32, i32, i32) {
    %c0_i32 = arith.constant 0 : i32
    %c0_i32_0 = arith.constant 0 : i32
    %c0_i32_1 = arith.constant 0 : i32
    %c0_i32_2 = arith.constant 0 : i32
    return %arg0, %c0_i32, %c0_i32_0, %c0_i32_1 : i32, i32, i32, i32
  }
  func.func @transform_1(%arg0: i32) -> (i32, i32) {
    %c0_i32 = arith.constant 0 : i32
    %c0_i32_0 = arith.constant 0 : i32
    %c0_i32_1 = arith.constant 0 : i32
    return %c0_i32, %c0_i32_0 : i32, i32
  }
  func.func @transform_2(%arg0: i32) -> (i32, i32) {
    %c0_i32 = arith.constant 0 : i32
    %c0_i32_0 = arith.constant 0 : i32
    %c0_i32_1 = arith.constant 0 : i32
    return %c0_i32, %c0_i32_0 : i32, i32
  }
  func.func @transform_3(%arg0: i32) -> (i32, i32, i32, i32) {
    %c0_i32 = arith.constant 0 : i32
    %c0_i32_0 = arith.constant 0 : i32
    %c0_i32_1 = arith.constant 0 : i32
    %c0_i32_2 = arith.constant 0 : i32
    return %arg0, %c0_i32, %c0_i32_0, %c0_i32_1 : i32, i32, i32, i32
  }
}

module attributes {stable_mosaic.version = 11 : i64} {
  func.func @_matmul_kernel(%arg0: i32, %arg1: i32, %arg2: memref<1x256x8xbf16, #tpu.memory_space<vmem>>, %arg3: memref<1x8x128xbf16, #tpu.memory_space<vmem>>, %arg4: memref<1x256x128xf32, #tpu.memory_space<vmem>>) attributes {dimension_semantics = [#tpu.dimension_semantics<parallel>, #tpu.dimension_semantics<parallel>], iteration_bounds = array<i64: 4, 2>, scalar_prefetch = 0 : i64, scratch_operands = 0 : i64, tpu.core_type = #tpu.core_type<tc>, window_params = [{transform_indices = @transform_0, window_bounds = array<i64: 1, 256, 8>}, {transform_indices = @transform_1, window_bounds = array<i64: 1, 8, 128>}, {transform_indices = @transform_2, window_bounds = array<i64: 1, 256, 128>}]} {
    %c0 = arith.constant 0 : index
    %c0_0 = arith.constant 0 : index
    %c0_1 = arith.constant 0 : index
    %0 = vector.load %arg2[%c0, %c0_0, %c0_1] : memref<1x256x8xbf16, #tpu.memory_space<vmem>>, vector<1x256x8xbf16>
    %1 = vector.shape_cast %0 : vector<1x256x8xbf16> to vector<256x8xbf16>
    %c0_2 = arith.constant 0 : index
    %c0_3 = arith.constant 0 : index
    %c0_4 = arith.constant 0 : index
    %2 = vector.load %arg3[%c0_2, %c0_3, %c0_4] : memref<1x8x128xbf16, #tpu.memory_space<vmem>>, vector<1x8x128xbf16>
    %3 = vector.shape_cast %2 : vector<1x8x128xbf16> to vector<8x128xbf16>
    %cst = arith.constant dense<0.000000e+00> : vector<256x128xf32>
    %4 = tpu.matmul %1, %3, %cst {dimension_numbers = #tpu.dot_dimension_numbers<[1], [0], [0], [1], [0, 0, 1, 1], [], []>} : vector<256x8xbf16>, vector<8x128xbf16>, vector<256x128xf32> -> vector<256x128xf32>
    %c0_5 = arith.constant 0 : index
    %c0_6 = arith.constant 0 : index
    %c0_7 = arith.constant 0 : index
    %5 = vector.load %arg4[%c0_5, %c0_6, %c0_7] : memref<1x256x128xf32, #tpu.memory_space<vmem>>, vector<1x256x128xf32>
    %6 = vector.shape_cast %5 : vector<1x256x128xf32> to vector<256x128xf32>
    %7 = vector.shape_cast %4 : vector<256x128xf32> to vector<1x256x128xf32>
    tpu.vector_store %arg4[%c0_5, %c0_6, %c0_7], %7 {strides = array<i32>} : memref<1x256x128xf32, #tpu.memory_space<vmem>>, vector<1x256x128xf32>,
    return
  }
  func.func @transform_0(%arg0: i32, %arg1: i32) -> (i32, i32, i32) {
    %c0_i32 = arith.constant 0 : i32
    %c0_i32_0 = arith.constant 0 : i32
    return %arg0, %arg1, %c0_i32 : i32, i32, i32
  }
  func.func @transform_1(%arg0: i32, %arg1: i32) -> (i32, i32, i32) {
    %c0_i32 = arith.constant 0 : i32
    %c0_i32_0 = arith.constant 0 : i32
    %c0_i32_1 = arith.constant 0 : i32
    return %arg0, %c0_i32, %c0_i32_0 : i32, i32, i32
  }
  func.func @transform_2(%arg0: i32, %arg1: i32) -> (i32, i32, i32) {
    %c0_i32 = arith.constant 0 : i32
    %c0_i32_0 = arith.constant 0 : i32
    return %arg0, %arg1, %c0_i32 : i32, i32, i32
  }
}

module attributes {stable_mosaic.version = 11 : i64} {
  func.func @_scan_kernel(%arg0: i32, %arg1: memref<256x128xf32, #tpu.memory_space<vmem>>, %arg2: memref<256x128xf32, #tpu.memory_space<vmem>>, %arg3: memref<1x128xf32, #tpu.memory_space<vmem>>, %arg4: memref<8x128xf32, #tpu.memory_space<vmem>>, %arg5: memref<1x128xf32, #tpu.memory_space<vmem>>, %arg6: memref<256x8x128xf32, #tpu.memory_space<vmem>>, %arg7: memref<256x8x128xf32, #tpu.memory_space<vmem>>, %arg8: memref<256x128xf32, #tpu.memory_space<vmem>>) attributes {dimension_semantics = [#tpu.dimension_semantics<parallel>], iteration_bounds = array<i64: 1>, scalar_prefetch = 0 : i64, scratch_operands = 0 : i64, tpu.core_type = #tpu.core_type<tc>, window_params = [{transform_indices = @transform_0, window_bounds = array<i64: 256, 128>}, {transform_indices = @transform_1, window_bounds = array<i64: 256, 128>}, {transform_indices = @transform_2, window_bounds = array<i64: 1, 128>}, {transform_indices = @transform_3, window_bounds = array<i64: 8, 128>}, {transform_indices = @transform_4, window_bounds = array<i64: 1, 128>}, {transform_indices = @transform_5, window_bounds = array<i64: 256, 8, 128>}, {transform_indices = @transform_6, window_bounds = array<i64: 256, 8, 128>}, {transform_indices = @transform_7, window_bounds = array<i64: 256, 128>}]} {
    %c0 = arith.constant 0 : index
    %c0_0 = arith.constant 0 : index
    %0 = vector.load %arg4[%c0, %c0_0] : memref<8x128xf32, #tpu.memory_space<vmem>>, vector<8x128xf32>
    %c0_1 = arith.constant 0 : index
    %c0_2 = arith.constant 0 : index
    %1 = vector.load %arg3[%c0_1, %c0_2] : memref<1x128xf32, #tpu.memory_space<vmem>>, vector<1x128xf32>
    %c0_3 = arith.constant 0 : index
    %c0_4 = arith.constant 0 : index
    %2 = vector.load %arg5[%c0_3, %c0_4] : memref<1x128xf32, #tpu.memory_space<vmem>>, vector<1x128xf32>
    %cst = arith.constant 0.000000e+00 : f32
    %3 = vector.broadcast %cst : f32 to vector<8x128xf32>
    %c0_i32 = arith.constant 0 : i32
    %c32_i32 = arith.constant 32 : i32
    %4 = arith.addi %c0_i32, %c32_i32 : i32
    %c1_i32 = arith.constant 1 : i32
    %5 = scf.for %arg9 = %c0_i32 to %4 step %c1_i32 iter_args(%arg10 = %3) -> (vector<8x128xf32>)  : i32 {
      %c8_i32 = arith.constant 8 : i32
      %6 = arith.muli %arg9, %c8_i32 : i32
      %7 = tpu.assume_multiple %6, 8 : i32
      %8 = arith.index_cast %7 : i32 to index
      %c0_6 = arith.constant 0 : index
      %9 = vector.load %arg1[%8, %c0_6] : memref<256x128xf32, #tpu.memory_space<vmem>>, vector<8x128xf32>
      %10 = arith.index_cast %7 : i32 to index
      %c0_7 = arith.constant 0 : index
      %11 = vector.load %arg2[%10, %c0_7] : memref<256x128xf32, #tpu.memory_space<vmem>>, vector<8x128xf32>
      %12 = arith.index_cast %7 : i32 to index
      %c0_8 = arith.constant 0 : index
      %c0_9 = arith.constant 0 : index
      %13 = vector.load %arg6[%12, %c0_8, %c0_9] : memref<256x8x128xf32, #tpu.memory_space<vmem>>, vector<8x8x128xf32>
      %14 = arith.index_cast %7 : i32 to index
      %c0_10 = arith.constant 0 : index
      %c0_11 = arith.constant 0 : index
      %15 = vector.load %arg7[%14, %c0_10, %c0_11] : memref<256x8x128xf32, #tpu.memory_space<vmem>>, vector<8x8x128xf32>
      %16 = vector.extract_strided_slice %9 {offsets = [0, 0], sizes = [1, 128], strides = [1, 1]} : vector<8x128xf32> to vector<1x128xf32>
      %17 = vector.extract_strided_slice %11 {offsets = [0, 0], sizes = [1, 128], strides = [1, 1]} : vector<8x128xf32> to vector<1x128xf32>
      %18 = arith.addf %17, %1 : vector<1x128xf32>
      %cst_12 = arith.constant 0.000000e+00 : f32
      %19 = vector.broadcast %cst_12 : f32 to vector<1x128xf32>
      %20 = arith.maximumf %18, %19 : vector<1x128xf32>
      %21 = math.absf %18 : vector<1x128xf32>
      %cst_13 = arith.constant 0.000000e+00 : f32
      %22 = vector.broadcast %cst_13 : f32 to vector<1x128xf32>
      %23 = arith.subf %22, %21 : vector<1x128xf32>
      %24 = math.exp %23 : vector<1x128xf32>
      %cst_14 = arith.constant 1.000000e+00 : f32
      %25 = vector.broadcast %cst_14 : f32 to vector<1x128xf32>
      %26 = arith.addf %25, %24 : vector<1x128xf32>
      %27 = math.log %26 : vector<1x128xf32>
      %28 = arith.addf %20, %27 : vector<1x128xf32>
      %29 = vector.broadcast %28 : vector<1x128xf32> to vector<8x128xf32>
      %30 = arith.mulf %29, %0 : vector<8x128xf32>
      %31 = math.exp %30 : vector<8x128xf32>
      %32 = arith.mulf %31, %arg10 : vector<8x128xf32>
      %33 = vector.extract_strided_slice %13 {offsets = [0, 0, 0], sizes = [1, 8, 128], strides = [1, 1, 1]} : vector<8x8x128xf32> to vector<1x8x128xf32>
      %34 = vector.shape_cast %33 : vector<1x8x128xf32> to vector<8x128xf32>
      %35 = arith.mulf %28, %16 : vector<1x128xf32>
      %36 = vector.broadcast %35 : vector<1x128xf32> to vector<8x128xf32>
      %37 = arith.mulf %34, %36 : vector<8x128xf32>
      %38 = arith.addf %32, %37 : vector<8x128xf32>
      %39 = vector.extract_strided_slice %15 {offsets = [0, 0, 0], sizes = [1, 8, 128], strides = [1, 1, 1]} : vector<8x8x128xf32> to vector<1x8x128xf32>
      %40 = vector.shape_cast %39 : vector<1x8x128xf32> to vector<8x128xf32>
      %41 = arith.mulf %38, %40 : vector<8x128xf32>
      %cst_15 = arith.constant dense<0.000000e+00> : vector<128xf32>
      %42 = vector.multi_reduction <add>, %41, %cst_15 [0] : vector<8x128xf32> to vector<128xf32>
      %43 = vector.shape_cast %42 : vector<128xf32> to vector<1x128xf32>
      %44 = arith.mulf %2, %16 : vector<1x128xf32>
      %45 = arith.addf %43, %44 : vector<1x128xf32>
      %46 = vector.extract_strided_slice %9 {offsets = [1, 0], sizes = [1, 128], strides = [1, 1]} : vector<8x128xf32> to vector<1x128xf32>
      %47 = vector.extract_strided_slice %11 {offsets = [1, 0], sizes = [1, 128], strides = [1, 1]} : vector<8x128xf32> to vector<1x128xf32>
      %48 = arith.addf %47, %1 : vector<1x128xf32>
      %cst_16 = arith.constant 0.000000e+00 : f32
      %49 = vector.broadcast %cst_16 : f32 to vector<1x128xf32>
      %50 = arith.maximumf %48, %49 : vector<1x128xf32>
      %51 = math.absf %48 : vector<1x128xf32>
      %cst_17 = arith.constant 0.000000e+00 : f32
      %52 = vector.broadcast %cst_17 : f32 to vector<1x128xf32>
      %53 = arith.subf %52, %51 : vector<1x128xf32>
      %54 = math.exp %53 : vector<1x128xf32>
      %cst_18 = arith.constant 1.000000e+00 : f32
      %55 = vector.broadcast %cst_18 : f32 to vector<1x128xf32>
      %56 = arith.addf %55, %54 : vector<1x128xf32>
      %57 = math.log %56 : vector<1x128xf32>
      %58 = arith.addf %50, %57 : vector<1x128xf32>
      %59 = vector.broadcast %58 : vector<1x128xf32> to vector<8x128xf32>
      %60 = arith.mulf %59, %0 : vector<8x128xf32>
      %61 = math.exp %60 : vector<8x128xf32>
      %62 = arith.mulf %61, %38 : vector<8x128xf32>
      %63 = vector.extract_strided_slice %13 {offsets = [1, 0, 0], sizes = [1, 8, 128], strides = [1, 1, 1]} : vector<8x8x128xf32> to vector<1x8x128xf32>
      %64 = vector.shape_cast %63 : vector<1x8x128xf32> to vector<8x128xf32>
      %65 = arith.mulf %58, %46 : vector<1x128xf32>
      %66 = vector.broadcast %65 : vector<1x128xf32> to vector<8x128xf32>
      %67 = arith.mulf %64, %66 : vector<8x128xf32>
      %68 = arith.addf %62, %67 : vector<8x128xf32>
      %69 = vector.extract_strided_slice %15 {offsets = [1, 0, 0], sizes = [1, 8, 128], strides = [1, 1, 1]} : vector<8x8x128xf32> to vector<1x8x128xf32>
      %70 = vector.shape_cast %69 : vector<1x8x128xf32> to vector<8x128xf32>
      %71 = arith.mulf %68, %70 : vector<8x128xf32>
      %cst_19 = arith.constant dense<0.000000e+00> : vector<128xf32>
      %72 = vector.multi_reduction <add>, %71, %cst_19 [0] : vector<8x128xf32> to vector<128xf32>
      %73 = vector.shape_cast %72 : vector<128xf32> to vector<1x128xf32>
      %74 = arith.mulf %2, %46 : vector<1x128xf32>
      %75 = arith.addf %73, %74 : vector<1x128xf32>
      %76 = vector.extract_strided_slice %9 {offsets = [2, 0], sizes = [1, 128], strides = [1, 1]} : vector<8x128xf32> to vector<1x128xf32>
      %77 = vector.extract_strided_slice %11 {offsets = [2, 0], sizes = [1, 128], strides = [1, 1]} : vector<8x128xf32> to vector<1x128xf32>
      %78 = arith.addf %77, %1 : vector<1x128xf32>
      %cst_20 = arith.constant 0.000000e+00 : f32
      %79 = vector.broadcast %cst_20 : f32 to vector<1x128xf32>
      %80 = arith.maximumf %78, %79 : vector<1x128xf32>
      %81 = math.absf %78 : vector<1x128xf32>
      %cst_21 = arith.constant 0.000000e+00 : f32
      %82 = vector.broadcast %cst_21 : f32 to vector<1x128xf32>
      %83 = arith.subf %82, %81 : vector<1x128xf32>
      %84 = math.exp %83 : vector<1x128xf32>
      %cst_22 = arith.constant 1.000000e+00 : f32
      %85 = vector.broadcast %cst_22 : f32 to vector<1x128xf32>
      %86 = arith.addf %85, %84 : vector<1x128xf32>
      %87 = math.log %86 : vector<1x128xf32>
      %88 = arith.addf %80, %87 : vector<1x128xf32>
      %89 = vector.broadcast %88 : vector<1x128xf32> to vector<8x128xf32>
      %90 = arith.mulf %89, %0 : vector<8x128xf32>
      %91 = math.exp %90 : vector<8x128xf32>
      %92 = arith.mulf %91, %68 : vector<8x128xf32>
      %93 = vector.extract_strided_slice %13 {offsets = [2, 0, 0], sizes = [1, 8, 128], strides = [1, 1, 1]} : vector<8x8x128xf32> to vector<1x8x128xf32>
      %94 = vector.shape_cast %93 : vector<1x8x128xf32> to vector<8x128xf32>
      %95 = arith.mulf %88, %76 : vector<1x128xf32>
      %96 = vector.broadcast %95 : vector<1x128xf32> to vector<8x128xf32>
      %97 = arith.mulf %94, %96 : vector<8x128xf32>
      %98 = arith.addf %92, %97 : vector<8x128xf32>
      %99 = vector.extract_strided_slice %15 {offsets = [2, 0, 0], sizes = [1, 8, 128], strides = [1, 1, 1]} : vector<8x8x128xf32> to vector<1x8x128xf32>
      %100 = vector.shape_cast %99 : vector<1x8x128xf32> to vector<8x128xf32>
      %101 = arith.mulf %98, %100 : vector<8x128xf32>
      %cst_23 = arith.constant dense<0.000000e+00> : vector<128xf32>
      %102 = vector.multi_reduction <add>, %101, %cst_23 [0] : vector<8x128xf32> to vector<128xf32>
      %103 = vector.shape_cast %102 : vector<128xf32> to vector<1x128xf32>
      %104 = arith.mulf %2, %76 : vector<1x128xf32>
      %105 = arith.addf %103, %104 : vector<1x128xf32>
      %106 = vector.extract_strided_slice %9 {offsets = [3, 0], sizes = [1, 128], strides = [1, 1]} : vector<8x128xf32> to vector<1x128xf32>
      %107 = vector.extract_strided_slice %11 {offsets = [3, 0], sizes = [1, 128], strides = [1, 1]} : vector<8x128xf32> to vector<1x128xf32>
      %108 = arith.addf %107, %1 : vector<1x128xf32>
      %cst_24 = arith.constant 0.000000e+00 : f32
      %109 = vector.broadcast %cst_24 : f32 to vector<1x128xf32>
      %110 = arith.maximumf %108, %109 : vector<1x128xf32>
      %111 = math.absf %108 : vector<1x128xf32>
      %cst_25 = arith.constant 0.000000e+00 : f32
      %112 = vector.broadcast %cst_25 : f32 to vector<1x128xf32>
      %113 = arith.subf %112, %111 : vector<1x128xf32>
      %114 = math.exp %113 : vector<1x128xf32>
      %cst_26 = arith.constant 1.000000e+00 : f32
      %115 = vector.broadcast %cst_26 : f32 to vector<1x128xf32>
      %116 = arith.addf %115, %114 : vector<1x128xf32>
      %117 = math.log %116 : vector<1x128xf32>
      %118 = arith.addf %110, %117 : vector<1x128xf32>
      %119 = vector.broadcast %118 : vector<1x128xf32> to vector<8x128xf32>
      %120 = arith.mulf %119, %0 : vector<8x128xf32>
      %121 = math.exp %120 : vector<8x128xf32>
      %122 = arith.mulf %121, %98 : vector<8x128xf32>
      %123 = vector.extract_strided_slice %13 {offsets = [3, 0, 0], sizes = [1, 8, 128], strides = [1, 1, 1]} : vector<8x8x128xf32> to vector<1x8x128xf32>
      %124 = vector.shape_cast %123 : vector<1x8x128xf32> to vector<8x128xf32>
      %125 = arith.mulf %118, %106 : vector<1x128xf32>
      %126 = vector.broadcast %125 : vector<1x128xf32> to vector<8x128xf32>
      %127 = arith.mulf %124, %126 : vector<8x128xf32>
      %128 = arith.addf %122, %127 : vector<8x128xf32>
      %129 = vector.extract_strided_slice %15 {offsets = [3, 0, 0], sizes = [1, 8, 128], strides = [1, 1, 1]} : vector<8x8x128xf32> to vector<1x8x128xf32>
      %130 = vector.shape_cast %129 : vector<1x8x128xf32> to vector<8x128xf32>
      %131 = arith.mulf %128, %130 : vector<8x128xf32>
      %cst_27 = arith.constant dense<0.000000e+00> : vector<128xf32>
      %132 = vector.multi_reduction <add>, %131, %cst_27 [0] : vector<8x128xf32> to vector<128xf32>
      %133 = vector.shape_cast %132 : vector<128xf32> to vector<1x128xf32>
      %134 = arith.mulf %2, %106 : vector<1x128xf32>
      %135 = arith.addf %133, %134 : vector<1x128xf32>
      %136 = vector.extract_strided_slice %9 {offsets = [4, 0], sizes = [1, 128], strides = [1, 1]} : vector<8x128xf32> to vector<1x128xf32>
      %137 = vector.extract_strided_slice %11 {offsets = [4, 0], sizes = [1, 128], strides = [1, 1]} : vector<8x128xf32> to vector<1x128xf32>
      %138 = arith.addf %137, %1 : vector<1x128xf32>
      %cst_28 = arith.constant 0.000000e+00 : f32
      %139 = vector.broadcast %cst_28 : f32 to vector<1x128xf32>
      %140 = arith.maximumf %138, %139 : vector<1x128xf32>
      %141 = math.absf %138 : vector<1x128xf32>
      %cst_29 = arith.constant 0.000000e+00 : f32
      %142 = vector.broadcast %cst_29 : f32 to vector<1x128xf32>
      %143 = arith.subf %142, %141 : vector<1x128xf32>
      %144 = math.exp %143 : vector<1x128xf32>
      %cst_30 = arith.constant 1.000000e+00 : f32
      %145 = vector.broadcast %cst_30 : f32 to vector<1x128xf32>
      %146 = arith.addf %145, %144 : vector<1x128xf32>
      %147 = math.log %146 : vector<1x128xf32>
      %148 = arith.addf %140, %147 : vector<1x128xf32>
      %149 = vector.broadcast %148 : vector<1x128xf32> to vector<8x128xf32>
      %150 = arith.mulf %149, %0 : vector<8x128xf32>
      %151 = math.exp %150 : vector<8x128xf32>
      %152 = arith.mulf %151, %128 : vector<8x128xf32>
      %153 = vector.extract_strided_slice %13 {offsets = [4, 0, 0], sizes = [1, 8, 128], strides = [1, 1, 1]} : vector<8x8x128xf32> to vector<1x8x128xf32>
      %154 = vector.shape_cast %153 : vector<1x8x128xf32> to vector<8x128xf32>
      %155 = arith.mulf %148, %136 : vector<1x128xf32>
      %156 = vector.broadcast %155 : vector<1x128xf32> to vector<8x128xf32>
      %157 = arith.mulf %154, %156 : vector<8x128xf32>
      %158 = arith.addf %152, %157 : vector<8x128xf32>
      %159 = vector.extract_strided_slice %15 {offsets = [4, 0, 0], sizes = [1, 8, 128], strides = [1, 1, 1]} : vector<8x8x128xf32> to vector<1x8x128xf32>
      %160 = vector.shape_cast %159 : vector<1x8x128xf32> to vector<8x128xf32>
      %161 = arith.mulf %158, %160 : vector<8x128xf32>
      %cst_31 = arith.constant dense<0.000000e+00> : vector<128xf32>
      %162 = vector.multi_reduction <add>, %161, %cst_31 [0] : vector<8x128xf32> to vector<128xf32>
      %163 = vector.shape_cast %162 : vector<128xf32> to vector<1x128xf32>
      %164 = arith.mulf %2, %136 : vector<1x128xf32>
      %165 = arith.addf %163, %164 : vector<1x128xf32>
      %166 = vector.extract_strided_slice %9 {offsets = [5, 0], sizes = [1, 128], strides = [1, 1]} : vector<8x128xf32> to vector<1x128xf32>
      %167 = vector.extract_strided_slice %11 {offsets = [5, 0], sizes = [1, 128], strides = [1, 1]} : vector<8x128xf32> to vector<1x128xf32>
      %168 = arith.addf %167, %1 : vector<1x128xf32>
      %cst_32 = arith.constant 0.000000e+00 : f32
      %169 = vector.broadcast %cst_32 : f32 to vector<1x128xf32>
      %170 = arith.maximumf %168, %169 : vector<1x128xf32>
      %171 = math.absf %168 : vector<1x128xf32>
      %cst_33 = arith.constant 0.000000e+00 : f32
      %172 = vector.broadcast %cst_33 : f32 to vector<1x128xf32>
      %173 = arith.subf %172, %171 : vector<1x128xf32>
      %174 = math.exp %173 : vector<1x128xf32>
      %cst_34 = arith.constant 1.000000e+00 : f32
      %175 = vector.broadcast %cst_34 : f32 to vector<1x128xf32>
      %176 = arith.addf %175, %174 : vector<1x128xf32>
      %177 = math.log %176 : vector<1x128xf32>
      %178 = arith.addf %170, %177 : vector<1x128xf32>
      %179 = vector.broadcast %178 : vector<1x128xf32> to vector<8x128xf32>
      %180 = arith.mulf %179, %0 : vector<8x128xf32>
      %181 = math.exp %180 : vector<8x128xf32>
      %182 = arith.mulf %181, %158 : vector<8x128xf32>
      %183 = vector.extract_strided_slice %13 {offsets = [5, 0, 0], sizes = [1, 8, 128], strides = [1, 1, 1]} : vector<8x8x128xf32> to vector<1x8x128xf32>
      %184 = vector.shape_cast %183 : vector<1x8x128xf32> to vector<8x128xf32>
      %185 = arith.mulf %178, %166 : vector<1x128xf32>
      %186 = vector.broadcast %185 : vector<1x128xf32> to vector<8x128xf32>
      %187 = arith.mulf %184, %186 : vector<8x128xf32>
      %188 = arith.addf %182, %187 : vector<8x128xf32>
      %189 = vector.extract_strided_slice %15 {offsets = [5, 0, 0], sizes = [1, 8, 128], strides = [1, 1, 1]} : vector<8x8x128xf32> to vector<1x8x128xf32>
      %190 = vector.shape_cast %189 : vector<1x8x128xf32> to vector<8x128xf32>
      %191 = arith.mulf %188, %190 : vector<8x128xf32>
      %cst_35 = arith.constant dense<0.000000e+00> : vector<128xf32>
      %192 = vector.multi_reduction <add>, %191, %cst_35 [0] : vector<8x128xf32> to vector<128xf32>
      %193 = vector.shape_cast %192 : vector<128xf32> to vector<1x128xf32>
      %194 = arith.mulf %2, %166 : vector<1x128xf32>
      %195 = arith.addf %193, %194 : vector<1x128xf32>
      %196 = vector.extract_strided_slice %9 {offsets = [6, 0], sizes = [1, 128], strides = [1, 1]} : vector<8x128xf32> to vector<1x128xf32>
      %197 = vector.extract_strided_slice %11 {offsets = [6, 0], sizes = [1, 128], strides = [1, 1]} : vector<8x128xf32> to vector<1x128xf32>
      %198 = arith.addf %197, %1 : vector<1x128xf32>
      %cst_36 = arith.constant 0.000000e+00 : f32
      %199 = vector.broadcast %cst_36 : f32 to vector<1x128xf32>
      %200 = arith.maximumf %198, %199 : vector<1x128xf32>
      %201 = math.absf %198 : vector<1x128xf32>
      %cst_37 = arith.constant 0.000000e+00 : f32
      %202 = vector.broadcast %cst_37 : f32 to vector<1x128xf32>
      %203 = arith.subf %202, %201 : vector<1x128xf32>
      %204 = math.exp %203 : vector<1x128xf32>
      %cst_38 = arith.constant 1.000000e+00 : f32
      %205 = vector.broadcast %cst_38 : f32 to vector<1x128xf32>
      %206 = arith.addf %205, %204 : vector<1x128xf32>
      %207 = math.log %206 : vector<1x128xf32>
      %208 = arith.addf %200, %207 : vector<1x128xf32>
      %209 = vector.broadcast %208 : vector<1x128xf32> to vector<8x128xf32>
      %210 = arith.mulf %209, %0 : vector<8x128xf32>
      %211 = math.exp %210 : vector<8x128xf32>
      %212 = arith.mulf %211, %188 : vector<8x128xf32>
      %213 = vector.extract_strided_slice %13 {offsets = [6, 0, 0], sizes = [1, 8, 128], strides = [1, 1, 1]} : vector<8x8x128xf32> to vector<1x8x128xf32>
      %214 = vector.shape_cast %213 : vector<1x8x128xf32> to vector<8x128xf32>
      %215 = arith.mulf %208, %196 : vector<1x128xf32>
      %216 = vector.broadcast %215 : vector<1x128xf32> to vector<8x128xf32>
      %217 = arith.mulf %214, %216 : vector<8x128xf32>
      %218 = arith.addf %212, %217 : vector<8x128xf32>
      %219 = vector.extract_strided_slice %15 {offsets = [6, 0, 0], sizes = [1, 8, 128], strides = [1, 1, 1]} : vector<8x8x128xf32> to vector<1x8x128xf32>
      %220 = vector.shape_cast %219 : vector<1x8x128xf32> to vector<8x128xf32>
      %221 = arith.mulf %218, %220 : vector<8x128xf32>
      %cst_39 = arith.constant dense<0.000000e+00> : vector<128xf32>
      %222 = vector.multi_reduction <add>, %221, %cst_39 [0] : vector<8x128xf32> to vector<128xf32>
      %223 = vector.shape_cast %222 : vector<128xf32> to vector<1x128xf32>
      %224 = arith.mulf %2, %196 : vector<1x128xf32>
      %225 = arith.addf %223, %224 : vector<1x128xf32>
      %226 = vector.extract_strided_slice %9 {offsets = [7, 0], sizes = [1, 128], strides = [1, 1]} : vector<8x128xf32> to vector<1x128xf32>
      %227 = vector.extract_strided_slice %11 {offsets = [7, 0], sizes = [1, 128], strides = [1, 1]} : vector<8x128xf32> to vector<1x128xf32>
      %228 = arith.addf %227, %1 : vector<1x128xf32>
      %cst_40 = arith.constant 0.000000e+00 : f32
      %229 = vector.broadcast %cst_40 : f32 to vector<1x128xf32>
      %230 = arith.maximumf %228, %229 : vector<1x128xf32>
      %231 = math.absf %228 : vector<1x128xf32>
      %cst_41 = arith.constant 0.000000e+00 : f32
      %232 = vector.broadcast %cst_41 : f32 to vector<1x128xf32>
      %233 = arith.subf %232, %231 : vector<1x128xf32>
      %234 = math.exp %233 : vector<1x128xf32>
      %cst_42 = arith.constant 1.000000e+00 : f32
      %235 = vector.broadcast %cst_42 : f32 to vector<1x128xf32>
      %236 = arith.addf %235, %234 : vector<1x128xf32>
      %237 = math.log %236 : vector<1x128xf32>
      %238 = arith.addf %230, %237 : vector<1x128xf32>
      %239 = vector.broadcast %238 : vector<1x128xf32> to vector<8x128xf32>
      %240 = arith.mulf %239, %0 : vector<8x128xf32>
      %241 = math.exp %240 : vector<8x128xf32>
      %242 = arith.mulf %241, %218 : vector<8x128xf32>
      %243 = vector.extract_strided_slice %13 {offsets = [7, 0, 0], sizes = [1, 8, 128], strides = [1, 1, 1]} : vector<8x8x128xf32> to vector<1x8x128xf32>
      %244 = vector.shape_cast %243 : vector<1x8x128xf32> to vector<8x128xf32>
      %245 = arith.mulf %238, %226 : vector<1x128xf32>
      %246 = vector.broadcast %245 : vector<1x128xf32> to vector<8x128xf32>
      %247 = arith.mulf %244, %246 : vector<8x128xf32>
      %248 = arith.addf %242, %247 : vector<8x128xf32>
      %249 = vector.extract_strided_slice %15 {offsets = [7, 0, 0], sizes = [1, 8, 128], strides = [1, 1, 1]} : vector<8x8x128xf32> to vector<1x8x128xf32>
      %250 = vector.shape_cast %249 : vector<1x8x128xf32> to vector<8x128xf32>
      %251 = arith.mulf %248, %250 : vector<8x128xf32>
      %cst_43 = arith.constant dense<0.000000e+00> : vector<128xf32>
      %252 = vector.multi_reduction <add>, %251, %cst_43 [0] : vector<8x128xf32> to vector<128xf32>
      %253 = vector.shape_cast %252 : vector<128xf32> to vector<1x128xf32>
      %254 = arith.mulf %2, %226 : vector<1x128xf32>
      %255 = arith.addf %253, %254 : vector<1x128xf32>
      %256 = tpu.concatenate %45, %75, %105, %135, %165, %195, %225, %255 in 0 : vector<1x128xf32>, vector<1x128xf32>, vector<1x128xf32>, vector<1x128xf32>, vector<1x128xf32>, vector<1x128xf32>, vector<1x128xf32>, vector<1x128xf32> -> vector<8x128xf32>
      %257 = arith.index_cast %7 : i32 to index
      %c0_44 = arith.constant 0 : index
      %258 = vector.load %arg8[%257, %c0_44] : memref<256x128xf32, #tpu.memory_space<vmem>>, vector<8x128xf32>
      tpu.vector_store %arg8[%257, %c0_44], %256 {strides = array<i32>} : memref<256x128xf32, #tpu.memory_space<vmem>>, vector<8x128xf32>,
      scf.yield %248 : vector<8x128xf32>
    }
    %c32_i32_5 = arith.constant 32 : i32
    return
  }
  func.func @transform_0(%arg0: i32) -> (i32, i32) {
    %c0_i32 = arith.constant 0 : i32
    %c0_i32_0 = arith.constant 0 : i32
    return %c0_i32, %arg0 : i32, i32
  }
  func.func @transform_1(%arg0: i32) -> (i32, i32) {
    %c0_i32 = arith.constant 0 : i32
    %c0_i32_0 = arith.constant 0 : i32
    return %c0_i32, %arg0 : i32, i32
  }
  func.func @transform_2(%arg0: i32) -> (i32, i32) {
    %c0_i32 = arith.constant 0 : i32
    %c0_i32_0 = arith.constant 0 : i32
    return %c0_i32, %arg0 : i32, i32
  }
  func.func @transform_3(%arg0: i32) -> (i32, i32) {
    %c0_i32 = arith.constant 0 : i32
    %c0_i32_0 = arith.constant 0 : i32
    return %c0_i32, %arg0 : i32, i32
  }
  func.func @transform_4(%arg0: i32) -> (i32, i32) {
    %c0_i32 = arith.constant 0 : i32
    %c0_i32_0 = arith.constant 0 : i32
    return %c0_i32, %arg0 : i32, i32
  }
  func.func @transform_5(%arg0: i32) -> (i32, i32, i32) {
    %c0_i32 = arith.constant 0 : i32
    %c0_i32_0 = arith.constant 0 : i32
    %c0_i32_1 = arith.constant 0 : i32
    return %c0_i32, %c0_i32_0, %arg0 : i32, i32, i32
  }
  func.func @transform_6(%arg0: i32) -> (i32, i32, i32) {
    %c0_i32 = arith.constant 0 : i32
    %c0_i32_0 = arith.constant 0 : i32
    %c0_i32_1 = arith.constant 0 : i32
    return %c0_i32, %c0_i32_0, %arg0 : i32, i32, i32
  }
  func.func @transform_7(%arg0: i32) -> (i32, i32) {
    %c0_i32 = arith.constant 0 : i32
    %c0_i32_0 = arith.constant 0 : i32
    return %c0_i32, %arg0 : i32, i32
  }
}

module attributes {stable_mosaic.version = 11 : i64} {
  func.func @_norm_gate_proj_kernel(%arg0: i32, %arg1: memref<256x8xf32, #tpu.memory_space<vmem>>, %arg2: memref<256x8xf32, #tpu.memory_space<vmem>>, %arg3: memref<1x8xf32, #tpu.memory_space<vmem>>, %arg4: memref<1x8xf32, #tpu.memory_space<vmem>>, %arg5: memref<8x128xbf16, #tpu.memory_space<vmem>>, %arg6: memref<256x128xf32, #tpu.memory_space<vmem>>) attributes {dimension_semantics = [#tpu.dimension_semantics<parallel>], iteration_bounds = array<i64: 2>, scalar_prefetch = 0 : i64, scratch_operands = 0 : i64, tpu.core_type = #tpu.core_type<tc>, window_params = [{transform_indices = @transform_0, window_bounds = array<i64: 256, 8>}, {transform_indices = @transform_1, window_bounds = array<i64: 256, 8>}, {pipeline_mode = #tpu.pipeline_mode<synchronous>, transform_indices = @transform_2, window_bounds = array<i64: 1, 8>}, {pipeline_mode = #tpu.pipeline_mode<synchronous>, transform_indices = @transform_3, window_bounds = array<i64: 1, 8>}, {pipeline_mode = #tpu.pipeline_mode<synchronous>, transform_indices = @transform_4, window_bounds = array<i64: 8, 128>}, {transform_indices = @transform_5, window_bounds = array<i64: 256, 128>}]} {
    %c0 = arith.constant 0 : index
    %c0_0 = arith.constant 0 : index
    %0 = vector.load %arg1[%c0, %c0_0] : memref<256x8xf32, #tpu.memory_space<vmem>>, vector<256x8xf32>
    %cst = arith.constant dense<0.000000e+00> : vector<256xf32>
    %1 = vector.multi_reduction <add>, %0, %cst [1] : vector<256x8xf32> to vector<256xf32>
    %2 = vector.shape_cast %1 : vector<256xf32> to vector<256x1xf32>
    %cst_1 = arith.constant 8.000000e+00 : f32
    %3 = vector.broadcast %cst_1 : f32 to vector<256x1xf32>
    %4 = arith.divf %2, %3 : vector<256x1xf32>
    %5 = vector.broadcast %4 : vector<256x1xf32> to vector<256x8xf32>
    %6 = arith.subf %0, %5 : vector<256x8xf32>
    %7 = arith.mulf %6, %6 : vector<256x8xf32>
    %cst_2 = arith.constant dense<0.000000e+00> : vector<256xf32>
    %8 = vector.multi_reduction <add>, %7, %cst_2 [1] : vector<256x8xf32> to vector<256xf32>
    %9 = vector.shape_cast %8 : vector<256xf32> to vector<256x1xf32>
    %cst_3 = arith.constant 8.000000e+00 : f32
    %10 = vector.broadcast %cst_3 : f32 to vector<256x1xf32>
    %11 = arith.divf %9, %10 : vector<256x1xf32>
    %cst_4 = arith.constant 9.99999974E-6 : f32
    %12 = vector.broadcast %cst_4 : f32 to vector<256x1xf32>
    %13 = arith.addf %11, %12 : vector<256x1xf32>
    %14 = math.rsqrt %13 : vector<256x1xf32>
    %15 = vector.broadcast %14 : vector<256x1xf32> to vector<256x8xf32>
    %16 = arith.mulf %6, %15 : vector<256x8xf32>
    %c0_5 = arith.constant 0 : index
    %c0_6 = arith.constant 0 : index
    %17 = vector.load %arg3[%c0_5, %c0_6] : memref<1x8xf32, #tpu.memory_space<vmem>>, vector<1x8xf32>
    %18 = vector.broadcast %17 : vector<1x8xf32> to vector<256x8xf32>
    %19 = arith.mulf %16, %18 : vector<256x8xf32>
    %c0_7 = arith.constant 0 : index
    %c0_8 = arith.constant 0 : index
    %20 = vector.load %arg4[%c0_7, %c0_8] : memref<1x8xf32, #tpu.memory_space<vmem>>, vector<1x8xf32>
    %21 = vector.broadcast %20 : vector<1x8xf32> to vector<256x8xf32>
    %22 = arith.addf %19, %21 : vector<256x8xf32>
    %c0_9 = arith.constant 0 : index
    %c0_10 = arith.constant 0 : index
    %23 = vector.load %arg2[%c0_9, %c0_10] : memref<256x8xf32, #tpu.memory_space<vmem>>, vector<256x8xf32>
    %24 = arith.negf %23 : vector<256x8xf32>
    %25 = math.exp %24 : vector<256x8xf32>
    %cst_11 = arith.constant 1.000000e+00 : f32
    %26 = vector.broadcast %cst_11 : f32 to vector<256x8xf32>
    %27 = arith.addf %26, %25 : vector<256x8xf32>
    %28 = arith.divf %26, %27 : vector<256x8xf32>
    %29 = arith.mulf %23, %28 : vector<256x8xf32>
    %30 = arith.mulf %22, %29 : vector<256x8xf32>
    %31 = arith.truncf %30 : vector<256x8xf32> to vector<256x8xbf16>
    %c0_12 = arith.constant 0 : index
    %c0_13 = arith.constant 0 : index
    %32 = vector.load %arg5[%c0_12, %c0_13] : memref<8x128xbf16, #tpu.memory_space<vmem>>, vector<8x128xbf16>
    %cst_14 = arith.constant dense<0.000000e+00> : vector<256x128xf32>
    %33 = tpu.matmul %31, %32, %cst_14 {dimension_numbers = #tpu.dot_dimension_numbers<[1], [0], [0], [1], [0, 0, 1, 1], [], []>} : vector<256x8xbf16>, vector<8x128xbf16>, vector<256x128xf32> -> vector<256x128xf32>
    %c0_15 = arith.constant 0 : index
    %c0_16 = arith.constant 0 : index
    %34 = vector.load %arg6[%c0_15, %c0_16] : memref<256x128xf32, #tpu.memory_space<vmem>>, vector<256x128xf32>
    tpu.vector_store %arg6[%c0_15, %c0_16], %33 {strides = array<i32>} : memref<256x128xf32, #tpu.memory_space<vmem>>, vector<256x128xf32>,
    return
  }
  func.func @transform_0(%arg0: i32) -> (i32, i32) {
    %c0_i32 = arith.constant 0 : i32
    %c0_i32_0 = arith.constant 0 : i32
    return %arg0, %c0_i32 : i32, i32
  }
  func.func @transform_1(%arg0: i32) -> (i32, i32) {
    %c0_i32 = arith.constant 0 : i32
    %c0_i32_0 = arith.constant 0 : i32
    return %arg0, %c0_i32 : i32, i32
  }
  func.func @transform_2(%arg0: i32) -> (i32, i32) {
    %c0_i32 = arith.constant 0 : i32
    %c0_i32_0 = arith.constant 0 : i32
    %c0_i32_1 = arith.constant 0 : i32
    return %c0_i32, %c0_i32_0 : i32, i32
  }
  func.func @transform_3(%arg0: i32) -> (i32, i32) {
    %c0_i32 = arith.constant 0 : i32
    %c0_i32_0 = arith.constant 0 : i32
    %c0_i32_1 = arith.constant 0 : i32
    return %c0_i32, %c0_i32_0 : i32, i32
  }
  func.func @transform_4(%arg0: i32) -> (i32, i32) {
    %c0_i32 = arith.constant 0 : i32
    %c0_i32_0 = arith.constant 0 : i32
    %c0_i32_1 = arith.constant 0 : i32
    return %c0_i32, %c0_i32_0 : i32, i32
  }
  func.func @transform_5(%arg0: i32) -> (i32, i32) {
    %c0_i32 = arith.constant 0 : i32
    %c0_i32_0 = arith.constant 0 : i32
    return %arg0, %c0_i32 : i32, i32
  }
}

</mosaic_0001>

<bundles_post_ra>
// kernel: run.15
= control target key start
LH: loop header
LB: loop body
LE: loop exit
PB: predicated region body
PF: predicated region fallthrough
CT: control target
= control target key end

     0   :  { %vm78_vm0 = vcmask 31744   ;;  %s2556_s0 = inlined_call_operand.vmem [shape: f32[512,4], index: 0, kind: input, shape index: {}]   ;;  %s2557_s1 = inlined_call_operand.vmem [shape: f32[1,4], index: 1, kind: input, shape index: {}]   ;;  %s2558_s2 = inlined_call_operand.vmem [shape: f32[1,4], index: 2, kind: input, shape index: {}]   ;;  %s2559_s3 = inlined_call_operand.vmem [shape: f32[512,4], index: 3, kind: output, shape index: {}]  }
   0x1   :  { %v1277_v0 = vld [vmem:[%s2556_s0] sm:$0xff]  ;;  %v1282_v1 = vld [vmem:[%s2556_s0 + $0x10] sm:$0xff]  ;;  %v1287_v2 = vld [vmem:[%s2556_s0 + $0x8] sm:$0xff] }
   0x2   :  { %v79_v3 = vsel %vm78_vm0, %v1277_v0, 0.0  ;;  %v85_v4 = vsel %vm78_vm0, %v1282_v1, 0.0  ;;  %v1296_v5 = vld [vmem:[%s2556_s0 + $0x18] sm:$0xff]  ;;  %v82_v6 = vsel %vm78_vm0, %v1287_v2, 0.0  ;;  %v1305_v8 = vld [vmem:[%s2556_s0 + $0x20] sm:$0xff]  ;;  %v1310_v9 = vld [vmem:[%s2556_s0 + $0x28] sm:$0xff] }
   0x3   :  { %80 = vadd.xlane.f32.xlu0 %v79_v3  ;;  %86 = vadd.xlane.f32.xlu1 %v85_v4  ;;  %v88_v7 = vsel %vm78_vm0, %v1296_v5, 0.0  ;;  %v91_v10 = vsel %vm78_vm0, %v1305_v8, 0.0  ;;  %v94_v11 = vsel %vm78_vm0, %v1310_v9, 0.0  ;;  %v1319_v12 = vld [vmem:[%s2556_s0 + $0x30] sm:$0xff]  ;;  %v1324_v13 = vld [vmem:[%s2556_s0 + $0x38] sm:$0xff]  ;;  %v1333_v16 = vld [vmem:[%s2556_s0 + $0x40] sm:$0xff] }
   0x4   :  { %v97_v14 = vsel %vm78_vm0, %v1319_v12, 0.0  ;;  %v100_v15 = vsel %vm78_vm0, %v1324_v13, 0.0  ;;  %v1338_v17 = vld [vmem:[%s2556_s0 + $0x48] sm:$0xff]  ;;  %v103_v18 = vsel %vm78_vm0, %v1333_v16, 0.0  ;;  %v1347_v20 = vld [vmem:[%s2556_s0 + $0x50] sm:$0xff]  ;;  %v1352_v21 = vld [vmem:[%s2556_s0 + $0x58] sm:$0xff] }
   0x5   :  { %v106_v19 = vsel %vm78_vm0, %v1338_v17, 0.0  ;;  %v109_v22 = vsel %vm78_vm0, %v1347_v20, 0.0  ;;  %v112_v23 = vsel %vm78_vm0, %v1352_v21, 0.0  ;;  %v1361_v24 = vld [vmem:[%s2556_s0 + $0x60] sm:$0xff]  ;;  %v1366_v25 = vld [vmem:[%s2556_s0 + $0x68] sm:$0xff]  ;;  %v1375_v28 = vld [vmem:[%s2556_s0 + $0x70] sm:$0xff] }
   0x6   :  { %v115_v26 = vsel %vm78_vm0, %v1361_v24, 0.0  ;;  %v118_v27 = vsel %vm78_vm0, %v1366_v25, 0.0  ;;  %v1380_v29 = vld [vmem:[%s2556_s0 + $0x78] sm:$0xff]  ;;  %v121_v30 = vsel %vm78_vm0, %v1375_v28, 0.0  ;;  %v1389_v32 = vld [vmem:[%s2556_s0 + $0x80] sm:$0xff]  ;;  %v1394_v33 = vld [vmem:[%s2556_s0 + $0x88] sm:$0xff] }
   0x7   :  { %83 = vadd.xlane.f32.xlu0 %v82_v6  ;;  %89 = vadd.xlane.f32.xlu1 %v88_v7  ;;  %v124_v31 = vsel %vm78_vm0, %v1380_v29, 0.0  ;;  %v127_v34 = vsel %vm78_vm0, %v1389_v32, 0.0  ;;  %v130_v35 = vsel %vm78_vm0, %v1394_v33, 0.0  ;;  %v1403_v36 = vld [vmem:[%s2556_s0 + $0x90] sm:$0xff]  ;;  %v1408_v37 = vld [vmem:[%s2556_s0 + $0x98] sm:$0xff]  ;;  %v1417_v40 = vld [vmem:[%s2556_s0 + $0xa0] sm:$0xff] }
   0x8   :  { %v133_v38 = vsel %vm78_vm0, %v1403_v36, 0.0  ;;  %v136_v39 = vsel %vm78_vm0, %v1408_v37, 0.0  ;;  %v1422_v41 = vld [vmem:[%s2556_s0 + $0xa8] sm:$0xff]  ;;  %v139_v42 = vsel %vm78_vm0, %v1417_v40, 0.0  ;;  %v1431_v44 = vld [vmem:[%s2556_s0 + $0xb0] sm:$0xff]  ;;  %v1436_v45 = vld [vmem:[%s2556_s0 + $0xb8] sm:$0xff] }
   0x9   :  { %v142_v43 = vsel %vm78_vm0, %v1422_v41, 0.0  ;;  %v145_v46 = vsel %vm78_vm0, %v1431_v44, 0.0  ;;  %v148_v47 = vsel %vm78_vm0, %v1436_v45, 0.0  ;;  %v1445_v48 = vld [vmem:[%s2556_s0 + $0xc0] sm:$0xff]  ;;  %v1450_v49 = vld [vmem:[%s2556_s0 + $0xc8] sm:$0xff]  ;;  %v1459_v52 = vld [vmem:[%s2556_s0 + $0xd0] sm:$0xff] }
   0xa   :  { %v151_v50 = vsel %vm78_vm0, %v1445_v48, 0.0  ;;  %v154_v51 = vsel %vm78_vm0, %v1450_v49, 0.0  ;;  %v1464_v53 = vld [vmem:[%s2556_s0 + $0xd8] sm:$0xff]  ;;  %v157_v54 = vsel %vm78_vm0, %v1459_v52, 0.0  ;;  %v1473_v56 = vld [vmem:[%s2556_s0 + $0xe0] sm:$0xff]  ;;  %v1478_v57 = vld [vmem:[%s2556_s0 + $0xe8] sm:$0xff] }
   0xb   :  { %92 = vadd.xlane.f32.xlu0 %v91_v10  ;;  %95 = vadd.xlane.f32.xlu1 %v94_v11  ;;  %v160_v55 = vsel %vm78_vm0, %v1464_v53, 0.0  ;;  %v163_v58 = vsel %vm78_vm0, %v1473_v56, 0.0  ;;  %v166_v59 = vsel %vm78_vm0, %v1478_v57, 0.0  ;;  %v1487_v60 = vld [vmem:[%s2556_s0 + $0xf0] sm:$0xff]  ;;  %v1492_v61 = vld [vmem:[%s2556_s0 + $0xf8] sm:$0xff]  ;;  %v1501_v3 = vld [vmem:[%s2556_s0 + $0x100] sm:$0xff] }
   0xc   :  { %v169_v62 = vsel %vm78_vm0, %v1487_v60, 0.0  ;;  %v172_v63 = vsel %vm78_vm0, %v1492_v61, 0.0  ;;  %v1506_v4 = vld [vmem:[%s2556_s0 + $0x108] sm:$0xff]  ;;  %v175_v6 = vsel %vm78_vm0, %v1501_v3, 0.0  ;;  %v1515_v10 = vld [vmem:[%s2556_s0 + $0x110] sm:$0xff]  ;;  %v1520_v11 = vld [vmem:[%s2556_s0 + $0x118] sm:$0xff] }
   0xd   :  { %v178_v7 = vsel %vm78_vm0, %v1506_v4, 0.0 }
   0xf   :  { %98 = vadd.xlane.f32.xlu0 %v97_v14  ;;  %101 = vadd.xlane.f32.xlu1 %v100_v15  ;;  %v181_v14 = vsel %vm78_vm0, %v1515_v10, 0.0  ;;  %v184_v15 = vsel %vm78_vm0, %v1520_v11, 0.0 }
  0x13   :  { %104 = vadd.xlane.f32.xlu0 %v103_v18  ;;  %107 = vadd.xlane.f32.xlu1 %v106_v19  ;;  %v1529_v18 = vld [vmem:[%s2556_s0 + $0x120] sm:$0xff]  ;;  %v1534_v19 = vld [vmem:[%s2556_s0 + $0x128] sm:$0xff] }
  0x17   :  { %110 = vadd.xlane.f32.xlu0 %v109_v22  ;;  %113 = vadd.xlane.f32.xlu1 %v112_v23  ;;  %v187_v22 = vsel %vm78_vm0, %v1529_v18, 0.0  ;;  %v190_v23 = vsel %vm78_vm0, %v1534_v19, 0.0 }
  0x1b   :  { %116 = vadd.xlane.f32.xlu0 %v115_v26  ;;  %119 = vadd.xlane.f32.xlu1 %v118_v27  ;;  %v1543_v26 = vld [vmem:[%s2556_s0 + $0x130] sm:$0xff]  ;;  %v1548_v27 = vld [vmem:[%s2556_s0 + $0x138] sm:$0xff] }
  0x1f   :  { %122 = vadd.xlane.f32.xlu0 %v121_v30  ;;  %125 = vadd.xlane.f32.xlu1 %v124_v31  ;;  %v193_v30 = vsel %vm78_vm0, %v1543_v26, 0.0  ;;  %v196_v31 = vsel %vm78_vm0, %v1548_v27, 0.0 }
  0x23   :  { %128 = vadd.xlane.f32.xlu0 %v127_v34  ;;  %131 = vadd.xlane.f32.xlu1 %v130_v35  ;;  %v1557_v34 = vld [vmem:[%s2556_s0 + $0x140] sm:$0xff]  ;;  %v1562_v35 = vld [vmem:[%s2556_s0 + $0x148] sm:$0xff] }
  0x27   :  { %134 = vadd.xlane.f32.xlu0 %v133_v38  ;;  %137 = vadd.xlane.f32.xlu1 %v136_v39  ;;  %v199_v38 = vsel %vm78_vm0, %v1557_v34, 0.0  ;;  %v202_v39 = vsel %vm78_vm0, %v1562_v35, 0.0 }
  0x2b   :  { %140 = vadd.xlane.f32.xlu0 %v139_v42  ;;  %143 = vadd.xlane.f32.xlu1 %v142_v43  ;;  %v1571_v42 = vld [vmem:[%s2556_s0 + $0x150] sm:$0xff]  ;;  %v1576_v43 = vld [vmem:[%s2556_s0 + $0x158] sm:$0xff] }
  0x2f   :  { %146 = vadd.xlane.f32.xlu0 %v145_v46  ;;  %149 = vadd.xlane.f32.xlu1 %v148_v47  ;;  %v205_v46 = vsel %vm78_vm0, %v1571_v42, 0.0  ;;  %v208_v47 = vsel %vm78_vm0, %v1576_v43, 0.0 }
  0x33   :  { %152 = vadd.xlane.f32.xlu0 %v151_v50  ;;  %155 = vadd.xlane.f32.xlu1 %v154_v51  ;;  %v1585_v50 = vld [vmem:[%s2556_s0 + $0x160] sm:$0xff]  ;;  %v1590_v51 = vld [vmem:[%s2556_s0 + $0x168] sm:$0xff] }
  0x37   :  { %158 = vadd.xlane.f32.xlu0 %v157_v54  ;;  %161 = vadd.xlane.f32.xlu1 %v160_v55  ;;  %v211_v54 = vsel %vm78_vm0, %v1585_v50, 0.0  ;;  %v214_v55 = vsel %vm78_vm0, %v1590_v51, 0.0 }
  0x3b   :  { %164 = vadd.xlane.f32.xlu0 %v163_v58  ;;  %167 = vadd.xlane.f32.xlu1 %v166_v59  ;;  %v1599_v58 = vld [vmem:[%s2556_s0 + $0x170] sm:$0xff]  ;;  %v1604_v59 = vld [vmem:[%s2556_s0 + $0x178] sm:$0xff] }
  0x3f   :  { %170 = vadd.xlane.f32.xlu0 %v169_v62  ;;  %173 = vadd.xlane.f32.xlu1 %v172_v63  ;;  %v217_v62 = vsel %vm78_vm0, %v1599_v58, 0.0  ;;  %v220_v63 = vsel %vm78_vm0, %v1604_v59, 0.0 }
  0x43   :  { %176 = vadd.xlane.f32.xlu0 %v175_v6  ;;  %179 = vadd.xlane.f32.xlu1 %v178_v7  ;;  %v1613_v6 = vld [vmem:[%s2556_s0 + $0x180] sm:$0xff]  ;;  %v1618_v7 = vld [vmem:[%s2556_s0 + $0x188] sm:$0xff] }
  0x47   :  { %182 = vadd.xlane.f32.xlu0 %v181_v14  ;;  %185 = vadd.xlane.f32.xlu1 %v184_v15  ;;  %v223_v14 = vsel %vm78_vm0, %v1613_v6, 0.0  ;;  %v226_v15 = vsel %vm78_vm0, %v1618_v7, 0.0 }
  0x4b   :  { %188 = vadd.xlane.f32.xlu0 %v187_v22  ;;  %191 = vadd.xlane.f32.xlu1 %v190_v23  ;;  %v1627_v22 = vld [vmem:[%s2556_s0 + $0x190] sm:$0xff]  ;;  %v1632_v23 = vld [vmem:[%s2556_s0 + $0x198] sm:$0xff] }
  0x4c   :  { %2592 = vst [vmem:[#allocation2_spill] sm:$0xff] %v1627_v22  ;;  %2593 = vst [vmem:[#allocation3_spill] sm:$0xff] %v1632_v23 }
  0x4f   :  { %194 = vadd.xlane.f32.xlu0 %v193_v30  ;;  %197 = vadd.xlane.f32.xlu1 %v196_v31  ;;  %v229_v30 = vsel %vm78_vm0, %v1627_v22, 0.0  ;;  %v232_v31 = vsel %vm78_vm0, %v1632_v23, 0.0 }
  0x53   :  { %200 = vadd.xlane.f32.xlu0 %v199_v38  ;;  %203 = vadd.xlane.f32.xlu1 %v202_v39  ;;  %v1641_v38 = vld [vmem:[%s2556_s0 + $0x1a0] sm:$0xff]  ;;  %v1646_v39 = vld [vmem:[%s2556_s0 + $0x1a8] sm:$0xff] }
  0x54   :  { %2594 = vst [vmem:[#allocation4_spill] sm:$0xff] %v1641_v38  ;;  %2595 = vst [vmem:[#allocation5_spill] sm:$0xff] %v1646_v39 }
  0x57   :  { %206 = vadd.xlane.f32.xlu0 %v205_v46  ;;  %209 = vadd.xlane.f32.xlu1 %v208_v47  ;;  %v235_v46 = vsel %vm78_vm0, %v1641_v38, 0.0  ;;  %v238_v47 = vsel %vm78_vm0, %v1646_v39, 0.0 }
  0x5b   :  { %212 = vadd.xlane.f32.xlu0 %v211_v54  ;;  %215 = vadd.xlane.f32.xlu1 %v214_v55  ;;  %v1655_v54 = vld [vmem:[%s2556_s0 + $0x1b0] sm:$0xff]  ;;  %v1660_v55 = vld [vmem:[%s2556_s0 + $0x1b8] sm:$0xff] }
  0x5c   :  { %2596 = vst [vmem:[#allocation6_spill] sm:$0xff] %v1655_v54  ;;  %2597 = vst [vmem:[#allocation7_spill] sm:$0xff] %v1660_v55 }
  0x5f   :  { %218 = vadd.xlane.f32.xlu0 %v217_v62  ;;  %221 = vadd.xlane.f32.xlu1 %v220_v63  ;;  %v241_v62 = vsel %vm78_vm0, %v1655_v54, 0.0  ;;  %v244_v63 = vsel %vm78_vm0, %v1660_v55, 0.0 }
  0x63   :  { %224 = vadd.xlane.f32.xlu0 %v223_v14  ;;  %227 = vadd.xlane.f32.xlu1 %v226_v15  ;;  %v1669_v14 = vld [vmem:[%s2556_s0 + $0x1c0] sm:$0xff]  ;;  %v1674_v15 = vld [vmem:[%s2556_s0 + $0x1c8] sm:$0xff] }
  0x64   :  { %2598 = vst [vmem:[#allocation8_spill] sm:$0xff] %v1669_v14  ;;  %2599 = vst [vmem:[#allocation9_spill] sm:$0xff] %v1674_v15 }
  0x67   :  { %230 = vadd.xlane.f32.xlu0 %v229_v30  ;;  %233 = vadd.xlane.f32.xlu1 %v232_v31  ;;  %v247_v30 = vsel %vm78_vm0, %v1669_v14, 0.0  ;;  %v250_v31 = vsel %vm78_vm0, %v1674_v15, 0.0  ;;  %v1697_v15 = vld [vmem:[%s2556_s0 + $0x1e0] sm:$0xff]  ;;  %v1702_v14 = vld [vmem:[%s2556_s0 + $0x1e8] sm:$0xff] }
  0x68   :  { %2602 = vst [vmem:[#allocation12_spill] sm:$0xff] %v1697_v15  ;;  %2603 = vst [vmem:[#allocation13_spill] sm:$0xff] %v1702_v14 }
  0x6b   :  { %236 = vadd.xlane.f32.xlu0 %v235_v46  ;;  %239 = vadd.xlane.f32.xlu1 %v238_v47  ;;  %v1683_v46 = vld [vmem:[%s2556_s0 + $0x1d0] sm:$0xff]  ;;  %v1688_v47 = vld [vmem:[%s2556_s0 + $0x1d8] sm:$0xff] }
  0x6c   :  { %2600 = vst [vmem:[#allocation10_spill] sm:$0xff] %v1683_v46  ;;  %2601 = vst [vmem:[#allocation11_spill] sm:$0xff] %v1688_v47 }
  0x6f   :  { %242 = vadd.xlane.f32.xlu0 %v241_v62  ;;  %245 = vadd.xlane.f32.xlu1 %v244_v63  ;;  %v253_v62 = vsel %vm78_vm0, %v1683_v46, 0.0  ;;  %v256_v63 = vsel %vm78_vm0, %v1688_v47, 0.0  ;;  %v1711_v47 = vld [vmem:[%s2556_s0 + $0x1f0] sm:$0xff]  ;;  %v1716_v46 = vld [vmem:[%s2556_s0 + $0x1f8] sm:$0xff] }
  0x70   :  { %2604 = vst [vmem:[#allocation14_spill] sm:$0xff] %v1711_v47 }
  0x73   :  { %248 = vadd.xlane.f32.xlu0 %v247_v30  ;;  %251 = vadd.xlane.f32.xlu1 %v250_v31  ;;  %v259_v30 = vsel %vm78_vm0, %v1697_v15, 0.0  ;;  %v262_v31 = vsel %vm78_vm0, %v1702_v14, 0.0 }
  0x77   :  { %254 = vadd.xlane.f32.xlu0 %v253_v62  ;;  %257 = vadd.xlane.f32.xlu1 %v256_v63  ;;  %v265_v62 = vsel %vm78_vm0, %v1711_v47, 0.0  ;;  %v268_v63 = vsel %vm78_vm0, %v1716_v46, 0.0 }
  0x7b   :  { %260 = vadd.xlane.f32.xlu0 %v259_v30  ;;  %263 = vadd.xlane.f32.xlu1 %v262_v31 }
  0x7f   :  { %266 = vadd.xlane.f32.xlu0 %v265_v62  ;;  %269 = vadd.xlane.f32.xlu1 %v268_v63 }
  0x8c   :  { %v81_v14 = vpop.xlane.xlu0 %80  ;;  %v87_v15 = vpop.xlane.xlu1 %86 }
  0x8d   :  { %v272_v55 = vmul.f32 0.25, %v81_v14  ;;  %v274_v54 = vmul.f32 0.25, %v87_v15 }
  0x8f   :  { %v1723_v39 = vsub.f32 %v1277_v0, %v272_v55  ;;  %v1726_v38 = vsub.f32 %v1282_v1, %v274_v54 }
  0x90   :  { %v84_v30 = vpop.xlane.xlu0 %83  ;;  %v90_v31 = vpop.xlane.xlu1 %89 }
  0x91   :  { %2605 = vst [vmem:[#allocation15_spill] sm:$0xff] %v1726_v38  ;;  %v273_v23 = vmul.f32 0.25, %v84_v30  ;;  %v275_v22 = vmul.f32 0.25, %v90_v31  ;;  %v400_v47 = vmul.f32 %v1723_v39, %v1723_v39  ;;  %v402_v62 = vmul.f32 %v1726_v38, %v1726_v38 }
  0x93   :  { %v1733_v63 = vsub.f32 %v1287_v2, %v273_v23  ;;  %v1736_v14 = vsub.f32 %v1296_v5, %v275_v22  ;;  %v464_v0 = vsel %vm78_vm0, %v400_v47, 0.0  ;;  %v470_v55 = vsel %vm78_vm0, %v402_v62, 0.0 }
  0x94   :  { %465 = vadd.xlane.f32.xlu0 %v464_v0  ;;  %v93_v1 = vpop.xlane.xlu0 %92  ;;  %v96_v54 = vpop.xlane.xlu1 %95 }
  0x95   :  { %v276_v15 = vmul.f32 0.25, %v93_v1  ;;  %v277_v30 = vmul.f32 0.25, %v96_v54  ;;  %v401_v31 = vmul.f32 %v1733_v63, %v1733_v63  ;;  %v403_v38 = vmul.f32 %v1736_v14, %v1736_v14 }
  0x97   :  { %v1745_v2 = vsub.f32 %v1305_v8, %v276_v15  ;;  %v1748_v5 = vsub.f32 %v1310_v9, %v277_v30  ;;  %v467_v22 = vsel %vm78_vm0, %v401_v31, 0.0  ;;  %v473_v62 = vsel %vm78_vm0, %v403_v38, 0.0 }
  0x98   :  { %471 = vadd.xlane.f32.xlu0 %v470_v55  ;;  %468 = vadd.xlane.f32.xlu1 %v467_v22  ;;  %v99_v23 = vpop.xlane.xlu0 %98  ;;  %v102_v47 = vpop.xlane.xlu1 %101 }
  0x99   :  { %v278_v0 = vmul.f32 0.25, %v99_v23  ;;  %v279_v1 = vmul.f32 0.25, %v102_v47  ;;  %v404_v54 = vmul.f32 %v1745_v2, %v1745_v2  ;;  %v405_v8 = vmul.f32 %v1748_v5, %v1748_v5 }
  0x9b   :  { %v1757_v15 = vsub.f32 %v1319_v12, %v278_v0  ;;  %v1760_v9 = vsub.f32 %v1324_v13, %v279_v1  ;;  %v476_v55 = vsel %vm78_vm0, %v404_v54, 0.0  ;;  %v479_v31 = vsel %vm78_vm0, %v405_v8, 0.0 }
  0x9c   :  { %474 = vadd.xlane.f32.xlu1 %v473_v62  ;;  %477 = vadd.xlane.f32.xlu0 %v476_v55  ;;  %v105_v30 = vpop.xlane.xlu0 %104  ;;  %v108_v38 = vpop.xlane.xlu1 %107 }
  0x9d   :  { %v280_v22 = vmul.f32 0.25, %v105_v30  ;;  %v281_v23 = vmul.f32 0.25, %v108_v38  ;;  %v406_v47 = vmul.f32 %v1757_v15, %v1757_v15  ;;  %v407_v12 = vmul.f32 %v1760_v9, %v1760_v9 }
  0x9f   :  { %v1769_v0 = vsub.f32 %v1333_v16, %v280_v22  ;;  %v1772_v13 = vsub.f32 %v1338_v17, %v281_v23  ;;  %v482_v62 = vsel %vm78_vm0, %v406_v47, 0.0  ;;  %v485_v8 = vsel %vm78_vm0, %v407_v12, 0.0 }
  0xa0   :  { %480 = vadd.xlane.f32.xlu1 %v479_v31  ;;  %483 = vadd.xlane.f32.xlu0 %v482_v62  ;;  %v111_v1 = vpop.xlane.xlu0 %110  ;;  %v114_v54 = vpop.xlane.xlu1 %113 }
  0xa1   :  { %v282_v55 = vmul.f32 0.25, %v111_v1  ;;  %v283_v30 = vmul.f32 0.25, %v114_v54  ;;  %v408_v38 = vmul.f32 %v1769_v0, %v1769_v0  ;;  %v409_v16 = vmul.f32 %v1772_v13, %v1772_v13 }
  0xa3   :  { %v1781_v22 = vsub.f32 %v1347_v20, %v282_v55  ;;  %v1784_v17 = vsub.f32 %v1352_v21, %v283_v30  ;;  %v488_v31 = vsel %vm78_vm0, %v408_v38, 0.0  ;;  %v491_v12 = vsel %vm78_vm0, %v409_v16, 0.0 }
  0xa4   :  { %486 = vadd.xlane.f32.xlu1 %v485_v8  ;;  %489 = vadd.xlane.f32.xlu0 %v488_v31  ;;  %v117_v23 = vpop.xlane.xlu0 %116  ;;  %v120_v47 = vpop.xlane.xlu1 %119 }
  0xa5   :  { %v284_v62 = vmul.f32 0.25, %v117_v23  ;;  %v285_v1 = vmul.f32 0.25, %v120_v47  ;;  %v410_v54 = vmul.f32 %v1781_v22, %v1781_v22  ;;  %v411_v20 = vmul.f32 %v1784_v17, %v1784_v17 }
  0xa7   :  { %v1793_v55 = vsub.f32 %v1361_v24, %v284_v62  ;;  %v1796_v21 = vsub.f32 %v1366_v25, %v285_v1  ;;  %v494_v8 = vsel %vm78_vm0, %v410_v54, 0.0  ;;  %v497_v16 = vsel %vm78_vm0, %v411_v20, 0.0 }
  0xa8   :  { %492 = vadd.xlane.f32.xlu1 %v491_v12  ;;  %495 = vadd.xlane.f32.xlu0 %v494_v8  ;;  %v123_v30 = vpop.xlane.xlu0 %122  ;;  %v126_v38 = vpop.xlane.xlu1 %125 }
  0xa9   :  { %v286_v31 = vmul.f32 0.25, %v123_v30  ;;  %v287_v23 = vmul.f32 0.25, %v126_v38  ;;  %v412_v47 = vmul.f32 %v1793_v55, %v1793_v55  ;;  %v413_v24 = vmul.f32 %v1796_v21, %v1796_v21 }
  0xab   :  { %v1805_v62 = vsub.f32 %v1375_v28, %v286_v31  ;;  %v1808_v25 = vsub.f32 %v1380_v29, %v287_v23  ;;  %v500_v12 = vsel %vm78_vm0, %v412_v47, 0.0  ;;  %v503_v20 = vsel %vm78_vm0, %v413_v24, 0.0 }
  0xac   :  { %498 = vadd.xlane.f32.xlu1 %v497_v16  ;;  %501 = vadd.xlane.f32.xlu0 %v500_v12  ;;  %v129_v1 = vpop.xlane.xlu0 %128  ;;  %v132_v54 = vpop.xlane.xlu1 %131 }
  0xad   :  { %v288_v8 = vmul.f32 0.25, %v129_v1  ;;  %v289_v30 = vmul.f32 0.25, %v132_v54  ;;  %v414_v38 = vmul.f32 %v1805_v62, %v1805_v62  ;;  %v415_v28 = vmul.f32 %v1808_v25, %v1808_v25 }
  0xaf   :  { %v1817_v31 = vsub.f32 %v1389_v32, %v288_v8  ;;  %v1820_v29 = vsub.f32 %v1394_v33, %v289_v30  ;;  %v506_v16 = vsel %vm78_vm0, %v414_v38, 0.0  ;;  %v509_v24 = vsel %vm78_vm0, %v415_v28, 0.0 }
  0xb0   :  { %504 = vadd.xlane.f32.xlu1 %v503_v20  ;;  %507 = vadd.xlane.f32.xlu0 %v506_v16  ;;  %v135_v23 = vpop.xlane.xlu0 %134  ;;  %v138_v47 = vpop.xlane.xlu1 %137 }
  0xb1   :  { %v290_v12 = vmul.f32 0.25, %v135_v23  ;;  %v291_v1 = vmul.f32 0.25, %v138_v47  ;;  %v416_v54 = vmul.f32 %v1817_v31, %v1817_v31  ;;  %v417_v32 = vmul.f32 %v1820_v29, %v1820_v29 }
  0xb3   :  { %v1829_v8 = vsub.f32 %v1403_v36, %v290_v12  ;;  %v1832_v33 = vsub.f32 %v1408_v37, %v291_v1  ;;  %v512_v20 = vsel %vm78_vm0, %v416_v54, 0.0  ;;  %v515_v28 = vsel %vm78_vm0, %v417_v32, 0.0 }
  0xb4   :  { %510 = vadd.xlane.f32.xlu1 %v509_v24  ;;  %513 = vadd.xlane.f32.xlu0 %v512_v20  ;;  %v141_v30 = vpop.xlane.xlu0 %140  ;;  %v144_v38 = vpop.xlane.xlu1 %143 }
  0xb5   :  { %v292_v16 = vmul.f32 0.25, %v141_v30  ;;  %v293_v23 = vmul.f32 0.25, %v144_v38  ;;  %v418_v47 = vmul.f32 %v1829_v8, %v1829_v8  ;;  %v419_v36 = vmul.f32 %v1832_v33, %v1832_v33 }
  0xb7   :  { %v1841_v12 = vsub.f32 %v1417_v40, %v292_v16  ;;  %v1844_v37 = vsub.f32 %v1422_v41, %v293_v23  ;;  %v518_v24 = vsel %vm78_vm0, %v418_v47, 0.0  ;;  %v521_v32 = vsel %vm78_vm0, %v419_v36, 0.0 }
  0xb8   :  { %516 = vadd.xlane.f32.xlu1 %v515_v28  ;;  %519 = vadd.xlane.f32.xlu0 %v518_v24  ;;  %v147_v1 = vpop.xlane.xlu0 %146  ;;  %v150_v54 = vpop.xlane.xlu1 %149 }
  0xb9   :  { %v294_v20 = vmul.f32 0.25, %v147_v1  ;;  %v295_v30 = vmul.f32 0.25, %v150_v54  ;;  %v420_v38 = vmul.f32 %v1841_v12, %v1841_v12  ;;  %v421_v40 = vmul.f32 %v1844_v37, %v1844_v37 }
  0xbb   :  { %v1853_v16 = vsub.f32 %v1431_v44, %v294_v20  ;;  %v1856_v41 = vsub.f32 %v1436_v45, %v295_v30  ;;  %v524_v28 = vsel %vm78_vm0, %v420_v38, 0.0  ;;  %v527_v36 = vsel %vm78_vm0, %v421_v40, 0.0 }
  0xbc   :  { %522 = vadd.xlane.f32.xlu1 %v521_v32  ;;  %525 = vadd.xlane.f32.xlu0 %v524_v28  ;;  %v153_v23 = vpop.xlane.xlu0 %152  ;;  %v156_v47 = vpop.xlane.xlu1 %155 }
  0xbd   :  { %v296_v24 = vmul.f32 0.25, %v153_v23  ;;  %v297_v1 = vmul.f32 0.25, %v156_v47  ;;  %v422_v54 = vmul.f32 %v1853_v16, %v1853_v16  ;;  %v423_v44 = vmul.f32 %v1856_v41, %v1856_v41 }
  0xbf   :  { %v1865_v20 = vsub.f32 %v1445_v48, %v296_v24  ;;  %v1868_v45 = vsub.f32 %v1450_v49, %v297_v1  ;;  %v530_v32 = vsel %vm78_vm0, %v422_v54, 0.0  ;;  %v533_v40 = vsel %vm78_vm0, %v423_v44, 0.0 }
  0xc0   :  { %528 = vadd.xlane.f32.xlu1 %v527_v36  ;;  %531 = vadd.xlane.f32.xlu0 %v530_v32  ;;  %v159_v30 = vpop.xlane.xlu0 %158  ;;  %v162_v38 = vpop.xlane.xlu1 %161 }
  0xc1   :  { %v298_v28 = vmul.f32 0.25, %v159_v30  ;;  %v299_v23 = vmul.f32 0.25, %v162_v38  ;;  %v424_v47 = vmul.f32 %v1865_v20, %v1865_v20  ;;  %v425_v48 = vmul.f32 %v1868_v45, %v1868_v45 }
  0xc3   :  { %v1877_v24 = vsub.f32 %v1459_v52, %v298_v28  ;;  %v1880_v49 = vsub.f32 %v1464_v53, %v299_v23  ;;  %v536_v36 = vsel %vm78_vm0, %v424_v47, 0.0  ;;  %v539_v44 = vsel %vm78_vm0, %v425_v48, 0.0 }
  0xc4   :  { %534 = vadd.xlane.f32.xlu1 %v533_v40  ;;  %537 = vadd.xlane.f32.xlu0 %v536_v36  ;;  %v165_v1 = vpop.xlane.xlu0 %164  ;;  %v168_v54 = vpop.xlane.xlu1 %167 }
  0xc5   :  { %v300_v32 = vmul.f32 0.25, %v165_v1  ;;  %v301_v30 = vmul.f32 0.25, %v168_v54  ;;  %v426_v38 = vmul.f32 %v1877_v24, %v1877_v24  ;;  %v427_v52 = vmul.f32 %v1880_v49, %v1880_v49 }
  0xc7   :  { %v1889_v28 = vsub.f32 %v1473_v56, %v300_v32  ;;  %v1892_v53 = vsub.f32 %v1478_v57, %v301_v30  ;;  %v542_v40 = vsel %vm78_vm0, %v426_v38, 0.0  ;;  %v545_v48 = vsel %vm78_vm0, %v427_v52, 0.0 }
  0xc8   :  { %540 = vadd.xlane.f32.xlu1 %v539_v44  ;;  %543 = vadd.xlane.f32.xlu0 %v542_v40  ;;  %v171_v23 = vpop.xlane.xlu0 %170  ;;  %v174_v47 = vpop.xlane.xlu1 %173 }
  0xc9   :  { %v302_v36 = vmul.f32 0.25, %v171_v23  ;;  %v303_v1 = vmul.f32 0.25, %v174_v47  ;;  %v428_v54 = vmul.f32 %v1889_v28, %v1889_v28  ;;  %v429_v56 = vmul.f32 %v1892_v53, %v1892_v53 }
  0xcb   :  { %v1901_v32 = vsub.f32 %v1487_v60, %v302_v36  ;;  %v1904_v57 = vsub.f32 %v1492_v61, %v303_v1  ;;  %v548_v44 = vsel %vm78_vm0, %v428_v54, 0.0  ;;  %v551_v52 = vsel %vm78_vm0, %v429_v56, 0.0 }
  0xcc   :  { %546 = vadd.xlane.f32.xlu1 %v545_v48  ;;  %549 = vadd.xlane.f32.xlu0 %v548_v44  ;;  %v177_v30 = vpop.xlane.xlu0 %176  ;;  %v180_v38 = vpop.xlane.xlu1 %179 }
  0xcd   :  { %v304_v40 = vmul.f32 0.25, %v177_v30  ;;  %v305_v23 = vmul.f32 0.25, %v180_v38  ;;  %v430_v47 = vmul.f32 %v1901_v32, %v1901_v32  ;;  %v431_v60 = vmul.f32 %v1904_v57, %v1904_v57 }
  0xcf   :  { %v1913_v36 = vsub.f32 %v1501_v3, %v304_v40  ;;  %v1916_v61 = vsub.f32 %v1506_v4, %v305_v23  ;;  %v554_v48 = vsel %vm78_vm0, %v430_v47, 0.0  ;;  %v557_v56 = vsel %vm78_vm0, %v431_v60, 0.0 }
  0xd0   :  { %552 = vadd.xlane.f32.xlu1 %v551_v52  ;;  %555 = vadd.xlane.f32.xlu0 %v554_v48  ;;  %v183_v1 = vpop.xlane.xlu0 %182  ;;  %v186_v54 = vpop.xlane.xlu1 %185 }
  0xd1   :  { %v306_v44 = vmul.f32 0.25, %v183_v1  ;;  %v307_v30 = vmul.f32 0.25, %v186_v54  ;;  %v432_v38 = vmul.f32 %v1913_v36, %v1913_v36  ;;  %v433_v3 = vmul.f32 %v1916_v61, %v1916_v61 }
  0xd3   :  { %v1925_v40 = vsub.f32 %v1515_v10, %v306_v44  ;;  %v1928_v4 = vsub.f32 %v1520_v11, %v307_v30  ;;  %v560_v52 = vsel %vm78_vm0, %v432_v38, 0.0  ;;  %v563_v60 = vsel %vm78_vm0, %v433_v3, 0.0 }
  0xd4   :  { %558 = vadd.xlane.f32.xlu1 %v557_v56  ;;  %561 = vadd.xlane.f32.xlu0 %v560_v52  ;;  %v189_v23 = vpop.xlane.xlu0 %188  ;;  %v192_v47 = vpop.xlane.xlu1 %191 }
  0xd5   :  { %v308_v48 = vmul.f32 0.25, %v189_v23  ;;  %v309_v1 = vmul.f32 0.25, %v192_v47  ;;  %v434_v54 = vmul.f32 %v1925_v40, %v1925_v40  ;;  %v435_v10 = vmul.f32 %v1928_v4, %v1928_v4 }
  0xd7   :  { %v1937_v44 = vsub.f32 %v1529_v18, %v308_v48  ;;  %v1940_v11 = vsub.f32 %v1534_v19, %v309_v1  ;;  %v566_v56 = vsel %vm78_vm0, %v434_v54, 0.0  ;;  %v569_v3 = vsel %vm78_vm0, %v435_v10, 0.0 }
  0xd8   :  { %564 = vadd.xlane.f32.xlu1 %v563_v60  ;;  %567 = vadd.xlane.f32.xlu0 %v566_v56  ;;  %v195_v30 = vpop.xlane.xlu0 %194  ;;  %v198_v38 = vpop.xlane.xlu1 %197 }
  0xd9   :  { %v310_v52 = vmul.f32 0.25, %v195_v30  ;;  %v311_v23 = vmul.f32 0.25, %v198_v38  ;;  %v436_v47 = vmul.f32 %v1937_v44, %v1937_v44  ;;  %v437_v18 = vmul.f32 %v1940_v11, %v1940_v11 }
  0xdb   :  { %v1949_v48 = vsub.f32 %v1543_v26, %v310_v52  ;;  %v1952_v19 = vsub.f32 %v1548_v27, %v311_v23  ;;  %v572_v60 = vsel %vm78_vm0, %v436_v47, 0.0  ;;  %v575_v10 = vsel %vm78_vm0, %v437_v18, 0.0 }
  0xdc   :  { %570 = vadd.xlane.f32.xlu1 %v569_v3  ;;  %573 = vadd.xlane.f32.xlu0 %v572_v60  ;;  %v201_v1 = vpop.xlane.xlu0 %200  ;;  %v204_v54 = vpop.xlane.xlu1 %203 }
  0xdd   :  { %v312_v56 = vmul.f32 0.25, %v201_v1  ;;  %v313_v30 = vmul.f32 0.25, %v204_v54  ;;  %v438_v38 = vmul.f32 %v1949_v48, %v1949_v48  ;;  %v439_v26 = vmul.f32 %v1952_v19, %v1952_v19 }
  0xdf   :  { %v1961_v52 = vsub.f32 %v1557_v34, %v312_v56  ;;  %v1964_v27 = vsub.f32 %v1562_v35, %v313_v30  ;;  %v578_v3 = vsel %vm78_vm0, %v438_v38, 0.0  ;;  %v581_v18 = vsel %vm78_vm0, %v439_v26, 0.0 }
  0xe0   :  { %576 = vadd.xlane.f32.xlu1 %v575_v10  ;;  %579 = vadd.xlane.f32.xlu0 %v578_v3  ;;  %v207_v23 = vpop.xlane.xlu0 %206  ;;  %v210_v47 = vpop.xlane.xlu1 %209 }
  0xe1   :  { %v314_v60 = vmul.f32 0.25, %v207_v23  ;;  %v315_v1 = vmul.f32 0.25, %v210_v47  ;;  %v440_v54 = vmul.f32 %v1961_v52, %v1961_v52  ;;  %v441_v34 = vmul.f32 %v1964_v27, %v1964_v27 }
  0xe3   :  { %v1973_v56 = vsub.f32 %v1571_v42, %v314_v60  ;;  %v1976_v35 = vsub.f32 %v1576_v43, %v315_v1  ;;  %v584_v10 = vsel %vm78_vm0, %v440_v54, 0.0  ;;  %v587_v26 = vsel %vm78_vm0, %v441_v34, 0.0 }
  0xe4   :  { %582 = vadd.xlane.f32.xlu1 %v581_v18  ;;  %585 = vadd.xlane.f32.xlu0 %v584_v10  ;;  %v213_v30 = vpop.xlane.xlu0 %212  ;;  %v216_v38 = vpop.xlane.xlu1 %215 }
  0xe5   :  { %v316_v3 = vmul.f32 0.25, %v213_v30  ;;  %v317_v23 = vmul.f32 0.25, %v216_v38  ;;  %v442_v47 = vmul.f32 %v1973_v56, %v1973_v56  ;;  %v443_v42 = vmul.f32 %v1976_v35, %v1976_v35 }
  0xe7   :  { %v1985_v60 = vsub.f32 %v1585_v50, %v316_v3  ;;  %v1988_v43 = vsub.f32 %v1590_v51, %v317_v23  ;;  %v590_v18 = vsel %vm78_vm0, %v442_v47, 0.0  ;;  %v593_v34 = vsel %vm78_vm0, %v443_v42, 0.0 }
  0xe8   :  { %588 = vadd.xlane.f32.xlu1 %v587_v26  ;;  %591 = vadd.xlane.f32.xlu0 %v590_v18  ;;  %v219_v1 = vpop.xlane.xlu0 %218  ;;  %v222_v54 = vpop.xlane.xlu1 %221 }
  0xe9   :  { %v318_v10 = vmul.f32 0.25, %v219_v1  ;;  %v319_v30 = vmul.f32 0.25, %v222_v54  ;;  %v444_v38 = vmul.f32 %v1985_v60, %v1985_v60  ;;  %v445_v50 = vmul.f32 %v1988_v43, %v1988_v43 }
  0xeb   :  { %v1997_v3 = vsub.f32 %v1599_v58, %v318_v10  ;;  %v2000_v51 = vsub.f32 %v1604_v59, %v319_v30  ;;  %v596_v26 = vsel %vm78_vm0, %v444_v38, 0.0  ;;  %v599_v42 = vsel %vm78_vm0, %v445_v50, 0.0 }
  0xec   :  { %594 = vadd.xlane.f32.xlu1 %v593_v34  ;;  %597 = vadd.xlane.f32.xlu0 %v596_v26  ;;  %v225_v23 = vpop.xlane.xlu0 %224  ;;  %v228_v47 = vpop.xlane.xlu1 %227 }
  0xed   :  { %2606 = vst [vmem:[#allocation16_spill] sm:$0xff] %v1997_v3  ;;  %2607 = vst [vmem:[#allocation17_spill] sm:$0xff] %v2000_v51  ;;  %v320_v18 = vmul.f32 0.25, %v225_v23  ;;  %v321_v1 = vmul.f32 0.25, %v228_v47  ;;  %v446_v54 = vmul.f32 %v1997_v3, %v1997_v3  ;;  %v447_v58 = vmul.f32 %v2000_v51, %v2000_v51 }
  0xef   :  { %v2009_v10 = vsub.f32 %v1613_v6, %v320_v18  ;;  %v2012_v59 = vsub.f32 %v1618_v7, %v321_v1  ;;  %v602_v34 = vsel %vm78_vm0, %v446_v54, 0.0  ;;  %v605_v50 = vsel %vm78_vm0, %v447_v58, 0.0  ;;  %v2610_v18 = vld [vmem:[#allocation2_spill] sm:$0xff]  ;;  %v2612_v7 = vld [vmem:[#allocation3_spill] sm:$0xff] }
  0xf0   :  { %600 = vadd.xlane.f32.xlu1 %v599_v42  ;;  %603 = vadd.xlane.f32.xlu0 %v602_v34  ;;  %v231_v30 = vpop.xlane.xlu0 %230  ;;  %v234_v38 = vpop.xlane.xlu1 %233 }
  0xf1   :  { %2608 = vst [vmem:[#allocation18_spill] sm:$0xff] %v2009_v10  ;;  %2609 = vst [vmem:[#allocation19_spill] sm:$0xff] %v2012_v59  ;;  %v322_v26 = vmul.f32 0.25, %v231_v30  ;;  %v323_v23 = vmul.f32 0.25, %v234_v38  ;;  %v448_v47 = vmul.f32 %v2009_v10, %v2009_v10  ;;  %v449_v6 = vmul.f32 %v2012_v59, %v2012_v59 }
  0xf3   :  { %v2021_v51 = vsub.f32 %v2610_v18, %v322_v26  ;;  %v2024_v1 = vsub.f32 %v2612_v7, %v323_v23  ;;  %v608_v42 = vsel %vm78_vm0, %v448_v47, 0.0  ;;  %v611_v34 = vsel %vm78_vm0, %v449_v6, 0.0  ;;  %v2614_v18 = vld [vmem:[#allocation4_spill] sm:$0xff]  ;;  %v2616_v23 = vld [vmem:[#allocation5_spill] sm:$0xff] }
  0xf4   :  { %606 = vadd.xlane.f32.xlu1 %v605_v50  ;;  %609 = vadd.xlane.f32.xlu0 %v608_v42  ;;  %v237_v54 = vpop.xlane.xlu0 %236  ;;  %v240_v58 = vpop.xlane.xlu1 %239 }
  0xf5   :  { %2611 = vst [vmem:[#allocation2_spill] sm:$0xff] %v2021_v51  ;;  %2613 = vst [vmem:[#allocation3_spill] sm:$0xff] %v2024_v1  ;;  %v324_v30 = vmul.f32 0.25, %v237_v54  ;;  %v325_v38 = vmul.f32 0.25, %v240_v58  ;;  %v450_v10 = vmul.f32 %v2021_v51, %v2021_v51  ;;  %v451_v26 = vmul.f32 %v2024_v1, %v2024_v1 }
  0xf7   :  { %v2033_v59 = vsub.f32 %v2614_v18, %v324_v30  ;;  %v2036_v7 = vsub.f32 %v2616_v23, %v325_v38  ;;  %v614_v50 = vsel %vm78_vm0, %v450_v10, 0.0  ;;  %v617_v42 = vsel %vm78_vm0, %v451_v26, 0.0  ;;  %v2618_v18 = vld [vmem:[#allocation6_spill] sm:$0xff]  ;;  %v2620_v38 = vld [vmem:[#allocation7_spill] sm:$0xff] }
  0xf8   :  { %612 = vadd.xlane.f32.xlu1 %v611_v34  ;;  %615 = vadd.xlane.f32.xlu0 %v614_v50  ;;  %v243_v47 = vpop.xlane.xlu0 %242  ;;  %v246_v6 = vpop.xlane.xlu1 %245 }
  0xf9   :  { %2615 = vst [vmem:[#allocation4_spill] sm:$0xff] %v2033_v59  ;;  %2617 = vst [vmem:[#allocation5_spill] sm:$0xff] %v2036_v7  ;;  %v326_v54 = vmul.f32 0.25, %v243_v47  ;;  %v327_v58 = vmul.f32 0.25, %v246_v6  ;;  %v452_v51 = vmul.f32 %v2033_v59, %v2033_v59  ;;  %v453_v30 = vmul.f32 %v2036_v7, %v2036_v7 }
  0xfb   :  { %v2045_v1 = vsub.f32 %v2618_v18, %v326_v54  ;;  %v2048_v23 = vsub.f32 %v2620_v38, %v327_v58  ;;  %v620_v10 = vsel %vm78_vm0, %v452_v51, 0.0  ;;  %v623_v50 = vsel %vm78_vm0, %v453_v30, 0.0  ;;  %v2622_v18 = vld [vmem:[#allocation8_spill] sm:$0xff]  ;;  %v2624_v58 = vld [vmem:[#allocation9_spill] sm:$0xff] }
  0xfc   :  { %618 = vadd.xlane.f32.xlu1 %v617_v42  ;;  %621 = vadd.xlane.f32.xlu0 %v620_v10  ;;  %v249_v34 = vpop.xlane.xlu0 %248  ;;  %v252_v26 = vpop.xlane.xlu1 %251 }
  0xfd   :  { %2619 = vst [vmem:[#allocation6_spill] sm:$0xff] %v2045_v1  ;;  %2621 = vst [vmem:[#allocation7_spill] sm:$0xff] %v2048_v23  ;;  %v328_v47 = vmul.f32 0.25, %v249_v34  ;;  %v329_v6 = vmul.f32 0.25, %v252_v26  ;;  %v454_v59 = vmul.f32 %v2045_v1, %v2045_v1  ;;  %v455_v54 = vmul.f32 %v2048_v23, %v2048_v23 }
  0xff   :  { %v2057_v7 = vsub.f32 %v2622_v18, %v328_v47  ;;  %v2060_v38 = vsub.f32 %v2624_v58, %v329_v6  ;;  %v626_v51 = vsel %vm78_vm0, %v454_v59, 0.0  ;;  %v629_v10 = vsel %vm78_vm0, %v455_v54, 0.0  ;;  %v2626_v18 = vld [vmem:[#allocation10_spill] sm:$0xff]  ;;  %v2628_v6 = vld [vmem:[#allocation11_spill] sm:$0xff] }
 0x100   :  { %624 = vadd.xlane.f32.xlu1 %v623_v50  ;;  %627 = vadd.xlane.f32.xlu0 %v626_v51  ;;  %v255_v42 = vpop.xlane.xlu0 %254  ;;  %v258_v30 = vpop.xlane.xlu1 %257 }
 0x101   :  { %2623 = vst [vmem:[#allocation8_spill] sm:$0xff] %v2057_v7  ;;  %2625 = vst [vmem:[#allocation9_spill] sm:$0xff] %v2060_v38  ;;  %v330_v34 = vmul.f32 0.25, %v255_v42  ;;  %v331_v26 = vmul.f32 0.25, %v258_v30  ;;  %v456_v1 = vmul.f32 %v2057_v7, %v2057_v7  ;;  %v457_v47 = vmul.f32 %v2060_v38, %v2060_v38 }
 0x103   :  { %v2069_v23 = vsub.f32 %v2626_v18, %v330_v34  ;;  %v2072_v58 = vsub.f32 %v2628_v6, %v331_v26  ;;  %v632_v59 = vsel %vm78_vm0, %v456_v1, 0.0  ;;  %v635_v51 = vsel %vm78_vm0, %v457_v47, 0.0  ;;  %v2630_v18 = vld [vmem:[#allocation12_spill] sm:$0xff]  ;;  %v2632_v26 = vld [vmem:[#allocation13_spill] sm:$0xff] }
 0x104   :  { %630 = vadd.xlane.f32.xlu1 %v629_v10  ;;  %633 = vadd.xlane.f32.xlu0 %v632_v59  ;;  %v261_v50 = vpop.xlane.xlu0 %260  ;;  %v264_v54 = vpop.xlane.xlu1 %263 }
 0x105   :  { %2627 = vst [vmem:[#allocation10_spill] sm:$0xff] %v2069_v23  ;;  %2629 = vst [vmem:[#allocation11_spill] sm:$0xff] %v2072_v58  ;;  %v332_v42 = vmul.f32 0.25, %v261_v50  ;;  %v333_v30 = vmul.f32 0.25, %v264_v54  ;;  %v458_v7 = vmul.f32 %v2069_v23, %v2069_v23  ;;  %v459_v34 = vmul.f32 %v2072_v58, %v2072_v58 }
 0x107   :  { %v2081_v38 = vsub.f32 %v2630_v18, %v332_v42  ;;  %v2084_v6 = vsub.f32 %v2632_v26, %v333_v30  ;;  %v638_v1 = vsel %vm78_vm0, %v458_v7, 0.0  ;;  %v641_v59 = vsel %vm78_vm0, %v459_v34, 0.0  ;;  %v2634_v18 = vld [vmem:[#allocation14_spill] sm:$0xff] }
 0x108   :  { %636 = vadd.xlane.f32.xlu1 %v635_v51  ;;  %639 = vadd.xlane.f32.xlu0 %v638_v1  ;;  %v267_v10 = vpop.xlane.xlu0 %266  ;;  %v270_v47 = vpop.xlane.xlu1 %269 }
 0x109   :  { %2631 = vst [vmem:[#allocation12_spill] sm:$0xff] %v2081_v38  ;;  %2633 = vst [vmem:[#allocation13_spill] sm:$0xff] %v2084_v6  ;;  %v334_v50 = vmul.f32 0.25, %v267_v10  ;;  %v335_v54 = vmul.f32 0.25, %v270_v47  ;;  %v460_v23 = vmul.f32 %v2081_v38, %v2081_v38  ;;  %v461_v42 = vmul.f32 %v2084_v6, %v2084_v6 }
 0x10b   :  { %v2093_v58 = vsub.f32 %v2634_v18, %v334_v50  ;;  %v2096_v30 = vsub.f32 %v1716_v46, %v335_v54  ;;  %v644_v7 = vsel %vm78_vm0, %v460_v23, 0.0  ;;  %v647_v51 = vsel %vm78_vm0, %v461_v42, 0.0 }
 0x10c   :  { %642 = vadd.xlane.f32.xlu1 %v641_v59  ;;  %645 = vadd.xlane.f32.xlu0 %v644_v7 }
 0x10d   :  { %2635 = vst [vmem:[#allocation14_spill] sm:$0xff] %v2093_v58  ;;  %2636 = vst [vmem:[#allocation20_spill] sm:$0xff] %v2096_v30  ;;  %v462_v34 = vmul.f32 %v2093_v58, %v2093_v58  ;;  %v463_v26 = vmul.f32 %v2096_v30, %v2096_v30 }
 0x10f   :  { %v650_v1 = vsel %vm78_vm0, %v462_v34, 0.0  ;;  %v653_v10 = vsel %vm78_vm0, %v463_v26, 0.0 }
 0x110   :  { %648 = vadd.xlane.f32.xlu1 %v647_v51  ;;  %651 = vadd.xlane.f32.xlu0 %v650_v1 }
 0x114   :  { %654 = vadd.xlane.f32.xlu1 %v653_v10 }
 0x11d   :  { %v466_v46 = vpop.xlane.xlu0 %465 }
 0x11e   :  { %v656_v47 = vmul.f32 0.25, %v466_v46 }
 0x120   :  { %v720_v23 = vadd.f32 1e-05, %v656_v47 }
 0x121   :  { %v469_v59 = vpop.xlane.xlu1 %468  ;;  %v472_v50 = vpop.xlane.xlu0 %471 }
 0x122   :  { %1124 = vrsqrt.f32 %v720_v23  ;;  %v657_v54 = vmul.f32 0.25, %v469_v59  ;;  %v658_v42 = vmul.f32 0.25, %v472_v50 }
 0x124   :  { %v721_v18 = vadd.f32 1e-05, %v657_v54  ;;  %v722_v7 = vadd.f32 1e-05, %v658_v42 }
 0x125   :  { %v475_v58 = vpop.xlane.xlu1 %474  ;;  %v478_v6 = vpop.xlane.xlu0 %477 }
 0x126   :  { %1126 = vrsqrt.f32 %v721_v18  ;;  %v659_v30 = vmul.f32 0.25, %v475_v58  ;;  %v660_v34 = vmul.f32 0.25, %v478_v6  ;;  %v2109_v58 = vld [vmem:[%s2557_s1] ss:$0 sm:$0xff] }
 0x127   :  { %1128 = vrsqrt.f32 %v722_v7  ;;  %v2115_v7 = vld [vmem:[%s2558_s2] ss:$0 sm:$0xff] }
 0x128   :  { %v723_v51 = vadd.f32 1e-05, %v659_v30  ;;  %v724_v1 = vadd.f32 1e-05, %v660_v34 }
 0x129   :  { %v481_v26 = vpop.xlane.xlu1 %480  ;;  %v484_v10 = vpop.xlane.xlu0 %483 }
 0x12a   :  { %1130 = vrsqrt.f32 %v723_v51  ;;  %v661_v46 = vmul.f32 0.25, %v481_v26  ;;  %v662_v47 = vmul.f32 0.25, %v484_v10 }
 0x12b   :  { %1132 = vrsqrt.f32 %v724_v1 }
 0x12c   :  { %v725_v38 = vadd.f32 1e-05, %v661_v46  ;;  %v726_v23 = vadd.f32 1e-05, %v662_v47 }
 0x12d   :  { %v487_v59 = vpop.xlane.xlu1 %486  ;;  %v490_v50 = vpop.xlane.xlu0 %489 }
 0x12e   :  { %1134 = vrsqrt.f32 %v725_v38  ;;  %v663_v54 = vmul.f32 0.25, %v487_v59  ;;  %v664_v42 = vmul.f32 0.25, %v490_v50  ;;  %v2637_v59 = vld [vmem:[#allocation15_spill] sm:$0xff] }
 0x12f   :  { %v1125_v3 = vpop.eup %1124  ;;  %1136 = vrsqrt.f32 %v726_v23 }
 0x130   :  { %v848_v6 = vmul.f32 %v1125_v3, %v1723_v39  ;;  %v727_v30 = vadd.f32 1e-05, %v663_v54  ;;  %v728_v18 = vadd.f32 1e-05, %v664_v42 }
 0x131   :  { %v493_v34 = vpop.xlane.xlu1 %492  ;;  %v496_v38 = vpop.xlane.xlu0 %495 }
 0x132   :  { %v919_v51 = vmul.f32 %v2109_v58, %v848_v6  ;;  %1138 = vrsqrt.f32 %v727_v30  ;;  %v665_v1 = vmul.f32 0.25, %v493_v34  ;;  %v666_v26 = vmul.f32 0.25, %v496_v38 }
 0x133   :  { %v1127_v10 = vpop.eup %1126  ;;  %1140 = vrsqrt.f32 %v728_v18 }
 0x134   :  { %v1129_v46 = vpop.eup %1128  ;;  %v990_v47 = vadd.f32 %v2115_v7, %v919_v51  ;;  %v849_v39 = vmul.f32 %v1127_v10, %v1733_v63  ;;  %v729_v3 = vadd.f32 1e-05, %v665_v1  ;;  %v730_v23 = vadd.f32 1e-05, %v666_v26 }
 0x135   :  { %v850_v50 = vmul.f32 %v1129_v46, %v2637_v59  ;;  %v499_v54 = vpop.xlane.xlu1 %498  ;;  %v502_v42 = vpop.xlane.xlu0 %501 }
 0x136   :  { %1054 = vst.msk [vmem:[%s2559_s3] sm:$0xff] %vm78_vm0, %v990_v47  ;;  %v920_v6 = vmul.f32 %v2109_v58, %v849_v39  ;;  %1142 = vrsqrt.f32 %v729_v3  ;;  %v667_v30 = vmul.f32 0.25, %v499_v54  ;;  %v668_v18 = vmul.f32 0.25, %v502_v42 }
 0x137   :  { %v1131_v34 = vpop.eup %1130  ;;  %v921_v38 = vmul.f32 %v2109_v58, %v850_v50  ;;  %1144 = vrsqrt.f32 %v730_v23 }
 0x138   :  { %v1133_v63 = vpop.eup %1132  ;;  %v991_v51 = vadd.f32 %v2115_v7, %v920_v6  ;;  %v851_v1 = vmul.f32 %v1131_v34, %v1736_v14  ;;  %v731_v26 = vadd.f32 1e-05, %v667_v30  ;;  %v732_v10 = vadd.f32 1e-05, %v668_v18 }
 0x139   :  { %v992_v46 = vadd.f32 %v2115_v7, %v921_v38  ;;  %v852_v47 = vmul.f32 %v1133_v63, %v1745_v2  ;;  %v505_v59 = vpop.xlane.xlu1 %504  ;;  %v508_v39 = vpop.xlane.xlu0 %507 }
 0x13a   :  { %1055 = vst.msk [vmem:[%s2559_s3 + $0x8] sm:$0xff] %vm78_vm0, %v991_v51  ;;  %v922_v3 = vmul.f32 %v2109_v58, %v851_v1  ;;  %1146 = vrsqrt.f32 %v731_v26  ;;  %v669_v23 = vmul.f32 0.25, %v505_v59  ;;  %v670_v50 = vmul.f32 0.25, %v508_v39 }
 0x13b   :  { %v1135_v54 = vpop.eup %1134  ;;  %1056 = vst.msk [vmem:[%s2559_s3 + $0x10] sm:$0xff] %vm78_vm0, %v992_v46  ;;  %v923_v14 = vmul.f32 %v2109_v58, %v852_v47  ;;  %1148 = vrsqrt.f32 %v732_v10 }
 0x13c   :  { %v1137_v2 = vpop.eup %1136  ;;  %v993_v42 = vadd.f32 %v2115_v7, %v922_v3  ;;  %v853_v6 = vmul.f32 %v1135_v54, %v1748_v5  ;;  %v733_v30 = vadd.f32 1e-05, %v669_v23  ;;  %v734_v18 = vadd.f32 1e-05, %v670_v50 }
 0x13d   :  { %v994_v34 = vadd.f32 %v2115_v7, %v923_v14  ;;  %v854_v38 = vmul.f32 %v1137_v2, %v1757_v15  ;;  %v511_v63 = vpop.xlane.xlu1 %510  ;;  %v514_v51 = vpop.xlane.xlu0 %513 }
 0x13e   :  { %1057 = vst.msk [vmem:[%s2559_s3 + $0x18] sm:$0xff] %vm78_vm0, %v993_v42  ;;  %v924_v1 = vmul.f32 %v2109_v58, %v853_v6  ;;  %1150 = vrsqrt.f32 %v733_v30  ;;  %v671_v26 = vmul.f32 0.25, %v511_v63  ;;  %v672_v10 = vmul.f32 0.25, %v514_v51 }
 0x13f   :  { %v1139_v46 = vpop.eup %1138  ;;  %1058 = vst.msk [vmem:[%s2559_s3 + $0x20] sm:$0xff] %vm78_vm0, %v994_v34  ;;  %v925_v5 = vmul.f32 %v2109_v58, %v854_v38  ;;  %1152 = vrsqrt.f32 %v734_v18 }
 0x140   :  { %v1141_v15 = vpop.eup %1140  ;;  %v995_v47 = vadd.f32 %v2115_v7, %v924_v1  ;;  %v855_v59 = vmul.f32 %v1139_v46, %v1760_v9  ;;  %v735_v39 = vadd.f32 1e-05, %v671_v26  ;;  %v736_v3 = vadd.f32 1e-05, %v672_v10 }
 0x141   :  { %v996_v23 = vadd.f32 %v2115_v7, %v925_v5  ;;  %v856_v50 = vmul.f32 %v1141_v15, %v1769_v0  ;;  %v517_v54 = vpop.xlane.xlu1 %516  ;;  %v520_v14 = vpop.xlane.xlu0 %519 }
 0x142   :  { %1059 = vst.msk [vmem:[%s2559_s3 + $0x28] sm:$0xff] %vm78_vm0, %v995_v47  ;;  %v926_v2 = vmul.f32 %v2109_v58, %v855_v59  ;;  %1154 = vrsqrt.f32 %v735_v39  ;;  %v673_v42 = vmul.f32 0.25, %v517_v54  ;;  %v674_v6 = vmul.f32 0.25, %v520_v14 }
 0x143   :  { %v1143_v30 = vpop.eup %1142  ;;  %1060 = vst.msk [vmem:[%s2559_s3 + $0x30] sm:$0xff] %vm78_vm0, %v996_v23  ;;  %v927_v9 = vmul.f32 %v2109_v58, %v856_v50  ;;  %1156 = vrsqrt.f32 %v736_v3 }
 0x144   :  { %v1145_v0 = vpop.eup %1144  ;;  %v997_v18 = vadd.f32 %v2115_v7, %v926_v2  ;;  %v857_v34 = vmul.f32 %v1143_v30, %v1772_v13  ;;  %v737_v38 = vadd.f32 1e-05, %v673_v42  ;;  %v738_v63 = vadd.f32 1e-05, %v674_v6 }
 0x145   :  { %v998_v51 = vadd.f32 %v2115_v7, %v927_v9  ;;  %v858_v1 = vmul.f32 %v1145_v0, %v1781_v22  ;;  %v523_v26 = vpop.xlane.xlu1 %522  ;;  %v526_v10 = vpop.xlane.xlu0 %525 }
 0x146   :  { %1061 = vst.msk [vmem:[%s2559_s3 + $0x38] sm:$0xff] %vm78_vm0, %v997_v18  ;;  %v928_v46 = vmul.f32 %v2109_v58, %v857_v34  ;;  %1158 = vrsqrt.f32 %v737_v38  ;;  %v675_v5 = vmul.f32 0.25, %v523_v26  ;;  %v676_v15 = vmul.f32 0.25, %v526_v10 }
 0x147   :  { %v1147_v47 = vpop.eup %1146  ;;  %1062 = vst.msk [vmem:[%s2559_s3 + $0x40] sm:$0xff] %vm78_vm0, %v998_v51  ;;  %v929_v13 = vmul.f32 %v2109_v58, %v858_v1  ;;  %1160 = vrsqrt.f32 %v738_v63 }
 0x148   :  { %v1149_v22 = vpop.eup %1148  ;;  %v999_v59 = vadd.f32 %v2115_v7, %v928_v46  ;;  %v859_v39 = vmul.f32 %v1147_v47, %v1784_v17  ;;  %v739_v3 = vadd.f32 1e-05, %v675_v5  ;;  %v740_v23 = vadd.f32 1e-05, %v676_v15 }
 0x149   :  { %v1000_v50 = vadd.f32 %v2115_v7, %v929_v13  ;;  %v860_v54 = vmul.f32 %v1149_v22, %v1793_v55  ;;  %v529_v14 = vpop.xlane.xlu1 %528  ;;  %v532_v2 = vpop.xlane.xlu0 %531 }
 0x14a   :  { %1063 = vst.msk [vmem:[%s2559_s3 + $0x48] sm:$0xff] %vm78_vm0, %v999_v59  ;;  %v930_v42 = vmul.f32 %v2109_v58, %v859_v39  ;;  %1162 = vrsqrt.f32 %v739_v3  ;;  %v677_v6 = vmul.f32 0.25, %v529_v14  ;;  %v678_v30 = vmul.f32 0.25, %v532_v2 }
 0x14b   :  { %v1151_v9 = vpop.eup %1150  ;;  %1064 = vst.msk [vmem:[%s2559_s3 + $0x50] sm:$0xff] %vm78_vm0, %v1000_v50  ;;  %v931_v17 = vmul.f32 %v2109_v58, %v860_v54  ;;  %1164 = vrsqrt.f32 %v740_v23 }
 0x14c   :  { %v1153_v55 = vpop.eup %1152  ;;  %v1001_v0 = vadd.f32 %v2115_v7, %v930_v42  ;;  %v861_v18 = vmul.f32 %v1151_v9, %v1796_v21  ;;  %v741_v34 = vadd.f32 1e-05, %v677_v6  ;;  %v742_v38 = vadd.f32 1e-05, %v678_v30 }
 0x14d   :  { %v1002_v63 = vadd.f32 %v2115_v7, %v931_v17  ;;  %v862_v51 = vmul.f32 %v1153_v55, %v1805_v62  ;;  %v535_v1 = vpop.xlane.xlu1 %534  ;;  %v538_v26 = vpop.xlane.xlu0 %537 }
 0x14e   :  { %1065 = vst.msk [vmem:[%s2559_s3 + $0x58] sm:$0xff] %vm78_vm0, %v1001_v0  ;;  %v932_v10 = vmul.f32 %v2109_v58, %v861_v18  ;;  %1166 = vrsqrt.f32 %v741_v34  ;;  %v679_v46 = vmul.f32 0.25, %v535_v1  ;;  %v680_v5 = vmul.f32 0.25, %v538_v26 }
 0x14f   :  { %v1155_v15 = vpop.eup %1154  ;;  %1066 = vst.msk [vmem:[%s2559_s3 + $0x60] sm:$0xff] %vm78_vm0, %v1002_v63  ;;  %v933_v21 = vmul.f32 %v2109_v58, %v862_v51  ;;  %1168 = vrsqrt.f32 %v742_v38 }
 0x150   :  { %v1157_v62 = vpop.eup %1156  ;;  %v1003_v47 = vadd.f32 %v2115_v7, %v932_v10  ;;  %v863_v13 = vmul.f32 %v1155_v15, %v1808_v25  ;;  %v743_v22 = vadd.f32 1e-05, %v679_v46  ;;  %v744_v59 = vadd.f32 1e-05, %v680_v5 }
 0x151   :  { %v1004_v39 = vadd.f32 %v2115_v7, %v933_v21  ;;  %v864_v3 = vmul.f32 %v1157_v62, %v1817_v31  ;;  %v541_v23 = vpop.xlane.xlu1 %540  ;;  %v544_v50 = vpop.xlane.xlu0 %543 }
 0x152   :  { %1067 = vst.msk [vmem:[%s2559_s3 + $0x68] sm:$0xff] %vm78_vm0, %v1003_v47  ;;  %v934_v54 = vmul.f32 %v2109_v58, %v863_v13  ;;  %1170 = vrsqrt.f32 %v743_v22  ;;  %v681_v14 = vmul.f32 0.25, %v541_v23  ;;  %v682_v2 = vmul.f32 0.25, %v544_v50 }
 0x153   :  { %v1159_v42 = vpop.eup %1158  ;;  %1068 = vst.msk [vmem:[%s2559_s3 + $0x70] sm:$0xff] %vm78_vm0, %v1004_v39  ;;  %v935_v25 = vmul.f32 %v2109_v58, %v864_v3  ;;  %1172 = vrsqrt.f32 %v744_v59 }
 0x154   :  { %v1161_v31 = vpop.eup %1160  ;;  %v1005_v6 = vadd.f32 %v2115_v7, %v934_v54  ;;  %v865_v30 = vmul.f32 %v1159_v42, %v1820_v29  ;;  %v745_v9 = vadd.f32 1e-05, %v681_v14  ;;  %v746_v17 = vadd.f32 1e-05, %v682_v2 }
 0x155   :  { %v1006_v55 = vadd.f32 %v2115_v7, %v935_v25  ;;  %v866_v0 = vmul.f32 %v1161_v31, %v1829_v8  ;;  %v547_v18 = vpop.xlane.xlu1 %546  ;;  %v550_v34 = vpop.xlane.xlu0 %549 }
 0x156   :  { %1069 = vst.msk [vmem:[%s2559_s3 + $0x78] sm:$0xff] %vm78_vm0, %v1005_v6  ;;  %v936_v38 = vmul.f32 %v2109_v58, %v865_v30  ;;  %1174 = vrsqrt.f32 %v745_v9  ;;  %v683_v63 = vmul.f32 0.25, %v547_v18  ;;  %v684_v51 = vmul.f32 0.25, %v550_v34 }
 0x157   :  { %v1163_v1 = vpop.eup %1162  ;;  %1070 = vst.msk [vmem:[%s2559_s3 + $0x80] sm:$0xff] %vm78_vm0, %v1006_v55  ;;  %v937_v29 = vmul.f32 %v2109_v58, %v866_v0  ;;  %1176 = vrsqrt.f32 %v746_v17 }
 0x158   :  { %v1165_v8 = vpop.eup %1164  ;;  %v1007_v26 = vadd.f32 %v2115_v7, %v936_v38  ;;  %v867_v10 = vmul.f32 %v1163_v1, %v1832_v33  ;;  %v747_v46 = vadd.f32 1e-05, %v683_v63  ;;  %v748_v5 = vadd.f32 1e-05, %v684_v51 }
 0x159   :  { %v1008_v15 = vadd.f32 %v2115_v7, %v937_v29  ;;  %v868_v21 = vmul.f32 %v1165_v8, %v1841_v12  ;;  %v553_v62 = vpop.xlane.xlu1 %552  ;;  %v556_v47 = vpop.xlane.xlu0 %555 }
 0x15a   :  { %1071 = vst.msk [vmem:[%s2559_s3 + $0x88] sm:$0xff] %vm78_vm0, %v1007_v26  ;;  %v938_v13 = vmul.f32 %v2109_v58, %v867_v10  ;;  %1178 = vrsqrt.f32 %v747_v46  ;;  %v685_v22 = vmul.f32 0.25, %v553_v62  ;;  %v686_v59 = vmul.f32 0.25, %v556_v47 }
 0x15b   :  { %v1167_v39 = vpop.eup %1166  ;;  %1072 = vst.msk [vmem:[%s2559_s3 + $0x90] sm:$0xff] %vm78_vm0, %v1008_v15  ;;  %v939_v33 = vmul.f32 %v2109_v58, %v868_v21  ;;  %1180 = vrsqrt.f32 %v748_v5 }
 0x15c   :  { %v1169_v12 = vpop.eup %1168  ;;  %v1009_v3 = vadd.f32 %v2115_v7, %v938_v13  ;;  %v869_v23 = vmul.f32 %v1167_v39, %v1844_v37  ;;  %v749_v50 = vadd.f32 1e-05, %v685_v22  ;;  %v750_v54 = vadd.f32 1e-05, %v686_v59 }
 0x15d   :  { %v1010_v14 = vadd.f32 %v2115_v7, %v939_v33  ;;  %v870_v2 = vmul.f32 %v1169_v12, %v1853_v16  ;;  %v559_v42 = vpop.xlane.xlu1 %558  ;;  %v562_v25 = vpop.xlane.xlu0 %561 }
 0x15e   :  { %1073 = vst.msk [vmem:[%s2559_s3 + $0x98] sm:$0xff] %vm78_vm0, %v1009_v3  ;;  %v940_v31 = vmul.f32 %v2109_v58, %v869_v23  ;;  %1182 = vrsqrt.f32 %v749_v50  ;;  %v687_v6 = vmul.f32 0.25, %v559_v42  ;;  %v688_v30 = vmul.f32 0.25, %v562_v25 }
 0x15f   :  { %v1171_v9 = vpop.eup %1170  ;;  %1074 = vst.msk [vmem:[%s2559_s3 + $0xa0] sm:$0xff] %vm78_vm0, %v1010_v14  ;;  %v941_v37 = vmul.f32 %v2109_v58, %v870_v2  ;;  %1184 = vrsqrt.f32 %v750_v54 }
 0x160   :  { %v1173_v16 = vpop.eup %1172  ;;  %v1011_v17 = vadd.f32 %v2115_v7, %v940_v31  ;;  %v871_v55 = vmul.f32 %v1171_v9, %v1856_v41  ;;  %v751_v0 = vadd.f32 1e-05, %v687_v6  ;;  %v752_v18 = vadd.f32 1e-05, %v688_v30 }
 0x161   :  { %v1012_v34 = vadd.f32 %v2115_v7, %v941_v37  ;;  %v872_v38 = vmul.f32 %v1173_v16, %v1865_v20  ;;  %v565_v63 = vpop.xlane.xlu1 %564  ;;  %v568_v51 = vpop.xlane.xlu0 %567 }
 0x162   :  { %1075 = vst.msk [vmem:[%s2559_s3 + $0xa8] sm:$0xff] %vm78_vm0, %v1011_v17  ;;  %v942_v1 = vmul.f32 %v2109_v58, %v871_v55  ;;  %1186 = vrsqrt.f32 %v751_v0  ;;  %v689_v29 = vmul.f32 0.25, %v565_v63  ;;  %v690_v8 = vmul.f32 0.25, %v568_v51 }
 0x163   :  { %v1175_v26 = vpop.eup %1174  ;;  %1076 = vst.msk [vmem:[%s2559_s3 + $0xb0] sm:$0xff] %vm78_vm0, %v1012_v34  ;;  %v943_v41 = vmul.f32 %v2109_v58, %v872_v38  ;;  %1188 = vrsqrt.f32 %v752_v18 }
 0x164   :  { %v1177_v20 = vpop.eup %1176  ;;  %v1013_v10 = vadd.f32 %v2115_v7, %v942_v1  ;;  %v873_v46 = vmul.f32 %v1175_v26, %v1868_v45  ;;  %v753_v5 = vadd.f32 1e-05, %v689_v29  ;;  %v754_v15 = vadd.f32 1e-05, %v690_v8 }
 0x165   :  { %v1014_v21 = vadd.f32 %v2115_v7, %v943_v41  ;;  %v874_v62 = vmul.f32 %v1177_v20, %v1877_v24  ;;  %v571_v47 = vpop.xlane.xlu1 %570  ;;  %v574_v13 = vpop.xlane.xlu0 %573 }
 0x166   :  { %1077 = vst.msk [vmem:[%s2559_s3 + $0xb8] sm:$0xff] %vm78_vm0, %v1013_v10  ;;  %v944_v22 = vmul.f32 %v2109_v58, %v873_v46  ;;  %1190 = vrsqrt.f32 %v753_v5  ;;  %v691_v59 = vmul.f32 0.25, %v571_v47  ;;  %v692_v39 = vmul.f32 0.25, %v574_v13 }
 0x167   :  { %v1179_v33 = vpop.eup %1178  ;;  %1078 = vst.msk [vmem:[%s2559_s3 + $0xc0] sm:$0xff] %vm78_vm0, %v1014_v21  ;;  %v945_v45 = vmul.f32 %v2109_v58, %v874_v62  ;;  %1192 = vrsqrt.f32 %v754_v15 }
 0x168   :  { %v1181_v24 = vpop.eup %1180  ;;  %v1015_v12 = vadd.f32 %v2115_v7, %v944_v22  ;;  %v875_v3 = vmul.f32 %v1179_v33, %v1880_v49  ;;  %v755_v23 = vadd.f32 1e-05, %v691_v59  ;;  %v756_v50 = vadd.f32 1e-05, %v692_v39 }
 0x169   :  { %v1016_v54 = vadd.f32 %v2115_v7, %v945_v45  ;;  %v876_v14 = vmul.f32 %v1181_v24, %v1889_v28  ;;  %v577_v2 = vpop.xlane.xlu1 %576  ;;  %v580_v42 = vpop.xlane.xlu0 %579 }
 0x16a   :  { %1079 = vst.msk [vmem:[%s2559_s3 + $0xc8] sm:$0xff] %vm78_vm0, %v1015_v12  ;;  %v946_v25 = vmul.f32 %v2109_v58, %v875_v3  ;;  %1194 = vrsqrt.f32 %v755_v23  ;;  %v693_v31 = vmul.f32 0.25, %v577_v2  ;;  %v694_v6 = vmul.f32 0.25, %v580_v42 }
 0x16b   :  { %v1183_v30 = vpop.eup %1182  ;;  %1080 = vst.msk [vmem:[%s2559_s3 + $0xd0] sm:$0xff] %vm78_vm0, %v1016_v54  ;;  %v947_v49 = vmul.f32 %v2109_v58, %v876_v14  ;;  %1196 = vrsqrt.f32 %v756_v50 }
 0x16c   :  { %v1185_v28 = vpop.eup %1184  ;;  %v1017_v9 = vadd.f32 %v2115_v7, %v946_v25  ;;  %v877_v37 = vmul.f32 %v1183_v30, %v1892_v53  ;;  %v757_v16 = vadd.f32 1e-05, %v693_v31  ;;  %v758_v17 = vadd.f32 1e-05, %v694_v6 }
 0x16d   :  { %v1018_v55 = vadd.f32 %v2115_v7, %v947_v49  ;;  %v878_v0 = vmul.f32 %v1185_v28, %v1901_v32  ;;  %v583_v18 = vpop.xlane.xlu1 %582  ;;  %v586_v34 = vpop.xlane.xlu0 %585 }
 0x16e   :  { %1081 = vst.msk [vmem:[%s2559_s3 + $0xd8] sm:$0xff] %vm78_vm0, %v1017_v9  ;;  %v948_v38 = vmul.f32 %v2109_v58, %v877_v37  ;;  %1198 = vrsqrt.f32 %v757_v16  ;;  %v695_v63 = vmul.f32 0.25, %v583_v18  ;;  %v696_v51 = vmul.f32 0.25, %v586_v34 }
 0x16f   :  { %v1187_v1 = vpop.eup %1186  ;;  %1082 = vst.msk [vmem:[%s2559_s3 + $0xe0] sm:$0xff] %vm78_vm0, %v1018_v55  ;;  %v949_v53 = vmul.f32 %v2109_v58, %v878_v0  ;;  %1200 = vrsqrt.f32 %v758_v17 }
 0x170   :  { %v1189_v32 = vpop.eup %1188  ;;  %v1019_v29 = vadd.f32 %v2115_v7, %v948_v38  ;;  %v879_v8 = vmul.f32 %v1187_v1, %v1904_v57  ;;  %v759_v26 = vadd.f32 1e-05, %v695_v63  ;;  %v760_v41 = vadd.f32 1e-05, %v696_v51 }
 0x171   :  { %v1020_v20 = vadd.f32 %v2115_v7, %v949_v53  ;;  %v880_v10 = vmul.f32 %v1189_v32, %v1913_v36  ;;  %v589_v46 = vpop.xlane.xlu1 %588  ;;  %v592_v5 = vpop.xlane.xlu0 %591 }
 0x172   :  { %1083 = vst.msk [vmem:[%s2559_s3 + $0xe8] sm:$0xff] %vm78_vm0, %v1019_v29  ;;  %v950_v15 = vmul.f32 %v2109_v58, %v879_v8  ;;  %1202 = vrsqrt.f32 %v759_v26  ;;  %v697_v21 = vmul.f32 0.25, %v589_v46  ;;  %v698_v62 = vmul.f32 0.25, %v592_v5 }
 0x173   :  { %v1191_v47 = vpop.eup %1190  ;;  %1084 = vst.msk [vmem:[%s2559_s3 + $0xf0] sm:$0xff] %vm78_vm0, %v1020_v20  ;;  %v951_v57 = vmul.f32 %v2109_v58, %v880_v10  ;;  %1204 = vrsqrt.f32 %v760_v41 }
 0x174   :  { %v1193_v36 = vpop.eup %1192  ;;  %v1021_v13 = vadd.f32 %v2115_v7, %v950_v15  ;;  %v881_v22 = vmul.f32 %v1191_v47, %v1916_v61  ;;  %v761_v59 = vadd.f32 1e-05, %v697_v21  ;;  %v762_v39 = vadd.f32 1e-05, %v698_v62 }
 0x175   :  { %v1022_v33 = vadd.f32 %v2115_v7, %v951_v57  ;;  %v882_v45 = vmul.f32 %v1193_v36, %v1925_v40  ;;  %v595_v24 = vpop.xlane.xlu1 %594  ;;  %v598_v12 = vpop.xlane.xlu0 %597 }
 0x176   :  { %1085 = vst.msk [vmem:[%s2559_s3 + $0xf8] sm:$0xff] %vm78_vm0, %v1021_v13  ;;  %v952_v3 = vmul.f32 %v2109_v58, %v881_v22  ;;  %1206 = vrsqrt.f32 %v761_v59  ;;  %v699_v23 = vmul.f32 0.25, %v595_v24  ;;  %v700_v50 = vmul.f32 0.25, %v598_v12 }
 0x177   :  { %v1195_v54 = vpop.eup %1194  ;;  %1086 = vst.msk [vmem:[%s2559_s3 + $0x100] sm:$0xff] %vm78_vm0, %v1022_v33  ;;  %v953_v61 = vmul.f32 %v2109_v58, %v882_v45  ;;  %1208 = vrsqrt.f32 %v762_v39 }
 0x178   :  { %v1197_v40 = vpop.eup %1196  ;;  %v1023_v14 = vadd.f32 %v2115_v7, %v952_v3  ;;  %v883_v2 = vmul.f32 %v1195_v54, %v1928_v4  ;;  %v763_v42 = vadd.f32 1e-05, %v699_v23  ;;  %v764_v25 = vadd.f32 1e-05, %v700_v50 }
 0x179   :  { %v1024_v31 = vadd.f32 %v2115_v7, %v953_v61  ;;  %v884_v6 = vmul.f32 %v1197_v40, %v1937_v44  ;;  %v601_v30 = vpop.xlane.xlu1 %600  ;;  %v604_v49 = vpop.xlane.xlu0 %603 }
 0x17a   :  { %1087 = vst.msk [vmem:[%s2559_s3 + $0x108] sm:$0xff] %vm78_vm0, %v1023_v14  ;;  %v954_v28 = vmul.f32 %v2109_v58, %v883_v2  ;;  %1210 = vrsqrt.f32 %v763_v42  ;;  %v701_v9 = vmul.f32 0.25, %v601_v30  ;;  %v702_v37 = vmul.f32 0.25, %v604_v49 }
 0x17b   :  { %v1199_v16 = vpop.eup %1198  ;;  %1088 = vst.msk [vmem:[%s2559_s3 + $0x110] sm:$0xff] %vm78_vm0, %v1024_v31  ;;  %v955_v4 = vmul.f32 %v2109_v58, %v884_v6  ;;  %1212 = vrsqrt.f32 %v764_v25 }
 0x17c   :  { %v1201_v44 = vpop.eup %1200  ;;  %v1025_v17 = vadd.f32 %v2115_v7, %v954_v28  ;;  %v885_v55 = vmul.f32 %v1199_v16, %v1940_v11  ;;  %v765_v0 = vadd.f32 1e-05, %v701_v9  ;;  %v766_v18 = vadd.f32 1e-05, %v702_v37 }
 0x17d   :  { %v1026_v34 = vadd.f32 %v2115_v7, %v955_v4  ;;  %v886_v38 = vmul.f32 %v1201_v44, %v1949_v48  ;;  %v607_v63 = vpop.xlane.xlu1 %606  ;;  %v610_v51 = vpop.xlane.xlu0 %609 }
 0x17e   :  { %1089 = vst.msk [vmem:[%s2559_s3 + $0x118] sm:$0xff] %vm78_vm0, %v1025_v17  ;;  %v956_v1 = vmul.f32 %v2109_v58, %v885_v55  ;;  %1214 = vrsqrt.f32 %v765_v0  ;;  %v703_v53 = vmul.f32 0.25, %v607_v63  ;;  %v704_v32 = vmul.f32 0.25, %v610_v51  ;;  %v2638_v17 = vld [vmem:[#allocation16_spill] sm:$0xff] }
 0x17f   :  { %v1203_v29 = vpop.eup %1202  ;;  %1090 = vst.msk [vmem:[%s2559_s3 + $0x120] sm:$0xff] %vm78_vm0, %v1026_v34  ;;  %v957_v11 = vmul.f32 %v2109_v58, %v886_v38  ;;  %1216 = vrsqrt.f32 %v766_v18 }
 0x180   :  { %v1205_v48 = vpop.eup %1204  ;;  %v1027_v8 = vadd.f32 %v2115_v7, %v956_v1  ;;  %v887_v26 = vmul.f32 %v1203_v29, %v1952_v19  ;;  %v767_v41 = vadd.f32 1e-05, %v703_v53  ;;  %v768_v20 = vadd.f32 1e-05, %v704_v32  ;;  %v2639_v32 = vld [vmem:[#allocation17_spill] sm:$0xff] }
 0x181   :  { %v1028_v10 = vadd.f32 %v2115_v7, %v957_v11  ;;  %v888_v46 = vmul.f32 %v1205_v48, %v1961_v52  ;;  %v613_v5 = vpop.xlane.xlu1 %612  ;;  %v616_v15 = vpop.xlane.xlu0 %615 }
 0x182   :  { %1091 = vst.msk [vmem:[%s2559_s3 + $0x128] sm:$0xff] %vm78_vm0, %v1027_v8  ;;  %v958_v21 = vmul.f32 %v2109_v58, %v887_v26  ;;  %1218 = vrsqrt.f32 %v767_v41  ;;  %v705_v62 = vmul.f32 0.25, %v613_v5  ;;  %v706_v47 = vmul.f32 0.25, %v616_v15  ;;  %v2640_v26 = vld [vmem:[#allocation18_spill] sm:$0xff] }
 0x183   :  { %v1207_v57 = vpop.eup %1206  ;;  %1092 = vst.msk [vmem:[%s2559_s3 + $0x130] sm:$0xff] %vm78_vm0, %v1028_v10  ;;  %v959_v19 = vmul.f32 %v2109_v58, %v888_v46  ;;  %1220 = vrsqrt.f32 %v768_v20 }
 0x184   :  { %v1209_v52 = vpop.eup %1208  ;;  %v1029_v36 = vadd.f32 %v2115_v7, %v958_v21  ;;  %v889_v13 = vmul.f32 %v1207_v57, %v1964_v27  ;;  %v769_v22 = vadd.f32 1e-05, %v705_v62  ;;  %v770_v59 = vadd.f32 1e-05, %v706_v47 }
 0x185   :  { %v1030_v39 = vadd.f32 %v2115_v7, %v959_v19  ;;  %v890_v33 = vmul.f32 %v1209_v52, %v1973_v56  ;;  %v619_v45 = vpop.xlane.xlu1 %618  ;;  %v622_v24 = vpop.xlane.xlu0 %621  ;;  %v2641_v19 = vld [vmem:[#allocation19_spill] sm:$0xff] }
 0x186   :  { %1093 = vst.msk [vmem:[%s2559_s3 + $0x138] sm:$0xff] %vm78_vm0, %v1029_v36  ;;  %v960_v12 = vmul.f32 %v2109_v58, %v889_v13  ;;  %1222 = vrsqrt.f32 %v769_v22  ;;  %v707_v3 = vmul.f32 0.25, %v619_v45  ;;  %v708_v23 = vmul.f32 0.25, %v622_v24 }
 0x187   :  { %v1211_v50 = vpop.eup %1210  ;;  %1094 = vst.msk [vmem:[%s2559_s3 + $0x140] sm:$0xff] %vm78_vm0, %v1030_v39  ;;  %v961_v27 = vmul.f32 %v2109_v58, %v890_v33  ;;  %1224 = vrsqrt.f32 %v770_v59  ;;  %v2642_v59 = vld [vmem:[#allocation2_spill] sm:$0xff] }
 0x188   :  { %v1213_v56 = vpop.eup %1212  ;;  %v1031_v54 = vadd.f32 %v2115_v7, %v960_v12  ;;  %v891_v61 = vmul.f32 %v1211_v50, %v1976_v35  ;;  %v771_v40 = vadd.f32 1e-05, %v707_v3  ;;  %v772_v14 = vadd.f32 1e-05, %v708_v23 }
 0x189   :  { %v1032_v2 = vadd.f32 %v2115_v7, %v961_v27  ;;  %v892_v42 = vmul.f32 %v1213_v56, %v1985_v60  ;;  %v625_v25 = vpop.xlane.xlu1 %624  ;;  %v628_v31 = vpop.xlane.xlu0 %627 }
 0x18a   :  { %1095 = vst.msk [vmem:[%s2559_s3 + $0x148] sm:$0xff] %vm78_vm0, %v1031_v54  ;;  %v962_v6 = vmul.f32 %v2109_v58, %v891_v61  ;;  %1226 = vrsqrt.f32 %v771_v40  ;;  %v709_v30 = vmul.f32 0.25, %v625_v25  ;;  %v710_v49 = vmul.f32 0.25, %v628_v31  ;;  %v2643_v54 = vld [vmem:[#allocation3_spill] sm:$0xff] }
 0x18b   :  { %v1215_v28 = vpop.eup %1214  ;;  %1096 = vst.msk [vmem:[%s2559_s3 + $0x150] sm:$0xff] %vm78_vm0, %v1032_v2  ;;  %v963_v35 = vmul.f32 %v2109_v58, %v892_v42  ;;  %1228 = vrsqrt.f32 %v772_v14  ;;  %v2644_v42 = vld [vmem:[#allocation4_spill] sm:$0xff] }
 0x18c   :  { %v1217_v60 = vpop.eup %1216  ;;  %v1033_v9 = vadd.f32 %v2115_v7, %v962_v6  ;;  %v893_v37 = vmul.f32 %v1215_v28, %v1988_v43  ;;  %v773_v16 = vadd.f32 1e-05, %v709_v30  ;;  %v774_v4 = vadd.f32 1e-05, %v710_v49 }
 0x18d   :  { %v1034_v44 = vadd.f32 %v2115_v7, %v963_v35  ;;  %v894_v55 = vmul.f32 %v1217_v60, %v2638_v17  ;;  %v631_v0 = vpop.xlane.xlu1 %630  ;;  %v634_v18 = vpop.xlane.xlu0 %633 }
 0x18e   :  { %1097 = vst.msk [vmem:[%s2559_s3 + $0x158] sm:$0xff] %vm78_vm0, %v1033_v9  ;;  %v964_v34 = vmul.f32 %v2109_v58, %v893_v37  ;;  %1230 = vrsqrt.f32 %v773_v16  ;;  %v711_v38 = vmul.f32 0.25, %v631_v0  ;;  %v712_v63 = vmul.f32 0.25, %v634_v18  ;;  %v2645_v16 = vld [vmem:[#allocation5_spill] sm:$0xff]  ;;  %v2646_v0 = vld [vmem:[#allocation6_spill] sm:$0xff] }
 0x18f   :  { %v1219_v51 = vpop.eup %1218  ;;  %1098 = vst.msk [vmem:[%s2559_s3 + $0x160] sm:$0xff] %vm78_vm0, %v1034_v44  ;;  %v965_v43 = vmul.f32 %v2109_v58, %v894_v55  ;;  %1232 = vrsqrt.f32 %v774_v4 }
 0x190   :  { %v1221_v1 = vpop.eup %1220  ;;  %v1035_v53 = vadd.f32 %v2115_v7, %v964_v34  ;;  %v895_v29 = vmul.f32 %v1219_v51, %v2639_v32  ;;  %v775_v11 = vadd.f32 1e-05, %v711_v38  ;;  %v776_v48 = vadd.f32 1e-05, %v712_v63  ;;  %v2647_v32 = vld [vmem:[#allocation7_spill] sm:$0xff] }
 0x191   :  { %v1036_v8 = vadd.f32 %v2115_v7, %v965_v43  ;;  %v896_v41 = vmul.f32 %v1221_v1, %v2640_v26  ;;  %v637_v20 = vpop.xlane.xlu1 %636  ;;  %v640_v10 = vpop.xlane.xlu0 %639 }
 0x192   :  { %1099 = vst.msk [vmem:[%s2559_s3 + $0x168] sm:$0xff] %vm78_vm0, %v1035_v53  ;;  %v966_v46 = vmul.f32 %v2109_v58, %v895_v29  ;;  %1234 = vrsqrt.f32 %v775_v11  ;;  %v713_v5 = vmul.f32 0.25, %v637_v20  ;;  %v714_v15 = vmul.f32 0.25, %v640_v10 }
 0x193   :  { %v1223_v21 = vpop.eup %1222  ;;  %1100 = vst.msk [vmem:[%s2559_s3 + $0x170] sm:$0xff] %vm78_vm0, %v1036_v8  ;;  %v967_v62 = vmul.f32 %v2109_v58, %v896_v41  ;;  %1236 = vrsqrt.f32 %v776_v48  ;;  %v2648_v8 = vld [vmem:[#allocation8_spill] sm:$0xff] }
 0x194   :  { %v1225_v47 = vpop.eup %1224  ;;  %v1037_v57 = vadd.f32 %v2115_v7, %v966_v46  ;;  %v897_v52 = vmul.f32 %v1223_v21, %v2641_v19  ;;  %v777_v36 = vadd.f32 1e-05, %v713_v5  ;;  %v778_v13 = vadd.f32 1e-05, %v714_v15  ;;  %v2649_v15 = vld [vmem:[#allocation9_spill] sm:$0xff] }
 0x195   :  { %v1038_v22 = vadd.f32 %v2115_v7, %v967_v62  ;;  %v898_v39 = vmul.f32 %v1225_v47, %v2642_v59  ;;  %v643_v33 = vpop.xlane.xlu1 %642  ;;  %v646_v45 = vpop.xlane.xlu0 %645  ;;  %v2650_v47 = vld [vmem:[#allocation10_spill] sm:$0xff]  ;;  %v2651_v59 = vld [vmem:[#allocation11_spill] sm:$0xff] }
 0x196   :  { %1101 = vst.msk [vmem:[%s2559_s3 + $0x178] sm:$0xff] %vm78_vm0, %v1037_v57  ;;  %v968_v24 = vmul.f32 %v2109_v58, %v897_v52  ;;  %1238 = vrsqrt.f32 %v777_v36  ;;  %v715_v12 = vmul.f32 0.25, %v643_v33  ;;  %v716_v3 = vmul.f32 0.25, %v646_v45  ;;  %v1252_v19 = vld [vmem:[%s2557_s1] ss:$0 sm:$0xff]  ;;  %v2652_v45 = vld [vmem:[#allocation12_spill] sm:$0xff] }
 0x197   :  { %v1227_v23 = vpop.eup %1226  ;;  %1102 = vst.msk [vmem:[%s2559_s3 + $0x180] sm:$0xff] %vm78_vm0, %v1038_v22  ;;  %v969_v50 = vmul.f32 %v2109_v58, %v898_v39  ;;  %1240 = vrsqrt.f32 %v778_v13  ;;  %v1253_v13 = vld [vmem:[%s2558_s2] ss:$0 sm:$0xff] }
 0x198   :  { %v1229_v27 = vpop.eup %1228  ;;  %v1039_v56 = vadd.f32 %v2115_v7, %v968_v24  ;;  %v899_v61 = vmul.f32 %v1227_v23, %v2643_v54  ;;  %v779_v40 = vadd.f32 1e-05, %v715_v12  ;;  %v780_v14 = vadd.f32 1e-05, %v716_v3 }
 0x199   :  { %v1040_v2 = vadd.f32 %v2115_v7, %v969_v50  ;;  %v900_v25 = vmul.f32 %v1229_v27, %v2644_v42  ;;  %v649_v31 = vpop.xlane.xlu1 %648  ;;  %v652_v6 = vpop.xlane.xlu0 %651 }
 0x19a   :  { %1103 = vst.msk [vmem:[%s2559_s3 + $0x188] sm:$0xff] %vm78_vm0, %v1039_v56  ;;  %v970_v30 = vmul.f32 %v2109_v58, %v899_v61  ;;  %1242 = vrsqrt.f32 %v779_v40  ;;  %v717_v49 = vmul.f32 0.25, %v649_v31  ;;  %v718_v28 = vmul.f32 0.25, %v652_v6  ;;  %v2653_v56 = vld [vmem:[#allocation13_spill] sm:$0xff]  ;;  %v2654_v40 = vld [vmem:[#allocation14_spill] sm:$0xff]  ;;  %v2655_v6 = vld [vmem:[#allocation20_spill] sm:$0xff] }
 0x19b   :  { %v1231_v35 = vpop.eup %1230  ;;  %1104 = vst.msk [vmem:[%s2559_s3 + $0x190] sm:$0xff] %vm78_vm0, %v1040_v2  ;;  %v971_v60 = vmul.f32 %v2109_v58, %v900_v25  ;;  %1244 = vrsqrt.f32 %v780_v14 }
 0x19c   :  { %v1233_v9 = vpop.eup %1232  ;;  %v1041_v37 = vadd.f32 %v2115_v7, %v970_v30  ;;  %v901_v4 = vmul.f32 %v1231_v35, %v2645_v16  ;;  %v781_v44 = vadd.f32 1e-05, %v717_v49  ;;  %v782_v17 = vadd.f32 1e-05, %v718_v28 }
 0x19d   :  { %v1042_v55 = vadd.f32 %v2115_v7, %v971_v60  ;;  %v902_v18 = vmul.f32 %v1233_v9, %v2646_v0  ;;  %v655_v34 = vpop.xlane.xlu1 %654 }
 0x19e   :  { %1105 = vst.msk [vmem:[%s2559_s3 + $0x198] sm:$0xff] %vm78_vm0, %v1041_v37  ;;  %v972_v38 = vmul.f32 %v2109_v58, %v901_v4  ;;  %1246 = vrsqrt.f32 %v781_v44  ;;  %v719_v63 = vmul.f32 0.25, %v655_v34 }
 0x19f   :  { %v1235_v51 = vpop.eup %1234  ;;  %1106 = vst.msk [vmem:[%s2559_s3 + $0x1a0] sm:$0xff] %vm78_vm0, %v1042_v55  ;;  %v973_v43 = vmul.f32 %v2109_v58, %v902_v18  ;;  %1248 = vrsqrt.f32 %v782_v17 }
 0x1a0   :  { %v1237_v1 = vpop.eup %1236  ;;  %v1043_v53 = vadd.f32 %v2115_v7, %v972_v38  ;;  %v903_v29 = vmul.f32 %v1235_v51, %v2647_v32  ;;  %v783_v11 = vadd.f32 1e-05, %v719_v63 }
 0x1a1   :  { %v1044_v48 = vadd.f32 %v2115_v7, %v973_v43  ;;  %v904_v26 = vmul.f32 %v1237_v1, %v2648_v8 }
 0x1a2   :  { %1107 = vst.msk [vmem:[%s2559_s3 + $0x1a8] sm:$0xff] %vm78_vm0, %v1043_v53  ;;  %v974_v41 = vmul.f32 %v2109_v58, %v903_v29  ;;  %1250 = vrsqrt.f32 %v783_v11 }
 0x1a3   :  { %v1239_v20 = vpop.eup %1238  ;;  %1108 = vst.msk [vmem:[%s2559_s3 + $0x1b0] sm:$0xff] %vm78_vm0, %v1044_v48  ;;  %v975_v10 = vmul.f32 %v2109_v58, %v904_v26 }
 0x1a4   :  { %v1241_v46 = vpop.eup %1240  ;;  %v1045_v5 = vadd.f32 %v2115_v7, %v974_v41  ;;  %v905_v21 = vmul.f32 %v1239_v20, %v2649_v15 }
 0x1a5   :  { %v1046_v62 = vadd.f32 %v2115_v7, %v975_v10  ;;  %v906_v57 = vmul.f32 %v1241_v46, %v2650_v47 }
 0x1a6   :  { %1109 = vst.msk [vmem:[%s2559_s3 + $0x1b8] sm:$0xff] %vm78_vm0, %v1045_v5  ;;  %v976_v52 = vmul.f32 %v1252_v19, %v905_v21 }
 0x1a7   :  { %v1243_v58 = vpop.eup %1242  ;;  %1110 = vst.msk [vmem:[%s2559_s3 + $0x1c0] sm:$0xff] %vm78_vm0, %v1046_v62  ;;  %v977_v36 = vmul.f32 %v1252_v19, %v906_v57 }
 0x1a8   :  { %v1245_v7 = vpop.eup %1244  ;;  %v1047_v22 = vadd.f32 %v1253_v13, %v976_v52  ;;  %v907_v39 = vmul.f32 %v1243_v58, %v2651_v59 }
 0x1a9   :  { %v1048_v33 = vadd.f32 %v1253_v13, %v977_v36  ;;  %v908_v24 = vmul.f32 %v1245_v7, %v2652_v45 }
 0x1aa   :  { %1111 = vst.msk [vmem:[%s2559_s3 + $0x1c8] sm:$0xff] %vm78_vm0, %v1047_v22  ;;  %v978_v12 = vmul.f32 %v1252_v19, %v907_v39 }
 0x1ab   :  { %v1247_v3 = vpop.eup %1246  ;;  %1112 = vst.msk [vmem:[%s2559_s3 + $0x1d0] sm:$0xff] %vm78_vm0, %v1048_v33  ;;  %v979_v23 = vmul.f32 %v1252_v19, %v908_v24 }
 0x1ac   :  { %v1249_v50 = vpop.eup %1248  ;;  %v1049_v27 = vadd.f32 %v1253_v13, %v978_v12  ;;  %v909_v54 = vmul.f32 %v1247_v3, %v2653_v56 }
 0x1ad   :  { %v1050_v61 = vadd.f32 %v1253_v13, %v979_v23  ;;  %v910_v14 = vmul.f32 %v1249_v50, %v2654_v40 }
 0x1ae   :  { %1113 = vst.msk [vmem:[%s2559_s3 + $0x1d8] sm:$0xff] %vm78_vm0, %v1049_v27  ;;  %v980_v2 = vmul.f32 %v1252_v19, %v909_v54 }
 0x1af   :  { %v1251_v42 = vpop.eup %1250  ;;  %1114 = vst.msk [vmem:[%s2559_s3 + $0x1e0] sm:$0xff] %vm78_vm0, %v1050_v61  ;;  %v981_v25 = vmul.f32 %v1252_v19, %v910_v14 }
 0x1b0   :  { %v1051_v31 = vadd.f32 %v1253_v13, %v980_v2  ;;  %v911_v30 = vmul.f32 %v1251_v42, %v2655_v6 }
 0x1b1   :  { %v1052_v49 = vadd.f32 %v1253_v13, %v981_v25 }
 0x1b2   :  { %1115 = vst.msk [vmem:[%s2559_s3 + $0x1e8] sm:$0xff] %vm78_vm0, %v1051_v31  ;;  %v982_v28 = vmul.f32 %v1252_v19, %v911_v30 }
 0x1b3   :  { %1116 = vst.msk [vmem:[%s2559_s3 + $0x1f0] sm:$0xff] %vm78_vm0, %v1052_v49 }
 0x1b4   :  { %v1053_v35 = vadd.f32 %v1253_v13, %v982_v28 }
 0x1b6   :  { %1117 = vst.msk [vmem:[%s2559_s3 + $0x1f8] sm:$0xff] %vm78_vm0, %v1053_v35 }

// kernel: run.16
= control target key start
LH: loop header
LB: loop body
LE: loop exit
PB: predicated region body
PF: predicated region fallthrough
CT: control target
= control target key end

     0   :  { %s1672_s1 = inlined_call_operand.vmem [shape: bf16[256,1024], index: 1, kind: input, shape index: {}]   ;;  %s1673_s0 = inlined_call_operand.vmem [shape: bf16[24,256], index: 0, kind: input, shape index: {}]   ;;  %s1674_s2 = inlined_call_operand.vmem [shape: f32[24,1024], index: 2, kind: output, shape index: {}]  }
   0x1   :  { %v70_v0 = vld [vmem:[%s1672_s1 + $0x1c0] sm:$0xff]  ;;  %v71_v2 = vld [vmem:[%s1672_s1 + $0x1c8] sm:$0xff] }
   0x2   :  { %v74_v1 = vld [vmem:[%s1672_s1 + $0x1e0] sm:$0xff]  ;;  %v75_v4 = vld [vmem:[%s1672_s1 + $0x1e8] sm:$0xff] }
   0x3   :  { %v1092_v3 = vcombine.high %v70_v0, %v74_v1  ;;  %v1091_v5 = vcombine.low %v70_v0, %v74_v1  ;;  %v62_v6 = vld [vmem:[%s1672_s1 + $0x180] sm:$0xff]  ;;  %v1094_v8 = vcombine.high %v71_v2, %v75_v4  ;;  %v1093_v9 = vcombine.low %v71_v2, %v75_v4  ;;  %v63_v11 = vld [vmem:[%s1672_s1 + $0x188] sm:$0xff] }
   0x4   :  { %v66_v7 = vld [vmem:[%s1672_s1 + $0x1a0] sm:$0xff]  ;;  %v67_v12 = vld [vmem:[%s1672_s1 + $0x1a8] sm:$0xff] }
   0x5   :  { %v1084_v10 = vcombine.high %v62_v6, %v66_v7  ;;  %v54_v13 = vld [vmem:[%s1672_s1 + $0x140] sm:$0xff]  ;;  %799 = vmatprep.subr.bf16.mxu0 %v1092_v3  ;;  %v1086_v14 = vcombine.high %v63_v11, %v67_v12  ;;  %v55_v16 = vld [vmem:[%s1672_s1 + $0x148] sm:$0xff]  ;;  %850 = vmatprep.subr.bf16.mxu1 %v1094_v8  ;;  %v1083_v18 = vcombine.low %v62_v6, %v66_v7 }
   0x6   :  { %v58_v15 = vld [vmem:[%s1672_s1 + $0x160] sm:$0xff]  ;;  %v59_v17 = vld [vmem:[%s1672_s1 + $0x168] sm:$0xff]  ;;  %800 = vmatpush1.bf16.msra.mxu0 %v1091_v5  ;;  %851 = vmatpush1.bf16.msra.mxu1 %v1093_v9  ;;  %v1085_v19 = vcombine.low %v63_v11, %v67_v12 }
   0x7   :  { %801 = vmatprep.subr.bf16.mxu0 %v1084_v10  ;;  %v1076_v20 = vcombine.high %v54_v13, %v58_v15  ;;  %852 = vmatprep.subr.bf16.mxu1 %v1086_v14  ;;  %v1078_v21 = vcombine.high %v55_v16, %v59_v17  ;;  %v46_v22 = vld [vmem:[%s1672_s1 + $0x100] sm:$0xff]  ;;  %v47_v24 = vld [vmem:[%s1672_s1 + $0x108] sm:$0xff]  ;;  %v1075_v26 = vcombine.low %v54_v13, %v58_v15 }
   0x8   :  { %v50_v23 = vld [vmem:[%s1672_s1 + $0x120] sm:$0xff]  ;;  %v51_v25 = vld [vmem:[%s1672_s1 + $0x128] sm:$0xff]  ;;  %v1077_v27 = vcombine.low %v55_v16, %v59_v17 }
   0x9   :  { %v1068_v28 = vcombine.high %v46_v22, %v50_v23  ;;  %v1070_v29 = vcombine.high %v47_v24, %v51_v25  ;;  %v38_v30 = vld [vmem:[%s1672_s1 + $0xc0] sm:$0xff]  ;;  %v39_v32 = vld [vmem:[%s1672_s1 + $0xc8] sm:$0xff]  ;;  %v1067_v34 = vcombine.low %v46_v22, %v50_v23  ;;  %v1069_v35 = vcombine.low %v47_v24, %v51_v25 }
   0xa   :  { %802 = vmatpush1.bf16.msra.mxu0 %v1083_v18  ;;  %853 = vmatpush1.bf16.msra.mxu1 %v1085_v19  ;;  %v42_v31 = vld [vmem:[%s1672_s1 + $0xe0] sm:$0xff]  ;;  %v43_v33 = vld [vmem:[%s1672_s1 + $0xe8] sm:$0xff] }
   0xb   :  { %803 = vmatprep.subr.bf16.mxu0 %v1076_v20  ;;  %854 = vmatprep.subr.bf16.mxu1 %v1078_v21  ;;  %v1060_v36 = vcombine.high %v38_v30, %v42_v31  ;;  %v1062_v37 = vcombine.high %v39_v32, %v43_v33  ;;  %v30_v38 = vld [vmem:[%s1672_s1 + $0x80] sm:$0xff]  ;;  %v31_v40 = vld [vmem:[%s1672_s1 + $0x88] sm:$0xff]  ;;  %v1059_v42 = vcombine.low %v38_v30, %v42_v31 }
   0xc   :  { %v34_v39 = vld [vmem:[%s1672_s1 + $0xa0] sm:$0xff]  ;;  %v35_v41 = vld [vmem:[%s1672_s1 + $0xa8] sm:$0xff]  ;;  %v1061_v43 = vcombine.low %v39_v32, %v43_v33 }
   0xd   :  { %v1052_v44 = vcombine.high %v30_v38, %v34_v39  ;;  %v1054_v45 = vcombine.high %v31_v40, %v35_v41  ;;  %v22_v46 = vld [vmem:[%s1672_s1 + $0x40] sm:$0xff]  ;;  %v23_v48 = vld [vmem:[%s1672_s1 + $0x48] sm:$0xff]  ;;  %v1051_v50 = vcombine.low %v30_v38, %v34_v39  ;;  %v1053_v51 = vcombine.low %v31_v40, %v35_v41 }
   0xe   :  { %804 = vmatpush1.bf16.msra.mxu0 %v1075_v26  ;;  %855 = vmatpush1.bf16.msra.mxu1 %v1077_v27  ;;  %v26_v47 = vld [vmem:[%s1672_s1 + $0x60] sm:$0xff]  ;;  %v27_v49 = vld [vmem:[%s1672_s1 + $0x68] sm:$0xff] }
   0xf   :  { %805 = vmatprep.subr.bf16.mxu0 %v1068_v28  ;;  %856 = vmatprep.subr.bf16.mxu1 %v1070_v29  ;;  %v1044_v52 = vcombine.high %v22_v46, %v26_v47  ;;  %v1046_v53 = vcombine.high %v23_v48, %v27_v49  ;;  %v14_v54 = vld [vmem:[%s1672_s1] sm:$0xff]  ;;  %v15_v57 = vld [vmem:[%s1672_s1 + $0x8] sm:$0xff]  ;;  %v1043_v59 = vcombine.low %v22_v46, %v26_v47 }
  0x10   :  { %v18_v55 = vld [vmem:[%s1672_s1 + $0x20] sm:$0xff]  ;;  %v19_v58 = vld [vmem:[%s1672_s1 + $0x28] sm:$0xff]  ;;  %v1045_v60 = vcombine.low %v23_v48, %v27_v49 }
  0x11   :  { %v1276_v56 = vld [vmem:[%s1673_s0 + $0x4] ss:$8 sps:$4 sm:$0xff]   ;;  %v1036_v61 = vcombine.high %v14_v54, %v18_v55  ;;  %v1038_v62 = vcombine.high %v15_v57, %v19_v58  ;;  %v1035_v3 = vcombine.low %v14_v54, %v18_v55  ;;  %v1037_v4 = vcombine.low %v15_v57, %v19_v58 }
  0x12   :  { %806 = vmatpush1.bf16.msra.mxu0 %v1067_v34  ;;  %857 = vmatpush1.bf16.msra.mxu1 %v1069_v35  ;;  %v134_v63 = vld [vmem:[%s1672_s1 + $0x3c0] sm:$0xff]  ;;  %v135_v1 = vld [vmem:[%s1672_s1 + $0x3c8] sm:$0xff] }
  0x13   :  { %807 = vmatprep.subr.bf16.mxu0 %v1060_v36  ;;  %858 = vmatprep.subr.bf16.mxu1 %v1062_v37  ;;  %v138_v0 = vld [vmem:[%s1672_s1 + $0x3e0] sm:$0xff]  ;;  %v139_v2 = vld [vmem:[%s1672_s1 + $0x3e8] sm:$0xff] }
  0x14   :  { %831 = vmatprep.mubr.bf16.mxu0 %v1276_v56  ;;  %882 = vmatprep.mubr.bf16.mxu1 %v1276_v56  ;;  %v1156_v5 = vcombine.high %v134_v63, %v138_v0  ;;  %v1158_v6 = vcombine.high %v135_v1, %v139_v2  ;;  %v126_v7 = vld [vmem:[%s1672_s1 + $0x380] sm:$0xff]  ;;  %v127_v9 = vld [vmem:[%s1672_s1 + $0x388] sm:$0xff]  ;;  %v1155_v11 = vcombine.low %v134_v63, %v138_v0  ;;  %v72_v0 = vld [vmem:[%s1672_s1 + $0x1d0] sm:$0xff] }
  0x15   :  { %v130_v8 = vld [vmem:[%s1672_s1 + $0x3a0] sm:$0xff]  ;;  %v131_v10 = vld [vmem:[%s1672_s1 + $0x3a8] sm:$0xff]  ;;  %v1157_v12 = vcombine.low %v135_v1, %v139_v2  ;;  %v76_v1 = vld [vmem:[%s1672_s1 + $0x1f0] sm:$0xff] }
  0x16   :  { %808 = vmatpush1.bf16.msra.mxu0 %v1059_v42  ;;  %859 = vmatpush1.bf16.msra.mxu1 %v1061_v43  ;;  %v1148_v13 = vcombine.high %v126_v7, %v130_v8  ;;  %v1150_v14 = vcombine.high %v127_v9, %v131_v10  ;;  %v118_v15 = vld [vmem:[%s1672_s1 + $0x340] sm:$0xff]  ;;  %v119_v17 = vld [vmem:[%s1672_s1 + $0x348] sm:$0xff]  ;;  %v1147_v19 = vcombine.low %v126_v7, %v130_v8  ;;  %v73_v2 = vld [vmem:[%s1672_s1 + $0x1d8] sm:$0xff] }
  0x17   :  { %809 = vmatprep.subr.bf16.mxu0 %v1052_v44  ;;  %860 = vmatprep.subr.bf16.mxu1 %v1054_v45  ;;  %v122_v16 = vld [vmem:[%s1672_s1 + $0x360] sm:$0xff]  ;;  %v123_v18 = vld [vmem:[%s1672_s1 + $0x368] sm:$0xff]  ;;  %v1149_v20 = vcombine.low %v127_v9, %v131_v10  ;;  %v64_v9 = vld [vmem:[%s1672_s1 + $0x190] sm:$0xff] }
  0x18   :  { %v1140_v21 = vcombine.high %v118_v15, %v122_v16  ;;  %v1142_v22 = vcombine.high %v119_v17, %v123_v18  ;;  %v110_v23 = vld [vmem:[%s1672_s1 + $0x300] sm:$0xff]  ;;  %v111_v25 = vld [vmem:[%s1672_s1 + $0x308] sm:$0xff]  ;;  %v1139_v27 = vcombine.low %v118_v15, %v122_v16  ;;  %v1141_v28 = vcombine.low %v119_v17, %v123_v18  ;;  %v68_v10 = vld [vmem:[%s1672_s1 + $0x1b0] sm:$0xff] }
  0x19   :  { %v114_v24 = vld [vmem:[%s1672_s1 + $0x320] sm:$0xff]  ;;  %v115_v26 = vld [vmem:[%s1672_s1 + $0x328] sm:$0xff]  ;;  %v1088_v16 = vcombine.high %v64_v9, %v68_v10  ;;  %v56_v18 = vld [vmem:[%s1672_s1 + $0x150] sm:$0xff] }
  0x1a   :  { %810 = vmatpush1.bf16.msra.mxu0 %v1051_v50  ;;  %861 = vmatpush1.bf16.msra.mxu1 %v1053_v51  ;;  %v1132_v29 = vcombine.high %v110_v23, %v114_v24  ;;  %v1134_v30 = vcombine.high %v111_v25, %v115_v26  ;;  %v102_v31 = vld [vmem:[%s1672_s1 + $0x2c0] sm:$0xff]  ;;  %v103_v33 = vld [vmem:[%s1672_s1 + $0x2c8] sm:$0xff]  ;;  %v1131_v35 = vcombine.low %v110_v23, %v114_v24 }
  0x1b   :  { %811 = vmatprep.subr.bf16.mxu0 %v1044_v52  ;;  %862 = vmatprep.subr.bf16.mxu1 %v1046_v53  ;;  %v106_v32 = vld [vmem:[%s1672_s1 + $0x2e0] sm:$0xff]  ;;  %v107_v34 = vld [vmem:[%s1672_s1 + $0x2e8] sm:$0xff]  ;;  %v1133_v36 = vcombine.low %v111_v25, %v115_v26  ;;  %v1087_v23 = vcombine.low %v64_v9, %v68_v10 }
  0x1c   :  { %v1124_v37 = vcombine.high %v102_v31, %v106_v32  ;;  %v1126_v38 = vcombine.high %v103_v33, %v107_v34  ;;  %v94_v39 = vld [vmem:[%s1672_s1 + $0x280] sm:$0xff]  ;;  %v95_v41 = vld [vmem:[%s1672_s1 + $0x288] sm:$0xff]  ;;  %v1123_v43 = vcombine.low %v102_v31, %v106_v32  ;;  %v1125_v44 = vcombine.low %v103_v33, %v107_v34 }
  0x1d   :  { %v98_v40 = vld [vmem:[%s1672_s1 + $0x2a0] sm:$0xff]  ;;  %v99_v42 = vld [vmem:[%s1672_s1 + $0x2a8] sm:$0xff] }
  0x1e   :  { %812 = vmatpush1.bf16.msra.mxu0 %v1043_v59  ;;  %863 = vmatpush1.bf16.msra.mxu1 %v1045_v60  ;;  %v1116_v45 = vcombine.high %v94_v39, %v98_v40  ;;  %v1118_v46 = vcombine.high %v95_v41, %v99_v42  ;;  %v86_v47 = vld [vmem:[%s1672_s1 + $0x240] sm:$0xff]  ;;  %v87_v49 = vld [vmem:[%s1672_s1 + $0x248] sm:$0xff]  ;;  %v1115_v51 = vcombine.low %v94_v39, %v98_v40  ;;  %v45_v39 = vld [vmem:[%s1672_s1 + $0xf8] sm:$0xff] }
  0x1f   :  { %813 = vmatprep.subr.bf16.mxu0 %v1036_v61  ;;  %864 = vmatprep.subr.bf16.mxu1 %v1038_v62  ;;  %v90_v48 = vld [vmem:[%s1672_s1 + $0x260] sm:$0xff]  ;;  %v91_v50 = vld [vmem:[%s1672_s1 + $0x268] sm:$0xff]  ;;  %v1117_v52 = vcombine.low %v95_v41, %v99_v42 }
  0x20   :  { %v1108_v53 = vcombine.high %v86_v47, %v90_v48  ;;  %v1110_v54 = vcombine.high %v87_v49, %v91_v50  ;;  %v78_v55 = vld [vmem:[%s1672_s1 + $0x200] sm:$0xff]  ;;  %v79_v58 = vld [vmem:[%s1672_s1 + $0x208] sm:$0xff]  ;;  %v1107_v60 = vcombine.low %v86_v47, %v90_v48  ;;  %v1109_v61 = vcombine.low %v87_v49, %v91_v50  ;;  %v37_v47 = vld [vmem:[%s1672_s1 + $0xb8] sm:$0xff] }
  0x21   :  { %v82_v57 = vld [vmem:[%s1672_s1 + $0x220] sm:$0xff]  ;;  %v83_v59 = vld [vmem:[%s1672_s1 + $0x228] sm:$0xff] }
  0x22   :  { %814 = vmatpush1.bf16.msra.mxu0 %v1035_v3  ;;  %865 = vmatpush1.bf16.msra.mxu1 %v1037_v4  ;;  %v1100_v62 = vcombine.high %v78_v55, %v82_v57  ;;  %v1102_v63 = vcombine.high %v79_v58, %v83_v59  ;;  %v77_v3 = vld [vmem:[%s1672_s1 + $0x1f8] sm:$0xff]  ;;  %v1099_v4 = vcombine.low %v78_v55, %v82_v57  ;;  %v1397_v7 = vld [vmem:[%s1673_s0] ss:$8 sps:$4 sm:$0xff]  }
  0x23   :  { %815 = vmatprep.subr.bf16.mxu0 %v1156_v5  ;;  %866 = vmatprep.subr.bf16.mxu1 %v1158_v6  ;;  %v1101_v5 = vcombine.low %v79_v58, %v83_v59  ;;  %v1096_v6 = vcombine.high %v72_v0, %v76_v1  ;;  %v1098_v8 = vcombine.high %v73_v2, %v77_v3 }
  0x24   :  { %v1097_v15 = vcombine.low %v73_v2, %v77_v3 }
  0x26   :  { %816 = vmatpush2.bf16.msra.mxu0 %v1155_v11  ;;  %867 = vmatpush2.bf16.msra.mxu1 %v1157_v12  ;;  %v65_v11 = vld [vmem:[%s1672_s1 + $0x198] sm:$0xff] }
  0x27   :  { %817 = vmatprep.subr.bf16.mxu0 %v1148_v13  ;;  %868 = vmatprep.subr.bf16.mxu1 %v1150_v14  ;;  %v69_v12 = vld [vmem:[%s1672_s1 + $0x1b8] sm:$0xff]  ;;  %v13_v13 = vld [vmem:[%s1673_s0 + $0x10] sm:$0xff]  ;;  %v1095_v14 = vcombine.low %v72_v0, %v76_v1 }
  0x28   :  { %v1090_v17 = vcombine.high %v65_v11, %v69_v12  ;;  %v1089_v24 = vcombine.low %v65_v11, %v69_v12  ;;  %v1444_v31 = vcombine.low %v13_v13, %v13_v13 }
  0x2a   :  { %818 = vmatpush2.bf16.msra.mxu0 %v1147_v19  ;;  %869 = vmatpush2.bf16.msra.mxu1 %v1149_v20  ;;  %v60_v19 = vld [vmem:[%s1672_s1 + $0x170] sm:$0xff]  ;;  %v1420_v20 = vcombine.high %v13_v13, %v13_v13 }
  0x2b   :  { %819 = vmatprep.subr.bf16.mxu0 %v1140_v21  ;;  %870 = vmatprep.subr.bf16.mxu1 %v1142_v22  ;;  %v57_v21 = vld [vmem:[%s1672_s1 + $0x158] sm:$0xff]  ;;  %v1080_v25 = vcombine.high %v56_v18, %v60_v19  ;;  %v1079_v32 = vcombine.low %v56_v18, %v60_v19  ;;  %v128_v13 = vld [vmem:[%s1672_s1 + $0x390] sm:$0xff] }
  0x2c   :  { %v61_v22 = vld [vmem:[%s1672_s1 + $0x178] sm:$0xff] }
  0x2d   :  { %v1082_v26 = vcombine.high %v57_v21, %v61_v22  ;;  %v1081_v33 = vcombine.low %v57_v21, %v61_v22  ;;  %v120_v22 = vld [vmem:[%s1672_s1 + $0x350] sm:$0xff] }
  0x2e   :  { %820 = vmatpush2.bf16.msra.mxu0 %v1139_v27  ;;  %871 = vmatpush2.bf16.msra.mxu1 %v1141_v28  ;;  %v48_v27 = vld [vmem:[%s1672_s1 + $0x110] sm:$0xff] }
  0x2f   :  { %821 = vmatprep.subr.bf16.mxu0 %v1132_v29  ;;  %872 = vmatprep.subr.bf16.mxu1 %v1134_v30  ;;  %v52_v28 = vld [vmem:[%s1672_s1 + $0x130] sm:$0xff]  ;;  %v49_v29 = vld [vmem:[%s1672_s1 + $0x118] sm:$0xff] }
  0x30   :  { %v53_v30 = vld [vmem:[%s1672_s1 + $0x138] sm:$0xff]  ;;  %v1072_v34 = vcombine.high %v48_v27, %v52_v28  ;;  %v1071_v40 = vcombine.low %v48_v27, %v52_v28 }
  0x31   :  { %v1073_v41 = vcombine.low %v49_v29, %v53_v30 }
  0x32   :  { %822 = vmatpush2.bf16.msra.mxu0 %v1131_v35  ;;  %873 = vmatpush2.bf16.msra.mxu1 %v1133_v36  ;;  %v1074_v35 = vcombine.high %v49_v29, %v53_v30  ;;  %v40_v36 = vld [vmem:[%s1672_s1 + $0xd0] sm:$0xff] }
  0x33   :  { %823 = vmatprep.subr.bf16.mxu0 %v1124_v37  ;;  %874 = vmatprep.subr.bf16.mxu1 %v1126_v38  ;;  %v44_v37 = vld [vmem:[%s1672_s1 + $0xf0] sm:$0xff]  ;;  %v41_v38 = vld [vmem:[%s1672_s1 + $0xd8] sm:$0xff] }
  0x34   :  { %v1064_v42 = vcombine.high %v40_v36, %v44_v37  ;;  %v1063_v48 = vcombine.low %v40_v36, %v44_v37  ;;  %v1065_v49 = vcombine.low %v41_v38, %v45_v39  ;;  %v112_v30 = vld [vmem:[%s1672_s1 + $0x310] sm:$0xff] }
  0x36   :  { %824 = vmatpush2.bf16.msra.mxu0 %v1123_v43  ;;  %875 = vmatpush2.bf16.msra.mxu1 %v1125_v44  ;;  %v1066_v43 = vcombine.high %v41_v38, %v45_v39  ;;  %v32_v44 = vld [vmem:[%s1672_s1 + $0x90] sm:$0xff] }
  0x37   :  { %825 = vmatprep.subr.bf16.mxu0 %v1116_v45  ;;  %876 = vmatprep.subr.bf16.mxu1 %v1118_v46  ;;  %v36_v45 = vld [vmem:[%s1672_s1 + $0xb0] sm:$0xff]  ;;  %v33_v46 = vld [vmem:[%s1672_s1 + $0x98] sm:$0xff] }
  0x38   :  { %v1056_v50 = vcombine.high %v32_v44, %v36_v45  ;;  %v1055_v55 = vcombine.low %v32_v44, %v36_v45  ;;  %v1057_v57 = vcombine.low %v33_v46, %v37_v47  ;;  %v104_v39 = vld [vmem:[%s1672_s1 + $0x2d0] sm:$0xff] }
  0x3a   :  { %826 = vmatpush2.bf16.msra.mxu0 %v1115_v51  ;;  %877 = vmatpush2.bf16.msra.mxu1 %v1117_v52  ;;  %v1058_v51 = vcombine.high %v33_v46, %v37_v47  ;;  %v24_v52 = vld [vmem:[%s1672_s1 + $0x50] sm:$0xff] }
  0x3b   :  { %827 = vmatprep.subr.bf16.mxu0 %v1108_v53  ;;  %878 = vmatprep.subr.bf16.mxu1 %v1110_v54  ;;  %v28_v53 = vld [vmem:[%s1672_s1 + $0x70] sm:$0xff]  ;;  %v29_v54 = vld [vmem:[%s1672_s1 + $0x78] sm:$0xff] }
  0x3c   :  { %v1048_v58 = vcombine.high %v24_v52, %v28_v53  ;;  %v1047_v0 = vcombine.low %v24_v52, %v28_v53  ;;  %v96_v47 = vld [vmem:[%s1672_s1 + $0x290] sm:$0xff] }
  0x3e   :  { %828 = vmatpush2.bf16.msra.mxu0 %v1107_v60  ;;  %879 = vmatpush2.bf16.msra.mxu1 %v1109_v61  ;;  %v16_v60 = vld [vmem:[%s1672_s1 + $0x10] sm:$0xff] }
  0x3f   :  { %829 = vmatprep.subr.bf16.mxu0 %v1100_v62  ;;  %880 = vmatprep.subr.bf16.mxu1 %v1102_v63  ;;  %v20_v61 = vld [vmem:[%s1672_s1 + $0x30] sm:$0xff]  ;;  %v17_v62 = vld [vmem:[%s1672_s1 + $0x18] sm:$0xff] }
  0x40   :  { %v21_v63 = vld [vmem:[%s1672_s1 + $0x38] sm:$0xff]  ;;  %v1040_v2 = vcombine.high %v16_v60, %v20_v61  ;;  %v1039_v9 = vcombine.low %v16_v60, %v20_v61 }
  0x41   :  { %v1042_v3 = vcombine.high %v17_v62, %v21_v63  ;;  %v1041_v10 = vcombine.low %v17_v62, %v21_v63  ;;  %v80_v63 = vld [vmem:[%s1672_s1 + $0x210] sm:$0xff] }
  0x42   :  { %830 = vmatpush2.bf16.msra.mxu0 %v1099_v4  ;;  %881 = vmatpush2.bf16.msra.mxu1 %v1101_v5  ;;  %v136_v4 = vld [vmem:[%s1672_s1 + $0x3d0] sm:$0xff] }
  0x43   :  { %901 = vmatprep.subr.bf16.mxu0 %v1096_v6  ;;  %952 = vmatprep.subr.bf16.mxu1 %v1098_v8  ;;  %v140_v5 = vld [vmem:[%s1672_s1 + $0x3f0] sm:$0xff]  ;;  %v137_v6 = vld [vmem:[%s1672_s1 + $0x3d8] sm:$0xff] }
  0x44   :  { %v141_v8 = vld [vmem:[%s1672_s1 + $0x3f8] sm:$0xff]  ;;  %v1160_v11 = vcombine.high %v136_v4, %v140_v5 }
  0x45   :  { %832 = vmatmul.mubr.bf16.vlgmr.msra.gmra.mxu0 %v1397_v7  ;;  %883 = vmatmul.mubr.bf16.vlgmr.msra.gmra.mxu1 %v1397_v7  ;;  %v1162_v12 = vcombine.high %v137_v6, %v141_v8  ;;  %v1161_v18 = vcombine.low %v137_v6, %v141_v8 }
  0x46   :  { %902 = vmatpush1.bf16.msra.mxu0 %v1095_v14  ;;  %953 = vmatpush1.bf16.msra.mxu1 %v1097_v15  ;;  %v132_v14 = vld [vmem:[%s1672_s1 + $0x3b0] sm:$0xff]  ;;  %v129_v15 = vld [vmem:[%s1672_s1 + $0x398] sm:$0xff] }
  0x47   :  { %903 = vmatprep.subr.bf16.mxu0 %v1088_v16  ;;  %954 = vmatprep.subr.bf16.mxu1 %v1090_v17  ;;  %v133_v16 = vld [vmem:[%s1672_s1 + $0x3b8] sm:$0xff]  ;;  %v1159_v17 = vcombine.low %v136_v4, %v140_v5  ;;  %v1152_v19 = vcombine.high %v128_v13, %v132_v14 }
  0x48   :  { %841 = vmatprep.mubr.bf16.mxu0 %v1420_v20  ;;  %892 = vmatprep.mubr.bf16.mxu1 %v1420_v20  ;;  %v1154_v21 = vcombine.high %v129_v15, %v133_v16  ;;  %v1153_v27 = vcombine.low %v129_v15, %v133_v16 }
  0x4a   :  { %904 = vmatpush1.bf16.msra.mxu0 %v1087_v23  ;;  %955 = vmatpush1.bf16.msra.mxu1 %v1089_v24  ;;  %v124_v23 = vld [vmem:[%s1672_s1 + $0x370] sm:$0xff]  ;;  %v121_v24 = vld [vmem:[%s1672_s1 + $0x358] sm:$0xff] }
  0x4b   :  { %905 = vmatprep.subr.bf16.mxu0 %v1080_v25  ;;  %956 = vmatprep.subr.bf16.mxu1 %v1082_v26  ;;  %v125_v25 = vld [vmem:[%s1672_s1 + $0x378] sm:$0xff]  ;;  %v1151_v26 = vcombine.low %v128_v13, %v132_v14  ;;  %v1144_v28 = vcombine.high %v120_v22, %v124_v23 }
  0x4c   :  { %v1146_v29 = vcombine.high %v121_v24, %v125_v25  ;;  %v1145_v36 = vcombine.low %v121_v24, %v125_v25 }
  0x4d   :  { %842 = vmatmul.mubr.bf16.gmra.mxu0 %v1444_v31  ;;  %893 = vmatmul.mubr.bf16.gmra.mxu1 %v1444_v31 }
  0x4e   :  { %906 = vmatpush1.bf16.msra.mxu0 %v1079_v32  ;;  %957 = vmatpush1.bf16.msra.mxu1 %v1081_v33  ;;  %v116_v32 = vld [vmem:[%s1672_s1 + $0x330] sm:$0xff]  ;;  %v113_v33 = vld [vmem:[%s1672_s1 + $0x318] sm:$0xff] }
  0x4f   :  { %907 = vmatprep.subr.bf16.mxu0 %v1072_v34  ;;  %958 = vmatprep.subr.bf16.mxu1 %v1074_v35  ;;  %v117_v34 = vld [vmem:[%s1672_s1 + $0x338] sm:$0xff]  ;;  %v1143_v35 = vcombine.low %v120_v22, %v124_v23  ;;  %v1136_v37 = vcombine.high %v112_v30, %v116_v32 }
  0x50   :  { %933 = vmatprep.mubr.bf16.mxu0 %v1276_v56  ;;  %984 = vmatprep.mubr.bf16.mxu1 %v1276_v56  ;;  %v25_v56 = vld [vmem:[%s1672_s1 + $0x58] sm:$0xff]  ;;  %v1138_v38 = vcombine.high %v113_v33, %v117_v34  ;;  %v1137_v44 = vcombine.low %v113_v33, %v117_v34 }
  0x51   :  { %v1050_v59 = vcombine.high %v25_v56, %v29_v54  ;;  %v1049_v1 = vcombine.low %v25_v56, %v29_v54  ;;  %v88_v54 = vld [vmem:[%s1672_s1 + $0x250] sm:$0xff] }
  0x52   :  { %908 = vmatpush1.bf16.msra.mxu0 %v1071_v40  ;;  %959 = vmatpush1.bf16.msra.mxu1 %v1073_v41  ;;  %v108_v40 = vld [vmem:[%s1672_s1 + $0x2f0] sm:$0xff]  ;;  %v105_v41 = vld [vmem:[%s1672_s1 + $0x2d8] sm:$0xff] }
  0x53   :  { %909 = vmatprep.subr.bf16.mxu0 %v1064_v42  ;;  %960 = vmatprep.subr.bf16.mxu1 %v1066_v43  ;;  %v109_v42 = vld [vmem:[%s1672_s1 + $0x2f8] sm:$0xff]  ;;  %v1135_v43 = vcombine.low %v112_v30, %v116_v32  ;;  %v1128_v45 = vcombine.high %v104_v39, %v108_v40 }
  0x54   :  { %v1130_v46 = vcombine.high %v105_v41, %v109_v42  ;;  %v1129_v52 = vcombine.low %v105_v41, %v109_v42 }
  0x56   :  { %910 = vmatpush1.bf16.msra.mxu0 %v1063_v48  ;;  %961 = vmatpush1.bf16.msra.mxu1 %v1065_v49  ;;  %v100_v48 = vld [vmem:[%s1672_s1 + $0x2b0] sm:$0xff]  ;;  %v97_v49 = vld [vmem:[%s1672_s1 + $0x298] sm:$0xff] }
  0x57   :  { %911 = vmatprep.subr.bf16.mxu0 %v1056_v50  ;;  %962 = vmatprep.subr.bf16.mxu1 %v1058_v51  ;;  %v101_v50 = vld [vmem:[%s1672_s1 + $0x2b8] sm:$0xff]  ;;  %v1127_v51 = vcombine.low %v104_v39, %v108_v40  ;;  %v1120_v53 = vcombine.high %v96_v47, %v100_v48 }
  0x58   :  { %v1122_v56 = vcombine.high %v97_v49, %v101_v50  ;;  %v1121_v60 = vcombine.low %v97_v49, %v101_v50 }
  0x5a   :  { %912 = vmatpush1.bf16.msra.mxu0 %v1055_v55  ;;  %963 = vmatpush1.bf16.msra.mxu1 %v1057_v57  ;;  %v92_v55 = vld [vmem:[%s1672_s1 + $0x270] sm:$0xff]  ;;  %v89_v57 = vld [vmem:[%s1672_s1 + $0x258] sm:$0xff] }
  0x5b   :  { %913 = vmatprep.subr.bf16.mxu0 %v1048_v58  ;;  %964 = vmatprep.subr.bf16.mxu1 %v1050_v59  ;;  %v93_v58 = vld [vmem:[%s1672_s1 + $0x278] sm:$0xff]  ;;  %v1119_v59 = vcombine.low %v96_v47, %v100_v48  ;;  %v1112_v61 = vcombine.high %v88_v54, %v92_v55 }
  0x5c   :  { %v1114_v62 = vcombine.high %v89_v57, %v93_v58  ;;  %v1113_v4 = vcombine.low %v89_v57, %v93_v58 }
  0x5e   :  { %914 = vmatpush1.bf16.msra.mxu0 %v1047_v0  ;;  %965 = vmatpush1.bf16.msra.mxu1 %v1049_v1  ;;  %v84_v0 = vld [vmem:[%s1672_s1 + $0x230] sm:$0xff]  ;;  %v81_v1 = vld [vmem:[%s1672_s1 + $0x218] sm:$0xff] }
  0x5f   :  { %915 = vmatprep.subr.bf16.mxu0 %v1040_v2  ;;  %966 = vmatprep.subr.bf16.mxu1 %v1042_v3  ;;  %v85_v2 = vld [vmem:[%s1672_s1 + $0x238] sm:$0xff]  ;;  %v1111_v3 = vcombine.low %v88_v54, %v92_v55  ;;  %v1104_v5 = vcombine.high %v80_v63, %v84_v0  ;;  %v1103_v8 = vcombine.low %v80_v63, %v84_v0 }
  0x60   :  { %v1106_v6 = vcombine.high %v81_v1, %v85_v2 }
  0x62   :  { %916 = vmatpush1.bf16.msra.mxu0 %v1039_v9  ;;  %967 = vmatpush1.bf16.msra.mxu1 %v1041_v10  ;;  %v1105_v9 = vcombine.low %v81_v1, %v85_v2 }
  0x63   :  { %917 = vmatprep.subr.bf16.mxu0 %v1160_v11  ;;  %968 = vmatprep.subr.bf16.mxu1 %v1162_v12 }
  0x66   :  { %918 = vmatpush2.bf16.msra.mxu0 %v1159_v17  ;;  %969 = vmatpush2.bf16.msra.mxu1 %v1161_v18 }
  0x67   :  { %919 = vmatprep.subr.bf16.mxu0 %v1152_v19  ;;  %970 = vmatprep.subr.bf16.mxu1 %v1154_v21 }
  0x6a   :  { %920 = vmatpush2.bf16.msra.mxu0 %v1151_v26  ;;  %971 = vmatpush2.bf16.msra.mxu1 %v1153_v27 }
  0x6b   :  { %921 = vmatprep.subr.bf16.mxu0 %v1144_v28  ;;  %972 = vmatprep.subr.bf16.mxu1 %v1146_v29 }
  0x6e   :  { %922 = vmatpush2.bf16.msra.mxu0 %v1143_v35  ;;  %973 = vmatpush2.bf16.msra.mxu1 %v1145_v36 }
  0x6f   :  { %923 = vmatprep.subr.bf16.mxu0 %v1136_v37  ;;  %974 = vmatprep.subr.bf16.mxu1 %v1138_v38 }
  0x72   :  { %924 = vmatpush2.bf16.msra.mxu0 %v1135_v43  ;;  %975 = vmatpush2.bf16.msra.mxu1 %v1137_v44 }
  0x73   :  { %925 = vmatprep.subr.bf16.mxu0 %v1128_v45  ;;  %976 = vmatprep.subr.bf16.mxu1 %v1130_v46 }
  0x76   :  { %926 = vmatpush2.bf16.msra.mxu0 %v1127_v51  ;;  %977 = vmatpush2.bf16.msra.mxu1 %v1129_v52 }
  0x77   :  { %927 = vmatprep.subr.bf16.mxu0 %v1120_v53  ;;  %978 = vmatprep.subr.bf16.mxu1 %v1122_v56 }
  0x7a   :  { %928 = vmatpush2.bf16.msra.mxu0 %v1119_v59  ;;  %979 = vmatpush2.bf16.msra.mxu1 %v1121_v60 }
  0x7b   :  { %929 = vmatprep.subr.bf16.mxu0 %v1112_v61  ;;  %980 = vmatprep.subr.bf16.mxu1 %v1114_v62 }
  0x7e   :  { %930 = vmatpush2.bf16.msra.mxu0 %v1111_v3  ;;  %981 = vmatpush2.bf16.msra.mxu1 %v1113_v4 }
  0x7f   :  { %931 = vmatprep.subr.bf16.mxu0 %v1104_v5  ;;  %982 = vmatprep.subr.bf16.mxu1 %v1106_v6 }
  0x82   :  { %932 = vmatpush2.bf16.msra.mxu0 %v1103_v8  ;;  %983 = vmatpush2.bf16.msra.mxu1 %v1105_v9 }
  0x85   :  { %934 = vmatmul.mubr.bf16.vlgmr.msra.gmra.mxu0 %v1397_v7  ;;  %985 = vmatmul.mubr.bf16.vlgmr.msra.gmra.mxu1 %v1397_v7 }
  0x86   :  { %943 = vmatprep.mubr.bf16.mxu0 %v1420_v20  ;;  %994 = vmatprep.mubr.bf16.mxu1 %v1420_v20 }
  0x8d   :  { %944 = vmatmul.mubr.bf16.gmra.mxu0 %v1444_v31  ;;  %995 = vmatmul.mubr.bf16.gmra.mxu1 %v1444_v31 }
 0x105   :  { %v833_v10 = vpop.f32.mrf.mxu0  ;;  %v884_v11 = vpop.f32.mrf.mxu1 }
 0x106   :  { %1003 = vst [vmem:[%s1674_s2] sm:$0xff] %v833_v10  ;;  %1005 = vst [vmem:[%s1674_s2 + $0x10] sm:$0xff] %v884_v11 }
 0x107   :  { %v835_v12 = vpop.f32.mrf.mxu0  ;;  %v886_v7 = vpop.f32.mrf.mxu1 }
 0x108   :  { %1004 = vst [vmem:[%s1674_s2 + $0x8] sm:$0xff] %v835_v12  ;;  %1006 = vst [vmem:[%s1674_s2 + $0x18] sm:$0xff] %v886_v7 }
 0x109   :  { %v837_v20 = vpop.f32.mrf.mxu0  ;;  %v888_v31 = vpop.f32.mrf.mxu1 }
 0x10a   :  { %1011 = vst [vmem:[%s1674_s2 + $0x40] sm:$0xff] %v837_v20  ;;  %1013 = vst [vmem:[%s1674_s2 + $0x50] sm:$0xff] %v888_v31 }
 0x10b   :  { %v839_v13 = vpop.f32.mrf.mxu0  ;;  %v890_v14 = vpop.f32.mrf.mxu1 }
 0x10c   :  { %1012 = vst [vmem:[%s1674_s2 + $0x48] sm:$0xff] %v839_v13  ;;  %1014 = vst [vmem:[%s1674_s2 + $0x58] sm:$0xff] %v890_v14 }
 0x10d   :  { %v843_v15 = vpop.f32.mrf.mxu0  ;;  %v894_v16 = vpop.f32.mrf.mxu1 }
 0x10e   :  { %1019 = vst [vmem:[%s1674_s2 + $0x80] sm:$0xff] %v843_v15  ;;  %1021 = vst [vmem:[%s1674_s2 + $0x90] sm:$0xff] %v894_v16 }
 0x10f   :  { %v845_v17 = vpop.f32.mrf.mxu0  ;;  %v896_v18 = vpop.f32.mrf.mxu1 }
 0x110   :  { %1020 = vst [vmem:[%s1674_s2 + $0x88] sm:$0xff] %v845_v17  ;;  %1022 = vst [vmem:[%s1674_s2 + $0x98] sm:$0xff] %v896_v18 }
 0x111   :  { %v847_v19 = vpop.f32.mrf.mxu0  ;;  %v898_v21 = vpop.f32.mrf.mxu1 }
 0x113   :  { %v848_v22 = vpop.f32.mrf.mxu0  ;;  %v899_v23 = vpop.f32.mrf.mxu1 }
 0x145   :  { %v935_v24 = vpop.f32.mrf.mxu0  ;;  %v986_v25 = vpop.f32.mrf.mxu1 }
 0x146   :  { %1007 = vst [vmem:[%s1674_s2 + $0x20] sm:$0xff] %v935_v24  ;;  %1009 = vst [vmem:[%s1674_s2 + $0x30] sm:$0xff] %v986_v25 }
 0x147   :  { %v937_v26 = vpop.f32.mrf.mxu0  ;;  %v988_v27 = vpop.f32.mrf.mxu1 }
 0x148   :  { %1008 = vst [vmem:[%s1674_s2 + $0x28] sm:$0xff] %v937_v26  ;;  %1010 = vst [vmem:[%s1674_s2 + $0x38] sm:$0xff] %v988_v27 }
 0x149   :  { %v939_v28 = vpop.f32.mrf.mxu0  ;;  %v990_v29 = vpop.f32.mrf.mxu1 }
 0x14a   :  { %1015 = vst [vmem:[%s1674_s2 + $0x60] sm:$0xff] %v939_v28  ;;  %1017 = vst [vmem:[%s1674_s2 + $0x70] sm:$0xff] %v990_v29 }
 0x14b   :  { %v941_v30 = vpop.f32.mrf.mxu0  ;;  %v992_v32 = vpop.f32.mrf.mxu1 }
 0x14c   :  { %1016 = vst [vmem:[%s1674_s2 + $0x68] sm:$0xff] %v941_v30  ;;  %1018 = vst [vmem:[%s1674_s2 + $0x78] sm:$0xff] %v992_v32 }
 0x14d   :  { %v945_v33 = vpop.f32.mrf.mxu0  ;;  %v996_v34 = vpop.f32.mrf.mxu1 }
 0x14e   :  { %1023 = vst [vmem:[%s1674_s2 + $0xa0] sm:$0xff] %v945_v33  ;;  %1025 = vst [vmem:[%s1674_s2 + $0xb0] sm:$0xff] %v996_v34 }
 0x14f   :  { %v947_v35 = vpop.f32.mrf.mxu0  ;;  %v998_v36 = vpop.f32.mrf.mxu1 }
 0x150   :  { %1024 = vst [vmem:[%s1674_s2 + $0xa8] sm:$0xff] %v947_v35  ;;  %1026 = vst [vmem:[%s1674_s2 + $0xb8] sm:$0xff] %v998_v36 }
 0x151   :  { %v949_v37 = vpop.f32.mrf.mxu0  ;;  %v1000_v38 = vpop.f32.mrf.mxu1 }
 0x153   :  { %v950_v39 = vpop.f32.mrf.mxu0  ;;  %v1001_v40 = vpop.f32.mrf.mxu1 }

// kernel: run.17
= control target key start
LH: loop header
LB: loop body
LE: loop exit
PB: predicated region body
PF: predicated region fallthrough
CT: control target
= control target key end

     0   :  { %s1071_s12 = smov 0   ;;  %s1588_s0 = inlined_call_operand.vmem [shape: f32[2,3,14,512], index: 0, kind: input, shape index: {}]   ;;  %s1589_s1 = inlined_call_operand.vmem [shape: f32[9,512], index: 1, kind: input, shape index: {}]   ;;  %s1590_s2 = inlined_call_operand.vmem [shape: f32[1,512], index: 2, kind: input, shape index: {}]   ;;  %s1591_s3 = inlined_call_operand.vmem [shape: f32[2,1,12,512], index: 3, kind: output, shape index: {}]  }
   0x1 LB: > { %s927_s13 = sadd.s32 4294967295, %s1049_s12   ;;  %p931_p0 = scmp.ge.s32.totalorder %s1049_s12, 1  ;;  %s1049_s12 = sphi %s1071_s12, %s13_s12  }
   0x2   : > { %p137_p1 = scmp.lt.s32.totalorder %s1049_s12, 3 }
   0x4   : > { %p138_p2 = pnand %p931_p0, %p137_p1 }
   0x6   : > { %141 = sbr.rel (%p138_p2) target bundleno = 135 (0x87), region = 32 }
   0xb   : > { %p161_p3 = scmp.lt.s32.totalorder %s927_s13, 1  ;;  %v201_v0 = vlaneseq  ;;  %v1082_v1 = vld [vmem:[%s1589_s1] ss:$8 sm:$0xf]  ;;  %vm282_vm0 = vcmask 1046528   ;;  %vm356_vm1 = vcmask 1045504  }
   0xc   : > { %v1087_v2 = vld [vmem:[%s1589_s1 + $0x1] ss:$8 sm:$0xf]  ;;  %v1094_v3 = vld [vmem:[%s1589_s1 + $0x2] ss:$8 sm:$0xf] }
   0xd   : > { %s1643_s13 = smov (!%p161_p3, %s927_s13), 1  ;;  %v1096_v4 = vshrl.u32 %v201_v0, 7  ;;  %v1101_v5 = vld [vmem:[%s1589_s1 + $0x3] ss:$8 sm:$0xf] }
   0xe   : > { %v1106_v6 = vld [vmem:[%s1589_s1 + $0x4] ss:$8 sm:$0xf]  ;;  %s1002_s24 = smul.u32 192, %s1643_s13  ;;  %v1199_v57 = vld [vmem:[%s1590_s2] sm:$0xf] }
   0xf   : > { %v1112_v7 = vld [vmem:[%s1589_s1 + $0x5] ss:$8 sm:$0xf]  ;;  %v1115_v8 = vsub.s32 0, %v1096_v4  ;;  %s1001_s11 = sshll.u32 %s1643_s13, 6 }
  0x10   : > { %v1120_v9 = vld [vmem:[%s1589_s1 + $0x6] ss:$8 sm:$0xf]  ;;  %s1125_s4 = scalar_lea.vmem %s1588_s0, %s1002_s24  ;;  %v1130_v10 = vld [vmem:[%s1589_s1 + $0x7] ss:$8 sm:$0xf]  ;;  %s1499_s15 = scalar_lea.vmem %s1591_s3, %s1001_s11 }
  0x11   : > { %v1135_v11 = vld [vmem:[%s1589_s1 + $0x20] ss:$8 sm:$0xf]  ;;  %v1139_v12 = vrot.slane %v1082_v1, %v1115_v8  ;;  %v249_v13 = vrot.slane %v1087_v2, %v1115_v8  ;;  %v323_v14 = vrot.slane %v1094_v3, %v1115_v8  ;;  %v237_v16 = vld [vmem:[%s1125_s4] sm:$0xfe]  ;;  %v1150_v18 = vrot.slane %v1101_v5, %v1115_v8 }
  0x12   : > { %v192_v15 = vld [vmem:[%s1125_s4] sm:$0xff]  ;;  %v446_v19 = vrot.slane %v1106_v6, %v1115_v8  ;;  %v519_v20 = vrot.slane %v1112_v7, %v1115_v8  ;;  %v1164_v27 = vrot.slane %v1120_v9, %v1115_v8  ;;  %v641_v33 = vrot.slane %v1130_v10, %v1115_v8 }
  0x13   : > { %v241_v17 = vld [vmem:[%s1125_s4 + $0x20] sm:$0x1f]  ;;  %v221_v21 = vmul.f32 %v1139_v12, %v192_v15  ;;  %v266_v22 = vmul.f32 %v249_v13, %v237_v16  ;;  %v714_v34 = vrot.slane %v1135_v11, %v1115_v8  ;;  %v1211_v16 = vsub.s32 1, %v1096_v4 }
  0x14   : > { %v1157_v23 = vmul.f32 %v249_v13, %v241_v17  ;;  %v311_v24 = vld [vmem:[%s1125_s4] sm:$0xfc]  ;;  %v238_v17 = vld [vmem:[%s1125_s4 + $0x8] sm:$0xfe] }
  0x15   : > { %v315_v25 = vld [vmem:[%s1125_s4 + $0x20] sm:$0x3f]  ;;  %v340_v28 = vmul.f32 %v323_v14, %v311_v24  ;;  %v283_v35 = vrot.slane %v266_v22, 1  ;;  %v1220_v22 = vrot.slane %v1199_v57, %v1115_v8  ;;  %v193_v24 = vld [vmem:[%s1125_s4 + $0x8] sm:$0xff] }
  0x16   : > { %v943_v26 = vld [vmem:[%s1125_s4 + $0x40] sm:$0xff]  ;;  %v1166_v29 = vmul.f32 %v323_v14, %v315_v25  ;;  %v1606_v36 = vrot.slane %v1157_v23, 1  ;;  %v242_v25 = vld [vmem:[%s1125_s4 + $0x28] sm:$0x1f] }
  0x17   : > { %v951_v30 = vld [vmem:[%s1125_s4 + $0x40] sm:$0xfe]  ;;  %v357_v41 = vrot.slane %v340_v28, 2  ;;  %v418_v48 = vmul.f32 %v943_v26, %v1150_v18  ;;  %v312_v26 = vld [vmem:[%s1125_s4 + $0x8] sm:$0xfc] }
  0x18   : > { %v955_v31 = vld [vmem:[%s1125_s4 + $0x60] sm:$0x1f]  ;;  %v463_v37 = vmul.f32 %v951_v30, %v446_v19  ;;  %v1604_v42 = vrot.slane %v1166_v29, 2  ;;  %v285_v47 = vsel %vm282_vm0, %v283_v35, %v1606_v36  ;;  %v1230_v30 = vrot.slane %v1082_v1, %v1211_v16  ;;  %v944_v8 = vld [vmem:[%s1125_s4 + $0x48] sm:$0xff] }
  0x19   : > { %v959_v32 = vld [vmem:[%s1125_s4 + $0x40] sm:$0xfc]  ;;  %v1176_v38 = vmul.f32 %v955_v31, %v446_v19  ;;  %v303_v53 = vadd.f32 %v285_v47, %v221_v21  ;;  %v253_v31 = vrot.slane %v1087_v2, %v1211_v16 }
  0x1a   : > { %v963_v39 = vld [vmem:[%s1125_s4 + $0x60] sm:$0x3f]  ;;  %v536_v43 = vmul.f32 %v959_v32, %v519_v20  ;;  %v479_v49 = vrot.slane %v463_v37, 1  ;;  %v359_v54 = vsel %vm356_vm1, %v357_v41, %v1604_v42  ;;  %v316_v32 = vld [vmem:[%s1125_s4 + $0x28] sm:$0x3f]  ;;  %v450_v41 = vrot.slane %v1106_v6, %v1211_v16 }
  0x1b   : > { %v967_v40 = vld [vmem:[%s1125_s4 + $0x80] sm:$0xff]  ;;  %v1181_v44 = vmul.f32 %v963_v39, %v519_v20  ;;  %v1598_v50 = vrot.slane %v1176_v38, 1  ;;  %v377_v61 = vadd.f32 %v359_v54, %v303_v53  ;;  %v1244_v39 = vrot.slane %v1101_v5, %v1211_v16  ;;  %v960_v53 = vld [vmem:[%s1125_s4 + $0x48] sm:$0xfc] }
  0x1c   : > { %v975_v45 = vld [vmem:[%s1125_s4 + $0x80] sm:$0xfe]  ;;  %v552_v55 = vrot.slane %v536_v43, 2  ;;  %v613_v63 = vmul.f32 %v967_v40, %v1164_v27  ;;  %v956_v40 = vld [vmem:[%s1125_s4 + $0x68] sm:$0x1f]  ;;  %v222_v43 = vmul.f32 %v1230_v30, %v193_v24 }
  0x1d   : > { %v979_v46 = vld [vmem:[%s1125_s4 + $0xa0] sm:$0x1f]  ;;  %v1597_v56 = vrot.slane %v1181_v44, 2  ;;  %v658_v58 = vmul.f32 %v975_v45, %v641_v33  ;;  %v481_v62 = vsel %vm282_vm0, %v479_v49, %v1598_v50  ;;  %v426_v19 = vadd.f32 %v418_v48, %v377_v61  ;;  %v964_v61 = vld [vmem:[%s1125_s4 + $0x68] sm:$0x3f] }
  0x1e   : > { %v983_v51 = vld [vmem:[%s1125_s4 + $0x80] sm:$0xfc]  ;;  %v1201_v59 = vmul.f32 %v979_v46, %v641_v33  ;;  %v327_v33 = vrot.slane %v1094_v3, %v1211_v16  ;;  %v267_v45 = vmul.f32 %v253_v31, %v238_v17  ;;  %v1250_v46 = vmul.f32 %v253_v31, %v242_v25  ;;  %v965_v50 = vld [vmem:[%s1125_s4 + $0x70] sm:$0x3f] }
  0x1f   : > { %v987_v52 = vld [vmem:[%s1125_s4 + $0xa0] sm:$0x3f]  ;;  %v731_v60 = vmul.f32 %v983_v51, %v714_v34  ;;  %v674_v13 = vrot.slane %v658_v58, 1  ;;  %v554_v20 = vsel %vm356_vm1, %v552_v55, %v1597_v56  ;;  %v499_v35 = vadd.f32 %v481_v62, %v426_v19  ;;  %v968_v19 = vld [vmem:[%s1125_s4 + $0x88] sm:$0xff] }
  0x20   : > { %v1207_v0 = vmul.f32 %v987_v52, %v714_v34  ;;  %v1594_v14 = vrot.slane %v1201_v59, 1  ;;  %v952_v34 = vld [vmem:[%s1125_s4 + $0x48] sm:$0xfe]  ;;  %v341_v47 = vmul.f32 %v327_v33, %v312_v26  ;;  %v1252_v49 = vmul.f32 %v327_v33, %v316_v32 }
  0x21   : > { %v747_v15 = vrot.slane %v731_v60, 2  ;;  %v572_v48 = vadd.f32 %v554_v20, %v499_v35  ;;  %v419_v51 = vmul.f32 %v944_v8, %v1244_v39  ;;  %v464_v52 = vmul.f32 %v952_v34, %v450_v41  ;;  %v976_v20 = vld [vmem:[%s1125_s4 + $0x88] sm:$0xfe] }
  0x22   : > { %v1593_v21 = vrot.slane %v1207_v0, 2  ;;  %v676_v28 = vsel %vm282_vm0, %v674_v13, %v1594_v14  ;;  %v286_v54 = vrot.slane %v267_v45, 1  ;;  %v1603_v55 = vrot.slane %v1250_v46, 1 }
  0x23   : > { %v360_v58 = vrot.slane %v341_v47, 2  ;;  %v1257_v60 = vmul.f32 %v956_v40, %v450_v41  ;;  %v621_v62 = vadd.f32 %v613_v63, %v572_v48  ;;  %v1599_v13 = vrot.slane %v1252_v49, 2  ;;  %v980_v63 = vld [vmem:[%s1125_s4 + $0xa8] sm:$0x1f] }
  0x24   : > { %v749_v37 = vsel %vm356_vm1, %v747_v15, %v1593_v21  ;;  %v482_v15 = vrot.slane %v464_v52, 1  ;;  %v523_v17 = vrot.slane %v1112_v7, %v1211_v16  ;;  %v288_v24 = vsel %vm282_vm0, %v286_v54, %v1603_v55  ;;  %v988_v54 = vld [vmem:[%s1125_s4 + $0xa8] sm:$0x3f] }
  0x25   : > { %v1596_v25 = vrot.slane %v1257_v60, 1  ;;  %v1271_v26 = vrot.slane %v1120_v9, %v1211_v16  ;;  %v645_v31 = vrot.slane %v1130_v10, %v1211_v16  ;;  %v694_v32 = vadd.f32 %v676_v28, %v621_v62 }
  0x26   : > { %v304_v33 = vadd.f32 %v288_v24, %v222_v43  ;;  %v362_v8 = vsel %vm356_vm1, %v360_v58, %v1599_v13  ;;  %v537_v34 = vmul.f32 %v960_v53, %v523_v17  ;;  %v1282_v40 = vmul.f32 %v964_v61, %v523_v17  ;;  %v984_v43 = vld [vmem:[%s1125_s4 + $0x88] sm:$0xfc] }
  0x27   : > { %v484_v35 = vsel %vm282_vm0, %v482_v15, %v1596_v25  ;;  %v614_v41 = vmul.f32 %v968_v19, %v1271_v26  ;;  %v659_v45 = vmul.f32 %v976_v20, %v645_v31  ;;  %v767_v47 = vadd.f32 %v749_v37, %v694_v32  ;;  %v957_v25 = vld [vmem:[%s1125_s4 + $0x70] sm:$0x1f] }
  0x28   : > { %v378_v48 = vadd.f32 %v362_v8, %v304_v33  ;;  %v555_v52 = vrot.slane %v537_v34, 2  ;;  %v1285_v28 = vmul.f32 %v980_v63, %v645_v31  ;;  %v1595_v53 = vrot.slane %v1282_v40, 2  ;;  %v239_v31 = vld [vmem:[%s1125_s4 + $0x10] sm:$0xfe] }
  0x29   : > { %v677_v58 = vrot.slane %v659_v45, 1  ;;  %v718_v62 = vrot.slane %v1135_v11, %v1211_v16  ;;  %v1294_v61 = vrot.slane %v1199_v57, %v1211_v16  ;;  %v1297_v37 = vadd.f32 %v1220_v22, %v767_v47  ;;  %v194_v16 = vld [vmem:[%s1125_s4 + $0x10] sm:$0xff] }
  0x2a   : > { %v427_v15 = vadd.f32 %v419_v51, %v378_v48  ;;  %v1592_v17 = vrot.slane %v1285_v28, 1  ;;  %v1301_v19 = vsub.s32 2, %v1096_v4  ;;  %v557_v20 = vsel %vm356_vm1, %v555_v52, %v1595_v53  ;;  %v243_v45 = vld [vmem:[%s1125_s4 + $0x30] sm:$0x1f] }
  0x2b   : > { %1616 = vst [vmem:[#allocation2_spill] sm:$0xff] %v1294_v61  ;;  %v732_v24 = vmul.f32 %v984_v43, %v718_v62  ;;  %v1306_v63 = vmul.f32 %v988_v54, %v718_v62  ;;  %v1311_v32 = vsub.s32 3, %v1096_v4  ;;  %v991_v51 = vmul.f32 -1.442695, %v1297_v37  ;;  %v313_v47 = vld [vmem:[%s1125_s4 + $0x10] sm:$0xfc] }
  0x2c   : > { %v500_v33 = vadd.f32 %v484_v35, %v427_v15  ;;  %v679_v8 = vsel %vm282_vm0, %v677_v58, %v1592_v17  ;;  %v1319_v34 = vrot.slane %v1082_v1, %v1301_v19  ;;  %v257_v4 = vrot.slane %v1087_v2, %v1301_v19  ;;  %v317_v43 = vld [vmem:[%s1125_s4 + $0x30] sm:$0x3f] }
  0x2d   : > { %v750_v48 = vrot.slane %v732_v24, 2  ;;  %v1600_v52 = vrot.slane %v1306_v63, 2  ;;  %v331_v35 = vrot.slane %v1094_v3, %v1301_v19  ;;  %v945_v54 = vld [vmem:[%s1125_s4 + $0x50] sm:$0xff]  ;;  %1011 = vpow2.f32 %v991_v51 }
  0x2e   : > { %v573_v58 = vadd.f32 %v557_v20, %v500_v33  ;;  %v223_v62 = vmul.f32 %v1319_v34, %v194_v16  ;;  %v1333_v15 = vrot.slane %v1101_v5, %v1301_v19  ;;  %v268_v17 = vmul.f32 %v257_v4, %v239_v31  ;;  %v953_v53 = vld [vmem:[%s1125_s4 + $0x50] sm:$0xfe] }
  0x2f   : > { %v752_v24 = vsel %vm356_vm1, %v750_v48, %v1600_v52  ;;  %v1338_v21 = vmul.f32 %v257_v4, %v243_v45  ;;  %v342_v14 = vmul.f32 %v331_v35, %v313_v47  ;;  %v1342_v51 = vmul.f32 %v331_v35, %v317_v43  ;;  %v961_v33 = vld [vmem:[%s1125_s4 + $0x50] sm:$0xfc] }
  0x30   : > { %v622_v56 = vadd.f32 %v614_v41, %v573_v58  ;;  %v420_v20 = vmul.f32 %v945_v54, %v1333_v15  ;;  %v454_v16 = vrot.slane %v1106_v6, %v1301_v19  ;;  %v289_v13 = vrot.slane %v268_v17, 1  ;;  %v969_v35 = vld [vmem:[%s1125_s4 + $0x90] sm:$0xff] }
  0x31   : > { %v1601_v48 = vrot.slane %v1338_v21, 1  ;;  %v363_v31 = vrot.slane %v342_v14, 2  ;;  %v527_v45 = vrot.slane %v1112_v7, %v1301_v19  ;;  %v1602_v41 = vrot.slane %v1342_v51, 2  ;;  %v981_v52 = vld [vmem:[%s1125_s4 + $0xb0] sm:$0x1f] }
  0x32   : > { %v695_v47 = vadd.f32 %v679_v8, %v622_v56  ;;  %v465_v4 = vmul.f32 %v953_v53, %v454_v16  ;;  %v1353_v43 = vmul.f32 %v957_v25, %v454_v16  ;;  %v1363_v14 = vrot.slane %v1120_v9, %v1301_v19  ;;  %v977_v16 = vld [vmem:[%s1125_s4 + $0x90] sm:$0xfe] }
  0x33   : > { %v291_v54 = vsel %vm282_vm0, %v289_v13, %v1601_v48  ;;  %v538_v17 = vmul.f32 %v961_v33, %v527_v45  ;;  %v1359_v58 = vmul.f32 %v965_v50, %v527_v45  ;;  %v365_v25 = vsel %vm356_vm1, %v363_v31, %v1602_v41  ;;  %v985_v31 = vld [vmem:[%s1125_s4 + $0x90] sm:$0xfc] }
  0x34   : > { %v768_v56 = vadd.f32 %v752_v24, %v695_v47  ;;  %v305_v53 = vadd.f32 %v291_v54, %v223_v62  ;;  %v485_v8 = vrot.slane %v465_v4, 1  ;;  %v1605_v13 = vrot.slane %v1353_v43, 1  ;;  %v989_v47 = vld [vmem:[%s1125_s4 + $0xb0] sm:$0x3f]  ;;  %v195_v54 = vld [vmem:[%s1125_s4 + $0x18] sm:$0xff] }
  0x35   : > { %v558_v33 = vrot.slane %v538_v17, 2  ;;  %v1607_v50 = vrot.slane %v1359_v58, 2  ;;  %v615_v45 = vmul.f32 %v969_v35, %v1363_v14  ;;  %v649_v24 = vrot.slane %v1130_v10, %v1301_v19 }
  0x36   : > { %v1374_v48 = vadd.f32 %v1294_v61, %v768_v56  ;;  %v379_v62 = vadd.f32 %v365_v25, %v305_v53  ;;  %v722_v4 = vrot.slane %v1135_v11, %v1301_v19  ;;  %v487_v35 = vsel %vm282_vm0, %v485_v8, %v1605_v13  ;;  %v240_v8 = vld [vmem:[%s1125_s4 + $0x18] sm:$0xfe] }
  0x37   : > { %v560_v17 = vsel %vm356_vm1, %v558_v33, %v1607_v50  ;;  %v1391_v56 = vrot.slane %v1199_v57, %v1301_v19  ;;  %v1395_v53 = vrot.slane %v1082_v1, %v1311_v32  ;;  %v660_v55 = vmul.f32 %v977_v16, %v649_v24  ;;  %v244_v13 = vld [vmem:[%s1125_s4 + $0x38] sm:$0x1f] }
  0x38   : > { %v992_v25 = vmul.f32 -1.442695, %v1374_v48  ;;  %v428_v41 = vadd.f32 %v420_v20, %v379_v62  ;;  %v1398_v42 = vmul.f32 %v981_v52, %v649_v24  ;;  %v733_v36 = vmul.f32 %v985_v31, %v722_v4 }
  0x39   : > { %v1402_v33 = vmul.f32 %v989_v47, %v722_v4  ;;  %v224_v19 = vmul.f32 %v1395_v53, %v195_v54  ;;  %v261_v50 = vrot.slane %v1087_v2, %v1311_v32  ;;  %v680_v61 = vrot.slane %v660_v55, 1  ;;  %v314_v47 = vld [vmem:[%s1125_s4 + $0x18] sm:$0xfc] }
  0x3a   : > { %1013 = vpow2.f32 %v992_v25  ;;  %v501_v1 = vadd.f32 %v487_v35, %v428_v41  ;;  %v1609_v20 = vrot.slane %v1398_v42, 1  ;;  %v1012_v52 = vpop.eup %1011  ;;  %v753_v16 = vrot.slane %v733_v36, 2  ;;  %v318_v4 = vld [vmem:[%s1125_s4 + $0x38] sm:$0x3f] }
  0x3b   : > { %1617 = vst [vmem:[#allocation3_spill] sm:$0xff] %v1402_v33  ;;  %v1610_v62 = vrot.slane %v1402_v33, 2  ;;  %v269_v24 = vmul.f32 %v261_v50, %v240_v8  ;;  %v1409_v31 = vmul.f32 %v261_v50, %v244_v13  ;;  %v828_v54 = vadd.f32 1.0, %v1012_v52  ;;  %v946_v36 = vld [vmem:[%s1125_s4 + $0x58] sm:$0xff] }
  0x3c   : > { %v574_v2 = vadd.f32 %v560_v17, %v501_v1  ;;  %v682_v55 = vsel %vm282_vm0, %v680_v61, %v1609_v20  ;;  %v335_v41 = vrot.slane %v1094_v3, %v1311_v32  ;;  %v1425_v25 = vrot.slane %v1101_v5, %v1311_v32  ;;  %v954_v17 = vld [vmem:[%s1125_s4 + $0x58] sm:$0xfe] }
  0x3d   : > { %v755_v13 = vsel %vm356_vm1, %v753_v16, %v1610_v62  ;;  %v292_v50 = vrot.slane %v269_v24, 1  ;;  %v1612_v35 = vrot.slane %v1409_v31, 1  ;;  %1015 = vrcp.f32 %v828_v54  ;;  %v958_v3 = vld [vmem:[%s1125_s4 + $0x78] sm:$0x1f] }
  0x3e   : > { %v623_v8 = vadd.f32 %v615_v45, %v574_v2  ;;  %v343_v1 = vmul.f32 %v335_v41, %v314_v47  ;;  %v1428_v61 = vmul.f32 %v335_v41, %v318_v4  ;;  %v962_v52 = vld [vmem:[%s1125_s4 + $0x58] sm:$0xfc]  ;;  %v421_v24 = vmul.f32 %v946_v36, %v1425_v25 }
  0x3f   : > { %v966_v20 = vld [vmem:[%s1125_s4 + $0x78] sm:$0x3f]  ;;  %v294_v16 = vsel %vm282_vm0, %v292_v50, %v1612_v35  ;;  %v458_v5 = vrot.slane %v1106_v6, %v1311_v32  ;;  %v531_v45 = vrot.slane %v1112_v7, %v1311_v32  ;;  %v1452_v7 = vrot.slane %v1120_v9, %v1311_v32 }
  0x40   : > { %v696_v47 = vadd.f32 %v682_v55, %v623_v8  ;;  %v306_v4 = vadd.f32 %v294_v16, %v224_v19  ;;  %v366_v54 = vrot.slane %v343_v1, 2  ;;  %v1614_v2 = vrot.slane %v1428_v61, 2  ;;  %v978_v36 = vld [vmem:[%s1125_s4 + $0x98] sm:$0xfe] }
  0x41   : > { %v466_v41 = vmul.f32 %v954_v17, %v458_v5  ;;  %v1442_v62 = vmul.f32 %v958_v3, %v458_v5  ;;  %v539_v33 = vmul.f32 %v962_v52, %v531_v45  ;;  %v1444_v50 = vmul.f32 %v966_v20, %v531_v45  ;;  %v982_v19 = vld [vmem:[%s1125_s4 + $0xb8] sm:$0x1f] }
  0x42   : > { %v769_v35 = vadd.f32 %v755_v13, %v696_v47  ;;  %v368_v6 = vsel %vm356_vm1, %v366_v54, %v1614_v2  ;;  %v653_v55 = vrot.slane %v1130_v10, %v1311_v32  ;;  %v970_v13 = vld [vmem:[%s1125_s4 + $0x98] sm:$0xff] }
  0x43   : > { %v380_v17 = vadd.f32 %v368_v6, %v306_v4  ;;  %v488_v8 = vrot.slane %v466_v41, 1  ;;  %v1613_v20 = vrot.slane %v1442_v62, 1  ;;  %v561_v1 = vrot.slane %v539_v33, 2  ;;  %v986_v9 = vld [vmem:[%s1125_s4 + $0x98] sm:$0xfc] }
  0x44   : > { %v1460_v3 = vadd.f32 %v1391_v56, %v769_v35  ;;  %v1615_v52 = vrot.slane %v1444_v50, 2  ;;  %v661_v16 = vmul.f32 %v978_v36, %v653_v55  ;;  %v990_v5 = vld [vmem:[%s1125_s4 + $0xb8] sm:$0x3f]  ;;  %v1468_v47 = vmul.f32 %v982_v19, %v653_v55  ;;  %v196_v4 = vld [vmem:[%s1125_s4 + $0x20] sm:$0xf] }
  0x45   : > { %v429_v45 = vadd.f32 %v421_v24, %v380_v17  ;;  %v490_v10 = vsel %vm282_vm0, %v488_v8, %v1613_v20  ;;  %v726_v33 = vrot.slane %v1135_v11, %v1311_v32  ;;  %v616_v24 = vmul.f32 %v970_v13, %v1452_v7  ;;  %v947_v36 = vld [vmem:[%s1125_s4 + $0x60] sm:$0xf]  ;;  %v197_v11 = vld [vmem:[%s1125_s4 + $0x28] sm:$0xf] }
  0x46   : > { %v993_v35 = vmul.f32 -1.442695, %v1460_v3  ;;  %v563_v54 = vsel %vm356_vm1, %v561_v1, %v1615_v52  ;;  %v683_v41 = vrot.slane %v661_v16, 1  ;;  %v684_v19 = vrot.slane %v1468_v47, 1  ;;  %v948_v1 = vld [vmem:[%s1125_s4 + $0x68] sm:$0xf] }
  0x47   : > { %v1014_v6 = vpop.eup %1013  ;;  %v502_v17 = vadd.f32 %v490_v10, %v429_v45  ;;  %v734_v55 = vmul.f32 %v986_v9, %v726_v33  ;;  %v1480_v8 = vmul.f32 %v990_v5, %v726_v33  ;;  %v225_v2 = vmul.f32 %v1139_v12, %v196_v4  ;;  %v198_v10 = vld [vmem:[%s1125_s4 + $0x30] sm:$0xf]  ;;  %v199_v4 = vld [vmem:[%s1125_s4 + $0x38] sm:$0xf] }
  0x48   : > { %v829_v20 = vadd.f32 1.0, %v1014_v6  ;;  %1017 = vpow2.f32 %v993_v35  ;;  %v422_v45 = vmul.f32 %v947_v36, %v1150_v18  ;;  %v685_v9 = vsel %vm282_vm0, %v683_v41, %v684_v19 }
  0x49   : > { %v575_v13 = vadd.f32 %v563_v54, %v502_v17  ;;  %v756_v16 = vrot.slane %v734_v55, 2  ;;  %v757_v52 = vrot.slane %v1480_v8, 2  ;;  %v1618_v5 = vrot.slane %v1157_v23, 1  ;;  %v949_v23 = vld [vmem:[%s1125_s4 + $0x70] sm:$0xf] }
  0x4a   : > { %1019 = vrcp.f32 %v829_v20  ;;  %v226_v12 = vmul.f32 %v1230_v30, %v197_v11  ;;  %v1016_v35 = vpop.eup %1015  ;;  %v423_v54 = vmul.f32 %v948_v1, %v1244_v39  ;;  %v1619_v30 = vrot.slane %v1166_v29, 2  ;;  %v950_v55 = vld [vmem:[%s1125_s4 + $0x78] sm:$0xf] }
  0x4b   : > { %v307_v33 = vadd.f32 %v1618_v5, %v225_v2  ;;  %v624_v18 = vadd.f32 %v616_v24, %v575_v13  ;;  %v758_v20 = vsel %vm356_vm1, %v756_v16, %v757_v52  ;;  %v852_v2 = vmul.f32 %v1016_v35, %v1297_v37  ;;  %v971_v13 = vld [vmem:[%s1125_s4 + $0xa0] sm:$0xf] }
  0x4c   : > { %v1620_v36 = vrot.slane %v1250_v46, 1  ;;  %v227_v17 = vmul.f32 %v1319_v34, %v198_v10  ;;  %v791_v11 = vrot.slane %v1199_v57, %v1311_v32  ;;  %v228_v39 = vmul.f32 %v1395_v53, %v199_v4  ;;  %v972_v10 = vld [vmem:[%s1125_s4 + $0xa8] sm:$0xf] }
  0x4d   : > { %v381_v41 = vadd.f32 %v1619_v30, %v307_v33  ;;  %v697_v24 = vadd.f32 %v685_v9, %v624_v18  ;;  %862 = vst [vmem:[%s1499_s15] sm:$0xff] %v852_v2  ;;  %v1621_v37 = vrot.slane %v1252_v49, 2  ;;  %v1622_v29 = vrot.slane %v1338_v21, 1  ;;  %v973_v2 = vld [vmem:[%s1125_s4 + $0xb0] sm:$0xf] }
  0x4e   : > { %v308_v6 = vadd.f32 %v1620_v36, %v226_v12  ;;  %v424_v46 = vmul.f32 %v949_v23, %v1333_v15  ;;  %v1623_v9 = vrot.slane %v1409_v31, 1  ;;  %v425_v32 = vmul.f32 %v950_v55, %v1425_v25 }
  0x4f   : > { %v430_v1 = vadd.f32 %v422_v45, %v381_v41  ;;  %v309_v5 = vadd.f32 %v1622_v29, %v227_v17  ;;  %v770_v34 = vadd.f32 %v758_v20, %v697_v24  ;;  %v1624_v53 = vrot.slane %v1176_v38, 1 }
  0x50   : > { %v382_v16 = vadd.f32 %v1621_v37, %v308_v6  ;;  %v310_v57 = vadd.f32 %v1623_v9, %v228_v39  ;;  %v617_v49 = vmul.f32 %v971_v13, %v1164_v27  ;;  %v1625_v21 = vrot.slane %v1342_v51, 2  ;;  %v974_v27 = vld [vmem:[%s1125_s4 + $0xb8] sm:$0xf] }
  0x51   : > { %v503_v45 = vadd.f32 %v1624_v53, %v430_v1  ;;  %v1532_v4 = vadd.f32 %v791_v11, %v770_v34  ;;  %v1626_v15 = vrot.slane %v1428_v61, 2  ;;  %v1627_v18 = vrot.slane %v1181_v44, 2 }
  0x52   : > { %v431_v33 = vadd.f32 %v423_v54, %v382_v16  ;;  %v383_v12 = vadd.f32 %v1625_v21, %v309_v5  ;;  %v1628_v20 = vrot.slane %v1257_v60, 1  ;;  %v618_v38 = vmul.f32 %v972_v10, %v1271_v26 }
  0x53   : > { %v384_v35 = vadd.f32 %v1626_v15, %v310_v57  ;;  %v576_v31 = vadd.f32 %v1627_v18, %v503_v45  ;;  %v994_v54 = vmul.f32 -1.442695, %v1532_v4  ;;  %v1629_v41 = vrot.slane %v1282_v40, 2  ;;  %v1640_v45 = vld [vmem:[#allocation3_spill] sm:$0xff] }
  0x54   : > { %v504_v25 = vadd.f32 %v1628_v20, %v431_v33  ;;  %v432_v23 = vadd.f32 %v424_v46, %v383_v12  ;;  %v1630_v61 = vrot.slane %v1353_v43, 1  ;;  %v619_v60 = vmul.f32 %v973_v2, %v1363_v14 }
  0x55   : > { %v433_v51 = vadd.f32 %v425_v32, %v384_v35  ;;  %v625_v30 = vadd.f32 %v617_v49, %v576_v31  ;;  %v1018_v44 = vpop.eup %1017  ;;  %1021 = vpow2.f32 %v994_v54  ;;  %v1631_v26 = vrot.slane %v1442_v62, 1 }
  0x56   : > { %v577_v36 = vadd.f32 %v1629_v41, %v504_v25  ;;  %v505_v6 = vadd.f32 %v1630_v61, %v432_v23  ;;  %v620_v55 = vmul.f32 %v974_v27, %v1452_v7  ;;  %v830_v24 = vadd.f32 1.0, %v1018_v44 }
  0x57   : > { %v506_v17 = vadd.f32 %v1631_v26, %v433_v51  ;;  %v1632_v13 = vrot.slane %v1201_v59, 1  ;;  %v1633_v40 = vrot.slane %v1359_v58, 2  ;;  %v1020_v43 = vpop.eup %1019  ;;  %v1634_v16 = vrot.slane %v1444_v50, 2 }
  0x58   : > { %v626_v1 = vadd.f32 %v618_v38, %v577_v36  ;;  %v853_v5 = vmul.f32 %v1020_v43, %v1374_v48  ;;  %1023 = vrcp.f32 %v830_v24  ;;  %v1635_v14 = vrot.slane %v1207_v0, 2  ;;  %v1639_v0 = vld [vmem:[#allocation2_spill] sm:$0xff] }
  0x59   : > { %v698_v39 = vadd.f32 %v1632_v13, %v625_v30  ;;  %v578_v37 = vadd.f32 %v1633_v40, %v505_v6  ;;  %v579_v29 = vadd.f32 %v1634_v16, %v506_v17  ;;  %v1636_v7 = vrot.slane %v1285_v28, 1 }
  0x5a   : > { %863 = vst [vmem:[%s1499_s15 + $0x8] sm:$0xff] %v853_v5  ;;  %v1637_v58 = vrot.slane %v1306_v63, 2  ;;  %v1638_v50 = vrot.slane %v1398_v42, 1  ;;  %v1641_v28 = vrot.slane %v1640_v45, 2 }
  0x5b   : > { %v771_v62 = vadd.f32 %v1635_v14, %v698_v39  ;;  %v699_v46 = vadd.f32 %v1636_v7, %v626_v1  ;;  %v627_v34 = vadd.f32 %v619_v60, %v578_v37  ;;  %v628_v59 = vadd.f32 %v620_v55, %v579_v29 }
  0x5d   : > { %v800_v10 = vadd.f32 %v1220_v22, %v771_v62  ;;  %v772_v9 = vadd.f32 %v1637_v58, %v699_v46  ;;  %v700_v57 = vadd.f32 %v1638_v50, %v627_v34  ;;  %v701_v48 = vadd.f32 %v684_v19, %v628_v59 }
  0x5f   : > { %v995_v32 = vmul.f32 -1.442695, %v800_v10  ;;  %v801_v53 = vadd.f32 %v1639_v0, %v772_v9  ;;  %v773_v49 = vadd.f32 %v1641_v28, %v700_v57  ;;  %v774_v33 = vadd.f32 %v757_v52, %v701_v48 }
  0x61   : > { %1025 = vpow2.f32 %v995_v32  ;;  %v996_v22 = vmul.f32 -1.442695, %v801_v53  ;;  %v802_v63 = vadd.f32 %v1391_v56, %v773_v49  ;;  %v803_v21 = vadd.f32 %v791_v11, %v774_v33 }
  0x62   : > { %v1022_v47 = vpop.eup %1021 }
  0x63   : > { %1027 = vpow2.f32 %v996_v22  ;;  %v997_v42 = vmul.f32 -1.442695, %v802_v63  ;;  %v998_v12 = vmul.f32 -1.442695, %v803_v21  ;;  %v831_v19 = vadd.f32 1.0, %v1022_v47 }
  0x65   : > { %1029 = vpow2.f32 %v997_v42  ;;  %v1024_v15 = vpop.eup %1023 }
  0x66   : > { %1031 = vpow2.f32 %v998_v12  ;;  %v854_v35 = vmul.f32 %v1024_v15, %v1460_v3 }
  0x67   : > { %1033 = vrcp.f32 %v831_v19 }
  0x68   : > { %864 = vst [vmem:[%s1499_s15 + $0x10] sm:$0xff] %v854_v35 }
  0x6e   : > { %v1026_v8 = vpop.eup %1025 }
  0x6f   : > { %v832_v52 = vadd.f32 1.0, %v1026_v8 }
  0x70   : > { %v1028_v18 = vpop.eup %1027 }
  0x71   : > { %1035 = vrcp.f32 %v832_v52  ;;  %v833_v56 = vadd.f32 1.0, %v1028_v18 }
  0x72   : > { %v1030_v11 = vpop.eup %1029 }
  0x73   : > { %1037 = vrcp.f32 %v833_v56  ;;  %v1032_v31 = vpop.eup %1031  ;;  %v834_v20 = vadd.f32 1.0, %v1030_v11 }
  0x74   : > { %v1034_v25 = vpop.eup %1033  ;;  %v835_v38 = vadd.f32 1.0, %v1032_v31 }
  0x75   : > { %v855_v23 = vmul.f32 %v1034_v25, %v1532_v4  ;;  %1039 = vrcp.f32 %v834_v20 }
  0x76   : > { %1041 = vrcp.f32 %v835_v38 }
  0x77   : > { %865 = vst [vmem:[%s1499_s15 + $0x18] sm:$0xff] %v855_v23 }
  0x7e   : > { %v1036_v3 = vpop.eup %1035 }
  0x7f   : > { %v856_v2 = vmul.f32 %v1036_v3, %v800_v10 }
  0x80   : > { %v1038_v27 = vpop.eup %1037 }
  0x81   : > { %866 = vst [vmem:[%s1499_s15 + $0x20] sm:$0xf] %v856_v2  ;;  %v857_v54 = vmul.f32 %v1038_v27, %v801_v53 }
  0x82   : > { %v1040_v51 = vpop.eup %1039 }
  0x83   : > { %867 = vst [vmem:[%s1499_s15 + $0x28] sm:$0xf] %v857_v54  ;;  %v1042_v30 = vpop.eup %1041  ;;  %v858_v41 = vmul.f32 %v1040_v51, %v802_v63 }
  0x84   : > { %v859_v36 = vmul.f32 %v1042_v30, %v803_v21 }
  0x85   : > { %868 = vst [vmem:[%s1499_s15 + $0x30] sm:$0xf] %v858_v41 }
  0x86   : > { %869 = vst [vmem:[%s1499_s15 + $0x38] sm:$0xf] %v859_v36 }
  0x87 PF: > { %s13_s12 = sadd.s32 1, %s1049_s12  }
  0x88   : > { %p10_p4 = scmp.ge.s32.totalorder %s13_s12, 4  }
  0x8a   :  { %12 = sbr.rel (!%p10_p4) target bundleno = 1 (0x1), region = 74 }

// kernel: run.18
= control target key start
LH: loop header
LB: loop body
LE: loop exit
PB: predicated region body
PF: predicated region fallthrough
CT: control target
= control target key end

     0   :  { %s2230_s9 = smov 0   ;;  %s2232_s10 = smov 0   ;;  %s2498_s0 = inlined_call_operand.vmem [shape: bf16[2,24,512], index: 0, kind: input, shape index: {}]   ;;  %s2499_s1 = inlined_call_operand.vmem [shape: bf16[2,512,640], index: 1, kind: input, shape index: {}]   ;;  %s2500_s2 = inlined_call_operand.vmem [shape: f32[2,24,640], index: 2, kind: output, shape index: {}]  }
   0x1   :  { %s2234_s11 = smov 0  }
   0x2 LB: > { %s24_s12 = sadd.s32 1, %s2209_s10  ;;  %p1700_p0 = scmp.ge.s32.totalorder %s2213_s11, 1  ;;  %s2213_s11 = sphi %s2234_s11, %s12_s11   ;;  %s2209_s10 = sphi %s2232_s10, %s2502_s10   ;;  %s2205_s9 = sphi %s2230_s9, %s2501_s9  }
   0x3   : > { %p26_p1 = scmp.ge.s32.totalorder %s24_s12, 2  ;;  %p144_p2 = scmp.lt.s32.totalorder %s2213_s11, 3 }
   0x5   : > { %s2504_s12 = smov (%p26_p1, %s24_s12), 0  ;;  %p145_p3 = pnand %p1700_p0, %p144_p2 }
   0x6   : > { %p182_p4 = scmp.lt.s32.totalorder (!%p145_p3), %s2205_s9, 1 }
   0x7   : > { %148 = sbr.rel (%p145_p3) target bundleno = 386 (0x182), region = 28 }
   0xc   : > { %s2506_s9 = smov (!%p182_p4, %s2205_s9), 1 }
   0xd   : > { %s1931_s13 = smul.u32 1280, %s2506_s9 }
   0xe   : > { %s1930_s17 = smul.u32 48, %s2506_s9 }
   0xf   : > { %s2254_s16 = scalar_lea.vmem %s2499_s1, %s1931_s13  ;;  %s1932_s21 = smul.u32 120, %s2506_s9 }
  0x10   : > { %v1957_v0 = vld [vmem:[%s2254_s16 + $0x11c] ss:$20 sps:$4 sm:$0xff]   ;;  %v1961_v2 = vld [vmem:[%s2254_s16 + $0x118] ss:$20 sps:$4 sm:$0xff]   ;;  %v1963_v4 = vld [vmem:[%s2254_s16 + $0xf4] ss:$20 sps:$4 sm:$0xff]   ;;  %s2305_s20 = scalar_lea.vmem %s2498_s0, %s1930_s17 }
  0x11   : > { %v1959_v1 = vld [vmem:[%s2254_s16 + $0x39c] ss:$20 sps:$4 sm:$0xff]   ;;  %1273 = vmatprep.subr.bf16.mxu0 %v1957_v0  ;;  %v1962_v3 = vld [vmem:[%s2254_s16 + $0x398] ss:$20 sps:$4 sm:$0xff]   ;;  %v1965_v5 = vld [vmem:[%s2254_s16 + $0x374] ss:$20 sps:$4 sm:$0xff]   ;;  %s2472_s24 = scalar_lea.vmem %s2500_s2, %s1932_s21 }
  0x12   : > { %1324 = vmatprep.subr.bf16.mxu1 %v1959_v1  ;;  %1274 = vmatpush1.bf16.msra.mxu0 %v1961_v2  ;;  %v1967_v6 = vld [vmem:[%s2254_s16 + $0xf0] ss:$20 sps:$4 sm:$0xff]   ;;  %v1969_v8 = vld [vmem:[%s2254_s16 + $0xcc] ss:$20 sps:$4 sm:$0xff]   ;;  %v1973_v10 = vld [vmem:[%s2254_s16 + $0xc8] ss:$20 sps:$4 sm:$0xff]  }
  0x13   : > { %1325 = vmatpush1.bf16.msra.mxu1 %v1962_v3  ;;  %1275 = vmatprep.subr.bf16.mxu0 %v1963_v4  ;;  %v1968_v7 = vld [vmem:[%s2254_s16 + $0x370] ss:$20 sps:$4 sm:$0xff]   ;;  %v1971_v9 = vld [vmem:[%s2254_s16 + $0x34c] ss:$20 sps:$4 sm:$0xff]   ;;  %v1974_v11 = vld [vmem:[%s2254_s16 + $0x348] ss:$20 sps:$4 sm:$0xff]  }
  0x14   : > { %1326 = vmatprep.subr.bf16.mxu1 %v1965_v5  ;;  %v1975_v12 = vld [vmem:[%s2254_s16 + $0xa4] ss:$20 sps:$4 sm:$0xff]   ;;  %v1979_v14 = vld [vmem:[%s2254_s16 + $0xa0] ss:$20 sps:$4 sm:$0xff]   ;;  %v1981_v16 = vld [vmem:[%s2254_s16 + $0x7c] ss:$20 sps:$4 sm:$0xff]  }
  0x15   : > { %v1977_v13 = vld [vmem:[%s2254_s16 + $0x324] ss:$20 sps:$4 sm:$0xff]   ;;  %v1980_v15 = vld [vmem:[%s2254_s16 + $0x320] ss:$20 sps:$4 sm:$0xff]   ;;  %v1983_v17 = vld [vmem:[%s2254_s16 + $0x2fc] ss:$20 sps:$4 sm:$0xff]  }
  0x16   : > { %1276 = vmatpush1.bf16.msra.mxu0 %v1967_v6  ;;  %v1985_v18 = vld [vmem:[%s2254_s16 + $0x78] ss:$20 sps:$4 sm:$0xff]   ;;  %v1987_v20 = vld [vmem:[%s2254_s16 + $0x54] ss:$20 sps:$4 sm:$0xff]   ;;  %v1991_v22 = vld [vmem:[%s2254_s16 + $0x50] ss:$20 sps:$4 sm:$0xff]  }
  0x17   : > { %1327 = vmatpush1.bf16.msra.mxu1 %v1968_v7  ;;  %1277 = vmatprep.subr.bf16.mxu0 %v1969_v8  ;;  %v1986_v19 = vld [vmem:[%s2254_s16 + $0x2f8] ss:$20 sps:$4 sm:$0xff]   ;;  %v1989_v21 = vld [vmem:[%s2254_s16 + $0x2d4] ss:$20 sps:$4 sm:$0xff]   ;;  %v1992_v23 = vld [vmem:[%s2254_s16 + $0x2d0] ss:$20 sps:$4 sm:$0xff]  }
  0x18   : > { %1328 = vmatprep.subr.bf16.mxu1 %v1971_v9  ;;  %v1993_v24 = vld [vmem:[%s2254_s16 + $0x2c] ss:$20 sps:$4 sm:$0xff]   ;;  %v1997_v26 = vld [vmem:[%s2254_s16 + $0x28] ss:$20 sps:$4 sm:$0xff]   ;;  %v1999_v28 = vld [vmem:[%s2254_s16 + $0x4] ss:$20 sps:$4 sm:$0xff]  }
  0x19   : > { %v1995_v25 = vld [vmem:[%s2254_s16 + $0x2ac] ss:$20 sps:$4 sm:$0xff]   ;;  %v1998_v27 = vld [vmem:[%s2254_s16 + $0x2a8] ss:$20 sps:$4 sm:$0xff]   ;;  %v2001_v29 = vld [vmem:[%s2254_s16 + $0x284] ss:$20 sps:$4 sm:$0xff]  }
  0x1a   : > { %1278 = vmatpush1.bf16.msra.mxu0 %v1973_v10  ;;  %v2003_v30 = vld [vmem:[%s2254_s16] ss:$20 sps:$4 sm:$0xff]   ;;  %v2005_v32 = vld [vmem:[%s2254_s16 + $0x25c] ss:$20 sps:$4 sm:$0xff]   ;;  %v2009_v34 = vld [vmem:[%s2254_s16 + $0x258] ss:$20 sps:$4 sm:$0xff]  }
  0x1b   : > { %1329 = vmatpush1.bf16.msra.mxu1 %v1974_v11  ;;  %1279 = vmatprep.subr.bf16.mxu0 %v1975_v12  ;;  %v2004_v31 = vld [vmem:[%s2254_s16 + $0x280] ss:$20 sps:$4 sm:$0xff]   ;;  %v2007_v33 = vld [vmem:[%s2254_s16 + $0x4dc] ss:$20 sps:$4 sm:$0xff]   ;;  %v2010_v35 = vld [vmem:[%s2254_s16 + $0x4d8] ss:$20 sps:$4 sm:$0xff]  }
  0x1c   : > { %1330 = vmatprep.subr.bf16.mxu1 %v1977_v13  ;;  %v2011_v36 = vld [vmem:[%s2254_s16 + $0x234] ss:$20 sps:$4 sm:$0xff]   ;;  %v2015_v38 = vld [vmem:[%s2254_s16 + $0x230] ss:$20 sps:$4 sm:$0xff]   ;;  %v2017_v40 = vld [vmem:[%s2254_s16 + $0x20c] ss:$20 sps:$4 sm:$0xff]  }
  0x1d   : > { %v2013_v37 = vld [vmem:[%s2254_s16 + $0x4b4] ss:$20 sps:$4 sm:$0xff]   ;;  %v2016_v39 = vld [vmem:[%s2254_s16 + $0x4b0] ss:$20 sps:$4 sm:$0xff]   ;;  %v2019_v41 = vld [vmem:[%s2254_s16 + $0x48c] ss:$20 sps:$4 sm:$0xff]  }
  0x1e   : > { %1280 = vmatpush1.bf16.msra.mxu0 %v1979_v14  ;;  %v2021_v42 = vld [vmem:[%s2254_s16 + $0x208] ss:$20 sps:$4 sm:$0xff]   ;;  %v2023_v44 = vld [vmem:[%s2254_s16 + $0x1e4] ss:$20 sps:$4 sm:$0xff]   ;;  %v2027_v46 = vld [vmem:[%s2254_s16 + $0x1e0] ss:$20 sps:$4 sm:$0xff]  }
  0x1f   : > { %1331 = vmatpush1.bf16.msra.mxu1 %v1980_v15  ;;  %1281 = vmatprep.subr.bf16.mxu0 %v1981_v16  ;;  %v2022_v43 = vld [vmem:[%s2254_s16 + $0x488] ss:$20 sps:$4 sm:$0xff]   ;;  %v2025_v45 = vld [vmem:[%s2254_s16 + $0x464] ss:$20 sps:$4 sm:$0xff]   ;;  %v2028_v47 = vld [vmem:[%s2254_s16 + $0x460] ss:$20 sps:$4 sm:$0xff]  }
  0x20   : > { %1332 = vmatprep.subr.bf16.mxu1 %v1983_v17  ;;  %v2311_v48 = vld [vmem:[%s2305_s20 + $0x4] ss:$16 sps:$4 sm:$0xff]   ;;  %v2029_v49 = vld [vmem:[%s2254_s16 + $0x1bc] ss:$20 sps:$4 sm:$0xff]   ;;  %v2033_v52 = vld [vmem:[%s2254_s16 + $0x1b8] ss:$20 sps:$4 sm:$0xff]  }
  0x21   : > { %v2315_v50 = vld [vmem:[%s2305_s20 + $0xc] ss:$16 sps:$4 sm:$0xff]   ;;  %1305 = vmatprep.mubr.bf16.mxu0 %v2311_v48  ;;  %v2035_v54 = vld [vmem:[%s2254_s16 + $0x194] ss:$20 sps:$4 sm:$0xff]   ;;  %v2039_v56 = vld [vmem:[%s2254_s16 + $0x190] ss:$20 sps:$4 sm:$0xff]  }
  0x22   : > { %1282 = vmatpush1.bf16.msra.mxu0 %v1985_v18  ;;  %v2031_v51 = vld [vmem:[%s2254_s16 + $0x43c] ss:$20 sps:$4 sm:$0xff]   ;;  %1356 = vmatprep.mubr.bf16.mxu1 %v2315_v50  ;;  %v2034_v53 = vld [vmem:[%s2254_s16 + $0x438] ss:$20 sps:$4 sm:$0xff]   ;;  %v2037_v55 = vld [vmem:[%s2254_s16 + $0x414] ss:$20 sps:$4 sm:$0xff]  }
  0x23   : > { %1333 = vmatpush1.bf16.msra.mxu1 %v1986_v19  ;;  %1283 = vmatprep.subr.bf16.mxu0 %v1987_v20  ;;  %v2040_v57 = vld [vmem:[%s2254_s16 + $0x410] ss:$20 sps:$4 sm:$0xff]   ;;  %v2041_v58 = vld [vmem:[%s2254_s16 + $0x16c] ss:$20 sps:$4 sm:$0xff]   ;;  %v2045_v60 = vld [vmem:[%s2254_s16 + $0x168] ss:$20 sps:$4 sm:$0xff]  }
  0x24   : > { %1334 = vmatprep.subr.bf16.mxu1 %v1989_v21  ;;  %v2043_v59 = vld [vmem:[%s2254_s16 + $0x3ec] ss:$20 sps:$4 sm:$0xff]   ;;  %v2046_v61 = vld [vmem:[%s2254_s16 + $0x3e8] ss:$20 sps:$4 sm:$0xff]   ;;  %v2047_v62 = vld [vmem:[%s2254_s16 + $0x144] ss:$20 sps:$4 sm:$0xff]  }
  0x25   : > { %v2049_v63 = vld [vmem:[%s2254_s16 + $0x3c4] ss:$20 sps:$4 sm:$0xff]   ;;  %v2051_v0 = vld [vmem:[%s2254_s16 + $0x140] ss:$20 sps:$4 sm:$0xff]   ;;  %v2067_v8 = vld [vmem:[%s2254_s16 + $0xfc] ss:$20 sps:$4 sm:$0xff]  }
  0x26   : > { %1284 = vmatpush1.bf16.msra.mxu0 %v1991_v22  ;;  %v2052_v1 = vld [vmem:[%s2254_s16 + $0x3c0] ss:$20 sps:$4 sm:$0xff]   ;;  %v2061_v2 = vld [vmem:[%s2254_s16 + $0x124] ss:$20 sps:$4 sm:$0xff]   ;;  %v2070_v9 = vld [vmem:[%s2254_s16 + $0x37c] ss:$20 sps:$4 sm:$0xff]  }
  0x27   : > { %1335 = vmatpush1.bf16.msra.mxu1 %v1992_v23  ;;  %1285 = vmatprep.subr.bf16.mxu0 %v1993_v24  ;;  %v2064_v3 = vld [vmem:[%s2254_s16 + $0x3a4] ss:$20 sps:$4 sm:$0xff]   ;;  %v2337_v4 = vld [vmem:[%s2305_s20] ss:$16 sps:$4 sm:$0xff]   ;;  %v2073_v12 = vld [vmem:[%s2254_s16 + $0xd4] ss:$20 sps:$4 sm:$0xff]  }
  0x28   : > { %1336 = vmatprep.subr.bf16.mxu1 %v1995_v25  ;;  %v2340_v5 = vld [vmem:[%s2305_s20 + $0x8] ss:$16 sps:$4 sm:$0xff]   ;;  %v2059_v6 = vld [vmem:[%s2254_s16 + $0x120] ss:$20 sps:$4 sm:$0xff]   ;;  %v2071_v14 = vld [vmem:[%s2254_s16 + $0xd0] ss:$20 sps:$4 sm:$0xff]  }
  0x29   : > { %v2062_v7 = vld [vmem:[%s2254_s16 + $0x3a0] ss:$20 sps:$4 sm:$0xff]   ;;  %v2065_v10 = vld [vmem:[%s2254_s16 + $0xf8] ss:$20 sps:$4 sm:$0xff]   ;;  %v2074_v15 = vld [vmem:[%s2254_s16 + $0x350] ss:$20 sps:$4 sm:$0xff]  }
  0x2a   : > { %1286 = vmatpush1.bf16.msra.mxu0 %v1997_v26  ;;  %v2068_v11 = vld [vmem:[%s2254_s16 + $0x378] ss:$20 sps:$4 sm:$0xff]   ;;  %v2076_v13 = vld [vmem:[%s2254_s16 + $0x354] ss:$20 sps:$4 sm:$0xff]   ;;  %v213_v24 = vld [vmem:[%s2305_s20 + $0x20] sm:$0xff] }
  0x2b   : > { %1337 = vmatpush1.bf16.msra.mxu1 %v1998_v27  ;;  %1287 = vmatprep.subr.bf16.mxu0 %v1999_v28  ;;  %v2079_v16 = vld [vmem:[%s2254_s16 + $0xac] ss:$20 sps:$4 sm:$0xff]   ;;  %v2077_v18 = vld [vmem:[%s2254_s16 + $0xa8] ss:$20 sps:$4 sm:$0xff]   ;;  %v2085_v20 = vld [vmem:[%s2254_s16 + $0x84] ss:$20 sps:$4 sm:$0xff]   ;;  %v2366_v28 = vcombine.high %v213_v24, %v213_v24 }
  0x2c   : > { %1338 = vmatprep.subr.bf16.mxu1 %v2001_v29  ;;  %v2082_v17 = vld [vmem:[%s2254_s16 + $0x32c] ss:$20 sps:$4 sm:$0xff]   ;;  %v2080_v19 = vld [vmem:[%s2254_s16 + $0x328] ss:$20 sps:$4 sm:$0xff]   ;;  %v2088_v21 = vld [vmem:[%s2254_s16 + $0x304] ss:$20 sps:$4 sm:$0xff]  }
  0x2d   : > { %v2083_v22 = vld [vmem:[%s2254_s16 + $0x80] ss:$20 sps:$4 sm:$0xff]   ;;  %v214_v25 = vld [vmem:[%s2305_s20 + $0x28] sm:$0xff]  ;;  %v2091_v26 = vld [vmem:[%s2254_s16 + $0x5c] ss:$20 sps:$4 sm:$0xff]  }
  0x2e   : > { %1288 = vmatpush1.bf16.msra.mxu0 %v2003_v30  ;;  %v2086_v23 = vld [vmem:[%s2254_s16 + $0x300] ss:$20 sps:$4 sm:$0xff]   ;;  %v2094_v27 = vld [vmem:[%s2254_s16 + $0x2dc] ss:$20 sps:$4 sm:$0xff]   ;;  %v2368_v29 = vcombine.high %v214_v25, %v214_v25  ;;  %v2370_v30 = vcombine.low %v213_v24, %v213_v24  ;;  %v2169_v24 = vld [vmem:[%s2254_s16 + $0xd8] ss:$20 sps:$4 sm:$0xff]  }
  0x2f   : > { %1339 = vmatpush1.bf16.msra.mxu1 %v2004_v31  ;;  %1289 = vmatprep.subr.bf16.mxu0 %v2005_v32  ;;  %v2372_v31 = vcombine.low %v214_v25, %v214_v25  ;;  %v2089_v32 = vld [vmem:[%s2254_s16 + $0x58] ss:$20 sps:$4 sm:$0xff]  }
  0x30   : > { %1340 = vmatprep.subr.bf16.mxu1 %v2007_v33  ;;  %v2092_v33 = vld [vmem:[%s2254_s16 + $0x2d8] ss:$20 sps:$4 sm:$0xff]  }
  0x31   : > { %v2170_v25 = vld [vmem:[%s2254_s16 + $0x358] ss:$20 sps:$4 sm:$0xff]  }
  0x32   : > { %1290 = vmatpush2.bf16.msra.mxu0 %v2009_v34  ;;  %v2097_v34 = vld [vmem:[%s2254_s16 + $0x34] ss:$20 sps:$4 sm:$0xff]  }
  0x33   : > { %1341 = vmatpush2.bf16.msra.mxu1 %v2010_v35  ;;  %1291 = vmatprep.subr.bf16.mxu0 %v2011_v36  ;;  %v2100_v35 = vld [vmem:[%s2254_s16 + $0x2b4] ss:$20 sps:$4 sm:$0xff]   ;;  %v2095_v36 = vld [vmem:[%s2254_s16 + $0x30] ss:$20 sps:$4 sm:$0xff]  }
  0x34   : > { %1342 = vmatprep.subr.bf16.mxu1 %v2013_v37  ;;  %v2098_v37 = vld [vmem:[%s2254_s16 + $0x2b0] ss:$20 sps:$4 sm:$0xff]  }
  0x36   : > { %1292 = vmatpush2.bf16.msra.mxu0 %v2015_v38  ;;  %v2103_v38 = vld [vmem:[%s2254_s16 + $0xc] ss:$20 sps:$4 sm:$0xff]  }
  0x37   : > { %1343 = vmatpush2.bf16.msra.mxu1 %v2016_v39  ;;  %1293 = vmatprep.subr.bf16.mxu0 %v2017_v40  ;;  %v2106_v39 = vld [vmem:[%s2254_s16 + $0x28c] ss:$20 sps:$4 sm:$0xff]   ;;  %v2101_v40 = vld [vmem:[%s2254_s16 + $0x8] ss:$20 sps:$4 sm:$0xff]  }
  0x38   : > { %1344 = vmatprep.subr.bf16.mxu1 %v2019_v41  ;;  %v2104_v41 = vld [vmem:[%s2254_s16 + $0x288] ss:$20 sps:$4 sm:$0xff]  }
  0x3a   : > { %1294 = vmatpush2.bf16.msra.mxu0 %v2021_v42  ;;  %v2109_v42 = vld [vmem:[%s2254_s16 + $0x264] ss:$20 sps:$4 sm:$0xff]  }
  0x3b   : > { %1345 = vmatpush2.bf16.msra.mxu1 %v2022_v43  ;;  %1295 = vmatprep.subr.bf16.mxu0 %v2023_v44  ;;  %v2112_v43 = vld [vmem:[%s2254_s16 + $0x4e4] ss:$20 sps:$4 sm:$0xff]   ;;  %v2107_v44 = vld [vmem:[%s2254_s16 + $0x260] ss:$20 sps:$4 sm:$0xff]  }
  0x3c   : > { %1346 = vmatprep.subr.bf16.mxu1 %v2025_v45  ;;  %v2110_v45 = vld [vmem:[%s2254_s16 + $0x4e0] ss:$20 sps:$4 sm:$0xff]  }
  0x3e   : > { %1296 = vmatpush2.bf16.msra.mxu0 %v2027_v46  ;;  %v2115_v46 = vld [vmem:[%s2254_s16 + $0x23c] ss:$20 sps:$4 sm:$0xff]  }
  0x3f   : > { %1347 = vmatpush2.bf16.msra.mxu1 %v2028_v47  ;;  %1297 = vmatprep.subr.bf16.mxu0 %v2029_v49  ;;  %v2118_v47 = vld [vmem:[%s2254_s16 + $0x4bc] ss:$20 sps:$4 sm:$0xff]   ;;  %v2113_v49 = vld [vmem:[%s2254_s16 + $0x238] ss:$20 sps:$4 sm:$0xff]  }
  0x40   : > { %1348 = vmatprep.subr.bf16.mxu1 %v2031_v51  ;;  %v2116_v51 = vld [vmem:[%s2254_s16 + $0x4b8] ss:$20 sps:$4 sm:$0xff]  }
  0x42   : > { %1298 = vmatpush2.bf16.msra.mxu0 %v2033_v52  ;;  %v2121_v52 = vld [vmem:[%s2254_s16 + $0x214] ss:$20 sps:$4 sm:$0xff]  }
  0x43   : > { %1349 = vmatpush2.bf16.msra.mxu1 %v2034_v53  ;;  %1299 = vmatprep.subr.bf16.mxu0 %v2035_v54  ;;  %v2124_v53 = vld [vmem:[%s2254_s16 + $0x494] ss:$20 sps:$4 sm:$0xff]   ;;  %v2119_v54 = vld [vmem:[%s2254_s16 + $0x210] ss:$20 sps:$4 sm:$0xff]  }
  0x44   : > { %1350 = vmatprep.subr.bf16.mxu1 %v2037_v55  ;;  %v2122_v55 = vld [vmem:[%s2254_s16 + $0x490] ss:$20 sps:$4 sm:$0xff]  }
  0x46   : > { %1300 = vmatpush2.bf16.msra.mxu0 %v2039_v56  ;;  %v2127_v56 = vld [vmem:[%s2254_s16 + $0x1ec] ss:$20 sps:$4 sm:$0xff]  }
  0x47   : > { %1351 = vmatpush2.bf16.msra.mxu1 %v2040_v57  ;;  %1301 = vmatprep.subr.bf16.mxu0 %v2041_v58  ;;  %v2130_v57 = vld [vmem:[%s2254_s16 + $0x46c] ss:$20 sps:$4 sm:$0xff]   ;;  %v2125_v58 = vld [vmem:[%s2254_s16 + $0x1e8] ss:$20 sps:$4 sm:$0xff]  }
  0x48   : > { %1352 = vmatprep.subr.bf16.mxu1 %v2043_v59  ;;  %v2128_v59 = vld [vmem:[%s2254_s16 + $0x468] ss:$20 sps:$4 sm:$0xff]  }
  0x4a   : > { %1302 = vmatpush2.bf16.msra.mxu0 %v2045_v60  ;;  %v2133_v60 = vld [vmem:[%s2254_s16 + $0x1c4] ss:$20 sps:$4 sm:$0xff]  }
  0x4b   : > { %1353 = vmatpush2.bf16.msra.mxu1 %v2046_v61  ;;  %1303 = vmatprep.subr.bf16.mxu0 %v2047_v62  ;;  %v2136_v61 = vld [vmem:[%s2254_s16 + $0x444] ss:$20 sps:$4 sm:$0xff]   ;;  %v2131_v62 = vld [vmem:[%s2254_s16 + $0x1c0] ss:$20 sps:$4 sm:$0xff]  }
  0x4c   : > { %1354 = vmatprep.subr.bf16.mxu1 %v2049_v63  ;;  %v2134_v63 = vld [vmem:[%s2254_s16 + $0x440] ss:$20 sps:$4 sm:$0xff]  }
  0x4e   : > { %1304 = vmatpush2.bf16.msra.mxu0 %v2051_v0  ;;  %v2143_v0 = vld [vmem:[%s2254_s16 + $0x19c] ss:$20 sps:$4 sm:$0xff]  }
  0x4f   : > { %1355 = vmatpush2.bf16.msra.mxu1 %v2052_v1  ;;  %1375 = vmatprep.subr.bf16.mxu0 %v2061_v2  ;;  %v2146_v1 = vld [vmem:[%s2254_s16 + $0x41c] ss:$20 sps:$4 sm:$0xff]   ;;  %v2141_v2 = vld [vmem:[%s2254_s16 + $0x198] ss:$20 sps:$4 sm:$0xff]  }
  0x50   : > { %1426 = vmatprep.subr.bf16.mxu1 %v2064_v3  ;;  %v2144_v3 = vld [vmem:[%s2254_s16 + $0x418] ss:$20 sps:$4 sm:$0xff]  }
  0x51   : > { %1306 = vmatmul.mubr.bf16.vlgmr.msra.gmra.mxu0 %v2337_v4 }
  0x52   : > { %1357 = vmatmul.mubr.bf16.vlgmr.msra.gmra.mxu1 %v2340_v5  ;;  %1376 = vmatpush1.bf16.msra.mxu0 %v2059_v6  ;;  %v2149_v6 = vld [vmem:[%s2254_s16 + $0x174] ss:$20 sps:$4 sm:$0xff]  }
  0x53   : > { %1427 = vmatpush1.bf16.msra.mxu1 %v2062_v7  ;;  %1377 = vmatprep.subr.bf16.mxu0 %v2067_v8  ;;  %v2152_v7 = vld [vmem:[%s2254_s16 + $0x3f4] ss:$20 sps:$4 sm:$0xff]   ;;  %v2147_v8 = vld [vmem:[%s2254_s16 + $0x170] ss:$20 sps:$4 sm:$0xff]  }
  0x54   : > { %1428 = vmatprep.subr.bf16.mxu1 %v2070_v9  ;;  %1315 = vmatprep.mubr.bf16.mxu0 %v2366_v28  ;;  %v2150_v9 = vld [vmem:[%s2254_s16 + $0x3f0] ss:$20 sps:$4 sm:$0xff]  }
  0x55   : > { %1366 = vmatprep.mubr.bf16.mxu1 %v2368_v29 }
  0x56   : > { %1378 = vmatpush1.bf16.msra.mxu0 %v2065_v10  ;;  %v2155_v10 = vld [vmem:[%s2254_s16 + $0x14c] ss:$20 sps:$4 sm:$0xff]  }
  0x57   : > { %1429 = vmatpush1.bf16.msra.mxu1 %v2068_v11  ;;  %1379 = vmatprep.subr.bf16.mxu0 %v2073_v12  ;;  %v2158_v11 = vld [vmem:[%s2254_s16 + $0x3cc] ss:$20 sps:$4 sm:$0xff]   ;;  %v2153_v12 = vld [vmem:[%s2254_s16 + $0x148] ss:$20 sps:$4 sm:$0xff]  }
  0x58   : > { %1430 = vmatprep.subr.bf16.mxu1 %v2076_v13  ;;  %v2156_v13 = vld [vmem:[%s2254_s16 + $0x3c8] ss:$20 sps:$4 sm:$0xff]  }
  0x59   : > { %1316 = vmatmul.mubr.bf16.gmra.mxu0 %v2370_v30 }
  0x5a   : > { %1380 = vmatpush1.bf16.msra.mxu0 %v2071_v14  ;;  %1367 = vmatmul.mubr.bf16.gmra.mxu1 %v2372_v31  ;;  %v2159_v14 = vld [vmem:[%s2254_s16 + $0x268] ss:$20 sps:$4 sm:$0xff]  }
  0x5b   : > { %1431 = vmatpush1.bf16.msra.mxu1 %v2074_v15  ;;  %1381 = vmatprep.subr.bf16.mxu0 %v2079_v16  ;;  %v2160_v15 = vld [vmem:[%s2254_s16 + $0x4e8] ss:$20 sps:$4 sm:$0xff]  }
  0x5c   : > { %1432 = vmatprep.subr.bf16.mxu1 %v2082_v17  ;;  %1407 = vmatprep.mubr.bf16.mxu0 %v2311_v48  ;;  %v2161_v16 = vld [vmem:[%s2254_s16 + $0x128] ss:$20 sps:$4 sm:$0xff]  }
  0x5d   : > { %1458 = vmatprep.mubr.bf16.mxu1 %v2315_v50  ;;  %v2162_v17 = vld [vmem:[%s2254_s16 + $0x3a8] ss:$20 sps:$4 sm:$0xff]  }
  0x5e   : > { %1382 = vmatpush1.bf16.msra.mxu0 %v2077_v18  ;;  %v2163_v18 = vld [vmem:[%s2254_s16 + $0x240] ss:$20 sps:$4 sm:$0xff]  }
  0x5f   : > { %1433 = vmatpush1.bf16.msra.mxu1 %v2080_v19  ;;  %1383 = vmatprep.subr.bf16.mxu0 %v2085_v20  ;;  %v2164_v19 = vld [vmem:[%s2254_s16 + $0x4c0] ss:$20 sps:$4 sm:$0xff]  }
  0x60   : > { %1434 = vmatprep.subr.bf16.mxu1 %v2088_v21  ;;  %v2165_v20 = vld [vmem:[%s2254_s16 + $0x100] ss:$20 sps:$4 sm:$0xff]  }
  0x61   : > { %v2166_v21 = vld [vmem:[%s2254_s16 + $0x380] ss:$20 sps:$4 sm:$0xff]  }
  0x62   : > { %1384 = vmatpush1.bf16.msra.mxu0 %v2083_v22  ;;  %v2167_v22 = vld [vmem:[%s2254_s16 + $0x218] ss:$20 sps:$4 sm:$0xff]  }
  0x63   : > { %1435 = vmatpush1.bf16.msra.mxu1 %v2086_v23  ;;  %1385 = vmatprep.subr.bf16.mxu0 %v2091_v26  ;;  %v2168_v23 = vld [vmem:[%s2254_s16 + $0x498] ss:$20 sps:$4 sm:$0xff]   ;;  %v2171_v26 = vld [vmem:[%s2254_s16 + $0x1f0] ss:$20 sps:$4 sm:$0xff]  }
  0x64   : > { %1436 = vmatprep.subr.bf16.mxu1 %v2094_v27  ;;  %v2172_v27 = vld [vmem:[%s2254_s16 + $0x470] ss:$20 sps:$4 sm:$0xff]  }
  0x66   : > { %1386 = vmatpush1.bf16.msra.mxu0 %v2089_v32  ;;  %v2173_v32 = vld [vmem:[%s2254_s16 + $0xb0] ss:$20 sps:$4 sm:$0xff]  }
  0x67   : > { %1437 = vmatpush1.bf16.msra.mxu1 %v2092_v33  ;;  %1387 = vmatprep.subr.bf16.mxu0 %v2097_v34  ;;  %v2174_v33 = vld [vmem:[%s2254_s16 + $0x330] ss:$20 sps:$4 sm:$0xff]   ;;  %v2175_v34 = vld [vmem:[%s2254_s16 + $0x1c8] ss:$20 sps:$4 sm:$0xff]  }
  0x68   : > { %1438 = vmatprep.subr.bf16.mxu1 %v2100_v35  ;;  %v2176_v35 = vld [vmem:[%s2254_s16 + $0x448] ss:$20 sps:$4 sm:$0xff]  }
  0x6a   : > { %1388 = vmatpush1.bf16.msra.mxu0 %v2095_v36  ;;  %v2177_v36 = vld [vmem:[%s2254_s16 + $0x88] ss:$20 sps:$4 sm:$0xff]  }
  0x6b   : > { %1439 = vmatpush1.bf16.msra.mxu1 %v2098_v37  ;;  %1389 = vmatprep.subr.bf16.mxu0 %v2103_v38  ;;  %v2178_v37 = vld [vmem:[%s2254_s16 + $0x308] ss:$20 sps:$4 sm:$0xff]   ;;  %v2179_v38 = vld [vmem:[%s2254_s16 + $0x1a0] ss:$20 sps:$4 sm:$0xff]  }
  0x6c   : > { %1440 = vmatprep.subr.bf16.mxu1 %v2106_v39  ;;  %v2180_v39 = vld [vmem:[%s2254_s16 + $0x420] ss:$20 sps:$4 sm:$0xff]  }
  0x6e   : > { %1390 = vmatpush1.bf16.msra.mxu0 %v2101_v40  ;;  %v2181_v40 = vld [vmem:[%s2254_s16 + $0x60] ss:$20 sps:$4 sm:$0xff]  }
  0x6f   : > { %1441 = vmatpush1.bf16.msra.mxu1 %v2104_v41  ;;  %1391 = vmatprep.subr.bf16.mxu0 %v2109_v42  ;;  %v2184_v41 = vld [vmem:[%s2254_s16 + $0x3f8] ss:$20 sps:$4 sm:$0xff]  }
  0x70   : > { %1442 = vmatprep.subr.bf16.mxu1 %v2112_v43  ;;  %v2185_v42 = vld [vmem:[%s2254_s16 + $0x38] ss:$20 sps:$4 sm:$0xff]  }
  0x71   : > { %v2186_v43 = vld [vmem:[%s2254_s16 + $0x2b8] ss:$20 sps:$4 sm:$0xff]  }
  0x72   : > { %1392 = vmatpush2.bf16.msra.mxu0 %v2107_v44  ;;  %v2187_v44 = vld [vmem:[%s2254_s16 + $0x150] ss:$20 sps:$4 sm:$0xff]  }
  0x73   : > { %1443 = vmatpush2.bf16.msra.mxu1 %v2110_v45  ;;  %1393 = vmatprep.subr.bf16.mxu0 %v2115_v46  ;;  %v2188_v45 = vld [vmem:[%s2254_s16 + $0x3d0] ss:$20 sps:$4 sm:$0xff]  }
  0x74   : > { %1444 = vmatprep.subr.bf16.mxu1 %v2118_v47  ;;  %v2189_v46 = vld [vmem:[%s2254_s16 + $0x10] ss:$20 sps:$4 sm:$0xff]  }
  0x75   : > { %v2190_v47 = vld [vmem:[%s2254_s16 + $0x290] ss:$20 sps:$4 sm:$0xff]  }
  0x76   : > { %1394 = vmatpush2.bf16.msra.mxu0 %v2113_v49 }
  0x77   : > { %1445 = vmatpush2.bf16.msra.mxu1 %v2116_v51  ;;  %1395 = vmatprep.subr.bf16.mxu0 %v2121_v52 }
  0x78   : > { %1446 = vmatprep.subr.bf16.mxu1 %v2124_v53 }
  0x7a   : > { %1396 = vmatpush2.bf16.msra.mxu0 %v2119_v54 }
  0x7b   : > { %1447 = vmatpush2.bf16.msra.mxu1 %v2122_v55  ;;  %1397 = vmatprep.subr.bf16.mxu0 %v2127_v56 }
  0x7c   : > { %1448 = vmatprep.subr.bf16.mxu1 %v2130_v57 }
  0x7e   : > { %1398 = vmatpush2.bf16.msra.mxu0 %v2125_v58 }
  0x7f   : > { %1449 = vmatpush2.bf16.msra.mxu1 %v2128_v59  ;;  %1399 = vmatprep.subr.bf16.mxu0 %v2133_v60 }
  0x80   : > { %1450 = vmatprep.subr.bf16.mxu1 %v2136_v61 }
  0x82   : > { %1400 = vmatpush2.bf16.msra.mxu0 %v2131_v62 }
  0x83   : > { %1451 = vmatpush2.bf16.msra.mxu1 %v2134_v63  ;;  %1401 = vmatprep.subr.bf16.mxu0 %v2143_v0 }
  0x84   : > { %1452 = vmatprep.subr.bf16.mxu1 %v2146_v1 }
  0x86   : > { %1402 = vmatpush2.bf16.msra.mxu0 %v2141_v2 }
  0x87   : > { %1453 = vmatpush2.bf16.msra.mxu1 %v2144_v3  ;;  %1403 = vmatprep.subr.bf16.mxu0 %v2149_v6 }
  0x88   : > { %1454 = vmatprep.subr.bf16.mxu1 %v2152_v7 }
  0x8a   : > { %1404 = vmatpush2.bf16.msra.mxu0 %v2147_v8 }
  0x8b   : > { %1455 = vmatpush2.bf16.msra.mxu1 %v2150_v9  ;;  %1405 = vmatprep.subr.bf16.mxu0 %v2155_v10 }
  0x8c   : > { %1456 = vmatprep.subr.bf16.mxu1 %v2158_v11 }
  0x8e   : > { %1406 = vmatpush2.bf16.msra.mxu0 %v2153_v12 }
  0x8f   : > { %1457 = vmatpush2.bf16.msra.mxu1 %v2156_v13  ;;  %1874 = vmatprep.subr.bf16.mxu0 %v2159_v14 }
  0x90   : > { %1902 = vmatprep.subr.bf16.mxu1 %v2160_v15 }
  0x91   : > { %1408 = vmatmul.mubr.bf16.vlgmr.msra.gmra.mxu0 %v2337_v4 }
  0x92   : > { %1459 = vmatmul.mubr.bf16.vlgmr.msra.gmra.mxu1 %v2340_v5  ;;  %1875 = vmatpush3.bf16.msra.mxu0 %v2161_v16 }
  0x93   : > { %1903 = vmatpush3.bf16.msra.mxu1 %v2162_v17  ;;  %1876 = vmatprep.subr.bf16.mxu0 %v2163_v18 }
  0x94   : > { %1904 = vmatprep.subr.bf16.mxu1 %v2164_v19  ;;  %1417 = vmatprep.mubr.bf16.mxu0 %v2366_v28 }
  0x95   : > { %1468 = vmatprep.mubr.bf16.mxu1 %v2368_v29 }
  0x96   : > { %1877 = vmatpush3.bf16.msra.mxu0 %v2165_v20 }
  0x97   : > { %1905 = vmatpush3.bf16.msra.mxu1 %v2166_v21  ;;  %1878 = vmatprep.subr.bf16.mxu0 %v2167_v22 }
  0x98   : > { %1906 = vmatprep.subr.bf16.mxu1 %v2168_v23 }
  0x99   : > { %1418 = vmatmul.mubr.bf16.gmra.mxu0 %v2370_v30 }
  0x9a   : > { %1469 = vmatmul.mubr.bf16.gmra.mxu1 %v2372_v31  ;;  %1879 = vmatpush3.bf16.msra.mxu0 %v2169_v24 }
  0x9b   : > { %1907 = vmatpush3.bf16.msra.mxu1 %v2170_v25  ;;  %1880 = vmatprep.subr.bf16.mxu0 %v2171_v26 }
  0x9c   : > { %1908 = vmatprep.subr.bf16.mxu1 %v2172_v27  ;;  %1509 = vmatprep.mubr.bf16.mxu0 %v2311_v48  ;;  %v2182_v48 = vld [vmem:[%s2254_s16 + $0x2e0] ss:$20 sps:$4 sm:$0xff]  }
  0x9d   : > { %1557 = vmatprep.mubr.bf16.mxu1 %v2315_v50  ;;  %v2183_v50 = vld [vmem:[%s2254_s16 + $0x178] ss:$20 sps:$4 sm:$0xff]  }
  0x9e   : > { %1881 = vmatpush3.bf16.msra.mxu0 %v2173_v32 }
  0x9f   : > { %1909 = vmatpush3.bf16.msra.mxu1 %v2174_v33  ;;  %1882 = vmatprep.subr.bf16.mxu0 %v2175_v34 }
  0xa0   : > { %1910 = vmatprep.subr.bf16.mxu1 %v2176_v35 }
  0xa2   : > { %1883 = vmatpush3.bf16.msra.mxu0 %v2177_v36 }
  0xa3   : > { %1911 = vmatpush3.bf16.msra.mxu1 %v2178_v37  ;;  %1884 = vmatprep.subr.bf16.mxu0 %v2179_v38 }
  0xa4   : > { %1912 = vmatprep.subr.bf16.mxu1 %v2180_v39 }
  0xa6   : > { %1885 = vmatpush3.bf16.msra.mxu0 %v2181_v40 }
  0xa7   : > { %1913 = vmatpush3.bf16.msra.mxu1 %v2182_v48  ;;  %1886 = vmatprep.subr.bf16.mxu0 %v2183_v50 }
  0xa8   : > { %1914 = vmatprep.subr.bf16.mxu1 %v2184_v41 }
  0xaa   : > { %1887 = vmatpush3.bf16.msra.mxu0 %v2185_v42 }
  0xab   : > { %1915 = vmatpush3.bf16.msra.mxu1 %v2186_v43  ;;  %1888 = vmatprep.subr.bf16.mxu0 %v2187_v44 }
  0xac   : > { %1916 = vmatprep.subr.bf16.mxu1 %v2188_v45 }
  0xae   : > { %1889 = vmatpush3.bf16.msra.mxu0 %v2189_v46 }
  0xaf   : > { %1917 = vmatpush3.bf16.msra.mxu1 %v2190_v47 }
  0xb1   : > { %1510 = vmatmul.mubr.bf16.vlgmr.msra.gmra.mxu0 %v2337_v4 }
  0xb2   : > { %1558 = vmatmul.mubr.bf16.vlgmr.msra.gmra.mxu1 %v2340_v5  ;;  %1517 = vmatprep.mubr.bf16.mxu0 %v2366_v28 }
  0xb3   : > { %1565 = vmatprep.mubr.bf16.mxu1 %v2368_v29 }
  0xb9   : > { %1518 = vmatmul.mubr.bf16.gmra.mxu0 %v2370_v30 }
  0xba   : > { %1566 = vmatmul.mubr.bf16.gmra.mxu1 %v2372_v31 }
 0x111   : > { %v1307_v49 = vpop.f32.mrf.mxu0 }
 0x112   : > { %v1358_v4 = vpop.f32.mrf.mxu1 }
 0x113   : > { %v1359_v5 = vadd.f32 %v1358_v4, %v1307_v49  ;;  %v1309_v28 = vpop.f32.mrf.mxu0 }
 0x114   : > { %v1360_v51 = vpop.f32.mrf.mxu1 }
 0x115   : > { %1573 = vst [vmem:[%s2472_s24] sm:$0xff] %v1359_v5  ;;  %v1361_v29 = vadd.f32 %v1360_v51, %v1309_v28  ;;  %v1311_v30 = vpop.f32.mrf.mxu0 }
 0x116   : > { %v1362_v31 = vpop.f32.mrf.mxu1 }
 0x117   : > { %1574 = vst [vmem:[%s2472_s24 + $0x8] sm:$0xff] %v1361_v29  ;;  %v1363_v52 = vadd.f32 %v1362_v31, %v1311_v30  ;;  %v1313_v53 = vpop.f32.mrf.mxu0 }
 0x118   : > { %v1364_v54 = vpop.f32.mrf.mxu1 }
 0x119   : > { %1578 = vst [vmem:[%s2472_s24 + $0x28] sm:$0xff] %v1363_v52  ;;  %v1365_v55 = vadd.f32 %v1364_v54, %v1313_v53  ;;  %v1317_v56 = vpop.f32.mrf.mxu0 }
 0x11a   : > { %v1368_v57 = vpop.f32.mrf.mxu1 }
 0x11b   : > { %1579 = vst [vmem:[%s2472_s24 + $0x30] sm:$0xff] %v1365_v55  ;;  %v1369_v58 = vadd.f32 %v1368_v57, %v1317_v56  ;;  %v1319_v59 = vpop.f32.mrf.mxu0 }
 0x11c   : > { %v1370_v60 = vpop.f32.mrf.mxu1 }
 0x11d   : > { %1583 = vst [vmem:[%s2472_s24 + $0x50] sm:$0xff] %v1369_v58  ;;  %v1371_v61 = vadd.f32 %v1370_v60, %v1319_v59  ;;  %v1321_v62 = vpop.f32.mrf.mxu0 }
 0x11e   : > { %v1372_v63 = vpop.f32.mrf.mxu1 }
 0x11f   : > { %1584 = vst [vmem:[%s2472_s24 + $0x58] sm:$0xff] %v1371_v61  ;;  %v1322_v0 = vpop.f32.mrf.mxu0 }
 0x120   : > { %v1373_v1 = vpop.f32.mrf.mxu1 }
 0x151   : > { %v1409_v2 = vpop.f32.mrf.mxu0 }
 0x152   : > { %v1460_v3 = vpop.f32.mrf.mxu1 }
 0x153   : > { %v1461_v6 = vadd.f32 %v1460_v3, %v1409_v2  ;;  %v1411_v7 = vpop.f32.mrf.mxu0 }
 0x154   : > { %v1462_v8 = vpop.f32.mrf.mxu1 }
 0x155   : > { %1575 = vst [vmem:[%s2472_s24 + $0x10] sm:$0xff] %v1461_v6  ;;  %v1463_v9 = vadd.f32 %v1462_v8, %v1411_v7  ;;  %v1413_v10 = vpop.f32.mrf.mxu0 }
 0x156   : > { %v1464_v11 = vpop.f32.mrf.mxu1 }
 0x157   : > { %1576 = vst [vmem:[%s2472_s24 + $0x18] sm:$0xff] %v1463_v9  ;;  %v1465_v12 = vadd.f32 %v1464_v11, %v1413_v10  ;;  %v1415_v13 = vpop.f32.mrf.mxu0 }
 0x158   : > { %v1466_v14 = vpop.f32.mrf.mxu1 }
 0x159   : > { %1580 = vst [vmem:[%s2472_s24 + $0x38] sm:$0xff] %v1465_v12  ;;  %v1467_v15 = vadd.f32 %v1466_v14, %v1415_v13  ;;  %v1419_v16 = vpop.f32.mrf.mxu0 }
 0x15a   : > { %v1470_v17 = vpop.f32.mrf.mxu1 }
 0x15b   : > { %1581 = vst [vmem:[%s2472_s24 + $0x40] sm:$0xff] %v1467_v15  ;;  %v1471_v18 = vadd.f32 %v1470_v17, %v1419_v16  ;;  %v1421_v19 = vpop.f32.mrf.mxu0 }
 0x15c   : > { %v1472_v20 = vpop.f32.mrf.mxu1 }
 0x15d   : > { %1585 = vst [vmem:[%s2472_s24 + $0x60] sm:$0xff] %v1471_v18  ;;  %v1473_v21 = vadd.f32 %v1472_v20, %v1421_v19  ;;  %v1423_v22 = vpop.f32.mrf.mxu0 }
 0x15e   : > { %v1474_v23 = vpop.f32.mrf.mxu1 }
 0x15f   : > { %1586 = vst [vmem:[%s2472_s24 + $0x68] sm:$0xff] %v1473_v21  ;;  %v1424_v24 = vpop.f32.mrf.mxu0 }
 0x160   : > { %v1475_v25 = vpop.f32.mrf.mxu1 }
 0x171   : > { %v1890_v26 = vpop.f32.mrf.mxu0 }
 0x172   : > { %v1918_v27 = vpop.f32.mrf.mxu1 }
 0x173   : > { %v1891_v32 = vpop.f32.mrf.mxu0 }
 0x174   : > { %v1919_v33 = vpop.f32.mrf.mxu1  ;;  %v1892_v34 = vadd.f32 %v1891_v32, %v1890_v26 }
 0x175   : > { %v1920_v35 = vadd.f32 %v1919_v33, %v1918_v27  ;;  %v1893_v36 = vpop.f32.mrf.mxu0 }
 0x176   : > { %v1921_v37 = vpop.f32.mrf.mxu1 }
 0x177   : > { %v1560_v38 = vadd.f32 %v1920_v35, %v1892_v34  ;;  %v1894_v39 = vpop.f32.mrf.mxu0 }
 0x178   : > { %v1922_v40 = vpop.f32.mrf.mxu1  ;;  %v1895_v48 = vadd.f32 %v1894_v39, %v1893_v36 }
 0x179   : > { %1577 = vst [vmem:[%s2472_s24 + $0x20] sm:$0xff] %v1560_v38  ;;  %v1923_v50 = vadd.f32 %v1922_v40, %v1921_v37  ;;  %v1896_v41 = vpop.f32.mrf.mxu0 }
 0x17a   : > { %v1924_v42 = vpop.f32.mrf.mxu1 }
 0x17b   : > { %v1563_v43 = vadd.f32 %v1923_v50, %v1895_v48  ;;  %v1897_v44 = vpop.f32.mrf.mxu0 }
 0x17c   : > { %v1925_v45 = vpop.f32.mrf.mxu1  ;;  %v1898_v46 = vadd.f32 %v1897_v44, %v1896_v41 }
 0x17d   : > { %1582 = vst [vmem:[%s2472_s24 + $0x48] sm:$0xff] %v1563_v43  ;;  %v1926_v47 = vadd.f32 %v1925_v45, %v1924_v42  ;;  %v1899_v49 = vpop.f32.mrf.mxu0 }
 0x17e   : > { %v1927_v4 = vpop.f32.mrf.mxu1 }
 0x17f   : > { %v1568_v5 = vadd.f32 %v1926_v47, %v1898_v46  ;;  %v1900_v28 = vpop.f32.mrf.mxu0 }
 0x180   : > { %v1928_v51 = vpop.f32.mrf.mxu1 }
 0x181   : > { %1587 = vst [vmem:[%s2472_s24 + $0x70] sm:$0xff] %v1568_v5 }
 0x182 PF: > { %s12_s11 = sadd.s32 1, %s2213_s11   ;;  %s2501_s9 = smov %s2209_s10 }
 0x183   : > { %p9_p5 = scmp.ge.s32.totalorder %s12_s11, 4   ;;  %s2502_s10 = smov %s2504_s12 }
 0x185   :  { %11 = sbr.rel (!%p9_p5) target bundleno = 2 (0x2), region = 61 }

// kernel: run.19
= control target key start
LH: loop header
LB: loop body
LE: loop exit
PB: predicated region body
PF: predicated region fallthrough
CT: control target
= control target key end

     0   :  { %s1363_s24 = smov 0   ;;  %s1365_s25 = smov 0   ;;  %s1648_s0 = inlined_call_operand.vmem [shape: f32[16,2048], index: 0, kind: input, shape index: {}]   ;;  %s1649_s1 = inlined_call_operand.vmem [shape: f32[16,2048], index: 1, kind: input, shape index: {}]   ;;  %s1650_s2 = inlined_call_operand.vmem [shape: f32[1,2048], index: 2, kind: input, shape index: {}]   ;;  %s1651_s3 = inlined_call_operand.vmem [shape: f32[8,2048], index: 3, kind: input, shape index: {}]   ;;  %s1652_s4 = inlined_call_operand.vmem [shape: f32[1,2048], index: 4, kind: input, shape index: {}]   ;;  %s1653_s5 = inlined_call_operand.vmem [shape: f32[16,8,2048], index: 5, kind: input, shape index: {}]   ;;  %s1654_s6 = inlined_call_operand.vmem [shape: f32[16,8,2048], index: 6, kind: input, shape index: {}]   ;;  %s1655_s7 = inlined_call_operand.vmem [shape: f32[16,2048], index: 7, kind: output, shape index: {}]  }
   0x1   :  { %s1367_s26 = smov 0  }
   0x2 LB: > { %s1379_s27 = sadd.s32 4294967295, %s1312_s26   ;;  %s1382_s28 = sadd.s32 1, %s1312_s26   ;;  %s1312_s26 = sphi %s1367_s26, %s1660_s26   ;;  %s1308_s25 = sphi %s1365_s25, %s1659_s25   ;;  %s1304_s24 = sphi %s1363_s24, %s1658_s24  }
   0x3   : > { %s21_s29 = ssub.s32 %s1312_s26, %s1382_s28  ;;  %s24_s30 = sadd.s32 1, %s1308_s25 }
   0x4   : > { %p22_p0 = scmp.eq.s32.totalorder %s21_s29, 0  ;;  %p31_p1 = scmp.ne.s32.totalorder %s1308_s25, %s1304_s24 }
   0x5   : > { %p32_p2 = scmp.eq.s32.totalorder %s1312_s26, 0  ;;  %p217_p3 = scmp.eq.s32.totalorder %s1379_s27, 15 }
   0x6   : > { %s1392_s8 = scalar_select %p22_p0, %s1308_s25, %s24_s30  }
   0x7   : > { %p1394_p4 = por %p32_p2, %p31_p1  ;;  %p1398_p5 = por %p217_p3, %p31_p1 }
   0x8   : > { %p1193_p6 = scmp.ge.s32.totalorder %s1312_s26, 16 }
   0xa   : > { %239 = sbr.rel (%p1193_p6) target bundleno = 67 (0x43), region = 16 }
   0xf   : > { %242 = sbr.rel (!%p1394_p4) target bundleno = 21 (0x15), region = 20  ;;  %s244_s11 = sand.u32 (%p1394_p4), 1, %s1308_s25  }
  0x10   : > { %s1195_s12 = sshll.u32 (%p1394_p4), %s1312_s26, 3  ;;  %s1194_s13 = sshll.u32 (%p1394_p4), %s244_s11, 4 }
  0x11   : > { %s248_s16 = scalar_lea.vmem (%p1394_p4), %s1648_s0, %s1195_s12  ;;  %s246_s17 = scalar_lea.vmem (%p1394_p4), [#allocation2], %s1194_s13 }
  0x12   : > { %v279_v0 = vld [vmem:[%s248_s16] sm:$0xff] (%p1394_p4) }
  0x13   : > { %v281_v1 = vld [vmem:[%s248_s16 + $0x80] sm:$0xff] (%p1394_p4)  ;;  %280 = vst [vmem:[%s246_s17] sm:$0xff] (%p1394_p4), %v279_v0 }
  0x14   : > { %282 = vst [vmem:[%s246_s17 + $0x8] sm:$0xff] %v281_v1 }
  0x15 PF: > { %288 = sbr.rel (!%p1394_p4) target bundleno = 27 (0x1b), region = 58  ;;  %s290_s18 = sand.u32 (%p1394_p4), 1, %s1308_s25  }
  0x16   : > { %s1197_s19 = sshll.u32 (%p1394_p4), %s1312_s26, 3  ;;  %s1196_s20 = sshll.u32 (%p1394_p4), %s290_s18, 4 }
  0x17   : > { %s294_s23 = scalar_lea.vmem (%p1394_p4), %s1649_s1, %s1197_s19  ;;  %s292_s29 = scalar_lea.vmem (%p1394_p4), [#allocation3], %s1196_s20 }
  0x18   : > { %v325_v2 = vld [vmem:[%s294_s23] sm:$0xff] (%p1394_p4) }
  0x19   : > { %v327_v3 = vld [vmem:[%s294_s23 + $0x80] sm:$0xff] (%p1394_p4)  ;;  %326 = vst [vmem:[%s292_s29] sm:$0xff] (%p1394_p4), %v325_v2 }
  0x1a   : > { %328 = vst [vmem:[%s292_s29 + $0x8] sm:$0xff] %v327_v3 }
  0x1b PF: > { %353 = sbr.rel (!%p1394_p4) target bundleno = 47 (0x2f), region = 108  ;;  %s355_s30 = sand.u32 (%p1394_p4), 1, %s1308_s25  }
  0x1c   : > { %s1199_s11 = sshll.u32 (%p1394_p4), %s1312_s26, 3  ;;  %s1198_s12 = sshll.u32 (%p1394_p4), %s355_s30, 7 }
  0x1d   : > { %s1424_s15 = scalar_lea.vmem (%p1394_p4), %s1653_s5, %s1199_s11  ;;  %s357_s16 = scalar_lea.vmem (%p1394_p4), [#allocation4], %s1198_s12 }
  0x1e   : > { %v418_v4 = vld [vmem:[%s1424_s15] sm:$0xff] (%p1394_p4) }
  0x1f   : > { %v420_v5 = vld [vmem:[%s1424_s15 + $0x80] sm:$0xff] (%p1394_p4)  ;;  %419 = vst [vmem:[%s357_s16] sm:$0xff] (%p1394_p4), %v418_v4 }
  0x20   : > { %v422_v6 = vld [vmem:[%s1424_s15 + $0x100] sm:$0xff]  ;;  %421 = vst [vmem:[%s357_s16 + $0x8] sm:$0xff] %v420_v5 }
  0x21   : > { %423 = vst [vmem:[%s357_s16 + $0x10] sm:$0xff] %v422_v6  ;;  %v424_v7 = vld [vmem:[%s1424_s15 + $0x180] sm:$0xff] }
  0x22   : > { %v426_v8 = vld [vmem:[%s1424_s15 + $0x200] sm:$0xff]  ;;  %425 = vst [vmem:[%s357_s16 + $0x18] sm:$0xff] %v424_v7 }
  0x23   : > { %v428_v9 = vld [vmem:[%s1424_s15 + $0x280] sm:$0xff]  ;;  %427 = vst [vmem:[%s357_s16 + $0x20] sm:$0xff] %v426_v8 }
  0x24   : > { %429 = vst [vmem:[%s357_s16 + $0x28] sm:$0xff] %v428_v9  ;;  %v430_v10 = vld [vmem:[%s1424_s15 + $0x300] sm:$0xff] }
  0x25   : > { %v432_v11 = vld [vmem:[%s1424_s15 + $0x380] sm:$0xff]  ;;  %431 = vst [vmem:[%s357_s16 + $0x30] sm:$0xff] %v430_v10 }
  0x26   : > { %v434_v12 = vld [vmem:[%s1424_s15 + $0x400] sm:$0xff]  ;;  %433 = vst [vmem:[%s357_s16 + $0x38] sm:$0xff] %v432_v11 }
  0x27   : > { %435 = vst [vmem:[%s357_s16 + $0x40] sm:$0xff] %v434_v12  ;;  %v436_v13 = vld [vmem:[%s1424_s15 + $0x480] sm:$0xff] }
  0x28   : > { %v438_v14 = vld [vmem:[%s1424_s15 + $0x500] sm:$0xff]  ;;  %437 = vst [vmem:[%s357_s16 + $0x48] sm:$0xff] %v436_v13 }
  0x29   : > { %v440_v15 = vld [vmem:[%s1424_s15 + $0x580] sm:$0xff]  ;;  %439 = vst [vmem:[%s357_s16 + $0x50] sm:$0xff] %v438_v14 }
  0x2a   : > { %441 = vst [vmem:[%s357_s16 + $0x58] sm:$0xff] %v440_v15  ;;  %v442_v16 = vld [vmem:[%s1424_s15 + $0x600] sm:$0xff] }
  0x2b   : > { %v444_v17 = vld [vmem:[%s1424_s15 + $0x680] sm:$0xff]  ;;  %443 = vst [vmem:[%s357_s16 + $0x60] sm:$0xff] %v442_v16 }
  0x2c   : > { %v446_v18 = vld [vmem:[%s1424_s15 + $0x700] sm:$0xff]  ;;  %445 = vst [vmem:[%s357_s16 + $0x68] sm:$0xff] %v444_v17 }
  0x2d   : > { %447 = vst [vmem:[%s357_s16 + $0x70] sm:$0xff] %v446_v18  ;;  %v448_v19 = vld [vmem:[%s1424_s15 + $0x780] sm:$0xff] }
  0x2e   : > { %449 = vst [vmem:[%s357_s16 + $0x78] sm:$0xff] %v448_v19 }
  0x2f PF: > { %455 = sbr.rel (!%p1394_p4) target bundleno = 67 (0x43), region = 146  ;;  %s457_s17 = sand.u32 (%p1394_p4), 1, %s1308_s25  }
  0x30   : > { %s1201_s18 = sshll.u32 (%p1394_p4), %s1312_s26, 3  ;;  %s1200_s19 = sshll.u32 (%p1394_p4), %s457_s17, 7 }
  0x31   : > { %s1449_s22 = scalar_lea.vmem (%p1394_p4), %s1654_s6, %s1201_s18  ;;  %s459_s9 = scalar_lea.vmem (%p1394_p4), [#allocation5], %s1200_s19 }
  0x32   : > { %v520_v20 = vld [vmem:[%s1449_s22] sm:$0xff] (%p1394_p4) }
  0x33   : > { %v522_v21 = vld [vmem:[%s1449_s22 + $0x80] sm:$0xff] (%p1394_p4)  ;;  %521 = vst [vmem:[%s459_s9] sm:$0xff] (%p1394_p4), %v520_v20 }
  0x34   : > { %v524_v22 = vld [vmem:[%s1449_s22 + $0x100] sm:$0xff]  ;;  %523 = vst [vmem:[%s459_s9 + $0x8] sm:$0xff] %v522_v21 }
  0x35   : > { %525 = vst [vmem:[%s459_s9 + $0x10] sm:$0xff] %v524_v22  ;;  %v526_v23 = vld [vmem:[%s1449_s22 + $0x180] sm:$0xff] }
  0x36   : > { %v528_v24 = vld [vmem:[%s1449_s22 + $0x200] sm:$0xff]  ;;  %527 = vst [vmem:[%s459_s9 + $0x18] sm:$0xff] %v526_v23 }
  0x37   : > { %v530_v25 = vld [vmem:[%s1449_s22 + $0x280] sm:$0xff]  ;;  %529 = vst [vmem:[%s459_s9 + $0x20] sm:$0xff] %v528_v24 }
  0x38   : > { %531 = vst [vmem:[%s459_s9 + $0x28] sm:$0xff] %v530_v25  ;;  %v532_v26 = vld [vmem:[%s1449_s22 + $0x300] sm:$0xff] }
  0x39   : > { %v534_v27 = vld [vmem:[%s1449_s22 + $0x380] sm:$0xff]  ;;  %533 = vst [vmem:[%s459_s9 + $0x30] sm:$0xff] %v532_v26 }
  0x3a   : > { %v536_v28 = vld [vmem:[%s1449_s22 + $0x400] sm:$0xff]  ;;  %535 = vst [vmem:[%s459_s9 + $0x38] sm:$0xff] %v534_v27 }
  0x3b   : > { %537 = vst [vmem:[%s459_s9 + $0x40] sm:$0xff] %v536_v28  ;;  %v538_v29 = vld [vmem:[%s1449_s22 + $0x480] sm:$0xff] }
  0x3c   : > { %v540_v30 = vld [vmem:[%s1449_s22 + $0x500] sm:$0xff]  ;;  %539 = vst [vmem:[%s459_s9 + $0x48] sm:$0xff] %v538_v29 }
  0x3d   : > { %v542_v31 = vld [vmem:[%s1449_s22 + $0x580] sm:$0xff]  ;;  %541 = vst [vmem:[%s459_s9 + $0x50] sm:$0xff] %v540_v30 }
  0x3e   : > { %543 = vst [vmem:[%s459_s9 + $0x58] sm:$0xff] %v542_v31  ;;  %v544_v32 = vld [vmem:[%s1449_s22 + $0x600] sm:$0xff] }
  0x3f   : > { %v546_v33 = vld [vmem:[%s1449_s22 + $0x680] sm:$0xff]  ;;  %545 = vst [vmem:[%s459_s9 + $0x60] sm:$0xff] %v544_v32 }
  0x40   : > { %v548_v34 = vld [vmem:[%s1449_s22 + $0x700] sm:$0xff]  ;;  %547 = vst [vmem:[%s459_s9 + $0x68] sm:$0xff] %v546_v33 }
  0x41   : > { %549 = vst [vmem:[%s459_s9 + $0x70] sm:$0xff] %v548_v34  ;;  %v550_v35 = vld [vmem:[%s1449_s22 + $0x780] sm:$0xff] }
  0x42   : > { %551 = vst [vmem:[%s459_s9 + $0x78] sm:$0xff] %v550_v35 }
  0x43 PF: > { %p1202_p7 = scmp.ge.s32.totalorder %s1312_s26, 1  ;;  %p556_p8 = scmp.lt.s32.totalorder %s1312_s26, 17 }
  0x45   : > { %p557_p9 = pnand %p1202_p7, %p556_p8 }
  0x46   : > { %s563_s23 = sand.u32 (!%p557_p9), 1, %s1304_s24   ;;  %p636_p10 = scmp.lt.s32.totalorder (!%p557_p9), %s1379_s27, 15 }
  0x47   : > { %560 = sbr.rel (%p557_p9) target bundleno = 209 (0xd1), region = 184  ;;  %s1471_s29 = sshll.u32 (!%p557_p9), %s563_s23, 4 }
  0x48   : > { %s1473_s30 = sshll.u32 (!%p557_p9), %s563_s23, 7  ;;  %s565_s20 = scalar_lea.vmem (!%p557_p9), [#allocation2], %s1471_s29 }
  0x49   : > { %s572_s21 = scalar_lea.vmem (!%p557_p9), [#allocation3], %s1471_s29  ;;  %s579_s22 = scalar_lea.vmem (!%p557_p9), [#allocation4], %s1473_s30 }
  0x4a   : > { %s586_s9 = scalar_lea.vmem (!%p557_p9), [#allocation5], %s1473_s30  ;;  %s1496_s23 = scalar_lea.vmem (!%p557_p9), [#allocation6], %s1471_s29 }
  0x4b   : > { %s1500_s12 = smov (!%p557_p9), 0  }
  0x4c   : > { %s637_s11 = scalar_select %p636_p10, %s1379_s27, 15  ;;  %v1498_v39 = vmov 0.0  }
  0x4e   : > { %s638_s26 = scalar_lea.vmem %s1650_s2, %s637_s11  ;;  %s1208_s14 = sshll.u32 %s637_s11, 3 }
  0x4f   : > { %s642_s24 = scalar_lea.vmem %s1651_s3, %s1208_s14  ;;  %s645_s19 = scalar_lea.vmem %s1652_s4, %s637_s11  ;;  %v1485_v36 = vld [vmem:[%s638_s26] sm:$0x1] }
  0x50   : > { %v1487_v37 = vld [vmem:[%s642_s24] sm:$0xff] }
  0x51   : > { %v1489_v38 = vld [vmem:[%s645_s19] sm:$0x1] }
  0x52 LB: >> { %v690_v40 = vlaneseq  ;;  %s1509_s11 = sshll.u32 %s1320_s12, 3  ;;  %s1215_s14 = sshll.u32 %s1320_s12, 6  ;;  %v1322_v27 = vmov 1966171168   ;;  %vm970_vm0 = vcmask 1040384   ;;  %vm972_vm1 = vcmask 1041408   ;;  %s1320_s12 = sphi %s1500_s12, %s654_s12   ;;  %v1316_v39 = vphi %v1498_v39, %v937_v39  }
  0x53   : >> { %s659_s13 = scalar_lea.vmem %s572_s21, %s1509_s11 [#allocation3]  ;;  %s657_s26 = scalar_lea.vmem %s565_s20, %s1509_s11 [#allocation2]  ;;  %v754_v28 = vunpack.c.l.s4 %v1322_v27  ;;  %vm974_vm2 = vcmask 1042432   ;;  %vm976_vm3 = vcmask 1043456   ;;  %vm978_vm4 = vcmask 1044480  }
  0x54   : >> { %v1511_v41 = vshrl.u32 %v690_v40, 7  ;;  %v660_v42 = vld [vmem:[%s659_s13] sm:$0xff]  ;;  %s1545_s15 = scalar_lea.vmem %s579_s22, %s1215_s14 [#allocation4]  ;;  %s1564_s16 = scalar_lea.vmem %s586_s9, %s1215_s14 [#allocation5]  ;;  %vm980_vm5 = vcmask 1045504   ;;  %vm982_vm6 = vcmask 1046528  }
  0x55   : >> { %v680_v44 = vadd.f32 %v660_v42, %v1485_v36  ;;  %v1535_v13 = vld [vmem:[%s657_s26] sm:$0xff]  ;;  %v664_v40 = vld [vmem:[%s1545_s15 + $0x8] sm:$0xff]  ;;  %s984_s24 = scalar_lea.vmem %s1496_s23, %s1509_s11 [#allocation6]  ;;  %s654_s12 = sadd.s32 1, %s1320_s12  }
  0x56   : >> { %v1517_v43 = vsub.s32 0, %v1511_v41  ;;  %v732_v0 = vsub.s32 1, %v1511_v41  ;;  %v780_v1 = vsub.s32 2, %v1511_v41  ;;  %v805_v3 = vsub.s32 3, %v1511_v41  ;;  %v663_v26 = vld [vmem:[%s1545_s15] sm:$0xff]  ;;  %p651_p11 = scmp.ge.s32.totalorder %s654_s12, 2  }
  0x57   : >> { %v682_v46 = vand.u32 2147483647, %v680_v44  ;;  %v681_v57 = vmax.f32 %v680_v44, 0.0  ;;  %v830_v12 = vsub.s32 4, %v1511_v41  ;;  %v869_v18 = vsub.s32 5, %v1511_v41  ;;  %v672_v44 = vld [vmem:[%s1564_s16] sm:$0xff] }
  0x58   : >> { %v718_v45 = vrot.slane %v1485_v36, %v1517_v43  ;;  %v901_v23 = vsub.s32 6, %v1511_v41  ;;  %v926_v32 = vsub.s32 7, %v1511_v41 }
  0x59   : >> { %v683_v48 = vsub.f32 0.0, %v682_v46 }
  0x5a   : >> { %v720_v47 = vadd.f32 %v718_v45, %v660_v42  ;;  %v755_v42 = vunpack.c.0.s8 %v754_v28 }
  0x5b   : >> { %v684_v50 = vmul.f32 1.442695, %v683_v48 }
  0x5c   : >> { %v722_v49 = vand.u32 2147483647, %v720_v47  ;;  %v721_v60 = vmax.f32 %v720_v47, 0.0 }
  0x5d   : >> { %1258 = vpow2.f32 %v684_v50 }
  0x5e   : >> { %v723_v51 = vsub.f32 0.0, %v722_v49 }
  0x60   : >> { %v724_v52 = vmul.f32 1.442695, %v723_v51 }
  0x62   : >> { %1260 = vpow2.f32 %v724_v52  ;;  %v665_v52 = vld [vmem:[%s1545_s15 + $0x10] sm:$0xff] }
  0x6a   : >> { %v1259_v53 = vpop.eup %1258 }
  0x6b   : >> { %v686_v54 = vadd.f32 1.0, %v1259_v53  ;;  %v1574_v53 = vsub.s32 %v755_v42, %v1511_v41  ;;  %v849_v42 = vcombine.high %v1535_v13, %v1535_v13 }
  0x6d   : >> { %1262 = vlog2.f32 %v686_v54 }
  0x6f   : >> { %v1261_v55 = vpop.eup %1260 }
  0x70   : >> { %v726_v56 = vadd.f32 1.0, %v1261_v55 }
  0x72   : >> { %1264 = vlog2.f32 %v726_v56  ;;  %v673_v56 = vld [vmem:[%s1564_s16 + $0x8] sm:$0xff] }
  0x7a   : >> { %v1263_v58 = vpop.eup %1262 }
  0x7b   : >> { %v688_v59 = vmul.f32 0.6931472, %v1263_v58 }
  0x7d   : >> { %v689_v62 = vadd.f32 %v688_v59, %v681_v57 }
  0x7f   : >> { %v1265_v61 = vpop.eup %1264  ;;  %v693_v2 = vrot.slane %v689_v62, %v1517_v43  ;;  %v698_v19 = vmul.f32 %v689_v62, %v1535_v13 }
  0x80   : >> { %v728_v63 = vmul.f32 0.6931472, %v1265_v61 }
  0x81   : >> { %v694_v5 = vmul.f32 %v693_v2, %v1487_v37  ;;  %v702_v24 = vrot.slane %v698_v19, %v1517_v43 }
  0x82   : >> { %v729_v4 = vadd.f32 %v728_v63, %v721_v60  ;;  %v666_v63 = vld [vmem:[%s1545_s15 + $0x18] sm:$0xff] }
  0x83   : >> { %v695_v8 = vmul.f32 1.442695, %v694_v5  ;;  %v703_v33 = vmul.f32 %v702_v24, %v663_v26 }
  0x84   : >> { %v733_v6 = vrot.slane %v729_v4, %v732_v0  ;;  %v781_v7 = vrot.slane %v729_v4, %v780_v1  ;;  %v806_v9 = vrot.slane %v729_v4, %v805_v3  ;;  %v831_v17 = vrot.slane %v729_v4, %v830_v12 }
  0x85   : >> { %1266 = vpow2.f32 %v695_v8  ;;  %v870_v22 = vrot.slane %v729_v4, %v869_v18  ;;  %v1553_v25 = vmul.f32 %v729_v4, %v1535_v13  ;;  %v902_v31 = vrot.slane %v729_v4, %v901_v23 }
  0x86   : >> { %v734_v10 = vmul.f32 %v733_v6, %v1487_v37  ;;  %v782_v11 = vmul.f32 %v781_v7, %v1487_v37  ;;  %v807_v16 = vmul.f32 %v806_v9, %v1487_v37  ;;  %v832_v21 = vmul.f32 %v831_v17, %v1487_v37  ;;  %v674_v6 = vld [vmem:[%s1564_s16 + $0x10] sm:$0xff] }
  0x87   : >> { %v871_v30 = vmul.f32 %v870_v22, %v1487_v37  ;;  %v742_v34 = vrot.slane %v1553_v25, %v732_v0  ;;  %v903_v46 = vmul.f32 %v902_v31, %v1487_v37  ;;  %v927_v47 = vrot.slane %v729_v4, %v926_v32 }
  0x88   : >> { %v735_v14 = vmul.f32 1.442695, %v734_v10  ;;  %v783_v15 = vmul.f32 1.442695, %v782_v11  ;;  %v808_v20 = vmul.f32 1.442695, %v807_v16  ;;  %v789_v51 = vrot.slane %v1553_v25, %v780_v1 }
  0x89   : >> { %v833_v29 = vmul.f32 1.442695, %v832_v21  ;;  %v872_v45 = vmul.f32 1.442695, %v871_v30  ;;  %v743_v50 = vmul.f32 %v742_v34, %v664_v40  ;;  %v904_v57 = vmul.f32 1.442695, %v903_v46 }
  0x8a   : >> { %1268 = vpow2.f32 %v735_v14  ;;  %v928_v58 = vmul.f32 %v927_v47, %v1487_v37  ;;  %v790_v61 = vmul.f32 %v789_v51, %v665_v52  ;;  %v814_v62 = vrot.slane %v1553_v25, %v805_v3  ;;  %v667_v14 = vld [vmem:[%s1545_s15 + $0x20] sm:$0xff]  ;;  %v668_v30 = vld [vmem:[%s1545_s15 + $0x28] sm:$0xff]  ;;  %v669_v52 = vld [vmem:[%s1545_s15 + $0x30] sm:$0xff] }
  0x8b   : >> { %1270 = vpow2.f32 %v783_v15  ;;  %v759_v0 = vrot.slane %v1535_v13, %v1574_v53  ;;  %v839_v3 = vrot.slane %v1553_v25, %v830_v12  ;;  %v878_v12 = vrot.slane %v1553_v25, %v869_v18 }
  0x8c   : >> { %1272 = vpow2.f32 %v808_v20  ;;  %v929_v7 = vmul.f32 1.442695, %v928_v58  ;;  %v815_v10 = vmul.f32 %v814_v62, %v666_v63  ;;  %v675_v20 = vld [vmem:[%s1564_s16 + $0x18] sm:$0xff]  ;;  %v910_v51 = vrot.slane %v1553_v25, %v901_v23  ;;  %v677_v62 = vld [vmem:[%s1564_s16 + $0x28] sm:$0xff] }
  0x8d   : >> { %1274 = vpow2.f32 %v833_v29  ;;  %v760_v11 = vcombine.high %v759_v0, %v759_v0  ;;  %v767_v24 = vrot.slane %v759_v0, %v1574_v53  ;;  %v840_v29 = vmul.f32 %v839_v3, %v667_v14 }
  0x8e   : >> { %1276 = vpow2.f32 %v872_v45 }
  0x8f   : >> { %1278 = vpow2.f32 %v904_v57  ;;  %v774_v28 = vrot.slane %v760_v11, %v1574_v53  ;;  %v799_v47 = vcombine.high %v767_v24, %v767_v24  ;;  %v712_v57 = vmul.f32 %v1535_v13, %v1489_v38  ;;  %v670_v13 = vld [vmem:[%s1545_s15 + $0x38] sm:$0xff] }
  0x90   : >> { %1280 = vpow2.f32 %v929_v7 }
  0x91   : >> { %v801_v0 = vmul.f32 %v799_v47, %v1489_v38  ;;  %v824_v23 = vcombine.high %v774_v28, %v774_v28 }
  0x92   : >> { %v1267_v35 = vpop.eup %1266 }
  0x93   : >> { %v697_v43 = vmul.f32 %v1316_v39, %v1267_v35 }
  0x95   : >> { %v704_v49 = vadd.f32 %v703_v33, %v697_v43 }
  0x97   : >> { %v1269_v48 = vpop.eup %1268  ;;  %v705_v54 = vmul.f32 %v704_v49, %v672_v44  ;;  %v676_v44 = vld [vmem:[%s1564_s16 + $0x20] sm:$0xff] }
  0x98   : >> { %v737_v39 = vmul.f32 %v1269_v48, %v704_v49  ;;  %v1271_v55 = vpop.eup %1270  ;;  %v776_v49 = vmul.f32 %v774_v28, %v1489_v38 }
  0x99   : >> { %v706_v59 = vrot.slane %v705_v54, 4  ;;  %v1273_v5 = vpop.eup %1272 }
  0x9a   : >> { %v744_v60 = vadd.f32 %v743_v50, %v737_v39  ;;  %v1275_v21 = vpop.eup %1274  ;;  %v879_v50 = vmul.f32 %v878_v12, %v668_v30 }
  0x9b   : >> { %v707_v1 = vadd.f32 %v706_v59, %v705_v54  ;;  %v1277_v43 = vpop.eup %1276  ;;  %v856_v59 = vrot.slane %v849_v42, %v1574_v53 }
  0x9c   : >> { %v745_v2 = vmul.f32 %v744_v60, %v673_v56  ;;  %v785_v4 = vmul.f32 %v1271_v55, %v744_v60 }
  0x9d   : >> { %v708_v15 = vrot.slane %v707_v1, 2  ;;  %v888_v41 = vcombine.high %v856_v59, %v856_v59 }
  0x9e   : >> { %v746_v8 = vrot.slane %v745_v2, 4  ;;  %v791_v9 = vadd.f32 %v790_v61, %v785_v4  ;;  %v1279_v61 = vpop.eup %1278 }
  0x9f   : >> { %v709_v31 = vadd.f32 %v708_v15, %v707_v1  ;;  %v1281_v15 = vpop.eup %1280 }
  0xa0   : >> { %v747_v16 = vadd.f32 %v746_v8, %v745_v2  ;;  %v792_v17 = vmul.f32 %v791_v9, %v674_v6  ;;  %v810_v19 = vmul.f32 %v1273_v5, %v791_v9  ;;  %v911_v5 = vmul.f32 %v910_v51, %v669_v52 }
  0xa1   : >> { %v710_v54 = vrot.slane %v709_v31, 1  ;;  %v935_v6 = vrot.slane %v1553_v25, %v926_v32 }
  0xa2   : >> { %v748_v22 = vrot.slane %v747_v16, 2  ;;  %v793_v26 = vrot.slane %v792_v17, 4  ;;  %v816_v27 = vadd.f32 %v815_v10, %v810_v19  ;;  %v826_v19 = vmul.f32 %v824_v23, %v1489_v38 }
  0xa3   : >> { %v711_v7 = vadd.f32 %v710_v54, %v709_v31 }
  0xa4   : >> { %v749_v33 = vadd.f32 %v748_v22, %v747_v16  ;;  %v794_v34 = vadd.f32 %v793_v26, %v792_v17  ;;  %v817_v35 = vmul.f32 %v816_v27, %v675_v20  ;;  %v835_v40 = vmul.f32 %v1275_v21, %v816_v27  ;;  %v678_v16 = vld [vmem:[%s1564_s16 + $0x30] sm:$0xff] }
  0xa5   : >> { %v863_v20 = vrot.slane %v856_v59, %v1574_v53  ;;  %v936_v22 = vmul.f32 %v935_v6, %v670_v13  ;;  %v713_v24 = vadd.f32 %v712_v57, %v711_v7 }
  0xa6   : >> { %v750_v45 = vrot.slane %v749_v33, 1  ;;  %v795_v46 = vrot.slane %v794_v34, 2  ;;  %v818_v48 = vrot.slane %v817_v35, 4  ;;  %v841_v18 = vadd.f32 %v840_v29, %v835_v40 }
  0xa7   : >> { %v895_v40 = vrot.slane %v888_v41, %v1574_v53  ;;  %v920_v51 = vcombine.high %v863_v20, %v863_v20 }
  0xa8   : >> { %v751_v39 = vadd.f32 %v750_v45, %v749_v33  ;;  %v796_v55 = vadd.f32 %v795_v46, %v794_v34  ;;  %v819_v56 = vadd.f32 %v818_v48, %v817_v35  ;;  %v842_v58 = vmul.f32 %v841_v18, %v676_v44  ;;  %v679_v33 = vld [vmem:[%s1564_s16 + $0x38] sm:$0xff] }
  0xa9   : >> { %v874_v60 = vmul.f32 %v1277_v43, %v841_v18  ;;  %v865_v35 = vmul.f32 %v863_v20, %v1489_v38 }
  0xaa   : >> { %v797_v63 = vrot.slane %v796_v55, 1  ;;  %v820_v1 = vrot.slane %v819_v56, 2  ;;  %v843_v2 = vrot.slane %v842_v58, 4  ;;  %v777_v8 = vadd.f32 %v776_v49, %v751_v39 }
  0xab   : >> { %v880_v4 = vadd.f32 %v879_v50, %v874_v60  ;;  %v897_v50 = vmul.f32 %v895_v40, %v1489_v38 }
  0xac   : >> { %v798_v9 = vadd.f32 %v797_v63, %v796_v55  ;;  %v821_v10 = vadd.f32 %v820_v1, %v819_v56  ;;  %v844_v11 = vadd.f32 %v843_v2, %v842_v58  ;;  %v950_v28 = vrot.slane %v777_v8, 7 }
  0xad   : >> { %v881_v3 = vmul.f32 %v880_v4, %v677_v62  ;;  %v906_v14 = vmul.f32 %v1279_v61, %v880_v4  ;;  %v922_v61 = vmul.f32 %v920_v51, %v1489_v38  ;;  %v945_v62 = vcombine.high %v895_v40, %v895_v40 }
  0xae   : >> { %v822_v17 = vrot.slane %v821_v10, 1  ;;  %v845_v21 = vrot.slane %v844_v11, 2  ;;  %v802_v26 = vadd.f32 %v801_v0, %v798_v9  ;;  %v971_v46 = vsel %vm970_vm0, %v713_v24, %v950_v28 }
  0xaf   : >> { %v882_v25 = vrot.slane %v881_v3, 4  ;;  %v912_v32 = vadd.f32 %v911_v5, %v906_v14  ;;  %v947_v9 = vmul.f32 %v945_v62, %v1489_v38 }
  0xb0   : >> { %v823_v27 = vadd.f32 %v822_v17, %v821_v10  ;;  %v846_v29 = vadd.f32 %v845_v21, %v844_v11  ;;  %v953_v45 = vrot.slane %v802_v26, 6 }
  0xb1   : >> { %v883_v12 = vadd.f32 %v882_v25, %v881_v3  ;;  %v913_v30 = vmul.f32 %v912_v32, %v678_v16  ;;  %v931_v31 = vmul.f32 %v1281_v15, %v912_v32 }
  0xb2   : >> { %v827_v34 = vadd.f32 %v826_v19, %v823_v27  ;;  %v847_v42 = vrot.slane %v846_v29, 1  ;;  %v973_v57 = vsel %vm972_vm1, %v971_v46, %v953_v45 }
  0xb3   : >> { %v884_v43 = vrot.slane %v883_v12, 2  ;;  %v914_v44 = vrot.slane %v913_v30, 4  ;;  %v937_v39 = vadd.f32 %v936_v22, %v931_v31  }
  0xb4   : >> { %v848_v47 = vadd.f32 %v847_v42, %v846_v29  ;;  %v956_v52 = vrot.slane %v827_v34, 5 }
  0xb5   : >> { %v885_v48 = vadd.f32 %v884_v43, %v883_v12  ;;  %v915_v49 = vadd.f32 %v914_v44, %v913_v30  ;;  %v938_v18 = vmul.f32 %v937_v39, %v679_v33 }
  0xb6   : >> { %v866_v54 = vadd.f32 %v865_v35, %v848_v47  ;;  %v975_v2 = vsel %vm974_vm2, %v973_v57, %v956_v52 }
  0xb7   : >> { %v886_v55 = vrot.slane %v885_v48, 1  ;;  %v916_v56 = vrot.slane %v915_v49, 2  ;;  %v939_v53 = vrot.slane %v938_v18, 4 }
  0xb8   : >> { %v959_v63 = vrot.slane %v866_v54, 4 }
  0xb9   : >> { %v887_v58 = vadd.f32 %v886_v55, %v885_v48  ;;  %v917_v59 = vadd.f32 %v916_v56, %v915_v49  ;;  %v940_v60 = vadd.f32 %v939_v53, %v938_v18 }
  0xba   : >> { %v977_v13 = vsel %vm976_vm3, %v975_v2, %v959_v63 }
  0xbb   : >> { %v898_v0 = vadd.f32 %v897_v50, %v887_v58  ;;  %v918_v1 = vrot.slane %v917_v59, 1  ;;  %v941_v23 = vrot.slane %v940_v60, 2 }
  0xbd   : >> { %v919_v4 = vadd.f32 %v918_v1, %v917_v59  ;;  %v942_v5 = vadd.f32 %v941_v23, %v940_v60  ;;  %v962_v6 = vrot.slane %v898_v0, 3 }
  0xbf   : >> { %v923_v7 = vadd.f32 %v922_v61, %v919_v4  ;;  %v943_v8 = vrot.slane %v942_v5, 1  ;;  %v979_v3 = vsel %vm978_vm4, %v977_v13, %v962_v6 }
  0xc1   : >> { %v944_v10 = vadd.f32 %v943_v8, %v942_v5  ;;  %v965_v11 = vrot.slane %v923_v7, 2 }
  0xc3   : >> { %v948_v14 = vadd.f32 %v947_v9, %v944_v10  ;;  %v981_v15 = vsel %vm980_vm5, %v979_v3, %v965_v11 }
  0xc4   : > { %653 = sbr.rel (!%p651_p11) target bundleno = 82 (0x52), region = 318 }
  0xc5   : >> { %v968_v16 = vrot.slane %v948_v14, 1 }
  0xc7   : >> { %v983_v17 = vsel %vm982_vm6, %v981_v15, %v968_v16 }
  0xc8   : >> { %985 = vst [vmem:[%s984_s24] sm:$0xff] %v983_v17 }
  0xc9   : > { %992 = sbr.rel (!%p1398_p5) target bundleno = 209 (0xd1), region = 211  ;;  %s1212_s17 = sshll.u32 (%p1398_p5), %s1379_s27, 3 }
  0xca   : > { %s994_s11 = scalar_lea.vmem (%p1398_p5), %s1655_s7, %s1212_s17 }
  0xcf   : > { %v1025_v19 = vld [vmem:[%s1496_s23] sm:$0xff]  ;;  %v1027_v20 = vld [vmem:[%s1496_s23 + $0x8] sm:$0xff] }
  0xd0   : > { %1026 = vst [vmem:[%s994_s11] sm:$0xff] %v1025_v19  ;;  %1028 = vst [vmem:[%s994_s11 + $0x80] sm:$0xff] %v1027_v20 }
  0xd1 PF: > { %p14_p12 = scmp.ge.s32.totalorder %s1382_s28, 18   ;;  %s1658_s24 = smov %s1308_s25 }
  0xd2   : > { %s1659_s25 = smov %s1392_s8  ;;  %s1660_s26 = smov %s1382_s28 }
  0xd3   :  { %16 = sbr.rel (!%p14_p12) target bundleno = 2 (0x2), region = 329 }

// kernel: run.20
= control target key start
LH: loop header
LB: loop body
LE: loop exit
PB: predicated region body
PF: predicated region fallthrough
CT: control target
= control target key end

     0   :  { %s1501_s0 = inlined_call_operand.vmem [shape: f32[24,512], index: 0, kind: input, shape index: {}]   ;;  %s1502_s4 = inlined_call_operand.vmem [shape: bf16[512,256], index: 4, kind: input, shape index: {}]   ;;  %s1503_s1 = inlined_call_operand.vmem [shape: f32[24,512], index: 1, kind: input, shape index: {}]   ;;  %s1504_s2 = inlined_call_operand.vmem [shape: f32[1,512], index: 2, kind: input, shape index: {}]   ;;  %s1505_s3 = inlined_call_operand.vmem [shape: f32[1,512], index: 3, kind: input, shape index: {}]   ;;  %s1506_s5 = inlined_call_operand.vmem [shape: f32[24,256], index: 5, kind: output, shape index: {}]  }
   0x1   :  { %v1050_v0 = vld [vmem:[%s1501_s0] sm:$0xff]  ;;  %v1055_v1 = vld [vmem:[%s1501_s0 + $0x8] sm:$0xff]  ;;  %v1060_v2 = vld [vmem:[%s1501_s0 + $0x10] sm:$0xff] }
   0x2   :  { %v32_v3 = vadd.f32 %v1055_v1, %v1050_v0  ;;  %v1067_v4 = vld [vmem:[%s1501_s0 + $0x40] sm:$0xff]  ;;  %v1072_v5 = vld [vmem:[%s1501_s0 + $0x48] sm:$0xff]  ;;  %v1077_v6 = vld [vmem:[%s1501_s0 + $0x18] sm:$0xff] }
   0x3   :  { %v1082_v7 = vld [vmem:[%s1501_s0 + $0x50] sm:$0xff]  ;;  %v42_v8 = vadd.f32 %v1072_v5, %v1067_v4  ;;  %v1089_v9 = vld [vmem:[%s1501_s0 + $0x20] sm:$0xff]  ;;  %v1095_v11 = vld [vmem:[%s1501_s0 + $0x58] sm:$0xff] }
   0x4   :  { %v33_v10 = vadd.f32 %v32_v3, %v1060_v2  ;;  %v1100_v12 = vld [vmem:[%s1501_s0 + $0x28] sm:$0xff]  ;;  %v1105_v13 = vld [vmem:[%s1501_s0 + $0x30] sm:$0xff]  ;;  %v1114_v17 = vld [vmem:[%s1501_s0 + $0x38] sm:$0xff] }
   0x5   :  { %v43_v14 = vadd.f32 %v42_v8, %v1082_v7  ;;  %v37_v15 = vadd.f32 %v1100_v12, %v1089_v9  ;;  %v867_v21 = vld [vmem:[%s1502_s4 + $0x74] ss:$8 sps:$4 sm:$0xff]   ;;  %v871_v23 = vld [vmem:[%s1502_s4 + $0x70] ss:$8 sps:$4 sm:$0xff]   ;;  %v873_v25 = vld [vmem:[%s1502_s4 + $0x64] ss:$8 sps:$4 sm:$0xff]  }
   0x6   :  { %v34_v16 = vadd.f32 %v33_v10, %v1077_v6  ;;  %v869_v22 = vld [vmem:[%s1502_s4 + $0x174] ss:$8 sps:$4 sm:$0xff]   ;;  %679 = vmatprep.subr.bf16.mxu0 %v867_v21  ;;  %v872_v24 = vld [vmem:[%s1502_s4 + $0x170] ss:$8 sps:$4 sm:$0xff]   ;;  %v875_v26 = vld [vmem:[%s1502_s4 + $0x164] ss:$8 sps:$4 sm:$0xff]  }
   0x7   :  { %v44_v18 = vadd.f32 %v43_v14, %v1095_v11  ;;  %v38_v19 = vadd.f32 %v37_v15, %v1105_v13  ;;  %730 = vmatprep.subr.bf16.mxu1 %v869_v22  ;;  %680 = vmatpush1.bf16.msra.mxu0 %v871_v23  ;;  %v877_v27 = vld [vmem:[%s1502_s4 + $0x60] ss:$8 sps:$4 sm:$0xff]   ;;  %v879_v29 = vld [vmem:[%s1502_s4 + $0x54] ss:$8 sps:$4 sm:$0xff]   ;;  %v883_v31 = vld [vmem:[%s1502_s4 + $0x50] ss:$8 sps:$4 sm:$0xff]  }
   0x8   :  { %35 = vadd.xlane.f32.xlu0 %v34_v16  ;;  %731 = vmatpush1.bf16.msra.mxu1 %v872_v24  ;;  %v878_v28 = vld [vmem:[%s1502_s4 + $0x160] ss:$8 sps:$4 sm:$0xff]   ;;  %v881_v30 = vld [vmem:[%s1502_s4 + $0x154] ss:$8 sps:$4 sm:$0xff]   ;;  %v884_v32 = vld [vmem:[%s1502_s4 + $0x150] ss:$8 sps:$4 sm:$0xff]  }
   0x9   :  { %45 = vadd.xlane.f32.xlu1 %v44_v18  ;;  %v39_v20 = vadd.f32 %v38_v19, %v1114_v17  ;;  %681 = vmatprep.subr.bf16.mxu0 %v873_v25  ;;  %v885_v33 = vld [vmem:[%s1502_s4 + $0x44] ss:$8 sps:$4 sm:$0xff]   ;;  %v889_v35 = vld [vmem:[%s1502_s4 + $0x40] ss:$8 sps:$4 sm:$0xff]   ;;  %v891_v37 = vld [vmem:[%s1502_s4 + $0x34] ss:$8 sps:$4 sm:$0xff]  }
   0xa   :  { %732 = vmatprep.subr.bf16.mxu1 %v875_v26  ;;  %v887_v34 = vld [vmem:[%s1502_s4 + $0x144] ss:$8 sps:$4 sm:$0xff]   ;;  %v890_v36 = vld [vmem:[%s1502_s4 + $0x140] ss:$8 sps:$4 sm:$0xff]   ;;  %v893_v38 = vld [vmem:[%s1502_s4 + $0x134] ss:$8 sps:$4 sm:$0xff]  }
   0xb   :  { %682 = vmatpush1.bf16.msra.mxu0 %v877_v27  ;;  %v895_v39 = vld [vmem:[%s1502_s4 + $0x30] ss:$8 sps:$4 sm:$0xff]   ;;  %v897_v41 = vld [vmem:[%s1502_s4 + $0x24] ss:$8 sps:$4 sm:$0xff]   ;;  %v901_v43 = vld [vmem:[%s1502_s4 + $0x20] ss:$8 sps:$4 sm:$0xff]  }
   0xc   :  { %40 = vadd.xlane.f32.xlu0 %v39_v20  ;;  %733 = vmatpush1.bf16.msra.mxu1 %v878_v28  ;;  %v896_v40 = vld [vmem:[%s1502_s4 + $0x130] ss:$8 sps:$4 sm:$0xff]   ;;  %v899_v42 = vld [vmem:[%s1502_s4 + $0x124] ss:$8 sps:$4 sm:$0xff]   ;;  %v902_v44 = vld [vmem:[%s1502_s4 + $0x120] ss:$8 sps:$4 sm:$0xff]  }
   0xd   :  { %683 = vmatprep.subr.bf16.mxu0 %v879_v29  ;;  %734 = vmatprep.subr.bf16.mxu1 %v881_v30  ;;  %v903_v45 = vld [vmem:[%s1502_s4 + $0x14] ss:$8 sps:$4 sm:$0xff]   ;;  %v907_v47 = vld [vmem:[%s1502_s4 + $0x10] ss:$8 sps:$4 sm:$0xff]   ;;  %v909_v49 = vld [vmem:[%s1502_s4 + $0x4] ss:$8 sps:$4 sm:$0xff]  }
   0xe   :  { %v905_v46 = vld [vmem:[%s1502_s4 + $0x114] ss:$8 sps:$4 sm:$0xff]   ;;  %v908_v48 = vld [vmem:[%s1502_s4 + $0x110] ss:$8 sps:$4 sm:$0xff]   ;;  %v911_v50 = vld [vmem:[%s1502_s4 + $0x104] ss:$8 sps:$4 sm:$0xff]  }
   0xf   :  { %684 = vmatpush1.bf16.msra.mxu0 %v883_v31  ;;  %v913_v51 = vld [vmem:[%s1502_s4] ss:$8 sps:$4 sm:$0xff]   ;;  %v915_v28 = vld [vmem:[%s1502_s4 + $0xf4] ss:$8 sps:$4 sm:$0xff]   ;;  %v919_v30 = vld [vmem:[%s1502_s4 + $0xf0] ss:$8 sps:$4 sm:$0xff]  }
  0x10   :  { %735 = vmatpush1.bf16.msra.mxu1 %v884_v32  ;;  %685 = vmatprep.subr.bf16.mxu0 %v885_v33  ;;  %v914_v52 = vld [vmem:[%s1502_s4 + $0x100] ss:$8 sps:$4 sm:$0xff]   ;;  %v917_v29 = vld [vmem:[%s1502_s4 + $0x1f4] ss:$8 sps:$4 sm:$0xff]   ;;  %v920_v31 = vld [vmem:[%s1502_s4 + $0x1f0] ss:$8 sps:$4 sm:$0xff]  }
  0x11   :  { %736 = vmatprep.subr.bf16.mxu1 %v887_v34  ;;  %v921_v32 = vld [vmem:[%s1502_s4 + $0xe4] ss:$8 sps:$4 sm:$0xff]   ;;  %v925_v34 = vld [vmem:[%s1502_s4 + $0xe0] ss:$8 sps:$4 sm:$0xff]  }
  0x12   :  { %v923_v33 = vld [vmem:[%s1502_s4 + $0x1e4] ss:$8 sps:$4 sm:$0xff]  }
  0x13   :  { %686 = vmatpush1.bf16.msra.mxu0 %v889_v35  ;;  %v926_v35 = vld [vmem:[%s1502_s4 + $0x1e0] ss:$8 sps:$4 sm:$0xff]  }
  0x14   :  { %737 = vmatpush1.bf16.msra.mxu1 %v890_v36  ;;  %687 = vmatprep.subr.bf16.mxu0 %v891_v37  ;;  %v927_v36 = vld [vmem:[%s1502_s4 + $0xd4] ss:$8 sps:$4 sm:$0xff]  }
  0x15   :  { %738 = vmatprep.subr.bf16.mxu1 %v893_v38  ;;  %v929_v37 = vld [vmem:[%s1502_s4 + $0x1d4] ss:$8 sps:$4 sm:$0xff]   ;;  %v931_v38 = vld [vmem:[%s1502_s4 + $0xd0] ss:$8 sps:$4 sm:$0xff]  }
  0x17   :  { %688 = vmatpush1.bf16.msra.mxu0 %v895_v39  ;;  %v932_v39 = vld [vmem:[%s1502_s4 + $0x1d0] ss:$8 sps:$4 sm:$0xff]  }
  0x18   :  { %739 = vmatpush1.bf16.msra.mxu1 %v896_v40  ;;  %689 = vmatprep.subr.bf16.mxu0 %v897_v41  ;;  %v933_v40 = vld [vmem:[%s1502_s4 + $0xc4] ss:$8 sps:$4 sm:$0xff]  }
  0x19   :  { %740 = vmatprep.subr.bf16.mxu1 %v899_v42  ;;  %v935_v41 = vld [vmem:[%s1502_s4 + $0x1c4] ss:$8 sps:$4 sm:$0xff]   ;;  %v937_v42 = vld [vmem:[%s1502_s4 + $0xc0] ss:$8 sps:$4 sm:$0xff]  }
  0x1b   :  { %690 = vmatpush1.bf16.msra.mxu0 %v901_v43  ;;  %v938_v43 = vld [vmem:[%s1502_s4 + $0x1c0] ss:$8 sps:$4 sm:$0xff]  }
  0x1c   :  { %741 = vmatpush1.bf16.msra.mxu1 %v902_v44  ;;  %691 = vmatprep.subr.bf16.mxu0 %v903_v45  ;;  %v939_v44 = vld [vmem:[%s1502_s4 + $0xb4] ss:$8 sps:$4 sm:$0xff]  }
  0x1d   :  { %742 = vmatprep.subr.bf16.mxu1 %v905_v46  ;;  %v941_v45 = vld [vmem:[%s1502_s4 + $0x1b4] ss:$8 sps:$4 sm:$0xff]   ;;  %v943_v46 = vld [vmem:[%s1502_s4 + $0xb0] ss:$8 sps:$4 sm:$0xff]  }
  0x1f   :  { %692 = vmatpush1.bf16.msra.mxu0 %v907_v47  ;;  %v944_v47 = vld [vmem:[%s1502_s4 + $0x1b0] ss:$8 sps:$4 sm:$0xff]  }
  0x20   :  { %743 = vmatpush1.bf16.msra.mxu1 %v908_v48  ;;  %693 = vmatprep.subr.bf16.mxu0 %v909_v49  ;;  %v945_v48 = vld [vmem:[%s1502_s4 + $0xa4] ss:$8 sps:$4 sm:$0xff]  }
  0x21   :  { %744 = vmatprep.subr.bf16.mxu1 %v911_v50  ;;  %v947_v49 = vld [vmem:[%s1502_s4 + $0x1a4] ss:$8 sps:$4 sm:$0xff]   ;;  %v949_v50 = vld [vmem:[%s1502_s4 + $0xa0] ss:$8 sps:$4 sm:$0xff]  }
  0x23   :  { %694 = vmatpush1.bf16.msra.mxu0 %v913_v51  ;;  %v950_v51 = vld [vmem:[%s1502_s4 + $0x1a0] ss:$8 sps:$4 sm:$0xff]  }
  0x24   :  { %745 = vmatpush1.bf16.msra.mxu1 %v914_v52  ;;  %695 = vmatprep.subr.bf16.mxu0 %v915_v28  ;;  %v951_v52 = vld [vmem:[%s1502_s4 + $0x94] ss:$8 sps:$4 sm:$0xff]   ;;  %v1434_v28 = vld [vmem:[%s1503_s1 + $0x40] sm:$0xff] }
  0x25   :  { %746 = vmatprep.subr.bf16.mxu1 %v917_v29  ;;  %v1439_v29 = vld [vmem:[%s1503_s1 + $0x50] sm:$0xff] }
  0x27   :  { %696 = vmatpush2.bf16.msra.mxu0 %v919_v30 }
  0x28   :  { %747 = vmatpush2.bf16.msra.mxu1 %v920_v31  ;;  %697 = vmatprep.subr.bf16.mxu0 %v921_v32  ;;  %v799_v32 = vmul.f32 -1.442695, %v1434_v28 }
  0x29   :  { %748 = vmatprep.subr.bf16.mxu1 %v923_v33 }
  0x2b   :  { %698 = vmatpush2.bf16.msra.mxu0 %v925_v34  ;;  %v801_v34 = vmul.f32 -1.442695, %v1439_v29 }
  0x2c   :  { %749 = vmatpush2.bf16.msra.mxu1 %v926_v35  ;;  %699 = vmatprep.subr.bf16.mxu0 %v927_v36 }
  0x2d   :  { %750 = vmatprep.subr.bf16.mxu1 %v929_v37 }
  0x2f   :  { %700 = vmatpush2.bf16.msra.mxu0 %v931_v38 }
  0x30   :  { %751 = vmatpush2.bf16.msra.mxu1 %v932_v39  ;;  %701 = vmatprep.subr.bf16.mxu0 %v933_v40 }
  0x31   :  { %752 = vmatprep.subr.bf16.mxu1 %v935_v41 }
  0x33   :  { %702 = vmatpush2.bf16.msra.mxu0 %v937_v42 }
  0x34   :  { %753 = vmatpush2.bf16.msra.mxu1 %v938_v43  ;;  %703 = vmatprep.subr.bf16.mxu0 %v939_v44 }
  0x35   :  { %754 = vmatprep.subr.bf16.mxu1 %v941_v45 }
  0x37   :  { %704 = vmatpush2.bf16.msra.mxu0 %v943_v46 }
  0x38   :  { %755 = vmatpush2.bf16.msra.mxu1 %v944_v47  ;;  %705 = vmatprep.subr.bf16.mxu0 %v945_v48 }
  0x39   :  { %756 = vmatprep.subr.bf16.mxu1 %v947_v49 }
  0x3b   :  { %706 = vmatpush2.bf16.msra.mxu0 %v949_v50 }
  0x3c   :  { %757 = vmatpush2.bf16.msra.mxu1 %v950_v51  ;;  %707 = vmatprep.subr.bf16.mxu0 %v951_v52 }
  0x91   :  { %v36_v53 = vpop.xlane.xlu0 %35 }
  0x92   :  { %v48_v54 = vmul.f32 0.001953125, %v36_v53  ;;  %v46_v55 = vpop.xlane.xlu1 %45  ;;  %v953_v53 = vld [vmem:[%s1502_s4 + $0x194] ss:$8 sps:$4 sm:$0xff]  }
  0x93   :  { %v50_v56 = vmul.f32 0.001953125, %v46_v55  ;;  %v956_v55 = vld [vmem:[%s1502_s4 + $0x190] ss:$8 sps:$4 sm:$0xff]   ;;  %758 = vmatprep.subr.bf16.mxu1 %v953_v53 }
  0x94   :  { %v1216_v57 = vsub.f32 %v1050_v0, %v48_v54  ;;  %v1219_v58 = vsub.f32 %v1055_v1, %v48_v54  ;;  %v1222_v59 = vsub.f32 %v1060_v2, %v48_v54  ;;  %v1225_v60 = vsub.f32 %v1077_v6, %v48_v54  ;;  %v955_v54 = vld [vmem:[%s1502_s4 + $0x90] ss:$8 sps:$4 sm:$0xff]   ;;  %759 = vmatpush2.bf16.msra.mxu1 %v956_v55 }
  0x95   :  { %v1228_v61 = vsub.f32 %v1067_v4, %v50_v56  ;;  %v1231_v62 = vsub.f32 %v1072_v5, %v50_v56  ;;  %v41_v63 = vpop.xlane.xlu0 %40  ;;  %v1234_v3 = vsub.f32 %v1082_v7, %v50_v56  ;;  %v1237_v0 = vsub.f32 %v1095_v11, %v50_v56  ;;  %v957_v56 = vld [vmem:[%s1502_s4 + $0x84] ss:$8 sps:$4 sm:$0xff]   ;;  %708 = vmatpush2.bf16.msra.mxu0 %v955_v54 }
  0x96   :  { %v49_v1 = vmul.f32 0.001953125, %v41_v63  ;;  %v63_v2 = vmul.f32 %v1216_v57, %v1216_v57  ;;  %v64_v6 = vmul.f32 %v1219_v58, %v1219_v58  ;;  %v65_v11 = vmul.f32 %v1222_v59, %v1222_v59  ;;  %v959_v63 = vld [vmem:[%s1502_s4 + $0x184] ss:$8 sps:$4 sm:$0xff]   ;;  %709 = vmatprep.subr.bf16.mxu0 %v957_v56 }
  0x97   :  { %v71_v4 = vmul.f32 %v1228_v61, %v1228_v61  ;;  %v72_v5 = vmul.f32 %v1231_v62, %v1231_v62  ;;  %v73_v7 = vmul.f32 %v1234_v3, %v1234_v3  ;;  %v66_v15 = vmul.f32 %v1225_v60, %v1225_v60  ;;  %760 = vmatprep.subr.bf16.mxu1 %v959_v63 }
  0x98   :  { %v1250_v8 = vsub.f32 %v1089_v9, %v49_v1  ;;  %v1253_v10 = vsub.f32 %v1100_v12, %v49_v1  ;;  %v75_v14 = vadd.f32 %v64_v6, %v63_v2  ;;  %v74_v16 = vmul.f32 %v1237_v0, %v1237_v0  ;;  %v962_v2 = vld [vmem:[%s1502_s4 + $0x180] ss:$8 sps:$4 sm:$0xff]  }
  0x99   :  { %v85_v18 = vadd.f32 %v72_v5, %v71_v4  ;;  %v1262_v19 = vsub.f32 %v1105_v13, %v49_v1  ;;  %v1265_v9 = vsub.f32 %v1114_v17, %v49_v1  ;;  %v961_v1 = vld [vmem:[%s1502_s4 + $0x80] ss:$8 sps:$4 sm:$0xff]   ;;  %761 = vmatpush2.bf16.msra.mxu1 %v962_v2  ;;  %v1379_v4 = vld [vmem:[%s1503_s1 + $0x18] sm:$0xff]  ;;  %v113_v63 = vlaneseq }
  0x9a   :  { %v76_v20 = vadd.f32 %v75_v14, %v65_v11  ;;  %v67_v12 = vmul.f32 %v1250_v8, %v1250_v8  ;;  %v68_v21 = vmul.f32 %v1253_v10, %v1253_v10  ;;  %710 = vmatpush2.bf16.msra.mxu0 %v961_v1  ;;  %v1374_v6 = vld [vmem:[%s1503_s1 + $0x8] sm:$0xff]  ;;  %v1390_v11 = vld [vmem:[%s1503_s1 + $0x38] sm:$0xff]  ;;  %v794_v14 = vmul.f32 -1.442695, %v1379_v4 }
  0x9b   :  { %v86_v22 = vadd.f32 %v85_v18, %v73_v7  ;;  %v69_v24 = vmul.f32 %v1262_v19, %v1262_v19  ;;  %v70_v13 = vmul.f32 %v1265_v9, %v1265_v9  ;;  %v1384_v5 = vld [vmem:[%s1503_s1 + $0x28] sm:$0xff]  ;;  %v792_v7 = vmul.f32 -1.442695, %v1374_v6  ;;  %v1402_v18 = vld [vmem:[%s1503_s1 + $0x20] sm:$0xff] }
  0x9c   :  { %v77_v23 = vadd.f32 %v76_v20, %v66_v15  ;;  %v80_v25 = vadd.f32 %v68_v21, %v67_v12  ;;  %v1396_v15 = vld [vmem:[%s1503_s1] sm:$0xff]  ;;  %v798_v20 = vmul.f32 -1.442695, %v1390_v11  ;;  %v1408_v12 = vld [vmem:[%s1503_s1 + $0x10] sm:$0xff] }
  0x9d   :  { %v87_v26 = vadd.f32 %v86_v22, %v74_v16  ;;  %v796_v16 = vmul.f32 -1.442695, %v1384_v5  ;;  %963 = vpow2.f32 %v792_v7  ;;  %v791_v21 = vmul.f32 -1.442695, %v1396_v15  ;;  %v1414_v22 = vld [vmem:[%s1503_s1 + $0x30] sm:$0xff] }
  0x9e   :  { %78 = vadd.xlane.f32.xlu1 %v77_v23  ;;  %v81_v27 = vadd.f32 %v80_v25, %v69_v24  ;;  %965 = vpow2.f32 %v794_v14  ;;  %v795_v23 = vmul.f32 -1.442695, %v1402_v18  ;;  %v1420_v24 = vld [vmem:[%s1503_s1 + $0x48] sm:$0xff]  ;;  %v793_v25 = vmul.f32 -1.442695, %v1408_v12 }
  0x9f   :  { %967 = vpow2.f32 %v796_v16 }
  0xa0   :  { %v82_v17 = vadd.f32 %v81_v27, %v70_v13  ;;  %969 = vpow2.f32 %v798_v20  ;;  %v1427_v13 = vld [vmem:[%s1503_s1 + $0x58] sm:$0xff]  ;;  %v800_v27 = vmul.f32 -1.442695, %v1420_v24 }
  0xa1   :  { %971 = vpow2.f32 %v791_v21  ;;  %v114_v21 = vshrl.u32 %v113_v63, 7 }
  0xa2   :  { %88 = vadd.xlane.f32.xlu1 %v87_v26  ;;  %83 = vadd.xlane.f32.xlu0 %v82_v17  ;;  %v797_v26 = vmul.f32 -1.442695, %v1414_v22  ;;  %973 = vpow2.f32 %v795_v23  ;;  %v802_v17 = vmul.f32 -1.442695, %v1427_v13 }
  0xa3   :  { %975 = vpow2.f32 %v793_v25 }
  0xa4   :  { %977 = vpow2.f32 %v797_v26 }
  0xa5   :  { %979 = vpow2.f32 %v800_v27 }
  0xa6   :  { %981 = vpow2.f32 %v802_v17 }
  0xa7   :  { %983 = vpow2.f32 %v799_v32  ;;  %v127_v32 = vsub.s32 3, %v114_v21 }
  0xa8   :  { %985 = vpow2.f32 %v801_v34  ;;  %v111_v34 = vld [vmem:[%s1504_s2] sm:$0xf] }
  0xaa   :  { %v964_v30 = vpop.eup %963 }
  0xab   :  { %v966_v31 = vpop.eup %965  ;;  %v228_v36 = vadd.f32 1.0, %v964_v30 }
  0xac   :  { %v968_v33 = vpop.eup %967  ;;  %v230_v38 = vadd.f32 1.0, %v966_v31  ;;  %v119_v31 = vsub.s32 1, %v114_v21 }
  0xad   :  { %v970_v35 = vpop.eup %969  ;;  %v232_v40 = vadd.f32 1.0, %v968_v33  ;;  %987 = vrcp.f32 %v228_v36  ;;  %v123_v36 = vsub.s32 2, %v114_v21 }
  0xae   :  { %v972_v37 = vpop.eup %971  ;;  %v234_v42 = vadd.f32 1.0, %v970_v35  ;;  %989 = vrcp.f32 %v230_v38  ;;  %v115_v35 = vsub.s32 0, %v114_v21  ;;  %v145_v38 = vld [vmem:[%s1505_s3] sm:$0xf] }
  0xaf   :  { %v974_v39 = vpop.eup %973  ;;  %v227_v44 = vadd.f32 1.0, %v972_v37  ;;  %991 = vrcp.f32 %v232_v40 }
  0xb0   :  { %v976_v41 = vpop.eup %975  ;;  %v231_v46 = vadd.f32 1.0, %v974_v39  ;;  %993 = vrcp.f32 %v234_v42  ;;  %v128_v42 = vrot.slane %v111_v34, %v127_v32 }
  0xb1   :  { %v978_v43 = vpop.eup %977  ;;  %v229_v47 = vadd.f32 1.0, %v976_v41  ;;  %995 = vrcp.f32 %v227_v44  ;;  %v120_v41 = vrot.slane %v111_v34, %v119_v31  ;;  %v154_v44 = vrot.slane %v145_v38, %v119_v31 }
  0xb2   :  { %v980_v45 = vpop.eup %979  ;;  %v233_v49 = vadd.f32 1.0, %v978_v43  ;;  %997 = vrcp.f32 %v231_v46  ;;  %v116_v46 = vrot.slane %v111_v34, %v115_v35 }
  0xb3   :  { %v982_v48 = vpop.eup %981  ;;  %v236_v51 = vadd.f32 1.0, %v980_v45  ;;  %999 = vrcp.f32 %v229_v47  ;;  %v162_v45 = vrot.slane %v145_v38, %v127_v32  ;;  %v124_v47 = vrot.slane %v111_v34, %v123_v36 }
  0xb4   :  { %v238_v53 = vadd.f32 1.0, %v982_v48  ;;  %1001 = vrcp.f32 %v233_v49  ;;  %v984_v7 = vpop.eup %983 }
  0xb5   :  { %1003 = vrcp.f32 %v236_v51  ;;  %v986_v20 = vpop.eup %985  ;;  %v235_v26 = vadd.f32 1.0, %v984_v7  ;;  %v1451_v51 = vrot.slane %v145_v38, %v115_v35 }
  0xb6   :  { %v237_v17 = vadd.f32 1.0, %v986_v20 }
  0xba   :  { %v988_v23 = vpop.eup %987 }
  0xbb   :  { %v990_v25 = vpop.eup %989  ;;  %v264_v49 = vmul.f32 %v988_v23, %v1374_v6 }
  0xbc   :  { %v992_v27 = vpop.eup %991 }
  0xbd   :  { %v994_v30 = vpop.eup %993 }
  0xbe   :  { %v996_v33 = vpop.eup %995 }
  0xbf   :  { %v998_v37 = vpop.eup %997  ;;  %v263_v6 = vmul.f32 %v996_v33, %v1396_v15 }
  0xc0   :  { %v1000_v39 = vpop.eup %999 }
  0xc1   :  { %v1002_v40 = vpop.eup %1001 }
  0xc2   :  { %v1004_v43 = vpop.eup %1003 }
 0x127   :  { %v79_v50 = vpop.xlane.xlu1 %78 }
 0x128   :  { %v90_v52 = vmul.f32 0.001953125, %v79_v50  ;;  %v266_v50 = vmul.f32 %v990_v25, %v1379_v4  ;;  %v265_v4 = vmul.f32 %v1000_v39, %v1408_v12 }
 0x12a   :  { %v93_v54 = vadd.f32 1e-05, %v90_v52  ;;  %v1453_v52 = vrot.slane %v145_v38, %v123_v36 }
 0x12b   :  { %v89_v55 = vpop.xlane.xlu1 %88  ;;  %v84_v56 = vpop.xlane.xlu0 %83 }
 0x12c   :  { %1005 = vrsqrt.f32 %v93_v54  ;;  %v92_v1 = vmul.f32 0.001953125, %v89_v55  ;;  %v91_v2 = vmul.f32 0.001953125, %v84_v56 }
 0x12d   :  { %1007 = vrcp.f32 %v238_v53 }
 0x12e   :  { %v95_v14 = vadd.f32 1e-05, %v92_v1  ;;  %v94_v16 = vadd.f32 1e-05, %v91_v2  ;;  %v268_v1 = vmul.f32 %v992_v27, %v1384_v5  ;;  %v270_v2 = vmul.f32 %v994_v30, %v1390_v11 }
 0x130   :  { %1009 = vrsqrt.f32 %v94_v16 }
 0x131   :  { %1011 = vrsqrt.f32 %v95_v14 }
 0x132   :  { %1013 = vrcp.f32 %v235_v26 }
 0x133   :  { %1015 = vrcp.f32 %v237_v17 }
 0x139   :  { %v1006_v48 = vpop.eup %1005 }
 0x13a   :  { %v1008_v53 = vpop.eup %1007  ;;  %v100_v54 = vmul.f32 %v1006_v48, %v1219_v58  ;;  %v102_v55 = vmul.f32 %v1006_v48, %v1225_v60  ;;  %v99_v56 = vmul.f32 %v1006_v48, %v1216_v57  ;;  %v101_v63 = vmul.f32 %v1006_v48, %v1222_v59 }
 0x13b   :  { %v267_v58 = vmul.f32 %v998_v37, %v1402_v18  ;;  %v269_v60 = vmul.f32 %v1002_v40, %v1414_v22  ;;  %v272_v57 = vmul.f32 %v1004_v43, %v1420_v24  ;;  %v274_v59 = vmul.f32 %v1008_v53, %v1427_v13 }
 0x13c   :  { %v134_v7 = vmul.f32 %v120_v41, %v100_v54  ;;  %v136_v14 = vmul.f32 %v128_v42, %v102_v55  ;;  %v133_v16 = vmul.f32 %v116_v46, %v99_v56  ;;  %v135_v20 = vmul.f32 %v124_v47, %v101_v63 }
 0x13d   :  { %v1010_v21 = vpop.eup %1009 }
 0x13e   :  { %v168_v5 = vadd.f32 %v154_v44, %v134_v7  ;;  %v170_v23 = vadd.f32 %v162_v45, %v136_v14  ;;  %v167_v11 = vadd.f32 %v1451_v51, %v133_v16  ;;  %v169_v15 = vadd.f32 %v1453_v52, %v135_v20  ;;  %v1012_v12 = vpop.eup %1011 }
 0x13f   :  { %v104_v25 = vmul.f32 %v1010_v21, %v1253_v10  ;;  %v106_v26 = vmul.f32 %v1010_v21, %v1265_v9  ;;  %v103_v18 = vmul.f32 %v1010_v21, %v1250_v8  ;;  %v105_v22 = vmul.f32 %v1010_v21, %v1262_v19  ;;  %v1014_v34 = vpop.eup %1013 }
 0x140   :  { %v276_v27 = vmul.f32 %v264_v49, %v168_v5  ;;  %v278_v24 = vmul.f32 %v266_v50, %v170_v23  ;;  %v275_v17 = vmul.f32 %v263_v6, %v167_v11  ;;  %v277_v13 = vmul.f32 %v265_v4, %v169_v15  ;;  %v1016_v8 = vpop.eup %1015 }
 0x141   :  { %v138_v30 = vmul.f32 %v120_v41, %v104_v25  ;;  %v140_v31 = vmul.f32 %v128_v42, %v106_v26  ;;  %v137_v32 = vmul.f32 %v116_v46, %v103_v18  ;;  %v139_v33 = vmul.f32 %v124_v47, %v105_v22 }
 0x142   :  { %v108_v35 = vmul.f32 %v1012_v12, %v1231_v62  ;;  %v110_v36 = vmul.f32 %v1012_v12, %v1237_v0  ;;  %v107_v10 = vmul.f32 %v1012_v12, %v1228_v61  ;;  %v109_v9 = vmul.f32 %v1012_v12, %v1234_v3 }
 0x143   :  { %v172_v37 = vadd.f32 %v154_v44, %v138_v30  ;;  %v174_v19 = vadd.f32 %v162_v45, %v140_v31  ;;  %v171_v38 = vadd.f32 %v1451_v51, %v137_v32  ;;  %v173_v39 = vadd.f32 %v1453_v52, %v139_v33 }
 0x144   :  { %v142_v40 = vmul.f32 %v120_v41, %v108_v35  ;;  %v144_v43 = vmul.f32 %v128_v42, %v110_v36  ;;  %v141_v48 = vmul.f32 %v116_v46, %v107_v10  ;;  %v143_v49 = vmul.f32 %v124_v47, %v109_v9 }
 0x145   :  { %v280_v50 = vmul.f32 %v268_v1, %v172_v37  ;;  %v282_v53 = vmul.f32 %v270_v2, %v174_v19  ;;  %v279_v62 = vmul.f32 %v267_v58, %v171_v38  ;;  %v281_v54 = vmul.f32 %v269_v60, %v173_v39 }
 0x146   :  { %v176_v0 = vadd.f32 %v154_v44, %v142_v40  ;;  %v178_v55 = vadd.f32 %v162_v45, %v144_v43  ;;  %v271_v61 = vmul.f32 %v1014_v34, %v1434_v28  ;;  %v273_v3 = vmul.f32 %v1016_v8, %v1439_v29 }
 0x147   :  { %v288_v56 = vpack.c.bf16 %v280_v50, %v276_v27  ;;  %v290_v63 = vpack.c.bf16 %v282_v53, %v278_v24  ;;  %v287_v6 = vpack.c.bf16 %v279_v62, %v275_v17  ;;  %v289_v4 = vpack.c.bf16 %v281_v54, %v277_v13 }
 0x148   :  { %v284_v7 = vmul.f32 %v272_v57, %v176_v0  ;;  %v286_v14 = vmul.f32 %v274_v59, %v178_v55  ;;  %v175_v41 = vadd.f32 %v1451_v51, %v141_v48  ;;  %v177_v42 = vadd.f32 %v1453_v52, %v143_v49 }
 0x149   :  { %711 = vmatprep.mubr.bf16.mxu0 %v288_v56  ;;  %762 = vmatprep.mubr.bf16.mxu1 %v290_v63 }
 0x14a   :  { %712 = vmatmul.mubr.bf16.vlgmr.msra.gmra.mxu0 %v287_v6  ;;  %763 = vmatmul.mubr.bf16.vlgmr.msra.gmra.mxu1 %v289_v4  ;;  %v292_v44 = vpack.c.bf16 %v284_v7, %v284_v7  ;;  %v294_v45 = vpack.c.bf16 %v286_v14, %v286_v14  ;;  %v283_v28 = vmul.f32 %v271_v61, %v175_v41 }
 0x14b   :  { %v285_v29 = vmul.f32 %v273_v3, %v177_v42 }
 0x14c   :  { %721 = vmatprep.mubr.bf16.mxu0 %v292_v44  ;;  %772 = vmatprep.mubr.bf16.mxu1 %v294_v45  ;;  %v291_v46 = vpack.c.bf16 %v283_v28, %v283_v28 }
 0x14d   :  { %v293_v47 = vpack.c.bf16 %v285_v29, %v285_v29 }
 0x152   :  { %722 = vmatmul.mubr.bf16.gmra.mxu0 %v291_v46  ;;  %773 = vmatmul.mubr.bf16.gmra.mxu1 %v293_v47 }
 0x20a   :  { %v713_v1 = vpop.f32.mrf.mxu0  ;;  %v764_v2 = vpop.f32.mrf.mxu1 }
 0x20b   :  { %v765_v16 = vadd.f32 %v764_v2, %v713_v1 }
 0x20c   :  { %v715_v51 = vpop.f32.mrf.mxu0  ;;  %v766_v20 = vpop.f32.mrf.mxu1 }
 0x20d   :  { %781 = vst [vmem:[%s1506_s5] sm:$0xff] %v765_v16  ;;  %v767_v52 = vadd.f32 %v766_v20, %v715_v51 }
 0x20e   :  { %v717_v58 = vpop.f32.mrf.mxu0  ;;  %v768_v60 = vpop.f32.mrf.mxu1 }
 0x20f   :  { %782 = vst [vmem:[%s1506_s5 + $0x8] sm:$0xff] %v767_v52  ;;  %v769_v57 = vadd.f32 %v768_v60, %v717_v58 }
 0x210   :  { %v719_v59 = vpop.f32.mrf.mxu0  ;;  %v770_v21 = vpop.f32.mrf.mxu1 }
 0x211   :  { %783 = vst [vmem:[%s1506_s5 + $0x10] sm:$0xff] %v769_v57  ;;  %v771_v5 = vadd.f32 %v770_v21, %v719_v59 }
 0x212   :  { %v723_v23 = vpop.f32.mrf.mxu0  ;;  %v774_v11 = vpop.f32.mrf.mxu1 }
 0x213   :  { %784 = vst [vmem:[%s1506_s5 + $0x18] sm:$0xff] %v771_v5  ;;  %v775_v15 = vadd.f32 %v774_v11, %v723_v23 }
 0x214   :  { %v725_v12 = vpop.f32.mrf.mxu0  ;;  %v776_v25 = vpop.f32.mrf.mxu1 }
 0x215   :  { %785 = vst [vmem:[%s1506_s5 + $0x20] sm:$0xff] %v775_v15  ;;  %v777_v26 = vadd.f32 %v776_v25, %v725_v12 }
 0x216   :  { %v727_v18 = vpop.f32.mrf.mxu0  ;;  %v778_v22 = vpop.f32.mrf.mxu1 }
 0x217   :  { %786 = vst [vmem:[%s1506_s5 + $0x28] sm:$0xff] %v777_v26 }
 0x218   :  { %v728_v27 = vpop.f32.mrf.mxu0  ;;  %v779_v24 = vpop.f32.mrf.mxu1 }

// kernel: run.21
= control target key start
LH: loop header
LB: loop body
LE: loop exit
PB: predicated region body
PF: predicated region fallthrough
CT: control target
= control target key end

     0   :  { %s716_s9 = smov 0   ;;  %s808_s0 = inlined_call_operand.vmem [shape: bf16[512,12], index: 0, kind: input, shape index: {}]   ;;  %s809_s1 = inlined_call_operand.vmem [shape: bf16[12,128], index: 1, kind: input, shape index: {}]   ;;  %s810_s2 = inlined_call_operand.vmem [shape: f32[512,128], index: 2, kind: output, shape index: {}]  }
   0x1 LB: > { %s569_s10 = sadd.s32 4294967295, %s699_s9   ;;  %p573_p0 = scmp.ge.s32.totalorder %s699_s9, 1  ;;  %s699_s9 = sphi %s716_s9, %s12_s9  }
   0x2   : > { %p113_p1 = scmp.lt.s32.totalorder %s699_s9, 3 }
   0x4   : > { %p114_p2 = pnand %p573_p0, %p113_p1 }
   0x5   : > { %s574_s13 = sshll.u32 (!%p114_p2), %s569_s10, 5 }
   0x6   : > { %117 = sbr.rel (%p114_p2) target bundleno = 241 (0xf1), region = 28  ;;  %p136_p3 = scmp.lt.s32.totalorder (!%p114_p2), %s574_s13, 63 }
   0xb   : > { %v676_v0 = vld [vmem:[%s809_s1] sm:$0x3f]   ;;  %vm316_vm0 = vcmask 1045504   ;;  %s812_s13 = smov (!%p136_p3, %s574_s13), 63  ;;  %vm267_vm1 = vcmask 97280  }
   0xc   : > { %666 = vmatprep.subr.msk.bf16.mxu0 %vm316_vm0, %v676_v0  ;;  %667 = vmatprep.subr.msk.bf16.mxu1 %vm316_vm0, %v676_v0  ;;  %v318_v1 = vsel %vm316_vm0, %v676_v0, 0  ;;  %s575_s14 = sshll.u32 %s812_s13, 2  ;;  %s577_s18 = sshll.u32 %s812_s13, 3 }
   0xd   : > { %631 = vmatpush3.bf16.msra.mxu0 %v318_v1  ;;  %665 = vmatpush3.bf16.msra.mxu1 %v318_v1  ;;  %s733_s17 = scalar_lea.vmem %s808_s0, %s575_s14  ;;  %s771_s21 = scalar_lea.vmem %s810_s2, %s577_s18 }
   0xe   : > { %v677_v2 = vld [vmem:[%s733_s17] sm:$0xff]   ;;  %v679_v4 = vld [vmem:[%s733_s17 + $0x8] sm:$0xff]   ;;  %v681_v6 = vld [vmem:[%s733_s17 + $0x10] sm:$0xff]  }
   0xf   : > { %v678_v3 = vld [vmem:[%s733_s17 + $0x40] sm:$0xff]   ;;  %632 = vmatprep.mubr.msk.bf16.mxu0 %vm267_vm1, %v677_v2  ;;  %v680_v5 = vld [vmem:[%s733_s17 + $0x48] sm:$0xff]   ;;  %v682_v7 = vld [vmem:[%s733_s17 + $0x50] sm:$0xff]  }
  0x10   : > { %648 = vmatprep.mubr.msk.bf16.mxu1 %vm267_vm1, %v678_v3  ;;  %633 = vmatmul.mubr.msk.bf16.vlgmr.msra.gmra.mxu0 %vm267_vm1, %v679_v4  ;;  %v683_v8 = vld [vmem:[%s733_s17 + $0x18] sm:$0xff]   ;;  %v685_v10 = vld [vmem:[%s733_s17 + $0x20] sm:$0xff]   ;;  %v687_v12 = vld [vmem:[%s733_s17 + $0x28] sm:$0xff]  }
  0x11   : > { %649 = vmatmul.mubr.msk.bf16.vlgmr.msra.gmra.mxu1 %vm267_vm1, %v680_v5  ;;  %636 = vmatprep.mubr.msk.bf16.mxu0 %vm267_vm1, %v681_v6  ;;  %v684_v9 = vld [vmem:[%s733_s17 + $0x58] sm:$0xff]   ;;  %v686_v11 = vld [vmem:[%s733_s17 + $0x60] sm:$0xff]   ;;  %v688_v13 = vld [vmem:[%s733_s17 + $0x68] sm:$0xff]  }
  0x12   : > { %652 = vmatprep.mubr.msk.bf16.mxu1 %vm267_vm1, %v682_v7  ;;  %v689_v14 = vld [vmem:[%s733_s17 + $0x30] sm:$0xff]   ;;  %v691_v16 = vld [vmem:[%s733_s17 + $0x38] sm:$0xff]  }
  0x13   : > { %v690_v15 = vld [vmem:[%s733_s17 + $0x70] sm:$0xff]   ;;  %v692_v17 = vld [vmem:[%s733_s17 + $0x78] sm:$0xff]  }
  0x18   : > { %637 = vmatmul.mubr.msk.bf16.gmra.mxu0 %vm267_vm1, %v683_v8 }
  0x19   : > { %653 = vmatmul.mubr.msk.bf16.gmra.mxu1 %vm267_vm1, %v684_v9  ;;  %640 = vmatprep.mubr.msk.bf16.mxu0 %vm267_vm1, %v685_v10 }
  0x1a   : > { %656 = vmatprep.mubr.msk.bf16.mxu1 %vm267_vm1, %v686_v11 }
  0x20   : > { %641 = vmatmul.mubr.msk.bf16.gmra.mxu0 %vm267_vm1, %v687_v12 }
  0x21   : > { %657 = vmatmul.mubr.msk.bf16.gmra.mxu1 %vm267_vm1, %v688_v13  ;;  %644 = vmatprep.mubr.msk.bf16.mxu0 %vm267_vm1, %v689_v14 }
  0x22   : > { %660 = vmatprep.mubr.msk.bf16.mxu1 %vm267_vm1, %v690_v15 }
  0x28   : > { %645 = vmatmul.mubr.msk.bf16.gmra.mxu0 %vm267_vm1, %v691_v16 }
  0x29   : > { %661 = vmatmul.mubr.msk.bf16.gmra.mxu1 %vm267_vm1, %v692_v17 }
  0xd0   : > { %v634_v18 = vpop.f32.mrf.mxu0 }
  0xd1   : > { %483 = vst [vmem:[%s771_s21 + $0x10] sm:$0xff] %v634_v18  ;;  %v650_v19 = vpop.f32.mrf.mxu1 }
  0xd2   : > { %499 = vst [vmem:[%s771_s21 + $0x90] sm:$0xff] %v650_v19  ;;  %v354_v20 = vpop.f32.mrf.mxu0 }
  0xd3   : > { %481 = vst [vmem:[%s771_s21] sm:$0xff] %v354_v20  ;;  %v418_v21 = vpop.f32.mrf.mxu1 }
  0xd4   : > { %497 = vst [vmem:[%s771_s21 + $0x80] sm:$0xff] %v418_v21  ;;  %v635_v22 = vpop.f32.mrf.mxu0 }
  0xd5   : > { %484 = vst [vmem:[%s771_s21 + $0x18] sm:$0xff] %v635_v22  ;;  %v651_v23 = vpop.f32.mrf.mxu1 }
  0xd6   : > { %500 = vst [vmem:[%s771_s21 + $0x98] sm:$0xff] %v651_v23  ;;  %v357_v24 = vpop.f32.mrf.mxu0 }
  0xd7   : > { %482 = vst [vmem:[%s771_s21 + $0x8] sm:$0xff] %v357_v24  ;;  %v421_v25 = vpop.f32.mrf.mxu1 }
  0xd8   : > { %498 = vst [vmem:[%s771_s21 + $0x88] sm:$0xff] %v421_v25  ;;  %v638_v26 = vpop.f32.mrf.mxu0 }
  0xd9   : > { %487 = vst [vmem:[%s771_s21 + $0x30] sm:$0xff] %v638_v26  ;;  %v654_v27 = vpop.f32.mrf.mxu1 }
  0xda   : > { %503 = vst [vmem:[%s771_s21 + $0xb0] sm:$0xff] %v654_v27  ;;  %v370_v28 = vpop.f32.mrf.mxu0 }
  0xdb   : > { %485 = vst [vmem:[%s771_s21 + $0x20] sm:$0xff] %v370_v28  ;;  %v434_v29 = vpop.f32.mrf.mxu1 }
  0xdc   : > { %501 = vst [vmem:[%s771_s21 + $0xa0] sm:$0xff] %v434_v29  ;;  %v639_v30 = vpop.f32.mrf.mxu0 }
  0xdd   : > { %488 = vst [vmem:[%s771_s21 + $0x38] sm:$0xff] %v639_v30  ;;  %v655_v31 = vpop.f32.mrf.mxu1 }
  0xde   : > { %504 = vst [vmem:[%s771_s21 + $0xb8] sm:$0xff] %v655_v31  ;;  %v373_v32 = vpop.f32.mrf.mxu0 }
  0xdf   : > { %486 = vst [vmem:[%s771_s21 + $0x28] sm:$0xff] %v373_v32  ;;  %v437_v33 = vpop.f32.mrf.mxu1 }
  0xe0   : > { %502 = vst [vmem:[%s771_s21 + $0xa8] sm:$0xff] %v437_v33  ;;  %v642_v34 = vpop.f32.mrf.mxu0 }
  0xe1   : > { %491 = vst [vmem:[%s771_s21 + $0x50] sm:$0xff] %v642_v34  ;;  %v658_v35 = vpop.f32.mrf.mxu1 }
  0xe2   : > { %507 = vst [vmem:[%s771_s21 + $0xd0] sm:$0xff] %v658_v35  ;;  %v386_v36 = vpop.f32.mrf.mxu0 }
  0xe3   : > { %489 = vst [vmem:[%s771_s21 + $0x40] sm:$0xff] %v386_v36  ;;  %v450_v37 = vpop.f32.mrf.mxu1 }
  0xe4   : > { %505 = vst [vmem:[%s771_s21 + $0xc0] sm:$0xff] %v450_v37  ;;  %v643_v38 = vpop.f32.mrf.mxu0 }
  0xe5   : > { %492 = vst [vmem:[%s771_s21 + $0x58] sm:$0xff] %v643_v38  ;;  %v659_v39 = vpop.f32.mrf.mxu1 }
  0xe6   : > { %508 = vst [vmem:[%s771_s21 + $0xd8] sm:$0xff] %v659_v39  ;;  %v389_v40 = vpop.f32.mrf.mxu0 }
  0xe7   : > { %490 = vst [vmem:[%s771_s21 + $0x48] sm:$0xff] %v389_v40  ;;  %v453_v41 = vpop.f32.mrf.mxu1 }
  0xe8   : > { %506 = vst [vmem:[%s771_s21 + $0xc8] sm:$0xff] %v453_v41  ;;  %v646_v42 = vpop.f32.mrf.mxu0 }
  0xe9   : > { %495 = vst [vmem:[%s771_s21 + $0x70] sm:$0xff] %v646_v42  ;;  %v662_v43 = vpop.f32.mrf.mxu1 }
  0xea   : > { %511 = vst [vmem:[%s771_s21 + $0xf0] sm:$0xff] %v662_v43  ;;  %v402_v44 = vpop.f32.mrf.mxu0 }
  0xeb   : > { %493 = vst [vmem:[%s771_s21 + $0x60] sm:$0xff] %v402_v44  ;;  %v466_v45 = vpop.f32.mrf.mxu1 }
  0xec   : > { %509 = vst [vmem:[%s771_s21 + $0xe0] sm:$0xff] %v466_v45  ;;  %v647_v46 = vpop.f32.mrf.mxu0 }
  0xed   : > { %496 = vst [vmem:[%s771_s21 + $0x78] sm:$0xff] %v647_v46  ;;  %v663_v47 = vpop.f32.mrf.mxu1 }
  0xee   : > { %512 = vst [vmem:[%s771_s21 + $0xf8] sm:$0xff] %v663_v47  ;;  %v405_v48 = vpop.f32.mrf.mxu0 }
  0xef   : > { %494 = vst [vmem:[%s771_s21 + $0x68] sm:$0xff] %v405_v48  ;;  %v469_v49 = vpop.f32.mrf.mxu1 }
  0xf0   : > { %510 = vst [vmem:[%s771_s21 + $0xe8] sm:$0xff] %v469_v49 }
  0xf1 PF: > { %s12_s9 = sadd.s32 1, %s699_s9  }
  0xf2   : > { %p9_p4 = scmp.ge.s32.totalorder %s12_s9, 4  }
  0xf4   :  { %11 = sbr.rel (!%p9_p4) target bundleno = 1 (0x1), region = 58 }

// kernel: run.22
= control target key start
LH: loop header
LB: loop body
LE: loop exit
PB: predicated region body
PF: predicated region fallthrough
CT: control target
= control target key end

     0   :  { %s1147_s12 = smov 0   ;;  %s1703_s0 = inlined_call_operand.vmem [shape: f32[2,18,18,8], index: 0, kind: input, shape index: {}]   ;;  %s1704_s1 = inlined_call_operand.vmem [shape: f32[9,8], index: 1, kind: input, shape index: {}]   ;;  %s1705_s2 = inlined_call_operand.vmem [shape: f32[1,8], index: 2, kind: input, shape index: {}]   ;;  %s1706_s3 = inlined_call_operand.vmem [shape: f32[2,16,16,8], index: 3, kind: output, shape index: {}]  }
   0x1 LB: > { %s889_s13 = sadd.s32 4294967295, %s1121_s12   ;;  %p893_p0 = scmp.ge.s32.totalorder %s1121_s12, 1  ;;  %s1121_s12 = sphi %s1147_s12, %s13_s12  }
   0x2   : > { %p137_p1 = scmp.lt.s32.totalorder %s1121_s12, 3 }
   0x4   : > { %p138_p2 = pnand %p893_p0, %p137_p1 }
   0x5   : > { %p161_p3 = scmp.lt.s32.totalorder (!%p138_p2), %s889_s13, 1  ;;  %s1215_s17 = smov (!%p138_p2), 0  }
   0x6   : > { %141 = sbr.rel (%p138_p2) target bundleno = 152 (0x98), region = 32 }
   0xb   : > { %v1158_v0 = vld [vmem:[%s1705_s2] ss:$0 sm:$0xff]  ;;  %v1168_v2 = vld [vmem:[%s1704_s1 + $0x1] ss:$0 sm:$0xff]  ;;  %v1173_v3 = vld [vmem:[%s1704_s1 + $0x2] ss:$0 sm:$0xff] }
   0xc   : > { %v1163_v1 = vld [vmem:[%s1704_s1] ss:$0 sm:$0xff]  ;;  %v1178_v4 = vld [vmem:[%s1704_s1 + $0x3] ss:$0 sm:$0xff]  ;;  %s1708_s13 = smov (!%p161_p3, %s889_s13), 1 }
   0xd   : > { %v1183_v5 = vld [vmem:[%s1704_s1 + $0x4] ss:$0 sm:$0xff]  ;;  %v1188_v6 = vld [vmem:[%s1704_s1 + $0x5] ss:$0 sm:$0xff]  ;;  %v1193_v7 = vld [vmem:[%s1704_s1 + $0x6] ss:$0 sm:$0xff] }
   0xe   : > { %v1198_v8 = vld [vmem:[%s1704_s1 + $0x7] ss:$0 sm:$0xff]  ;;  %v1203_v9 = vld [vmem:[%s1704_s1 + $0x8] ss:$0 sm:$0xff]  ;;  %s1030_s7 = smul.u32 432, %s1708_s13  ;;  %s1028_s8 = sshll.u32 %s1708_s13, 8 }
   0xf   : > { %s1208_s11 = scalar_lea.vmem %s1706_s3, %s1028_s8 }
  0x10   : > { %s1213_s16 = scalar_lea.vmem %s1703_s0, %s1030_s7 }
  0x11 LB: >> { %s898_s13 = smul.u32 192, %s1125_s17  ;;  %vm800_vm0 = vcmask 64512   ;;  %s1029_s19 = sshll.u32 %s1125_s17, 7  ;;  %s1125_s17 = sphi %s1215_s17, %s186_s17  }
  0x12   : >> { %s1508_s20 = scalar_lea.vmem %s1208_s11, %s1029_s19  ;;  %s186_s17 = sadd.s32 1, %s1125_s17  }
  0x13   : >> { %s1222_s18 = scalar_lea.vmem %s1213_s16, %s898_s13  ;;  %p183_p4 = scmp.ge.s32.totalorder %s186_s17, 2  }
  0x14   : >> { %v190_v10 = vld [vmem:[%s1222_s18] sm:$0xff]  ;;  %v904_v16 = vld [vmem:[%s1222_s18 + $0x18] sm:$0xff]  ;;  %v1236_v21 = vld [vmem:[%s1222_s18 + $0x30] sm:$0xff] }
  0x15   : >> { %v242_v11 = vld [vmem:[%s1222_s18 + $0x1] sm:$0xff]  ;;  %v210_v13 = vmul.f32 %v1163_v1, %v190_v10  ;;  %v921_v17 = vld [vmem:[%s1222_s18 + $0x19] sm:$0xff]  ;;  %v369_v18 = vmul.f32 %v1178_v4, %v904_v16  ;;  %v528_v24 = vmul.f32 %v1193_v7, %v1236_v21  ;;  %v243_v26 = vld [vmem:[%s1222_s18 + $0x9] sm:$0xff]  ;;  %v212_v28 = vmul.f32 %v904_v16, %v1163_v1 }
  0x16   : >> { %v294_v12 = vld [vmem:[%s1222_s18 + $0x2] sm:$0xff]  ;;  %v262_v14 = vmul.f32 %v1168_v2, %v242_v11  ;;  %v421_v19 = vmul.f32 %v1183_v5, %v921_v17  ;;  %v938_v20 = vld [vmem:[%s1222_s18 + $0x1a] sm:$0xff]  ;;  %v295_v27 = vld [vmem:[%s1222_s18 + $0xa] sm:$0xff]  ;;  %v263_v32 = vmul.f32 %v1168_v2, %v243_v26  ;;  %v264_v35 = vmul.f32 %v921_v17, %v1168_v2 }
  0x17   : >> { %v314_v15 = vmul.f32 %v1173_v3, %v294_v12  ;;  %v473_v23 = vmul.f32 %v1188_v6, %v938_v20  ;;  %v191_v25 = vld [vmem:[%s1222_s18 + $0x8] sm:$0xff]  ;;  %v974_v29 = vld [vmem:[%s1222_s18 + $0x31] sm:$0xff]  ;;  %v315_v33 = vmul.f32 %v1173_v3, %v295_v27  ;;  %v905_v34 = vld [vmem:[%s1222_s18 + $0x20] sm:$0xff]  ;;  %v316_v51 = vmul.f32 %v938_v20, %v1173_v3 }
  0x18   : >> { %v278_v22 = vadd.f32 %v262_v14, %v210_v13  ;;  %v991_v30 = vld [vmem:[%s1222_s18 + $0x32] sm:$0xff]  ;;  %v211_v31 = vmul.f32 %v1163_v1, %v191_v25  ;;  %v580_v37 = vmul.f32 %v1198_v8, %v974_v29  ;;  %v370_v39 = vmul.f32 %v1178_v4, %v905_v34  ;;  %v922_v40 = vld [vmem:[%s1222_s18 + $0x21] sm:$0xff]  ;;  %v1285_v63 = vld [vmem:[%s1222_s18 + $0x49] sm:$0xff] }
  0x19   : >> { %v632_v38 = vmul.f32 %v1203_v9, %v991_v30  ;;  %v939_v41 = vld [vmem:[%s1222_s18 + $0x22] sm:$0xff]  ;;  %v1258_v42 = vld [vmem:[%s1222_s18 + $0x38] sm:$0xff]  ;;  %v422_v44 = vmul.f32 %v1183_v5, %v922_v40  ;;  %v280_v50 = vadd.f32 %v264_v35, %v212_v28  ;;  %v371_v52 = vmul.f32 %v1236_v21, %v1178_v4  ;;  %v1288_v10 = vld [vmem:[%s1222_s18 + $0x4a] sm:$0xff] }
  0x1a   : >> { %v330_v36 = vadd.f32 %v314_v15, %v278_v22  ;;  %v279_v43 = vadd.f32 %v263_v32, %v211_v31  ;;  %v474_v45 = vmul.f32 %v1188_v6, %v939_v41  ;;  %v529_v46 = vmul.f32 %v1193_v7, %v1258_v42  ;;  %v1265_v48 = vld [vmem:[%s1222_s18 + $0x39] sm:$0xff]  ;;  %v1279_v57 = vld [vmem:[%s1222_s18 + $0x48] sm:$0xff]  ;;  %v1302_v25 = vld [vmem:[%s1222_s18 + $0x50] sm:$0xff] }
  0x1b   : >> { %v1268_v49 = vld [vmem:[%s1222_s18 + $0x3a] sm:$0xff]  ;;  %v581_v54 = vmul.f32 %v1198_v8, %v1265_v48  ;;  %v423_v56 = vmul.f32 %v974_v29, %v1183_v5  ;;  %v332_v59 = vadd.f32 %v316_v51, %v280_v50  ;;  %v475_v60 = vmul.f32 %v991_v30, %v1188_v6 }
  0x1c   : >> { %v385_v47 = vadd.f32 %v369_v18, %v330_v36  ;;  %v331_v53 = vadd.f32 %v315_v33, %v279_v43  ;;  %v633_v55 = vmul.f32 %v1203_v9, %v1268_v49  ;;  %v530_v61 = vmul.f32 %v1193_v7, %v1279_v57  ;;  %v1309_v33 = vld [vmem:[%s1222_s18 + $0x51] sm:$0xff] }
  0x1d   : >> { %v213_v11 = vmul.f32 %v905_v34, %v1163_v1  ;;  %v265_v12 = vmul.f32 %v922_v40, %v1168_v2  ;;  %v317_v13 = vmul.f32 %v939_v41, %v1173_v3  ;;  %v387_v15 = vadd.f32 %v371_v52, %v332_v59 }
  0x1e   : >> { %v437_v58 = vadd.f32 %v421_v19, %v385_v47  ;;  %v386_v62 = vadd.f32 %v370_v39, %v331_v53  ;;  %v582_v16 = vmul.f32 %v1198_v8, %v1285_v63  ;;  %v634_v17 = vmul.f32 %v1203_v9, %v1288_v10 }
  0x1f   : >> { %v281_v19 = vadd.f32 %v265_v12, %v213_v11  ;;  %v372_v20 = vmul.f32 %v1258_v42, %v1178_v4  ;;  %v424_v22 = vmul.f32 %v1265_v48, %v1183_v5  ;;  %v476_v27 = vmul.f32 %v1268_v49, %v1188_v6 }
  0x20   : >> { %v489_v14 = vadd.f32 %v473_v23, %v437_v58  ;;  %v438_v18 = vadd.f32 %v422_v44, %v386_v62  ;;  %v439_v23 = vadd.f32 %v423_v56, %v387_v15  ;;  %v531_v28 = vmul.f32 %v1193_v7, %v1302_v25  ;;  %v1318_v44 = vld [vmem:[%s1222_s18 + $0x52] sm:$0xff] }
  0x21   : >> { %v333_v32 = vadd.f32 %v317_v13, %v281_v19  ;;  %v214_v34 = vmul.f32 %v1236_v21, %v1163_v1  ;;  %v266_v35 = vmul.f32 %v974_v29, %v1168_v2  ;;  %v318_v40 = vmul.f32 %v991_v30, %v1173_v3 }
  0x22   : >> { %v544_v26 = vadd.f32 %v528_v24, %v489_v14  ;;  %v490_v31 = vadd.f32 %v474_v45, %v438_v18  ;;  %v491_v39 = vadd.f32 %v475_v60, %v439_v23  ;;  %v583_v24 = vmul.f32 %v1198_v8, %v1309_v33 }
  0x23   : >> { %v388_v43 = vadd.f32 %v372_v20, %v333_v32  ;;  %v282_v45 = vadd.f32 %v266_v35, %v214_v34  ;;  %v373_v47 = vmul.f32 %v1279_v57, %v1178_v4  ;;  %v635_v29 = vmul.f32 %v1203_v9, %v1318_v44 }
  0x24   : >> { %v596_v36 = vadd.f32 %v580_v37, %v544_v26  ;;  %v545_v41 = vadd.f32 %v529_v46, %v490_v31  ;;  %v546_v21 = vadd.f32 %v530_v61, %v491_v39  ;;  %v425_v37 = vmul.f32 %v1285_v63, %v1183_v5  ;;  %v1329_v46 = vld [vmem:[%s1222_s18 + $0x60] sm:$0xff] }
  0x25   : >> { %v440_v52 = vadd.f32 %v424_v22, %v388_v43  ;;  %v334_v53 = vadd.f32 %v318_v40, %v282_v45  ;;  %v477_v30 = vmul.f32 %v1288_v10, %v1188_v6  ;;  %v532_v58 = vmul.f32 %v1193_v7, %v1329_v46  ;;  %v995_v26 = vld [vmem:[%s1222_s18 + $0x62] sm:$0xff] }
  0x26   : >> { %v648_v50 = vadd.f32 %v632_v38, %v596_v36  ;;  %v597_v51 = vadd.f32 %v581_v54, %v545_v41  ;;  %v598_v38 = vadd.f32 %v582_v16, %v546_v21  ;;  %v215_v59 = vmul.f32 %v1258_v42, %v1163_v1  ;;  %v1349_v16 = vld [vmem:[%s1222_s18 + $0x61] sm:$0xff]  ;;  %v1382_v21 = vld [vmem:[%s1222_s18 + $0x6a] sm:$0xff] }
  0x27   : >> { %v492_v54 = vadd.f32 %v476_v27, %v440_v52  ;;  %v389_v61 = vadd.f32 %v373_v47, %v334_v53  ;;  %v267_v62 = vmul.f32 %v1265_v48, %v1168_v2  ;;  %v319_v13 = vmul.f32 %v1268_v49, %v1173_v3  ;;  %v1365_v36 = vld [vmem:[%s1222_s18 + $0x68] sm:$0xff] }
  0x28   : >> { %v1332_v56 = vadd.f32 %v1158_v0, %v648_v50  ;;  %v649_v60 = vadd.f32 %v633_v55, %v597_v51  ;;  %v650_v12 = vadd.f32 %v634_v17, %v598_v38  ;;  %v374_v14 = vmul.f32 %v1302_v25, %v1178_v4  ;;  %v1379_v50 = vld [vmem:[%s1222_s18 + $0x69] sm:$0xff] }
  0x29   : >> { %v547_v42 = vadd.f32 %v531_v28, %v492_v54  ;;  %v441_v55 = vadd.f32 %v425_v37, %v389_v61  ;;  %v283_v18 = vadd.f32 %v267_v62, %v215_v59  ;;  %v584_v17 = vmul.f32 %v1198_v8, %v1349_v16  ;;  %v1402_v61 = vld [vmem:[%s1222_s18 + $0x78] sm:$0xff] }
  0x2a   : >> { %v1009_v11 = vmul.f32 -1.442695, %v1332_v56  ;;  %v1346_v15 = vadd.f32 %v1158_v0, %v649_v60  ;;  %v1352_v48 = vadd.f32 %v1158_v0, %v650_v12  ;;  %v426_v49 = vmul.f32 %v1309_v33, %v1183_v5 }
  0x2b   : >> { %v599_v20 = vadd.f32 %v583_v24, %v547_v42  ;;  %v493_v22 = vadd.f32 %v477_v30, %v441_v55  ;;  %v335_v23 = vadd.f32 %v319_v13, %v283_v18  ;;  %v636_v28 = vmul.f32 %v1203_v9, %v995_v26  ;;  %v1409_v13 = vld [vmem:[%s1222_s18 + $0x79] sm:$0xff] }
  0x2c   : >> { %1047 = vpow2.f32 %v1009_v11  ;;  %v1010_v19 = vmul.f32 -1.442695, %v1346_v15  ;;  %v1011_v27 = vmul.f32 -1.442695, %v1352_v48  ;;  %v478_v31 = vmul.f32 %v1318_v44, %v1188_v6 }
  0x2d   : >> { %v651_v32 = vadd.f32 %v635_v29, %v599_v20  ;;  %v548_v34 = vadd.f32 %v532_v58, %v493_v22  ;;  %v390_v35 = vadd.f32 %v374_v14, %v335_v23  ;;  %v216_v39 = vmul.f32 %v1279_v57, %v1163_v1 }
  0x2e   : >> { %1049 = vpow2.f32 %v1010_v19  ;;  %v268_v24 = vmul.f32 %v1285_v63, %v1168_v2  ;;  %v320_v40 = vmul.f32 %v1288_v10, %v1173_v3  ;;  %v533_v47 = vmul.f32 %v1193_v7, %v1365_v36 }
  0x2f   : >> { %1051 = vpow2.f32 %v1011_v27  ;;  %v1374_v41 = vadd.f32 %v1158_v0, %v651_v32  ;;  %v600_v43 = vadd.f32 %v584_v17, %v548_v34  ;;  %v442_v45 = vadd.f32 %v426_v49, %v390_v35  ;;  %v1430_v35 = vld [vmem:[%s1222_s18 + $0x80] sm:$0xff] }
  0x30   : >> { %v585_v57 = vmul.f32 %v1198_v8, %v1379_v50  ;;  %v637_v63 = vmul.f32 %v1203_v9, %v1382_v21  ;;  %v284_v10 = vadd.f32 %v268_v24, %v216_v39  ;;  %v375_v29 = vmul.f32 %v1329_v46, %v1178_v4 }
  0x31   : >> { %v1012_v37 = vmul.f32 -1.442695, %v1374_v41  ;;  %v652_v51 = vadd.f32 %v636_v28, %v600_v43  ;;  %v494_v52 = vadd.f32 %v478_v31, %v442_v45  ;;  %v427_v53 = vmul.f32 %v1349_v16, %v1183_v5  ;;  %v1439_v43 = vld [vmem:[%s1222_s18 + $0x81] sm:$0xff] }
  0x32   : >> { %v336_v30 = vadd.f32 %v320_v40, %v284_v10  ;;  %v479_v38 = vmul.f32 %v995_v26, %v1188_v6  ;;  %v217_v58 = vmul.f32 %v1302_v25, %v1163_v1  ;;  %v269_v59 = vmul.f32 %v1309_v33, %v1168_v2  ;;  %v1412_v25 = vld [vmem:[%s1222_s18 + $0x7a] sm:$0xff] }
  0x33   : >> { %1053 = vpow2.f32 %v1012_v37  ;;  %v1399_v60 = vadd.f32 %v1158_v0, %v652_v51  ;;  %v549_v54 = vadd.f32 %v533_v47, %v494_v52  ;;  %v321_v62 = vmul.f32 %v1318_v44, %v1173_v3  ;;  %v1447_v37 = vld [vmem:[%s1222_s18 + $0x82] sm:$0xff] }
  0x34   : >> { %v391_v11 = vadd.f32 %v375_v29, %v336_v30  ;;  %v534_v12 = vmul.f32 %v1193_v7, %v1402_v61  ;;  %v285_v14 = vadd.f32 %v269_v59, %v217_v58  ;;  %v376_v33 = vmul.f32 %v1365_v36, %v1178_v4 }
  0x35   : >> { %v1013_v42 = vmul.f32 -1.442695, %v1399_v60  ;;  %v601_v55 = vadd.f32 %v585_v57, %v549_v54  ;;  %v586_v18 = vmul.f32 %v1198_v8, %v1409_v13  ;;  %v638_v44 = vmul.f32 %v1203_v9, %v1412_v25 }
  0x36   : >> { %v443_v17 = vadd.f32 %v427_v53, %v391_v11  ;;  %v337_v49 = vadd.f32 %v321_v62, %v285_v14  ;;  %v428_v19 = vmul.f32 %v1379_v50, %v1183_v5  ;;  %v480_v20 = vmul.f32 %v1382_v21, %v1188_v6  ;;  %v1458_v14 = vld [vmem:[%s1222_s18 + $0x90] sm:$0xff] }
  0x37   : >> { %1055 = vpow2.f32 %v1013_v42  ;;  %v653_v23 = vadd.f32 %v637_v63, %v601_v55  ;;  %v218_v27 = vmul.f32 %v1329_v46, %v1163_v1  ;;  %v270_v28 = vmul.f32 %v1349_v16, %v1168_v2 }
  0x38   : >> { %v495_v32 = vadd.f32 %v479_v38, %v443_v17  ;;  %v392_v34 = vadd.f32 %v376_v33, %v337_v49  ;;  %v322_v39 = vmul.f32 %v995_v26, %v1173_v3  ;;  %v535_v40 = vmul.f32 %v1193_v7, %v1430_v35  ;;  %v1470_v49 = vld [vmem:[%s1222_s18 + $0x91] sm:$0xff] }
  0x39   : >> { %v1048_v22 = vpop.eup %1047  ;;  %v1434_v24 = vadd.f32 %v1158_v0, %v653_v23  ;;  %v286_v46 = vadd.f32 %v270_v28, %v218_v27  ;;  %v377_v16 = vmul.f32 %v1402_v61, %v1178_v4  ;;  %v587_v63 = vmul.f32 %v1198_v8, %v1439_v43 }
  0x3a   : >> { %v734_v31 = vadd.f32 1.0, %v1048_v22  ;;  %v550_v47 = vadd.f32 %v534_v12, %v495_v32  ;;  %v444_v57 = vadd.f32 %v428_v19, %v392_v34  ;;  %v429_v52 = vmul.f32 %v1409_v13, %v1183_v5  ;;  %v1473_v19 = vld [vmem:[%s1222_s18 + $0x92] sm:$0xff] }
  0x3b   : >> { %v1050_v45 = vpop.eup %1049  ;;  %v1014_v29 = vmul.f32 -1.442695, %v1434_v24  ;;  %v338_v51 = vadd.f32 %v322_v39, %v286_v46  ;;  %v639_v58 = vmul.f32 %v1203_v9, %v1447_v37  ;;  %v481_v54 = vmul.f32 %v1412_v25, %v1188_v6 }
  0x3c   : >> { %1057 = vrcp.f32 %v734_v31  ;;  %v1052_v26 = vpop.eup %1051  ;;  %v735_v10 = vadd.f32 1.0, %v1050_v45  ;;  %v602_v30 = vadd.f32 %v586_v18, %v550_v47  ;;  %v496_v38 = vadd.f32 %v480_v20, %v444_v57  ;;  %v1493_v57 = vld [vmem:[%s1222_s18 + $0x98] sm:$0xff] }
  0x3d   : >> { %v736_v53 = vadd.f32 1.0, %v1052_v26  ;;  %v393_v59 = vadd.f32 %v377_v16, %v338_v51  ;;  %v219_v62 = vmul.f32 %v1365_v36, %v1163_v1  ;;  %v271_v33 = vmul.f32 %v1379_v50, %v1168_v2 }
  0x3e   : >> { %1059 = vrcp.f32 %v735_v10  ;;  %v654_v11 = vadd.f32 %v638_v44, %v602_v30  ;;  %v551_v12 = vadd.f32 %v535_v40, %v496_v38  ;;  %v536_v55 = vmul.f32 %v1193_v7, %v1458_v14 }
  0x3f   : >> { %1061 = vrcp.f32 %v736_v53  ;;  %v445_v42 = vadd.f32 %v429_v52, %v393_v59  ;;  %v323_v18 = vmul.f32 %v1382_v21, %v1173_v3  ;;  %v287_v50 = vadd.f32 %v271_v33, %v219_v62  ;;  %v1503_v53 = vld [vmem:[%s1222_s18 + $0x99] sm:$0xff] }
  0x40   : >> { %1063 = vpow2.f32 %v1014_v29  ;;  %v1054_v17 = vpop.eup %1053  ;;  %v1467_v36 = vadd.f32 %v1158_v0, %v654_v11  ;;  %v603_v44 = vadd.f32 %v587_v63, %v551_v12  ;;  %v378_v20 = vmul.f32 %v1430_v35, %v1178_v4  ;;  %v1516_v11 = vld [vmem:[%s1222_s18 + $0x9a] sm:$0xff] }
  0x41   : >> { %v737_v22 = vadd.f32 1.0, %v1054_v17  ;;  %v497_v23 = vadd.f32 %v481_v54, %v445_v42  ;;  %v588_v21 = vmul.f32 %v1198_v8, %v1470_v49  ;;  %v640_v27 = vmul.f32 %v1203_v9, %v1473_v19 }
  0x42   : >> { %v1015_v28 = vmul.f32 -1.442695, %v1467_v36  ;;  %v655_v31 = vadd.f32 %v639_v58, %v603_v44  ;;  %v339_v32 = vadd.f32 %v323_v18, %v287_v50  ;;  %v430_v34 = vmul.f32 %v1439_v43, %v1183_v5  ;;  %v1530_v50 = vld [vmem:[%s1222_s18 + $0xa8] sm:$0xff] }
  0x43   : >> { %1065 = vrcp.f32 %v737_v22  ;;  %v552_v39 = vadd.f32 %v536_v55, %v497_v23  ;;  %v482_v40 = vmul.f32 %v1447_v37, %v1188_v6  ;;  %v220_v46 = vmul.f32 %v1402_v61, %v1163_v1 }
  0x44   : >> { %v1056_v16 = vpop.eup %1055  ;;  %1067 = vpow2.f32 %v1015_v28  ;;  %v1490_v45 = vadd.f32 %v1158_v0, %v655_v31  ;;  %v394_v47 = vadd.f32 %v378_v20, %v339_v32  ;;  %v272_v63 = vmul.f32 %v1409_v13, %v1168_v2 }
  0x45   : >> { %v738_v26 = vadd.f32 1.0, %v1056_v16  ;;  %v604_v10 = vadd.f32 %v588_v21, %v552_v39  ;;  %v537_v29 = vmul.f32 %v1193_v7, %v1493_v57  ;;  %v324_v61 = vmul.f32 %v1412_v25, %v1173_v3  ;;  %v1544_v39 = vld [vmem:[%s1222_s18 + $0xa9] sm:$0xff] }
  0x46   : >> { %v1016_v51 = vmul.f32 -1.442695, %v1490_v45  ;;  %v446_v52 = vadd.f32 %v430_v34, %v394_v47  ;;  %v288_v30 = vadd.f32 %v272_v63, %v220_v46  ;;  %v379_v38 = vmul.f32 %v1458_v14, %v1178_v4 }
  0x47   : >> { %1069 = vrcp.f32 %v738_v26  ;;  %v656_v13 = vadd.f32 %v640_v27, %v604_v10  ;;  %v589_v59 = vmul.f32 %v1198_v8, %v1503_v53  ;;  %v431_v25 = vmul.f32 %v1470_v49, %v1183_v5 }
  0x48   : >> { %1071 = vpow2.f32 %v1016_v51  ;;  %v498_v62 = vadd.f32 %v482_v40, %v446_v52  ;;  %v340_v12 = vadd.f32 %v324_v61, %v288_v30  ;;  %v641_v42 = vmul.f32 %v1203_v9, %v1516_v11 }
  0x49   : >> { %v1058_v58 = vpop.eup %1057  ;;  %v1519_v33 = vadd.f32 %v1158_v0, %v656_v13  ;;  %v483_v55 = vmul.f32 %v1473_v19, %v1188_v6  ;;  %v221_v18 = vmul.f32 %v1430_v35, %v1163_v1  ;;  %v273_v20 = vmul.f32 %v1439_v43, %v1168_v2 }
  0x4a   : >> { %v782_v54 = vmul.f32 %v1058_v58, %v1332_v56  ;;  %v553_v56 = vadd.f32 %v537_v29, %v498_v62  ;;  %v395_v44 = vadd.f32 %v379_v38, %v340_v12  ;;  %v325_v22 = vmul.f32 %v1447_v37, %v1173_v3  ;;  %v1547_v37 = vld [vmem:[%s1222_s18 + $0xaa] sm:$0xff] }
  0x4b   : >> { %v1060_v17 = vpop.eup %1059  ;;  %v1017_v35 = vmul.f32 -1.442695, %v1519_v33  ;;  %v538_v27 = vmul.f32 %v1193_v7, %v1530_v50  ;;  %v380_v28 = vmul.f32 %v1493_v57, %v1178_v4  ;;  %v289_v40 = vadd.f32 %v273_v20, %v221_v18  ;;  %v1569_v58 = vld [vmem:[%s1222_s18 + $0xb0] sm:$0xff] }
  0x4c   : >> { %801 = vst.msk [vmem:[%s1508_s20] sm:$0xff] %vm800_vm0, %v782_v54  ;;  %v1062_v23 = vpop.eup %1061  ;;  %v783_v21 = vmul.f32 %v1060_v17, %v1346_v15  ;;  %v605_v34 = vadd.f32 %v589_v59, %v553_v56  ;;  %v447_v43 = vadd.f32 %v431_v25, %v395_v44  ;;  %v590_v46 = vmul.f32 %v1198_v8, %v1544_v39  ;;  %v1580_v18 = vld [vmem:[%s1222_s18 + $0xb1] sm:$0xff] }
  0x4d   : >> { %v1064_v31 = vpop.eup %1063  ;;  %v784_v32 = vmul.f32 %v1062_v23, %v1352_v48  ;;  %1073 = vpow2.f32 %v1017_v35  ;;  %v642_v16 = vmul.f32 %v1203_v9, %v1547_v37  ;;  %v341_v63 = vadd.f32 %v325_v22, %v289_v40  ;;  %v1583_v17 = vld [vmem:[%s1222_s18 + $0xb2] sm:$0xff]  ;;  %v969_v40 = vld [vmem:[%s1222_s18 + $0xc0] sm:$0xff] }
  0x4e   : >> { %802 = vst.msk [vmem:[%s1508_s20 + $0x8] sm:$0xff] %vm800_vm0, %v783_v21  ;;  %v739_v15 = vadd.f32 1.0, %v1064_v31  ;;  %v657_v48 = vadd.f32 %v641_v42, %v605_v34  ;;  %v499_v47 = vadd.f32 %v483_v55, %v447_v43  ;;  %v432_v26 = vmul.f32 %v1503_v53, %v1183_v5 }
  0x4f   : >> { %803 = vst.msk [vmem:[%s1508_s20 + $0x10] sm:$0xff] %vm800_vm0, %v784_v32  ;;  %v484_v10 = vmul.f32 %v1516_v11, %v1188_v6  ;;  %v222_v29 = vmul.f32 %v1458_v14, %v1163_v1  ;;  %v274_v61 = vmul.f32 %v1470_v49, %v1168_v2  ;;  %v396_v38 = vadd.f32 %v380_v28, %v341_v63  ;;  %v986_v63 = vld [vmem:[%s1222_s18 + $0xc1] sm:$0xff] }
  0x50   : >> { %1075 = vrcp.f32 %v739_v15  ;;  %v1066_v51 = vpop.eup %1065  ;;  %v1566_v52 = vadd.f32 %v1158_v0, %v657_v48  ;;  %v554_v30 = vadd.f32 %v538_v27, %v499_v47  ;;  %v326_v13 = vmul.f32 %v1473_v19, %v1173_v3 }
  0x51   : >> { %v1068_v59 = vpop.eup %1067  ;;  %v785_v14 = vmul.f32 %v1066_v51, %v1374_v41  ;;  %v539_v49 = vmul.f32 %v1193_v7, %v1569_v58  ;;  %v290_v25 = vadd.f32 %v274_v61, %v222_v29  ;;  %v381_v54 = vmul.f32 %v1530_v50, %v1178_v4 }
  0x52   : >> { %v740_v62 = vadd.f32 1.0, %v1068_v59  ;;  %v1018_v12 = vmul.f32 -1.442695, %v1566_v52  ;;  %v606_v42 = vadd.f32 %v590_v46, %v554_v30  ;;  %v448_v55 = vadd.f32 %v432_v26, %v396_v38  ;;  %v1003_v26 = vld [vmem:[%s1222_s18 + $0xc2] sm:$0xff] }
  0x53   : >> { %804 = vst.msk [vmem:[%s1508_s20 + $0x18] sm:$0xff] %vm800_vm0, %v785_v14  ;;  %v591_v41 = vmul.f32 %v1198_v8, %v1580_v18  ;;  %v643_v19 = vmul.f32 %v1203_v9, %v1583_v17  ;;  %v342_v56 = vadd.f32 %v326_v13, %v290_v25  ;;  %v433_v44 = vmul.f32 %v1544_v39, %v1183_v5 }
  0x54   : >> { %v1070_v20 = vpop.eup %1069  ;;  %1077 = vrcp.f32 %v740_v62  ;;  %v658_v22 = vadd.f32 %v642_v16, %v606_v42  ;;  %v500_v23 = vadd.f32 %v484_v10, %v448_v55  ;;  %v485_v21 = vmul.f32 %v1547_v37, %v1188_v6 }
  0x55   : >> { %v1072_v35 = vpop.eup %1071  ;;  %v786_v27 = vmul.f32 %v1070_v20, %v1399_v60  ;;  %1079 = vpow2.f32 %v1018_v12  ;;  %v397_v28 = vadd.f32 %v381_v54, %v342_v56  ;;  %v223_v31 = vmul.f32 %v1493_v57, %v1163_v1  ;;  %v987_v56 = vld [vmem:[%s1222_s18 + $0xc9] sm:$0xff] }
  0x56   : >> { %v741_v32 = vadd.f32 1.0, %v1072_v35  ;;  %v1599_v34 = vadd.f32 %v1158_v0, %v658_v22  ;;  %v555_v43 = vadd.f32 %v539_v49, %v500_v23  ;;  %v275_v15 = vmul.f32 %v1503_v53, %v1168_v2 }
  0x57   : >> { %805 = vst.msk [vmem:[%s1508_s20 + $0x20] sm:$0xff] %vm800_vm0, %v786_v27  ;;  %v449_v46 = vadd.f32 %v433_v44, %v397_v28  ;;  %v540_v60 = vmul.f32 %v1193_v7, %v969_v40  ;;  %v327_v16 = vmul.f32 %v1516_v11, %v1173_v3  ;;  %v382_v57 = vmul.f32 %v1569_v58, %v1178_v4  ;;  %v971_v28 = vld [vmem:[%s1222_s18 + $0xd8] sm:$0xff] }
  0x58   : >> { %1081 = vrcp.f32 %v741_v32  ;;  %v1019_v48 = vmul.f32 -1.442695, %v1599_v34  ;;  %v607_v47 = vadd.f32 %v591_v41, %v555_v43  ;;  %v291_v10 = vadd.f32 %v275_v15, %v223_v31 }
  0x59   : >> { %v501_v29 = vadd.f32 %v485_v21, %v449_v46  ;;  %v592_v53 = vmul.f32 %v1198_v8, %v986_v63  ;;  %v644_v61 = vmul.f32 %v1203_v9, %v1003_v26  ;;  %v434_v51 = vmul.f32 %v1580_v18, %v1183_v5  ;;  %v1004_v21 = vld [vmem:[%s1222_s18 + $0xca] sm:$0xff] }
  0x5a   : >> { %v1074_v30 = vpop.eup %1073  ;;  %1083 = vpow2.f32 %v1019_v48  ;;  %v659_v11 = vadd.f32 %v643_v19, %v607_v47  ;;  %v343_v38 = vadd.f32 %v327_v16, %v291_v10  ;;  %v486_v13 = vmul.f32 %v1583_v17, %v1188_v6  ;;  %v970_v19 = vld [vmem:[%s1222_s18 + $0xc8] sm:$0xff] }
  0x5b   : >> { %v742_v59 = vadd.f32 1.0, %v1074_v30  ;;  %v556_v14 = vadd.f32 %v540_v60, %v501_v29  ;;  %v224_v49 = vmul.f32 %v1530_v50, %v1163_v1  ;;  %v276_v25 = vmul.f32 %v1544_v39, %v1168_v2  ;;  %v988_v60 = vld [vmem:[%s1222_s18 + $0xd9] sm:$0xff] }
  0x5c   : >> { %v1625_v62 = vadd.f32 %v1158_v0, %v659_v11  ;;  %v398_v12 = vadd.f32 %v382_v57, %v343_v38  ;;  %v328_v42 = vmul.f32 %v1547_v37, %v1173_v3  ;;  %v383_v55 = vmul.f32 %v969_v40, %v1178_v4 }
  0x5d   : >> { %v1076_v54 = vpop.eup %1075  ;;  %1085 = vrcp.f32 %v742_v59  ;;  %v608_v50 = vadd.f32 %v592_v53, %v556_v14  ;;  %v292_v39 = vadd.f32 %v276_v25, %v224_v49  ;;  %v541_v22 = vmul.f32 %v1193_v7, %v970_v19  ;;  %v972_v14 = vld [vmem:[%s1222_s18 + $0xe0] sm:$0xff] }
  0x5e   : >> { %v787_v41 = vmul.f32 %v1076_v54, %v1434_v24  ;;  %v1020_v44 = vmul.f32 -1.442695, %v1625_v62  ;;  %v450_v20 = vadd.f32 %v434_v51, %v398_v12  ;;  %v593_v23 = vmul.f32 %v1198_v8, %v987_v56 }
  0x5f   : >> { %v660_v37 = vadd.f32 %v644_v61, %v608_v50  ;;  %v645_v24 = vmul.f32 %v1203_v9, %v1004_v21  ;;  %v344_v35 = vadd.f32 %v328_v42, %v292_v39  ;;  %v435_v27 = vmul.f32 %v986_v63, %v1183_v5  ;;  %v989_v50 = vld [vmem:[%s1222_s18 + $0xe1] sm:$0xff] }
  0x60   : >> { %806 = vst.msk [vmem:[%s1508_s20 + $0x28] sm:$0xff] %vm800_vm0, %v787_v41  ;;  %1087 = vpow2.f32 %v1020_v44  ;;  %v502_v31 = vadd.f32 %v486_v13, %v450_v20  ;;  %v487_v32 = vmul.f32 %v1003_v26, %v1188_v6  ;;  %v225_v43 = vmul.f32 %v1569_v58, %v1163_v1  ;;  %v1006_v20 = vld [vmem:[%s1222_s18 + $0xe2] sm:$0xff] }
  0x61   : >> { %v1078_v40 = vpop.eup %1077  ;;  %v1646_v15 = vadd.f32 %v1158_v0, %v660_v37  ;;  %v399_v46 = vadd.f32 %v383_v55, %v344_v35  ;;  %v277_v16 = vmul.f32 %v1580_v18, %v1168_v2  ;;  %v329_v57 = vmul.f32 %v1583_v17, %v1173_v3  ;;  %v1005_v17 = vld [vmem:[%s1222_s18 + $0xda] sm:$0xff] }
  0x62   : >> { %v1080_v48 = vpop.eup %1079  ;;  %v788_v47 = vmul.f32 %v1078_v40, %v1467_v36  ;;  %v557_v63 = vadd.f32 %v541_v22, %v502_v31  ;;  %v542_v58 = vmul.f32 %v1193_v7, %v971_v28  ;;  %v384_v26 = vmul.f32 %v970_v19, %v1178_v4 }
  0x63   : >> { %v743_v10 = vadd.f32 1.0, %v1080_v48  ;;  %v1021_v29 = vmul.f32 -1.442695, %v1646_v15  ;;  %v451_v53 = vadd.f32 %v435_v27, %v399_v46  ;;  %v293_v61 = vadd.f32 %v277_v16, %v225_v43 }
  0x64   : >> { %807 = vst.msk [vmem:[%s1508_s20 + $0x30] sm:$0xff] %vm800_vm0, %v788_v47  ;;  %v609_v18 = vadd.f32 %v593_v23, %v557_v63  ;;  %v594_v51 = vmul.f32 %v1198_v8, %v988_v60  ;;  %v436_v38 = vmul.f32 %v987_v56, %v1183_v5  ;;  %v646_v54 = vmul.f32 %v1203_v9, %v1005_v17 }
  0x65   : >> { %v1082_v30 = vpop.eup %1081  ;;  %1089 = vrcp.f32 %v743_v10  ;;  %v503_v36 = vadd.f32 %v487_v32, %v451_v53  ;;  %v345_v11 = vadd.f32 %v329_v57, %v293_v61  ;;  %v488_v42 = vmul.f32 %v1004_v21, %v1188_v6 }
  0x66   : >> { %v789_v13 = vmul.f32 %v1082_v30, %v1490_v45  ;;  %1091 = vpow2.f32 %v1021_v29  ;;  %v661_v59 = vadd.f32 %v645_v24, %v609_v18  ;;  %v543_v56 = vmul.f32 %v1193_v7, %v972_v14 }
  0x67   : >> { %v1084_v49 = vpop.eup %1083  ;;  %v558_v25 = vadd.f32 %v542_v58, %v503_v36  ;;  %v400_v12 = vadd.f32 %v384_v26, %v345_v11  ;;  %v595_v21 = vmul.f32 %v1198_v8, %v989_v50  ;;  %v647_v28 = vmul.f32 %v1203_v9, %v1006_v20 }
  0x68   : >> { %808 = vst.msk [vmem:[%s1508_s20 + $0x38] sm:$0xff] %vm800_vm0, %v789_v13  ;;  %v744_v55 = vadd.f32 1.0, %v1084_v49  ;;  %v683_v41 = vadd.f32 %v1158_v0, %v661_v59 }
  0x69   : >> { %v610_v19 = vadd.f32 %v594_v51, %v558_v25  ;;  %v452_v45 = vadd.f32 %v436_v38, %v400_v12 }
  0x6a   : >> { %v1086_v39 = vpop.eup %1085  ;;  %1093 = vrcp.f32 %v744_v55  ;;  %v1022_v44 = vmul.f32 -1.442695, %v683_v41 }
  0x6b   : >> { %v790_v22 = vmul.f32 %v1086_v39, %v1519_v33  ;;  %v662_v23 = vadd.f32 %v646_v54, %v610_v19  ;;  %v504_v37 = vadd.f32 %v488_v42, %v452_v45 }
  0x6c   : >> { %1095 = vpow2.f32 %v1022_v44 }
  0x6d   : >> { %v1088_v24 = vpop.eup %1087  ;;  %809 = vst.msk [vmem:[%s1508_s20 + $0x40] sm:$0xff] %vm800_vm0, %v790_v22  ;;  %v684_v35 = vadd.f32 %v1158_v0, %v662_v23  ;;  %v559_v27 = vadd.f32 %v543_v56, %v504_v37 }
  0x6e   : >> { %v745_v31 = vadd.f32 1.0, %v1088_v24 }
  0x6f   : >> { %v1023_v32 = vmul.f32 -1.442695, %v684_v35  ;;  %v611_v43 = vadd.f32 %v595_v21, %v559_v27 }
  0x70   : >> { %1097 = vrcp.f32 %v745_v31 }
  0x71   : >> { %1099 = vpow2.f32 %v1023_v32  ;;  %v663_v33 = vadd.f32 %v647_v28, %v611_v43 }
  0x72   : >> { %v1090_v40 = vpop.eup %1089 }
  0x73   : >> { %v1092_v46 = vpop.eup %1091  ;;  %v791_v60 = vmul.f32 %v1090_v40, %v1566_v52  ;;  %v685_v16 = vadd.f32 %v1158_v0, %v663_v33 }
  0x74   : >> { %v746_v57 = vadd.f32 1.0, %v1092_v46 }
  0x75   : >> { %810 = vst.msk [vmem:[%s1508_s20 + $0x48] sm:$0xff] %vm800_vm0, %v791_v60  ;;  %v1024_v48 = vmul.f32 -1.442695, %v685_v16 }
  0x76   : >> { %1101 = vrcp.f32 %v746_v57 }
  0x77   : >> { %v1094_v47 = vpop.eup %1093  ;;  %1103 = vpow2.f32 %v1024_v48 }
  0x78   : >> { %v792_v63 = vmul.f32 %v1094_v47, %v1599_v34 }
  0x79   : >> { %v1096_v58 = vpop.eup %1095 }
  0x7a   : >> { %811 = vst.msk [vmem:[%s1508_s20 + $0x50] sm:$0xff] %vm800_vm0, %v792_v63  ;;  %v747_v26 = vadd.f32 1.0, %v1096_v58 }
  0x7c   : >> { %1105 = vrcp.f32 %v747_v26 }
  0x7d   : >> { %v1098_v52 = vpop.eup %1097 }
  0x7e   : >> { %v1100_v10 = vpop.eup %1099  ;;  %v793_v29 = vmul.f32 %v1098_v52, %v1625_v62 }
  0x7f   : >> { %v748_v53 = vadd.f32 1.0, %v1100_v10 }
  0x80   : >> { %812 = vst.msk [vmem:[%s1508_s20 + $0x58] sm:$0xff] %vm800_vm0, %v793_v29 }
  0x81   : >> { %1107 = vrcp.f32 %v748_v53 }
  0x83   : >> { %v1102_v61 = vpop.eup %1101 }
  0x84   : >> { %v1104_v18 = vpop.eup %1103  ;;  %v794_v34 = vmul.f32 %v1102_v61, %v1646_v15 }
  0x85   : >> { %v749_v51 = vadd.f32 1.0, %v1104_v18 }
  0x86   : >> { %813 = vst.msk [vmem:[%s1508_s20 + $0x60] sm:$0xff] %vm800_vm0, %v794_v34 }
  0x87   : >> { %1109 = vrcp.f32 %v749_v51 }
  0x89   : >> { %v1106_v17 = vpop.eup %1105 }
  0x8a   : >> { %v795_v30 = vmul.f32 %v1106_v17, %v683_v41 }
  0x8c   : >> { %814 = vst.msk [vmem:[%s1508_s20 + $0x68] sm:$0xff] %vm800_vm0, %v795_v30 }
  0x8e   : >> { %v1108_v36 = vpop.eup %1107 }
  0x8f   : >> { %v796_v11 = vmul.f32 %v1108_v36, %v684_v35 }
  0x91   : >> { %815 = vst.msk [vmem:[%s1508_s20 + $0x70] sm:$0xff] %vm800_vm0, %v796_v11 }
  0x93   : > { %185 = sbr.rel (!%p183_p4) target bundleno = 17 (0x11), region = 73 }
  0x94   : >> { %v1110_v62 = vpop.eup %1109 }
  0x95   : >> { %v797_v38 = vmul.f32 %v1110_v62, %v685_v16 }
  0x97   : >> { %816 = vst.msk [vmem:[%s1508_s20 + $0x78] sm:$0xff] %vm800_vm0, %v797_v38 }
  0x98 PF: > { %s13_s12 = sadd.s32 1, %s1121_s12  }
  0x99   : > { %p10_p5 = scmp.ge.s32.totalorder %s13_s12, 4  }
  0x9b   :  { %12 = sbr.rel (!%p10_p5) target bundleno = 1 (0x1), region = 84 }

// kernel: run.23
= control target key start
LH: loop header
LB: loop body
LE: loop exit
PB: predicated region body
PF: predicated region fallthrough
CT: control target
= control target key end

     0   :  { %s874_s9 = smov 0   ;;  %s876_s10 = smov 0   ;;  %s1000_s0 = inlined_call_operand.vmem [shape: bf16[4,512,8], index: 0, kind: input, shape index: {}]   ;;  %s1001_s1 = inlined_call_operand.vmem [shape: bf16[4,8,128], index: 1, kind: input, shape index: {}]   ;;  %s1002_s2 = inlined_call_operand.vmem [shape: f32[4,512,128], index: 2, kind: output, shape index: {}]  }
   0x1   :  { %s878_s11 = smov 0   ;;  %s880_s12 = smov 0  }
   0x2   :  { %s882_s13 = smov 0  }
   0x3 LB: > { %s21_s14 = sadd.s32 1, %s849_s11  ;;  %s24_s15 = sadd.s32 1, %s853_s12  ;;  %s857_s13 = sphi %s882_s13, %s12_s13   ;;  %s853_s12 = sphi %s880_s12, %s1006_s12   ;;  %s849_s11 = sphi %s878_s11, %s1005_s11   ;;  %s845_s10 = sphi %s876_s10, %s1004_s10   ;;  %s841_s9 = sphi %s874_s9, %s1003_s9  }
   0x4   : > { %p22_p0 = scmp.ge.s32.totalorder %s21_s14, 2  ;;  %p666_p1 = scmp.ge.s32.totalorder %s857_s13, 1 }
   0x5   : > { %p142_p2 = scmp.lt.s32.totalorder %s857_s13, 9 }
   0x6   : > { %s1008_s14 = smov (%p22_p0, %s21_s14), 0  ;;  %s1010_s15 = smov (!%p22_p0, %s24_s15), %s853_s12 }
   0x7   : > { %p143_p3 = pnand %p666_p1, %p142_p2  ;;  %p26_p4 = scmp.ge.s32.totalorder %s1010_s15, 4 }
   0x8   : > { %s667_s16 = sshll.u32 (!%p143_p3), %s841_s9, 5  ;;  %p177_p5 = scmp.lt.s32.totalorder (!%p143_p3), %s845_s10, 3 }
   0x9   : > { %s1012_s15 = smov (%p26_p4, %s1010_s15), 0  ;;  %146 = sbr.rel (%p143_p3) target bundleno = 246 (0xf6), region = 28 }
   0xa   : > { %p179_p6 = scmp.lt.s32.totalorder (!%p143_p3), %s667_s16, 63 }
   0xe   : > { %s1014_s10 = smov (!%p177_p5, %s845_s10), 3  ;;  %s1016_s16 = smov (!%p179_p6, %s667_s16), 63  ;;  %vm363_vm0 = vcmask 1043456   ;;  %vm314_vm1 = vcmask 64512  }
   0xf   : > { %s668_s17 = sshll.u32 %s1014_s10, 6  ;;  %s670_s18 = sshll.u32 %s1014_s10, 2 }
  0x10   : > { %s904_s19 = sadd.s32 %s668_s17, %s1016_s16  ;;  %s189_s22 = scalar_lea.vmem %s1001_s1, %s670_s18 }
  0x11   : > { %s669_s23 = sshll.u32 %s904_s19, 2  ;;  %v233_v0 = vld [vmem:[%s189_s22] sm:$0xf]  ;;  %s673_s27 = sshll.u32 %s904_s19, 3 }
  0x12   : > { %s913_s26 = scalar_lea.vmem %s1000_s0, %s669_s23  ;;  %761 = vmatprep.subr.msk.bf16.mxu0 %vm363_vm0, %v233_v0  ;;  %762 = vmatprep.subr.msk.bf16.mxu1 %vm363_vm0, %v233_v0  ;;  %v365_v1 = vsel %vm363_vm0, %v233_v0, 0  ;;  %s951_s30 = scalar_lea.vmem %s1002_s2, %s673_s27 }
  0x13   : > { %726 = vmatpush3.bf16.msra.mxu0 %v365_v1  ;;  %760 = vmatpush3.bf16.msra.mxu1 %v365_v1  ;;  %v803_v2 = vld [vmem:[%s913_s26] sm:$0xff]   ;;  %v805_v4 = vld [vmem:[%s913_s26 + $0x8] sm:$0xff]   ;;  %v807_v6 = vld [vmem:[%s913_s26 + $0x10] sm:$0xff]  }
  0x14   : > { %v804_v3 = vld [vmem:[%s913_s26 + $0x40] sm:$0xff]   ;;  %727 = vmatprep.mubr.msk.bf16.mxu0 %vm314_vm1, %v803_v2  ;;  %v806_v5 = vld [vmem:[%s913_s26 + $0x48] sm:$0xff]   ;;  %v808_v7 = vld [vmem:[%s913_s26 + $0x50] sm:$0xff]  }
  0x15   : > { %743 = vmatprep.mubr.msk.bf16.mxu1 %vm314_vm1, %v804_v3  ;;  %v809_v8 = vld [vmem:[%s913_s26 + $0x18] sm:$0xff]   ;;  %v811_v10 = vld [vmem:[%s913_s26 + $0x20] sm:$0xff]   ;;  %v813_v12 = vld [vmem:[%s913_s26 + $0x28] sm:$0xff]  }
  0x16   : > { %728 = vmatmul.mubr.msk.bf16.vlgmr.msra.gmra.mxu0 %vm314_vm1, %v805_v4  ;;  %744 = vmatmul.mubr.msk.bf16.vlgmr.msra.gmra.mxu1 %vm314_vm1, %v806_v5  ;;  %v810_v9 = vld [vmem:[%s913_s26 + $0x58] sm:$0xff]   ;;  %v812_v11 = vld [vmem:[%s913_s26 + $0x60] sm:$0xff]   ;;  %v814_v13 = vld [vmem:[%s913_s26 + $0x68] sm:$0xff]  }
  0x17   : > { %731 = vmatprep.mubr.msk.bf16.mxu0 %vm314_vm1, %v807_v6  ;;  %747 = vmatprep.mubr.msk.bf16.mxu1 %vm314_vm1, %v808_v7  ;;  %v815_v14 = vld [vmem:[%s913_s26 + $0x30] sm:$0xff]   ;;  %v817_v16 = vld [vmem:[%s913_s26 + $0x38] sm:$0xff]  }
  0x18   : > { %v816_v15 = vld [vmem:[%s913_s26 + $0x70] sm:$0xff]   ;;  %v818_v17 = vld [vmem:[%s913_s26 + $0x78] sm:$0xff]  }
  0x1e   : > { %732 = vmatmul.mubr.msk.bf16.gmra.mxu0 %vm314_vm1, %v809_v8  ;;  %748 = vmatmul.mubr.msk.bf16.gmra.mxu1 %vm314_vm1, %v810_v9 }
  0x1f   : > { %735 = vmatprep.mubr.msk.bf16.mxu0 %vm314_vm1, %v811_v10  ;;  %751 = vmatprep.mubr.msk.bf16.mxu1 %vm314_vm1, %v812_v11 }
  0x26   : > { %736 = vmatmul.mubr.msk.bf16.gmra.mxu0 %vm314_vm1, %v813_v12  ;;  %752 = vmatmul.mubr.msk.bf16.gmra.mxu1 %vm314_vm1, %v814_v13 }
  0x27   : > { %739 = vmatprep.mubr.msk.bf16.mxu0 %vm314_vm1, %v815_v14  ;;  %755 = vmatprep.mubr.msk.bf16.mxu1 %vm314_vm1, %v816_v15 }
  0x2e   : > { %740 = vmatmul.mubr.msk.bf16.gmra.mxu0 %vm314_vm1, %v817_v16  ;;  %756 = vmatmul.mubr.msk.bf16.gmra.mxu1 %vm314_vm1, %v818_v17 }
  0xd6   : > { %v729_v18 = vpop.f32.mrf.mxu0  ;;  %v745_v19 = vpop.f32.mrf.mxu1 }
  0xd7   : > { %530 = vst [vmem:[%s951_s30 + $0x10] sm:$0xff] %v729_v18  ;;  %546 = vst [vmem:[%s951_s30 + $0x90] sm:$0xff] %v745_v19 }
  0xd8   : > { %v401_v20 = vpop.f32.mrf.mxu0  ;;  %v465_v21 = vpop.f32.mrf.mxu1 }
  0xd9   : > { %528 = vst [vmem:[%s951_s30] sm:$0xff] %v401_v20  ;;  %544 = vst [vmem:[%s951_s30 + $0x80] sm:$0xff] %v465_v21 }
  0xda   : > { %v730_v22 = vpop.f32.mrf.mxu0  ;;  %v746_v23 = vpop.f32.mrf.mxu1 }
  0xdb   : > { %531 = vst [vmem:[%s951_s30 + $0x18] sm:$0xff] %v730_v22  ;;  %547 = vst [vmem:[%s951_s30 + $0x98] sm:$0xff] %v746_v23 }
  0xdc   : > { %v404_v24 = vpop.f32.mrf.mxu0  ;;  %v468_v25 = vpop.f32.mrf.mxu1 }
  0xdd   : > { %529 = vst [vmem:[%s951_s30 + $0x8] sm:$0xff] %v404_v24  ;;  %545 = vst [vmem:[%s951_s30 + $0x88] sm:$0xff] %v468_v25 }
  0xde   : > { %v733_v26 = vpop.f32.mrf.mxu0  ;;  %v749_v27 = vpop.f32.mrf.mxu1 }
  0xdf   : > { %534 = vst [vmem:[%s951_s30 + $0x30] sm:$0xff] %v733_v26  ;;  %550 = vst [vmem:[%s951_s30 + $0xb0] sm:$0xff] %v749_v27 }
  0xe0   : > { %v417_v28 = vpop.f32.mrf.mxu0  ;;  %v481_v29 = vpop.f32.mrf.mxu1 }
  0xe1   : > { %532 = vst [vmem:[%s951_s30 + $0x20] sm:$0xff] %v417_v28  ;;  %548 = vst [vmem:[%s951_s30 + $0xa0] sm:$0xff] %v481_v29 }
  0xe2   : > { %v734_v30 = vpop.f32.mrf.mxu0  ;;  %v750_v31 = vpop.f32.mrf.mxu1 }
  0xe3   : > { %535 = vst [vmem:[%s951_s30 + $0x38] sm:$0xff] %v734_v30  ;;  %551 = vst [vmem:[%s951_s30 + $0xb8] sm:$0xff] %v750_v31 }
  0xe4   : > { %v420_v32 = vpop.f32.mrf.mxu0  ;;  %v484_v33 = vpop.f32.mrf.mxu1 }
  0xe5   : > { %533 = vst [vmem:[%s951_s30 + $0x28] sm:$0xff] %v420_v32  ;;  %549 = vst [vmem:[%s951_s30 + $0xa8] sm:$0xff] %v484_v33 }
  0xe6   : > { %v737_v34 = vpop.f32.mrf.mxu0  ;;  %v753_v35 = vpop.f32.mrf.mxu1 }
  0xe7   : > { %538 = vst [vmem:[%s951_s30 + $0x50] sm:$0xff] %v737_v34  ;;  %554 = vst [vmem:[%s951_s30 + $0xd0] sm:$0xff] %v753_v35 }
  0xe8   : > { %v433_v36 = vpop.f32.mrf.mxu0  ;;  %v497_v37 = vpop.f32.mrf.mxu1 }
  0xe9   : > { %536 = vst [vmem:[%s951_s30 + $0x40] sm:$0xff] %v433_v36  ;;  %552 = vst [vmem:[%s951_s30 + $0xc0] sm:$0xff] %v497_v37 }
  0xea   : > { %v738_v38 = vpop.f32.mrf.mxu0  ;;  %v754_v39 = vpop.f32.mrf.mxu1 }
  0xeb   : > { %539 = vst [vmem:[%s951_s30 + $0x58] sm:$0xff] %v738_v38  ;;  %555 = vst [vmem:[%s951_s30 + $0xd8] sm:$0xff] %v754_v39 }
  0xec   : > { %v436_v40 = vpop.f32.mrf.mxu0  ;;  %v500_v41 = vpop.f32.mrf.mxu1 }
  0xed   : > { %537 = vst [vmem:[%s951_s30 + $0x48] sm:$0xff] %v436_v40  ;;  %553 = vst [vmem:[%s951_s30 + $0xc8] sm:$0xff] %v500_v41 }
  0xee   : > { %v741_v42 = vpop.f32.mrf.mxu0  ;;  %v757_v43 = vpop.f32.mrf.mxu1 }
  0xef   : > { %542 = vst [vmem:[%s951_s30 + $0x70] sm:$0xff] %v741_v42  ;;  %558 = vst [vmem:[%s951_s30 + $0xf0] sm:$0xff] %v757_v43 }
  0xf0   : > { %v449_v44 = vpop.f32.mrf.mxu0  ;;  %v513_v45 = vpop.f32.mrf.mxu1 }
  0xf1   : > { %540 = vst [vmem:[%s951_s30 + $0x60] sm:$0xff] %v449_v44  ;;  %556 = vst [vmem:[%s951_s30 + $0xe0] sm:$0xff] %v513_v45 }
  0xf2   : > { %v742_v46 = vpop.f32.mrf.mxu0  ;;  %v758_v47 = vpop.f32.mrf.mxu1 }
  0xf3   : > { %543 = vst [vmem:[%s951_s30 + $0x78] sm:$0xff] %v742_v46  ;;  %559 = vst [vmem:[%s951_s30 + $0xf8] sm:$0xff] %v758_v47 }
  0xf4   : > { %v452_v48 = vpop.f32.mrf.mxu0  ;;  %v516_v49 = vpop.f32.mrf.mxu1 }
  0xf5   : > { %541 = vst [vmem:[%s951_s30 + $0x68] sm:$0xff] %v452_v48  ;;  %557 = vst [vmem:[%s951_s30 + $0xe8] sm:$0xff] %v516_v49 }
  0xf6 PF: > { %s12_s13 = sadd.s32 1, %s857_s13   ;;  %s1003_s9 = smov %s849_s11 }
  0xf7   : > { %p9_p7 = scmp.ge.s32.totalorder %s12_s13, 10   ;;  %s1004_s10 = smov %s853_s12 }
  0xf8   : > { %s1005_s11 = smov %s1008_s14  ;;  %s1006_s12 = smov %s1012_s15 }
  0xf9   :  { %11 = sbr.rel (!%p9_p7) target bundleno = 3 (0x3), region = 61 }

// kernel: squeeze.13
= control target key start
LH: loop header
LB: loop body
LE: loop exit
PB: predicated region body
PF: predicated region fallthrough
CT: control target
= control target key end

     0   :  { %s385_s10 = smov 112   ;;  %s386_s15 = smov 96   ;;  %vm3_vm0 = vcmask 130048   ;;  %s714_s0 = inlined_call_operand.vmem [shape: f32[2,1,8,256], index: 0, kind: input, shape index: {}]   ;;  %s715_s1 = inlined_call_operand.vmem [shape: f32[2,8,16,16], index: 1, kind: output, shape index: {}]  }
   0x1   :  { %v306_v0 = vld.sshfl [vmem:[%s714_s0 + $0x10] sm:$0xff pattern:$0xb3a29180]   ;;  %v41_v1 = vld.sshfl [vmem:[%s714_s0] sm:$0xff pattern:$0xb3a29180]  }
   0x2   :  { %60 = vrot.lane.b32.xlu1 %v306_v0, %s385_s10  ;;  %42 = vrot.lane.b32.xlu0 %v41_v1, %s385_s10  ;;  %v309_v2 = vld.sshfl [vmem:[%s714_s0 + $0x14] sm:$0xff pattern:$0xb3a29180]   ;;  %v303_v3 = vld.sshfl [vmem:[%s714_s0 + $0x4] sm:$0xff pattern:$0xb3a29180]  }
   0x3   :  { %s387_s16 = smov 80   ;;  %s388_s17 = smov 64   ;;  %v2_v4 = vld [vmem:[%s714_s0] sm:$0xff]   ;;  %v286_v5 = vld [vmem:[%s714_s0 + $0x8] sm:$0xff]   ;;  %v291_v6 = vld [vmem:[%s714_s0 + $0x10] sm:$0xff]  }
   0x4   :  { %s389_s18 = smov 48   ;;  %4 = vst.msk [vmem:[%s715_s1] ss:$16 sm:$0x3] %vm3_vm0, %v2_v4   ;;  %v296_v7 = vld [vmem:[%s714_s0 + $0x18] sm:$0xff]   ;;  %s390_s0 = smov 32  }
   0x5   :  { %5 = vst.msk [vmem:[%s715_s1] ss:$16 sm:$0xc] %vm3_vm0, %v2_v4   ;;  %6 = vst.msk [vmem:[%s715_s1] ss:$16 sm:$0x30] %vm3_vm0, %v2_v4  }
   0x6   :  { %69 = vrot.lane.b32.xlu1 %v309_v2, %s385_s10  ;;  %51 = vrot.lane.b32.xlu0 %v303_v3, %s385_s10  ;;  %7 = vst.msk [vmem:[%s715_s1] ss:$16 sm:$0xc0] %vm3_vm0, %v2_v4   ;;  %287 = vst.msk [vmem:[%s715_s1 + $0x8] ss:$16 sm:$0x3] %vm3_vm0, %v286_v5  }
   0x7   :  { %288 = vst.msk [vmem:[%s715_s1 + $0x8] ss:$16 sm:$0xc] %vm3_vm0, %v286_v5   ;;  %289 = vst.msk [vmem:[%s715_s1 + $0x8] ss:$16 sm:$0x30] %vm3_vm0, %v286_v5  }
   0x8   :  { %290 = vst.msk [vmem:[%s715_s1 + $0x8] ss:$16 sm:$0xc0] %vm3_vm0, %v286_v5   ;;  %292 = vst.msk [vmem:[%s715_s1 + $0x80] ss:$16 sm:$0x3] %vm3_vm0, %v291_v6  }
   0x9   :  { %293 = vst.msk [vmem:[%s715_s1 + $0x80] ss:$16 sm:$0xc] %vm3_vm0, %v291_v6   ;;  %294 = vst.msk [vmem:[%s715_s1 + $0x80] ss:$16 sm:$0x30] %vm3_vm0, %v291_v6  }
   0xa   :  { %86 = vrot.lane.b32.xlu1 %v303_v3, %s386_s15  ;;  %77 = vrot.lane.b32.xlu0 %v41_v1, %s386_s15  ;;  %295 = vst.msk [vmem:[%s715_s1 + $0x80] ss:$16 sm:$0xc0] %vm3_vm0, %v291_v6   ;;  %297 = vst.msk [vmem:[%s715_s1 + $0x88] ss:$16 sm:$0x3] %vm3_vm0, %v296_v7  }
   0xb   :  { %298 = vst.msk [vmem:[%s715_s1 + $0x88] ss:$16 sm:$0xc] %vm3_vm0, %v296_v7   ;;  %299 = vst.msk [vmem:[%s715_s1 + $0x88] ss:$16 sm:$0x30] %vm3_vm0, %v296_v7  }
   0xc   :  { %300 = vst.msk [vmem:[%s715_s1 + $0x88] ss:$16 sm:$0xc0] %vm3_vm0, %v296_v7   ;;  %s391_s30 = smov 16  }
   0xe   :  { %104 = vrot.lane.b32.xlu1 %v309_v2, %s386_s15  ;;  %95 = vrot.lane.b32.xlu0 %v306_v0, %s386_s15 }
  0x12   :  { %121 = vrot.lane.b32.xlu1 %v303_v3, %s387_s16  ;;  %112 = vrot.lane.b32.xlu0 %v41_v1, %s387_s16 }
  0x16   :  { %139 = vrot.lane.b32.xlu1 %v309_v2, %s387_s16  ;;  %130 = vrot.lane.b32.xlu0 %v306_v0, %s387_s16 }
  0x1a   :  { %156 = vrot.lane.b32.xlu1 %v303_v3, %s388_s17  ;;  %147 = vrot.lane.b32.xlu0 %v41_v1, %s388_s17 }
  0x1e   :  { %174 = vrot.lane.b32.xlu1 %v309_v2, %s388_s17  ;;  %165 = vrot.lane.b32.xlu0 %v306_v0, %s388_s17 }
  0x22   :  { %191 = vrot.lane.b32.xlu1 %v303_v3, %s389_s18  ;;  %182 = vrot.lane.b32.xlu0 %v41_v1, %s389_s18 }
  0x26   :  { %209 = vrot.lane.b32.xlu1 %v309_v2, %s389_s18  ;;  %200 = vrot.lane.b32.xlu0 %v306_v0, %s389_s18 }
  0x2a   :  { %226 = vrot.lane.b32.xlu1 %v303_v3, %s390_s0  ;;  %217 = vrot.lane.b32.xlu0 %v41_v1, %s390_s0 }
  0x2e   :  { %244 = vrot.lane.b32.xlu1 %v309_v2, %s390_s0  ;;  %235 = vrot.lane.b32.xlu0 %v306_v0, %s390_s0 }
  0x32   :  { %261 = vrot.lane.b32.xlu1 %v303_v3, %s391_s30  ;;  %252 = vrot.lane.b32.xlu0 %v41_v1, %s391_s30 }
  0x36   :  { %279 = vrot.lane.b32.xlu1 %v309_v2, %s391_s30  ;;  %270 = vrot.lane.b32.xlu0 %v306_v0, %s391_s30 }
  0x74   :  { %v61_v8 = vpop.permute.xlu1 %60   ;;  %v43_v9 = vpop.permute.xlu0 %42  }
  0x75   :  { %307 = vst.msk [vmem:[%s715_s1 + $0x81] ss:$8 sm:$0xf] %vm3_vm0, %v61_v8   ;;  %308 = vst.msk [vmem:[%s715_s1 + $0x81] ss:$8 sm:$0xf0] %vm3_vm0, %v61_v8  }
  0x76   :  { %301 = vst.msk [vmem:[%s715_s1 + $0x1] ss:$8 sm:$0xf] %vm3_vm0, %v43_v9   ;;  %302 = vst.msk [vmem:[%s715_s1 + $0x1] ss:$8 sm:$0xf0] %vm3_vm0, %v43_v9  }
  0x78   :  { %v70_v10 = vpop.permute.xlu1 %69   ;;  %v52_v11 = vpop.permute.xlu0 %51  }
  0x79   :  { %310 = vst.msk [vmem:[%s715_s1 + $0xc1] ss:$8 sm:$0xf] %vm3_vm0, %v70_v10   ;;  %311 = vst.msk [vmem:[%s715_s1 + $0xc1] ss:$8 sm:$0xf0] %vm3_vm0, %v70_v10  }
  0x7a   :  { %304 = vst.msk [vmem:[%s715_s1 + $0x41] ss:$8 sm:$0xf] %vm3_vm0, %v52_v11   ;;  %305 = vst.msk [vmem:[%s715_s1 + $0x41] ss:$8 sm:$0xf0] %vm3_vm0, %v52_v11  }
  0x7c   :  { %v87_v12 = vpop.permute.xlu1 %86   ;;  %v78_v13 = vpop.permute.xlu0 %77  }
  0x7d   :  { %315 = vst.msk [vmem:[%s715_s1 + $0x42] ss:$8 sm:$0xf] %vm3_vm0, %v87_v12   ;;  %316 = vst.msk [vmem:[%s715_s1 + $0x42] ss:$8 sm:$0xf0] %vm3_vm0, %v87_v12  }
  0x7e   :  { %312 = vst.msk [vmem:[%s715_s1 + $0x2] ss:$8 sm:$0xf] %vm3_vm0, %v78_v13   ;;  %313 = vst.msk [vmem:[%s715_s1 + $0x2] ss:$8 sm:$0xf0] %vm3_vm0, %v78_v13  }
  0x80   :  { %v105_v14 = vpop.permute.xlu1 %104   ;;  %v96_v15 = vpop.permute.xlu0 %95  }
  0x81   :  { %321 = vst.msk [vmem:[%s715_s1 + $0xc2] ss:$8 sm:$0xf] %vm3_vm0, %v105_v14   ;;  %322 = vst.msk [vmem:[%s715_s1 + $0xc2] ss:$8 sm:$0xf0] %vm3_vm0, %v105_v14  }
  0x82   :  { %318 = vst.msk [vmem:[%s715_s1 + $0x82] ss:$8 sm:$0xf] %vm3_vm0, %v96_v15   ;;  %319 = vst.msk [vmem:[%s715_s1 + $0x82] ss:$8 sm:$0xf0] %vm3_vm0, %v96_v15  }
  0x84   :  { %v122_v16 = vpop.permute.xlu1 %121   ;;  %v113_v17 = vpop.permute.xlu0 %112  }
  0x85   :  { %326 = vst.msk [vmem:[%s715_s1 + $0x43] ss:$8 sm:$0xf] %vm3_vm0, %v122_v16   ;;  %327 = vst.msk [vmem:[%s715_s1 + $0x43] ss:$8 sm:$0xf0] %vm3_vm0, %v122_v16  }
  0x86   :  { %323 = vst.msk [vmem:[%s715_s1 + $0x3] ss:$8 sm:$0xf] %vm3_vm0, %v113_v17   ;;  %324 = vst.msk [vmem:[%s715_s1 + $0x3] ss:$8 sm:$0xf0] %vm3_vm0, %v113_v17  }
  0x88   :  { %v140_v18 = vpop.permute.xlu1 %139   ;;  %v131_v19 = vpop.permute.xlu0 %130  }
  0x89   :  { %332 = vst.msk [vmem:[%s715_s1 + $0xc3] ss:$8 sm:$0xf] %vm3_vm0, %v140_v18   ;;  %333 = vst.msk [vmem:[%s715_s1 + $0xc3] ss:$8 sm:$0xf0] %vm3_vm0, %v140_v18  }
  0x8a   :  { %329 = vst.msk [vmem:[%s715_s1 + $0x83] ss:$8 sm:$0xf] %vm3_vm0, %v131_v19   ;;  %330 = vst.msk [vmem:[%s715_s1 + $0x83] ss:$8 sm:$0xf0] %vm3_vm0, %v131_v19  }
  0x8c   :  { %v157_v20 = vpop.permute.xlu1 %156   ;;  %v148_v21 = vpop.permute.xlu0 %147  }
  0x8d   :  { %337 = vst.msk [vmem:[%s715_s1 + $0x44] ss:$8 sm:$0xf] %vm3_vm0, %v157_v20   ;;  %338 = vst.msk [vmem:[%s715_s1 + $0x44] ss:$8 sm:$0xf0] %vm3_vm0, %v157_v20  }
  0x8e   :  { %334 = vst.msk [vmem:[%s715_s1 + $0x4] ss:$8 sm:$0xf] %vm3_vm0, %v148_v21   ;;  %335 = vst.msk [vmem:[%s715_s1 + $0x4] ss:$8 sm:$0xf0] %vm3_vm0, %v148_v21  }
  0x90   :  { %v175_v22 = vpop.permute.xlu1 %174   ;;  %v166_v23 = vpop.permute.xlu0 %165  }
  0x91   :  { %343 = vst.msk [vmem:[%s715_s1 + $0xc4] ss:$8 sm:$0xf] %vm3_vm0, %v175_v22   ;;  %344 = vst.msk [vmem:[%s715_s1 + $0xc4] ss:$8 sm:$0xf0] %vm3_vm0, %v175_v22  }
  0x92   :  { %340 = vst.msk [vmem:[%s715_s1 + $0x84] ss:$8 sm:$0xf] %vm3_vm0, %v166_v23   ;;  %341 = vst.msk [vmem:[%s715_s1 + $0x84] ss:$8 sm:$0xf0] %vm3_vm0, %v166_v23  }
  0x94   :  { %v192_v24 = vpop.permute.xlu1 %191   ;;  %v183_v25 = vpop.permute.xlu0 %182  }
  0x95   :  { %348 = vst.msk [vmem:[%s715_s1 + $0x45] ss:$8 sm:$0xf] %vm3_vm0, %v192_v24   ;;  %349 = vst.msk [vmem:[%s715_s1 + $0x45] ss:$8 sm:$0xf0] %vm3_vm0, %v192_v24  }
  0x96   :  { %345 = vst.msk [vmem:[%s715_s1 + $0x5] ss:$8 sm:$0xf] %vm3_vm0, %v183_v25   ;;  %346 = vst.msk [vmem:[%s715_s1 + $0x5] ss:$8 sm:$0xf0] %vm3_vm0, %v183_v25  }
  0x98   :  { %v210_v26 = vpop.permute.xlu1 %209   ;;  %v201_v27 = vpop.permute.xlu0 %200  }
  0x99   :  { %354 = vst.msk [vmem:[%s715_s1 + $0xc5] ss:$8 sm:$0xf] %vm3_vm0, %v210_v26   ;;  %355 = vst.msk [vmem:[%s715_s1 + $0xc5] ss:$8 sm:$0xf0] %vm3_vm0, %v210_v26  }
  0x9a   :  { %351 = vst.msk [vmem:[%s715_s1 + $0x85] ss:$8 sm:$0xf] %vm3_vm0, %v201_v27   ;;  %352 = vst.msk [vmem:[%s715_s1 + $0x85] ss:$8 sm:$0xf0] %vm3_vm0, %v201_v27  }
  0x9c   :  { %v227_v28 = vpop.permute.xlu1 %226   ;;  %v218_v29 = vpop.permute.xlu0 %217  }
  0x9d   :  { %359 = vst.msk [vmem:[%s715_s1 + $0x46] ss:$8 sm:$0xf] %vm3_vm0, %v227_v28   ;;  %360 = vst.msk [vmem:[%s715_s1 + $0x46] ss:$8 sm:$0xf0] %vm3_vm0, %v227_v28  }
  0x9e   :  { %356 = vst.msk [vmem:[%s715_s1 + $0x6] ss:$8 sm:$0xf] %vm3_vm0, %v218_v29   ;;  %357 = vst.msk [vmem:[%s715_s1 + $0x6] ss:$8 sm:$0xf0] %vm3_vm0, %v218_v29  }
  0xa0   :  { %v245_v30 = vpop.permute.xlu1 %244   ;;  %v236_v31 = vpop.permute.xlu0 %235  }
  0xa1   :  { %365 = vst.msk [vmem:[%s715_s1 + $0xc6] ss:$8 sm:$0xf] %vm3_vm0, %v245_v30   ;;  %366 = vst.msk [vmem:[%s715_s1 + $0xc6] ss:$8 sm:$0xf0] %vm3_vm0, %v245_v30  }
  0xa2   :  { %362 = vst.msk [vmem:[%s715_s1 + $0x86] ss:$8 sm:$0xf] %vm3_vm0, %v236_v31   ;;  %363 = vst.msk [vmem:[%s715_s1 + $0x86] ss:$8 sm:$0xf0] %vm3_vm0, %v236_v31  }
  0xa4   :  { %v262_v32 = vpop.permute.xlu1 %261   ;;  %v253_v33 = vpop.permute.xlu0 %252  }
  0xa5   :  { %370 = vst.msk [vmem:[%s715_s1 + $0x47] ss:$8 sm:$0xf] %vm3_vm0, %v262_v32   ;;  %371 = vst.msk [vmem:[%s715_s1 + $0x47] ss:$8 sm:$0xf0] %vm3_vm0, %v262_v32  }
  0xa6   :  { %367 = vst.msk [vmem:[%s715_s1 + $0x7] ss:$8 sm:$0xf] %vm3_vm0, %v253_v33   ;;  %368 = vst.msk [vmem:[%s715_s1 + $0x7] ss:$8 sm:$0xf0] %vm3_vm0, %v253_v33  }
  0xa8   :  { %v280_v34 = vpop.permute.xlu1 %279   ;;  %v271_v35 = vpop.permute.xlu0 %270  }
  0xa9   :  { %376 = vst.msk [vmem:[%s715_s1 + $0xc7] ss:$8 sm:$0xf] %vm3_vm0, %v280_v34   ;;  %377 = vst.msk [vmem:[%s715_s1 + $0xc7] ss:$8 sm:$0xf0] %vm3_vm0, %v280_v34  }
  0xaa   :  { %373 = vst.msk [vmem:[%s715_s1 + $0x87] ss:$8 sm:$0xf] %vm3_vm0, %v271_v35   ;;  %374 = vst.msk [vmem:[%s715_s1 + $0x87] ss:$8 sm:$0xf0] %vm3_vm0, %v271_v35  }

// kernel: run.25
= control target key start
LH: loop header
LB: loop body
LE: loop exit
PB: predicated region body
PF: predicated region fallthrough
CT: control target
= control target key end

     0   :  { %s1753_s18 = smov 0   ;;  %s2624_s0 = inlined_call_operand.vmem [shape: f32[512,8], index: 0, kind: input, shape index: {}]   ;;  %s2625_s1 = inlined_call_operand.vmem [shape: f32[512,8], index: 1, kind: input, shape index: {}]   ;;  %s2626_s2 = inlined_call_operand.vmem [shape: f32[1,8], index: 2, kind: input, shape index: {}]   ;;  %s2627_s3 = inlined_call_operand.vmem [shape: f32[1,8], index: 3, kind: input, shape index: {}]   ;;  %s2628_s4 = inlined_call_operand.vmem [shape: bf16[8,128], index: 4, kind: input, shape index: {}]   ;;  %s2629_s5 = inlined_call_operand.vmem [shape: f32[512,128], index: 5, kind: output, shape index: {}]  }
   0x1 LB: > { %s1397_s19 = sadd.s32 4294967295, %s1721_s18   ;;  %p1401_p0 = scmp.ge.s32.totalorder %s1721_s18, 1  ;;  %s1721_s18 = sphi %s1753_s18, %s15_s18  }
   0x2   : > { %p199_p1 = scmp.lt.s32.totalorder %s1721_s18, 3 }
   0x4   : > { %p200_p2 = pnand %p1401_p0, %p199_p1 }
   0x6   : > { %203 = sbr.rel (%p200_p2) target bundleno = 594 (0x252), region = 40 }
   0xb   : > { %s1402_s20 = sshll.u32 %s1397_s19, 5  ;;  %vm283_vm0 = vcmask 64512   ;;  %vm1132_vm1 = vcmask 1043456  }
   0xc   : > { %p233_p3 = scmp.lt.s32.totalorder %s1402_s20, 63 }
   0xe   : > { %s2733_s20 = smov (!%p233_p3, %s1402_s20), 63 }
   0xf   : > { %s1761_s21 = sshll.u32 %s2733_s20, 3 }
  0x10   : > { %s1767_s24 = scalar_lea.vmem %s2624_s0, %s1761_s21  ;;  %s2128_s29 = scalar_lea.vmem %s2625_s1, %s1761_s21 }
  0x11   : > { %v1770_v0 = vld [vmem:[%s1767_s24] sm:$0xff]  ;;  %v1776_v2 = vld [vmem:[%s1767_s24 + $0x8] sm:$0xff]  ;;  %v1790_v8 = vld [vmem:[%s1767_s24 + $0x10] sm:$0xff]  ;;  %s2587_s11 = scalar_lea.vmem %s2629_s5, %s1761_s21 }
  0x12   : > { %v1773_v1 = vld [vmem:[%s1767_s24 + $0x80] sm:$0xff]  ;;  %v284_v3 = vsel %vm283_vm0, %v1770_v0, 0.0  ;;  %v1783_v5 = vld [vmem:[%s1767_s24 + $0x88] sm:$0xff]  ;;  %v287_v6 = vsel %vm283_vm0, %v1776_v2, 0.0  ;;  %v1793_v9 = vld [vmem:[%s1767_s24 + $0x18] sm:$0xff]  ;;  %v290_v10 = vsel %vm283_vm0, %v1790_v8, 0.0 }
  0x13   : > { %v332_v4 = vsel %vm283_vm0, %v1773_v1, 0.0  ;;  %285 = vadd.xlane.f32.xlu0 %v284_v3  ;;  %v335_v7 = vsel %vm283_vm0, %v1783_v5, 0.0  ;;  %v293_v11 = vsel %vm283_vm0, %v1793_v9, 0.0  ;;  %v1800_v12 = vld [vmem:[%s1767_s24 + $0x90] sm:$0xff]  ;;  %v1803_v13 = vld [vmem:[%s1767_s24 + $0x98] sm:$0xff]  ;;  %v1810_v16 = vld [vmem:[%s1767_s24 + $0x20] sm:$0xff] }
  0x14   : > { %333 = vadd.xlane.f32.xlu1 %v332_v4  ;;  %v338_v14 = vsel %vm283_vm0, %v1800_v12, 0.0  ;;  %v341_v15 = vsel %vm283_vm0, %v1803_v13, 0.0  ;;  %v1813_v17 = vld [vmem:[%s1767_s24 + $0x28] sm:$0xff]  ;;  %v296_v18 = vsel %vm283_vm0, %v1810_v16, 0.0  ;;  %v1820_v20 = vld [vmem:[%s1767_s24 + $0xa0] sm:$0xff]  ;;  %v1830_v24 = vld [vmem:[%s1767_s24 + $0x30] sm:$0xff] }
  0x15   : > { %v299_v19 = vsel %vm283_vm0, %v1813_v17, 0.0  ;;  %v1823_v21 = vld [vmem:[%s1767_s24 + $0xa8] sm:$0xff]  ;;  %v344_v22 = vsel %vm283_vm0, %v1820_v20, 0.0  ;;  %v1833_v25 = vld [vmem:[%s1767_s24 + $0x38] sm:$0xff]  ;;  %v302_v26 = vsel %vm283_vm0, %v1830_v24, 0.0  ;;  %v1840_v28 = vld [vmem:[%s1767_s24 + $0xb0] sm:$0xff] }
  0x16   : > { %v347_v23 = vsel %vm283_vm0, %v1823_v21, 0.0  ;;  %v305_v27 = vsel %vm283_vm0, %v1833_v25, 0.0  ;;  %v1843_v29 = vld [vmem:[%s1767_s24 + $0xb8] sm:$0xff]  ;;  %v350_v30 = vsel %vm283_vm0, %v1840_v28, 0.0  ;;  %v1850_v32 = vld [vmem:[%s1767_s24 + $0x40] sm:$0xff]  ;;  %v1853_v33 = vld [vmem:[%s1767_s24 + $0x48] sm:$0xff] }
  0x17   : > { %288 = vadd.xlane.f32.xlu0 %v287_v6  ;;  %v353_v31 = vsel %vm283_vm0, %v1843_v29, 0.0  ;;  %v308_v34 = vsel %vm283_vm0, %v1850_v32, 0.0  ;;  %v311_v35 = vsel %vm283_vm0, %v1853_v33, 0.0  ;;  %v1860_v36 = vld [vmem:[%s1767_s24 + $0xc0] sm:$0xff]  ;;  %v1863_v37 = vld [vmem:[%s1767_s24 + $0xc8] sm:$0xff]  ;;  %v1870_v40 = vld [vmem:[%s1767_s24 + $0x50] sm:$0xff] }
  0x18   : > { %336 = vadd.xlane.f32.xlu1 %v335_v7  ;;  %v356_v38 = vsel %vm283_vm0, %v1860_v36, 0.0  ;;  %v359_v39 = vsel %vm283_vm0, %v1863_v37, 0.0  ;;  %v1873_v41 = vld [vmem:[%s1767_s24 + $0x58] sm:$0xff]  ;;  %v314_v42 = vsel %vm283_vm0, %v1870_v40, 0.0  ;;  %v1880_v44 = vld [vmem:[%s1767_s24 + $0xd0] sm:$0xff]  ;;  %v1890_v48 = vld [vmem:[%s1767_s24 + $0x60] sm:$0xff] }
  0x19   : > { %v317_v43 = vsel %vm283_vm0, %v1873_v41, 0.0  ;;  %v1883_v45 = vld [vmem:[%s1767_s24 + $0xd8] sm:$0xff]  ;;  %v362_v46 = vsel %vm283_vm0, %v1880_v44, 0.0  ;;  %v1893_v49 = vld [vmem:[%s1767_s24 + $0x68] sm:$0xff]  ;;  %v320_v50 = vsel %vm283_vm0, %v1890_v48, 0.0  ;;  %v1900_v52 = vld [vmem:[%s1767_s24 + $0xe0] sm:$0xff] }
  0x1a   : > { %v365_v47 = vsel %vm283_vm0, %v1883_v45, 0.0  ;;  %v323_v51 = vsel %vm283_vm0, %v1893_v49, 0.0  ;;  %v1903_v53 = vld [vmem:[%s1767_s24 + $0xe8] sm:$0xff]  ;;  %v368_v54 = vsel %vm283_vm0, %v1900_v52, 0.0  ;;  %v1910_v56 = vld [vmem:[%s1767_s24 + $0x70] sm:$0xff]  ;;  %v1913_v57 = vld [vmem:[%s1767_s24 + $0x78] sm:$0xff] }
  0x1b   : > { %291 = vadd.xlane.f32.xlu0 %v290_v10  ;;  %v371_v55 = vsel %vm283_vm0, %v1903_v53, 0.0  ;;  %v326_v58 = vsel %vm283_vm0, %v1910_v56, 0.0  ;;  %v329_v59 = vsel %vm283_vm0, %v1913_v57, 0.0  ;;  %v1920_v60 = vld [vmem:[%s1767_s24 + $0xf0] sm:$0xff]  ;;  %v1923_v61 = vld [vmem:[%s1767_s24 + $0xf8] sm:$0xff] }
  0x1c   : > { %294 = vadd.xlane.f32.xlu1 %v293_v11  ;;  %v374_v62 = vsel %vm283_vm0, %v1920_v60, 0.0  ;;  %v377_v63 = vsel %vm283_vm0, %v1923_v61, 0.0 }
  0x1f   : > { %339 = vadd.xlane.f32.xlu0 %v338_v14 }
  0x20   : > { %342 = vadd.xlane.f32.xlu1 %v341_v15 }
  0x23   : > { %297 = vadd.xlane.f32.xlu0 %v296_v18 }
  0x24   : > { %300 = vadd.xlane.f32.xlu1 %v299_v19 }
  0x27   : > { %345 = vadd.xlane.f32.xlu0 %v344_v22 }
  0x28   : > { %348 = vadd.xlane.f32.xlu1 %v347_v23 }
  0x2b   : > { %303 = vadd.xlane.f32.xlu0 %v302_v26 }
  0x2c   : > { %306 = vadd.xlane.f32.xlu1 %v305_v27 }
  0x2f   : > { %351 = vadd.xlane.f32.xlu0 %v350_v30 }
  0x30   : > { %354 = vadd.xlane.f32.xlu1 %v353_v31 }
  0x33   : > { %309 = vadd.xlane.f32.xlu0 %v308_v34 }
  0x34   : > { %312 = vadd.xlane.f32.xlu1 %v311_v35 }
  0x37   : > { %357 = vadd.xlane.f32.xlu0 %v356_v38 }
  0x38   : > { %360 = vadd.xlane.f32.xlu1 %v359_v39 }
  0x3b   : > { %315 = vadd.xlane.f32.xlu0 %v314_v42 }
  0x3c   : > { %318 = vadd.xlane.f32.xlu1 %v317_v43 }
  0x3f   : > { %363 = vadd.xlane.f32.xlu0 %v362_v46 }
  0x40   : > { %366 = vadd.xlane.f32.xlu1 %v365_v47 }
  0x43   : > { %321 = vadd.xlane.f32.xlu0 %v320_v50 }
  0x44   : > { %324 = vadd.xlane.f32.xlu1 %v323_v51 }
  0x47   : > { %369 = vadd.xlane.f32.xlu0 %v368_v54 }
  0x48   : > { %372 = vadd.xlane.f32.xlu1 %v371_v55 }
  0x4b   : > { %327 = vadd.xlane.f32.xlu0 %v326_v58 }
  0x4c   : > { %330 = vadd.xlane.f32.xlu1 %v329_v59 }
  0x4f   : > { %375 = vadd.xlane.f32.xlu0 %v374_v62 }
  0x50   : > { %378 = vadd.xlane.f32.xlu1 %v377_v63 }
  0x9c   : > { %v286_v3 = vpop.xlane.xlu0 %285 }
  0x9d   : > { %v334_v4 = vpop.xlane.xlu1 %333  ;;  %v381_v6 = vmul.f32 0.125, %v286_v3 }
  0x9e   : > { %v397_v7 = vmul.f32 0.125, %v334_v4 }
  0x9f   : > { %v1930_v10 = vsub.f32 %v1770_v0, %v381_v6 }
  0xa0   : > { %v1933_v11 = vsub.f32 %v1773_v1, %v397_v7  ;;  %v289_v14 = vpop.xlane.xlu0 %288 }
  0xa1   : > { %v337_v15 = vpop.xlane.xlu1 %336  ;;  %v382_v18 = vmul.f32 0.125, %v289_v14  ;;  %v445_v22 = vmul.f32 %v1930_v10, %v1930_v10 }
  0xa2   : > { %v398_v19 = vmul.f32 0.125, %v337_v15  ;;  %v461_v23 = vmul.f32 %v1933_v11, %v1933_v11 }
  0xa3   : > { %v1940_v26 = vsub.f32 %v1776_v2, %v382_v18  ;;  %v477_v0 = vsel %vm283_vm0, %v445_v22, 0.0 }
  0xa4   : > { %v1943_v27 = vsub.f32 %v1783_v5, %v398_v19  ;;  %478 = vadd.xlane.f32.xlu0 %v477_v0  ;;  %v292_v1 = vpop.xlane.xlu0 %291  ;;  %v525_v31 = vsel %vm283_vm0, %v461_v23, 0.0 }
  0xa5   : > { %v295_v30 = vpop.xlane.xlu1 %294  ;;  %v383_v34 = vmul.f32 0.125, %v292_v1  ;;  %v446_v38 = vmul.f32 %v1940_v26, %v1940_v26 }
  0xa6   : > { %v384_v35 = vmul.f32 0.125, %v295_v30  ;;  %v462_v39 = vmul.f32 %v1943_v27, %v1943_v27 }
  0xa7   : > { %v1952_v2 = vsub.f32 %v1790_v8, %v383_v34  ;;  %v480_v42 = vsel %vm283_vm0, %v446_v38, 0.0 }
  0xa8   : > { %v1955_v5 = vsub.f32 %v1793_v9, %v384_v35  ;;  %526 = vadd.xlane.f32.xlu0 %v525_v31  ;;  %481 = vadd.xlane.f32.xlu1 %v480_v42  ;;  %v340_v43 = vpop.xlane.xlu0 %339  ;;  %v528_v47 = vsel %vm283_vm0, %v462_v39, 0.0 }
  0xa9   : > { %v343_v46 = vpop.xlane.xlu1 %342  ;;  %v399_v50 = vmul.f32 0.125, %v340_v43  ;;  %v447_v54 = vmul.f32 %v1952_v2, %v1952_v2 }
  0xaa   : > { %v400_v51 = vmul.f32 0.125, %v343_v46  ;;  %v448_v8 = vmul.f32 %v1955_v5, %v1955_v5 }
  0xab   : > { %v1964_v55 = vsub.f32 %v1800_v12, %v399_v50  ;;  %v483_v58 = vsel %vm283_vm0, %v447_v54, 0.0 }
  0xac   : > { %v1967_v9 = vsub.f32 %v1803_v13, %v400_v51  ;;  %529 = vadd.xlane.f32.xlu1 %v528_v47  ;;  %484 = vadd.xlane.f32.xlu0 %v483_v58  ;;  %v298_v59 = vpop.xlane.xlu0 %297  ;;  %v486_v63 = vsel %vm283_vm0, %v448_v8, 0.0 }
  0xad   : > { %v301_v62 = vpop.xlane.xlu1 %300  ;;  %v385_v3 = vmul.f32 0.125, %v298_v59  ;;  %v463_v6 = vmul.f32 %v1964_v55, %v1964_v55 }
  0xae   : > { %v386_v4 = vmul.f32 0.125, %v301_v62  ;;  %v464_v12 = vmul.f32 %v1967_v9, %v1967_v9 }
  0xaf   : > { %v1976_v7 = vsub.f32 %v1810_v16, %v385_v3  ;;  %v531_v14 = vsel %vm283_vm0, %v463_v6, 0.0 }
  0xb0   : > { %v1979_v13 = vsub.f32 %v1813_v17, %v386_v4  ;;  %487 = vadd.xlane.f32.xlu1 %v486_v63  ;;  %532 = vadd.xlane.f32.xlu0 %v531_v14  ;;  %v346_v15 = vpop.xlane.xlu0 %345  ;;  %v534_v19 = vsel %vm283_vm0, %v464_v12, 0.0 }
  0xb1   : > { %v349_v18 = vpop.xlane.xlu1 %348  ;;  %v401_v22 = vmul.f32 0.125, %v346_v15  ;;  %v449_v0 = vmul.f32 %v1976_v7, %v1976_v7 }
  0xb2   : > { %2664 = vst [vmem:[#allocation2_spill] sm:$0xff] %v1979_v13  ;;  %v402_v23 = vmul.f32 0.125, %v349_v18  ;;  %v450_v16 = vmul.f32 %v1979_v13, %v1979_v13 }
  0xb3   : > { %v1988_v1 = vsub.f32 %v1820_v20, %v401_v22  ;;  %v489_v30 = vsel %vm283_vm0, %v449_v0, 0.0 }
  0xb4   : > { %v1991_v17 = vsub.f32 %v1823_v21, %v402_v23  ;;  %535 = vadd.xlane.f32.xlu1 %v534_v19  ;;  %490 = vadd.xlane.f32.xlu0 %v489_v30  ;;  %v304_v31 = vpop.xlane.xlu0 %303  ;;  %v492_v35 = vsel %vm283_vm0, %v450_v16, 0.0 }
  0xb5   : > { %2665 = vst [vmem:[#allocation3_spill] sm:$0xff] %v1988_v1  ;;  %v307_v34 = vpop.xlane.xlu1 %306  ;;  %v387_v38 = vmul.f32 0.125, %v304_v31  ;;  %v465_v42 = vmul.f32 %v1988_v1, %v1988_v1 }
  0xb6   : > { %2666 = vst [vmem:[#allocation4_spill] sm:$0xff] %v1991_v17  ;;  %v388_v39 = vmul.f32 0.125, %v307_v34  ;;  %v466_v20 = vmul.f32 %v1991_v17, %v1991_v17 }
  0xb7   : > { %v2000_v43 = vsub.f32 %v1830_v24, %v387_v38  ;;  %v537_v46 = vsel %vm283_vm0, %v465_v42, 0.0 }
  0xb8   : > { %v2003_v21 = vsub.f32 %v1833_v25, %v388_v39  ;;  %493 = vadd.xlane.f32.xlu1 %v492_v35  ;;  %538 = vadd.xlane.f32.xlu0 %v537_v46  ;;  %v352_v47 = vpop.xlane.xlu0 %351  ;;  %v540_v51 = vsel %vm283_vm0, %v466_v20, 0.0 }
  0xb9   : > { %2667 = vst [vmem:[#allocation5_spill] sm:$0xff] %v2000_v43  ;;  %v355_v50 = vpop.xlane.xlu1 %354  ;;  %v403_v54 = vmul.f32 0.125, %v352_v47  ;;  %v451_v58 = vmul.f32 %v2000_v43, %v2000_v43 }
  0xba   : > { %2668 = vst [vmem:[#allocation6_spill] sm:$0xff] %v2003_v21  ;;  %v404_v8 = vmul.f32 0.125, %v355_v50  ;;  %v452_v24 = vmul.f32 %v2003_v21, %v2003_v21 }
  0xbb   : > { %v2012_v59 = vsub.f32 %v1840_v28, %v403_v54  ;;  %v495_v62 = vsel %vm283_vm0, %v451_v58, 0.0 }
  0xbc   : > { %v2015_v25 = vsub.f32 %v1843_v29, %v404_v8  ;;  %541 = vadd.xlane.f32.xlu1 %v540_v51  ;;  %496 = vadd.xlane.f32.xlu0 %v495_v62  ;;  %v310_v63 = vpop.xlane.xlu0 %309  ;;  %v498_v4 = vsel %vm283_vm0, %v452_v24, 0.0 }
  0xbd   : > { %2669 = vst [vmem:[#allocation7_spill] sm:$0xff] %v2012_v59  ;;  %v313_v3 = vpop.xlane.xlu1 %312  ;;  %v389_v6 = vmul.f32 0.125, %v310_v63  ;;  %v467_v14 = vmul.f32 %v2012_v59, %v2012_v59 }
  0xbe   : > { %2670 = vst [vmem:[#allocation8_spill] sm:$0xff] %v2015_v25  ;;  %v390_v12 = vmul.f32 0.125, %v313_v3  ;;  %v468_v28 = vmul.f32 %v2015_v25, %v2015_v25 }
  0xbf   : > { %v2024_v15 = vsub.f32 %v1850_v32, %v389_v6  ;;  %v543_v18 = vsel %vm283_vm0, %v467_v14, 0.0 }
  0xc0   : > { %v2027_v29 = vsub.f32 %v1853_v33, %v390_v12  ;;  %499 = vadd.xlane.f32.xlu1 %v498_v4  ;;  %544 = vadd.xlane.f32.xlu0 %v543_v18  ;;  %v358_v19 = vpop.xlane.xlu0 %357  ;;  %v546_v23 = vsel %vm283_vm0, %v468_v28, 0.0 }
  0xc1   : > { %2671 = vst [vmem:[#allocation9_spill] sm:$0xff] %v2024_v15  ;;  %v361_v22 = vpop.xlane.xlu1 %360  ;;  %v405_v0 = vmul.f32 0.125, %v358_v19  ;;  %v453_v30 = vmul.f32 %v2024_v15, %v2024_v15 }
  0xc2   : > { %2672 = vst [vmem:[#allocation10_spill] sm:$0xff] %v2027_v29  ;;  %v406_v16 = vmul.f32 0.125, %v361_v22  ;;  %v454_v32 = vmul.f32 %v2027_v29, %v2027_v29 }
  0xc3   : > { %v2036_v31 = vsub.f32 %v1860_v36, %v405_v0  ;;  %v501_v34 = vsel %vm283_vm0, %v453_v30, 0.0 }
  0xc4   : > { %v2039_v33 = vsub.f32 %v1863_v37, %v406_v16  ;;  %547 = vadd.xlane.f32.xlu1 %v546_v23  ;;  %502 = vadd.xlane.f32.xlu0 %v501_v34  ;;  %v316_v35 = vpop.xlane.xlu0 %315  ;;  %v504_v39 = vsel %vm283_vm0, %v454_v32, 0.0 }
  0xc5   : > { %2673 = vst [vmem:[#allocation11_spill] sm:$0xff] %v2036_v31  ;;  %v319_v38 = vpop.xlane.xlu1 %318  ;;  %v391_v42 = vmul.f32 0.125, %v316_v35  ;;  %v469_v46 = vmul.f32 %v2036_v31, %v2036_v31 }
  0xc6   : > { %2674 = vst [vmem:[#allocation12_spill] sm:$0xff] %v2039_v33  ;;  %v392_v20 = vmul.f32 0.125, %v319_v38  ;;  %v470_v36 = vmul.f32 %v2039_v33, %v2039_v33  ;;  %v2254_v33 = vld [vmem:[%s2128_s29 + $0xe8] sm:$0xff] }
  0xc7   : > { %v2048_v47 = vsub.f32 %v1870_v40, %v391_v42  ;;  %v549_v50 = vsel %vm283_vm0, %v469_v46, 0.0  ;;  %2694 = vst [vmem:[#allocation32_spill] sm:$0xff] %v2254_v33 }
  0xc8   : > { %v2051_v37 = vsub.f32 %v1873_v41, %v392_v20  ;;  %505 = vadd.xlane.f32.xlu1 %v504_v39  ;;  %550 = vadd.xlane.f32.xlu0 %v549_v50  ;;  %v364_v51 = vpop.xlane.xlu0 %363  ;;  %v552_v8 = vsel %vm283_vm0, %v470_v36, 0.0 }
  0xc9   : > { %2675 = vst [vmem:[#allocation13_spill] sm:$0xff] %v2048_v47  ;;  %v367_v54 = vpop.xlane.xlu1 %366  ;;  %v407_v58 = vmul.f32 0.125, %v364_v51  ;;  %v455_v62 = vmul.f32 %v2048_v47, %v2048_v47 }
  0xca   : > { %2676 = vst [vmem:[#allocation14_spill] sm:$0xff] %v2051_v37  ;;  %v408_v24 = vmul.f32 0.125, %v367_v54  ;;  %v456_v40 = vmul.f32 %v2051_v37, %v2051_v37 }
  0xcb   : > { %v2060_v63 = vsub.f32 %v1880_v44, %v407_v58  ;;  %v507_v3 = vsel %vm283_vm0, %v455_v62, 0.0 }
  0xcc   : > { %v2063_v41 = vsub.f32 %v1883_v45, %v408_v24  ;;  %553 = vadd.xlane.f32.xlu1 %v552_v8  ;;  %508 = vadd.xlane.f32.xlu0 %v507_v3  ;;  %v322_v4 = vpop.xlane.xlu0 %321  ;;  %v510_v12 = vsel %vm283_vm0, %v456_v40, 0.0 }
  0xcd   : > { %2677 = vst [vmem:[#allocation15_spill] sm:$0xff] %v2060_v63  ;;  %v325_v6 = vpop.xlane.xlu1 %324  ;;  %v393_v14 = vmul.f32 0.125, %v322_v4  ;;  %v471_v18 = vmul.f32 %v2060_v63, %v2060_v63 }
  0xce   : > { %2678 = vst [vmem:[#allocation16_spill] sm:$0xff] %v2063_v41  ;;  %v394_v28 = vmul.f32 0.125, %v325_v6  ;;  %v472_v44 = vmul.f32 %v2063_v41, %v2063_v41  ;;  %v2242_v41 = vld [vmem:[%s2128_s29 + $0x68] sm:$0xff] }
  0xcf   : > { %v2072_v19 = vsub.f32 %v1890_v48, %v393_v14  ;;  %v555_v22 = vsel %vm283_vm0, %v471_v18, 0.0  ;;  %2692 = vst [vmem:[#allocation30_spill] sm:$0xff] %v2242_v41 }
  0xd0   : > { %v2075_v45 = vsub.f32 %v1893_v49, %v394_v28  ;;  %511 = vadd.xlane.f32.xlu1 %v510_v12  ;;  %556 = vadd.xlane.f32.xlu0 %v555_v22  ;;  %v370_v23 = vpop.xlane.xlu0 %369  ;;  %v558_v16 = vsel %vm283_vm0, %v472_v44, 0.0  ;;  %v1083_v49 = vld [vmem:[%s2628_s4] sm:$0xf] }
  0xd1   : > { %2679 = vst [vmem:[#allocation17_spill] sm:$0xff] %v2072_v19  ;;  %v373_v0 = vpop.xlane.xlu1 %372  ;;  %v409_v30 = vmul.f32 0.125, %v370_v23  ;;  %v457_v34 = vmul.f32 %v2072_v19, %v2072_v19  ;;  %1513 = vmatprep.subr.msk.bf16.mxu0 %vm1132_vm1, %v1083_v49  ;;  %1514 = vmatprep.subr.msk.bf16.mxu1 %vm1132_vm1, %v1083_v49  ;;  %v1134_v36 = vsel %vm1132_vm1, %v1083_v49, 0 }
  0xd2   : > { %2680 = vst [vmem:[#allocation18_spill] sm:$0xff] %v2075_v45  ;;  %v410_v32 = vmul.f32 0.125, %v373_v0  ;;  %v458_v48 = vmul.f32 %v2075_v45, %v2075_v45  ;;  %1478 = vmatpush3.bf16.msra.mxu0 %v1134_v36  ;;  %1512 = vmatpush3.bf16.msra.mxu1 %v1134_v36  ;;  %v2135_v0 = vld [vmem:[%s2128_s29 + $0x8] sm:$0xff]  ;;  %v2158_v36 = vld [vmem:[%s2128_s29 + $0x98] sm:$0xff] }
  0xd3   : > { %v2087_v35 = vsub.f32 %v1900_v52, %v409_v30  ;;  %v513_v39 = vsel %vm283_vm0, %v457_v34, 0.0  ;;  %v1411_v30 = vmul.f32 -1.442695, %v2135_v0 }
  0xd4   : > { %v2090_v38 = vsub.f32 %v1903_v53, %v410_v32  ;;  %559 = vadd.xlane.f32.xlu1 %v558_v16  ;;  %514 = vadd.xlane.f32.xlu0 %v513_v39  ;;  %v328_v42 = vpop.xlane.xlu0 %327  ;;  %v516_v46 = vsel %vm283_vm0, %v458_v48, 0.0  ;;  %v2138_v16 = vld [vmem:[%s2128_s29 + $0x80] sm:$0xff]  ;;  %v2142_v32 = vld [vmem:[%s2128_s29 + $0x88] sm:$0xff]  ;;  %v2146_v48 = vld [vmem:[%s2128_s29 + $0x10] sm:$0xff] }
  0xd5   : > { %2681 = vst [vmem:[#allocation19_spill] sm:$0xff] %v2087_v35  ;;  %v331_v20 = vpop.xlane.xlu1 %330  ;;  %v395_v50 = vmul.f32 0.125, %v328_v42  ;;  %v473_v52 = vmul.f32 %v2087_v35, %v2087_v35  ;;  %v1426_v34 = vmul.f32 -1.442695, %v2138_v16  ;;  %v1427_v49 = vmul.f32 -1.442695, %v2142_v32 }
  0xd6   : > { %2682 = vst [vmem:[#allocation20_spill] sm:$0xff] %v2090_v38  ;;  %v396_v51 = vmul.f32 0.125, %v331_v20  ;;  %v474_v53 = vmul.f32 %v2090_v38, %v2090_v38  ;;  %v2150_v39 = vld [vmem:[%s2128_s29 + $0x18] sm:$0xff]  ;;  %v1412_v42 = vmul.f32 -1.442695, %v2146_v48  ;;  %v2154_v20 = vld [vmem:[%s2128_s29 + $0x90] sm:$0xff] }
  0xd7   : > { %v2099_v54 = vsub.f32 %v1910_v56, %v395_v50  ;;  %v561_v58 = vsel %vm283_vm0, %v473_v52, 0.0  ;;  %v1428_v50 = vmul.f32 -1.442695, %v2154_v20  ;;  %v1429_v52 = vmul.f32 -1.442695, %v2158_v36 }
  0xd8   : > { %v2102_v8 = vsub.f32 %v1913_v57, %v396_v51  ;;  %517 = vadd.xlane.f32.xlu1 %v516_v46  ;;  %562 = vadd.xlane.f32.xlu0 %v561_v58  ;;  %v376_v24 = vpop.xlane.xlu0 %375  ;;  %v564_v40 = vsel %vm283_vm0, %v474_v53, 0.0  ;;  %v1413_v46 = vmul.f32 -1.442695, %v2150_v39  ;;  %v2162_v51 = vld [vmem:[%s2128_s29 + $0x20] sm:$0xff]  ;;  %v2166_v53 = vld [vmem:[%s2128_s29 + $0x28] sm:$0xff] }
  0xd9   : > { %2683 = vst [vmem:[#allocation21_spill] sm:$0xff] %v2099_v54  ;;  %v379_v62 = vpop.xlane.xlu1 %378  ;;  %v411_v3 = vmul.f32 0.125, %v376_v24  ;;  %v459_v6 = vmul.f32 %v2099_v54, %v2099_v54  ;;  %v1414_v58 = vmul.f32 -1.442695, %v2162_v51  ;;  %v2170_v24 = vld [vmem:[%s2128_s29 + $0xa0] sm:$0xff] }
  0xda   : > { %2684 = vst [vmem:[#allocation22_spill] sm:$0xff] %v2102_v8  ;;  %v412_v4 = vmul.f32 0.125, %v379_v62  ;;  %v460_v56 = vmul.f32 %v2102_v8, %v2102_v8  ;;  %v2212_v8 = vld [vmem:[%s2128_s29 + $0x50] sm:$0xff] }
  0xdb   : > { %v2111_v57 = vsub.f32 %v1920_v60, %v411_v3  ;;  %v519_v14 = vsel %vm283_vm0, %v459_v6, 0.0  ;;  %v2174_v3 = vld [vmem:[%s2128_s29 + $0xa8] sm:$0xff]  ;;  %v2178_v6 = vld [vmem:[%s2128_s29 + $0x30] sm:$0xff]  ;;  %2687 = vst [vmem:[#allocation25_spill] sm:$0xff] %v2212_v8 }
  0xdc   : > { %v2114_v12 = vsub.f32 %v1923_v61, %v412_v4  ;;  %565 = vadd.xlane.f32.xlu1 %v564_v40  ;;  %520 = vadd.xlane.f32.xlu0 %v519_v14  ;;  %v522_v28 = vsel %vm283_vm0, %v460_v56, 0.0  ;;  %v2131_v61 = vld [vmem:[%s2128_s29] sm:$0xff]  ;;  %v1415_v40 = vmul.f32 -1.442695, %v2166_v53  ;;  %v1430_v4 = vmul.f32 -1.442695, %v2170_v24 }
  0xdd   : > { %2685 = vst [vmem:[#allocation23_spill] sm:$0xff] %v2111_v57  ;;  %v475_v18 = vmul.f32 %v2111_v57, %v2111_v57  ;;  %v1410_v23 = vmul.f32 -1.442695, %v2131_v61  ;;  %v2181_v14 = vld [vmem:[%s2128_s29 + $0x38] sm:$0xff] }
  0xde   : > { %2686 = vst [vmem:[#allocation24_spill] sm:$0xff] %v2114_v12  ;;  %v476_v44 = vmul.f32 %v2114_v12, %v2114_v12 }
  0xdf   : > { %v567_v22 = vsel %vm283_vm0, %v475_v18, 0.0  ;;  %1523 = vpow2.f32 %v1410_v23  ;;  %v1431_v18 = vmul.f32 -1.442695, %v2174_v3  ;;  %v1417_v23 = vmul.f32 -1.442695, %v2181_v14 }
  0xe0   : > { %523 = vadd.xlane.f32.xlu1 %v522_v28  ;;  %568 = vadd.xlane.f32.xlu0 %v567_v22  ;;  %v570_v60 = vsel %vm283_vm0, %v476_v44, 0.0  ;;  %1525 = vpow2.f32 %v1411_v30  ;;  %v1416_v44 = vmul.f32 -1.442695, %v2178_v6  ;;  %v2186_v22 = vld [vmem:[%s2128_s29 + $0xb0] sm:$0xff] }
  0xe1   : > { %1527 = vpow2.f32 %v1426_v34 }
  0xe2   : > { %1529 = vpow2.f32 %v1427_v49  ;;  %v2190_v49 = vld [vmem:[%s2128_s29 + $0xb8] sm:$0xff] }
  0xe3   : > { %1531 = vpow2.f32 %v1412_v42  ;;  %v1432_v42 = vmul.f32 -1.442695, %v2186_v22 }
  0xe4   : > { %571 = vadd.xlane.f32.xlu1 %v570_v60  ;;  %1533 = vpow2.f32 %v1413_v46 }
  0xe5   : > { %1535 = vpow2.f32 %v1428_v50 }
  0xe6   : > { %1537 = vpow2.f32 %v1429_v52 }
  0xe7   : > { %1539 = vpow2.f32 %v1414_v58 }
  0xe8   : > { %1541 = vpow2.f32 %v1415_v40  ;;  %v2195_v40 = vld [vmem:[%s2128_s29 + $0x40] sm:$0xff] }
  0xe9   : > { %1543 = vpow2.f32 %v1430_v4 }
  0xec   : > { %v1524_v62 = vpop.eup %1523 }
  0xed   : > { %v907_v56 = vadd.f32 1.0, %v1524_v62  ;;  %v1526_v28 = vpop.eup %1525  ;;  %v1433_v62 = vmul.f32 -1.442695, %v2190_v49 }
  0xee   : > { %v1528_v60 = vpop.eup %1527  ;;  %v908_v34 = vadd.f32 1.0, %v1526_v28 }
  0xef   : > { %v1530_v30 = vpop.eup %1529  ;;  %1545 = vrcp.f32 %v907_v56  ;;  %v923_v50 = vadd.f32 1.0, %v1528_v60 }
  0xf0   : > { %1547 = vpow2.f32 %v1431_v18  ;;  %v1532_v46 = vpop.eup %1531  ;;  %v924_v58 = vadd.f32 1.0, %v1530_v30  ;;  %v2198_v18 = vld [vmem:[%s2128_s29 + $0x48] sm:$0xff] }
  0xf1   : > { %1549 = vpow2.f32 %v1416_v44  ;;  %v1534_v52 = vpop.eup %1533  ;;  %v909_v56 = vadd.f32 1.0, %v1532_v46  ;;  %v1418_v44 = vmul.f32 -1.442695, %v2195_v40 }
  0xf2   : > { %1551 = vpow2.f32 %v1417_v23  ;;  %v1536_v4 = vpop.eup %1535  ;;  %v910_v28 = vadd.f32 1.0, %v1534_v52  ;;  %v2202_v23 = vld [vmem:[%s2128_s29 + $0xc0] sm:$0xff] }
  0xf3   : > { %1553 = vrcp.f32 %v908_v34  ;;  %v1538_v12 = vpop.eup %1537  ;;  %v925_v60 = vadd.f32 1.0, %v1536_v4  ;;  %v1419_v34 = vmul.f32 -1.442695, %v2198_v18  ;;  %v1434_v52 = vmul.f32 -1.442695, %v2202_v23 }
  0xf4   : > { %1555 = vpow2.f32 %v1432_v42  ;;  %v1540_v30 = vpop.eup %1539  ;;  %v926_v42 = vadd.f32 1.0, %v1538_v12 }
  0xf5   : > { %1557 = vrcp.f32 %v923_v50  ;;  %v1542_v46 = vpop.eup %1541  ;;  %v2206_v50 = vld [vmem:[%s2128_s29 + $0xc8] sm:$0xff]  ;;  %v911_v57 = vadd.f32 1.0, %v1540_v30 }
  0xf6   : > { %1559 = vrcp.f32 %v924_v58  ;;  %v1544_v58 = vpop.eup %1543 }
  0xf7   : > { %1561 = vpow2.f32 %v1433_v62  ;;  %v912_v62 = vadd.f32 1.0, %v1542_v46 }
  0xf8   : > { %1563 = vrcp.f32 %v909_v56 }
  0xf9   : > { %1565 = vrcp.f32 %v910_v28  ;;  %v1435_v28 = vmul.f32 -1.442695, %v2206_v50 }
  0xfa   : > { %1567 = vpow2.f32 %v1418_v44  ;;  %v927_v44 = vadd.f32 1.0, %v1544_v58 }
  0xfb   : > { %1569 = vrcp.f32 %v925_v60  ;;  %v1420_v60 = vmul.f32 -1.442695, %v2212_v8 }
  0xfc   : > { %v2209_v4 = vpop.eup %1545  ;;  %1571 = vpow2.f32 %v1419_v34  ;;  %v2219_v34 = vld [vmem:[%s2128_s29 + $0x58] sm:$0xff] }
  0xfd   : > { %v1548_v56 = vpop.eup %1547  ;;  %1573 = vrcp.f32 %v926_v42  ;;  %2688 = vst [vmem:[#allocation26_spill] sm:$0xff] %v2219_v34  ;;  %v1421_v45 = vmul.f32 -1.442695, %v2219_v34  ;;  %v2260_v34 = vld [vmem:[%s2128_s29 + $0x70] sm:$0xff] }
  0xfe   : > { %v1550_v12 = vpop.eup %1549  ;;  %1575 = vpow2.f32 %v1434_v52  ;;  %v928_v46 = vadd.f32 1.0, %v1548_v56  ;;  %v2224_v52 = vld [vmem:[%s2128_s29 + $0xd0] sm:$0xff]  ;;  %2695 = vst [vmem:[#allocation33_spill] sm:$0xff] %v2260_v34 }
  0xff   : > { %v1552_v54 = vpop.eup %1551  ;;  %1577 = vrcp.f32 %v911_v57  ;;  %v913_v35 = vadd.f32 1.0, %v1550_v12  ;;  %2689 = vst [vmem:[#allocation27_spill] sm:$0xff] %v2224_v52 }
 0x100   : > { %v2216_v30 = vpop.eup %1553  ;;  %1579 = vrcp.f32 %v912_v62  ;;  %v914_v58 = vadd.f32 1.0, %v1552_v54  ;;  %v2230_v62 = vld [vmem:[%s2128_s29 + $0xd8] sm:$0xff]  ;;  %v2236_v54 = vld [vmem:[%s2128_s29 + $0x60] sm:$0xff] }
 0x101   : > { %v1556_v38 = vpop.eup %1555  ;;  %1581 = vpow2.f32 %v1435_v28  ;;  %2690 = vst [vmem:[#allocation28_spill] sm:$0xff] %v2230_v62  ;;  %v1436_v28 = vmul.f32 -1.442695, %v2224_v52  ;;  %2691 = vst [vmem:[#allocation29_spill] sm:$0xff] %v2236_v54 }
 0x102   : > { %v2221_v42 = vpop.eup %1557  ;;  %1583 = vrcp.f32 %v927_v44  ;;  %v929_v12 = vadd.f32 1.0, %v1556_v38  ;;  %v2248_v38 = vld [vmem:[%s2128_s29 + $0xe0] sm:$0xff] }
 0x103   : > { %v2226_v57 = vpop.eup %1559  ;;  %1585 = vpow2.f32 %v1420_v60  ;;  %v1437_v60 = vmul.f32 -1.442695, %v2230_v62  ;;  %2693 = vst [vmem:[#allocation31_spill] sm:$0xff] %v2248_v38 }
 0x104   : > { %v1562_v56 = vpop.eup %1561  ;;  %1587 = vrcp.f32 %v928_v46 }
 0x105   : > { %v2232_v19 = vpop.eup %1563  ;;  %1589 = vrcp.f32 %v913_v35  ;;  %v930_v37 = vadd.f32 1.0, %v1562_v56  ;;  %v1422_v35 = vmul.f32 -1.442695, %v2236_v54 }
 0x106   : > { %v2238_v44 = vpop.eup %1565  ;;  %1591 = vrcp.f32 %v914_v58  ;;  %v1423_v58 = vmul.f32 -1.442695, %v2242_v41  ;;  %v1439_v41 = vmul.f32 -1.442695, %v2254_v33 }
 0x107   : > { %v1568_v63 = vpop.eup %1567  ;;  %1593 = vpow2.f32 %v1421_v45  ;;  %v1438_v45 = vmul.f32 -1.442695, %v2248_v38  ;;  %v1424_v38 = vmul.f32 -1.442695, %v2260_v34  ;;  %v2279_v34 = vld [vmem:[%s2128_s29 + $0xf0] sm:$0xff] }
 0x108   : > { %v2244_v46 = vpop.eup %1569  ;;  %1595 = vrcp.f32 %v929_v12  ;;  %v915_v62 = vadd.f32 1.0, %v1568_v63  ;;  %2697 = vst [vmem:[#allocation35_spill] sm:$0xff] %v2279_v34 }
 0x109   : > { %v1572_v52 = vpop.eup %1571  ;;  %1597 = vpow2.f32 %v1436_v28 }
 0x10a   : > { %v2251_v47 = vpop.eup %1573  ;;  %1599 = vpow2.f32 %v1437_v60  ;;  %v916_v54 = vadd.f32 1.0, %v1572_v52 }
 0x10b   : > { %v1576_v56 = vpop.eup %1575  ;;  %1601 = vrcp.f32 %v930_v37  ;;  %v2268_v37 = vld [vmem:[%s2128_s29 + $0x78] sm:$0xff] }
 0x10c   : > { %v2257_v12 = vpop.eup %1577  ;;  %1603 = vpow2.f32 %v1422_v35  ;;  %v931_v60 = vadd.f32 1.0, %v1576_v56  ;;  %2696 = vst [vmem:[#allocation34_spill] sm:$0xff] %v2268_v37  ;;  %v1425_v56 = vmul.f32 -1.442695, %v2268_v37  ;;  %v1440_v37 = vmul.f32 -1.442695, %v2279_v34 }
 0x10d   : > { %v2262_v28 = vpop.eup %1579  ;;  %1605 = vpow2.f32 %v1423_v58 }
 0x10e   : > { %v1582_v63 = vpop.eup %1581  ;;  %1607 = vrcp.f32 %v915_v62 }
 0x10f   : > { %v2265_v31 = vpop.eup %1583  ;;  %1609 = vpow2.f32 %v1438_v45  ;;  %v932_v58 = vadd.f32 1.0, %v1582_v63 }
 0x110   : > { %v1586_v52 = vpop.eup %1585  ;;  %1611 = vrcp.f32 %v916_v54 }
 0x111   : > { %v2271_v15 = vpop.eup %1587  ;;  %1613 = vpow2.f32 %v1439_v41  ;;  %v917_v21 = vadd.f32 1.0, %v1586_v52 }
 0x112   : > { %v2273_v33 = vpop.eup %1589  ;;  %1615 = vrcp.f32 %v931_v60 }
 0x113   : > { %v2276_v25 = vpop.eup %1591  ;;  %1617 = vpow2.f32 %v1424_v38 }
 0x12d   : > { %v479_v29 = vpop.xlane.xlu0 %478 }
 0x12e   : > { %v573_v35 = vmul.f32 0.125, %v479_v29  ;;  %v1594_v29 = vpop.eup %1593 }
 0x12f   : > { %v2281_v63 = vpop.eup %1595  ;;  %v918_v52 = vadd.f32 1.0, %v1594_v29 }
 0x130   : > { %v605_v62 = vadd.f32 1e-05, %v573_v35  ;;  %v1598_v41 = vpop.eup %1597 }
 0x131   : > { %v482_v45 = vpop.xlane.xlu1 %481  ;;  %v527_v59 = vpop.xlane.xlu0 %526  ;;  %v933_v34 = vadd.f32 1.0, %v1598_v41 }
 0x132   : > { %1619 = vrsqrt.f32 %v605_v62  ;;  %v574_v54 = vmul.f32 0.125, %v482_v45  ;;  %v589_v8 = vmul.f32 0.125, %v527_v59  ;;  %v1600_v43 = vpop.eup %1599 }
 0x133   : > { %1621 = vrcp.f32 %v932_v58  ;;  %v2284_v38 = vpop.eup %1601  ;;  %v2288_v58 = vmul.f32 %v2209_v4, %v2131_v61  ;;  %v934_v61 = vadd.f32 1.0, %v1600_v43  ;;  %v2301_v4 = vld [vmem:[%s2128_s29 + $0xf8] sm:$0xff]  ;;  %v2315_v43 = vmul.f32 %v2238_v44, %v2150_v39 }
 0x134   : > { %v606_v35 = vadd.f32 1e-05, %v574_v54  ;;  %v621_v60 = vadd.f32 1e-05, %v589_v8  ;;  %1623 = vpow2.f32 %v1425_v56  ;;  %v1604_v59 = vpop.eup %1603 }
 0x135   : > { %v530_v17 = vpop.xlane.xlu1 %529  ;;  %v485_v1 = vpop.xlane.xlu0 %484  ;;  %1625 = vrcp.f32 %v917_v21  ;;  %v919_v39 = vadd.f32 1.0, %v1604_v59 }
 0x136   : > { %1627 = vrsqrt.f32 %v606_v35  ;;  %v590_v62 = vmul.f32 0.125, %v530_v17  ;;  %v575_v45 = vmul.f32 0.125, %v485_v1  ;;  %v1606_v8 = vpop.eup %1605  ;;  %v2294_v17 = vmul.f32 %v2216_v30, %v2135_v0 }
 0x137   : > { %1629 = vrsqrt.f32 %v621_v60  ;;  %v2290_v13 = vpop.eup %1607  ;;  %v2298_v1 = vmul.f32 %v2221_v42, %v2138_v16  ;;  %v2305_v60 = vmul.f32 %v2226_v57, %v2142_v32  ;;  %v2311_v0 = vmul.f32 %v2232_v19, %v2146_v48 }
 0x138   : > { %v622_v56 = vadd.f32 1e-05, %v590_v62  ;;  %v607_v54 = vadd.f32 1e-05, %v575_v45  ;;  %1631 = vpow2.f32 %v1440_v37  ;;  %v1610_v35 = vpop.eup %1609  ;;  %v2319_v16 = vmul.f32 %v2244_v46, %v2154_v20 }
 0x139   : > { %v488_v21 = vpop.xlane.xlu1 %487  ;;  %v533_v29 = vpop.xlane.xlu0 %532  ;;  %1633 = vrcp.f32 %v918_v52  ;;  %v1441_v32 = vmul.f32 -1.442695, %v2301_v4  ;;  %v2324_v19 = vmul.f32 %v2251_v47, %v2158_v36  ;;  %v2328_v48 = vmul.f32 %v2257_v12, %v2162_v51  ;;  %v2339_v47 = vld [vmem:[%s2626_s2] ss:$0 sm:$0xff] }
 0x13a   : > { %1635 = vrsqrt.f32 %v622_v56  ;;  %v576_v41 = vmul.f32 0.125, %v488_v21  ;;  %v591_v37 = vmul.f32 0.125, %v533_v29  ;;  %v2307_v62 = vpop.eup %1611  ;;  %v2334_v46 = vmul.f32 %v2262_v28, %v2166_v53 }
 0x13b   : > { %1637 = vrsqrt.f32 %v607_v54  ;;  %v1614_v30 = vpop.eup %1613  ;;  %v2343_v36 = vmul.f32 %v2265_v31, %v2170_v24  ;;  %v2347_v51 = vmul.f32 %v2271_v15, %v2174_v3  ;;  %v920_v12 = vadd.f32 1.0, %v1606_v8 }
 0x13c   : > { %v608_v42 = vadd.f32 1e-05, %v576_v41  ;;  %v623_v52 = vadd.f32 1e-05, %v591_v37  ;;  %1639 = vrcp.f32 %v933_v34  ;;  %v1616_v57 = vpop.eup %1615  ;;  %v2356_v31 = vmul.f32 %v2273_v33, %v2178_v6 }
 0x13d   : > { %v536_v45 = vpop.xlane.xlu1 %535  ;;  %v491_v56 = vpop.xlane.xlu0 %490  ;;  %1641 = vrcp.f32 %v934_v61  ;;  %v2360_v15 = vmul.f32 %v2276_v25, %v2181_v14  ;;  %v935_v24 = vadd.f32 1.0, %v1610_v35  ;;  %v2372_v25 = vmul.f32 %v2281_v63, %v2186_v22 }
 0x13e   : > { %v2330_v20 = vpop.eup %1617  ;;  %1643 = vrsqrt.f32 %v608_v42  ;;  %v592_v44 = vmul.f32 0.125, %v536_v45  ;;  %v577_v34 = vmul.f32 0.125, %v491_v56  ;;  %v2368_v42 = vld [vmem:[%s2627_s3] ss:$0 sm:$0xff]  ;;  %v2376_v6 = vmul.f32 %v2284_v38, %v2190_v49 }
 0x13f   : > { %v1620_v54 = vpop.eup %1619  ;;  %1645 = vrsqrt.f32 %v623_v52  ;;  %v2380_v14 = vmul.f32 %v2290_v13, %v2195_v40  ;;  %v936_v49 = vadd.f32 1.0, %v1614_v30 }
 0x140   : > { %v2349_v59 = vpop.eup %1621  ;;  %v624_v53 = vadd.f32 1e-05, %v592_v44  ;;  %v609_v28 = vadd.f32 1e-05, %v577_v34  ;;  %v669_v21 = vmul.f32 %v1620_v54, %v1930_v10  ;;  %1647 = vpow2.f32 %v1441_v32 }
 0x141   : > { %v2352_v29 = vpop.eup %1623  ;;  %v494_v61 = vpop.xlane.xlu1 %493  ;;  %1649 = vrcp.f32 %v919_v39 }
 0x142   : > { %v539_v41 = vpop.xlane.xlu0 %538  ;;  %v2362_v3 = vpop.eup %1625  ;;  %1651 = vrsqrt.f32 %v624_v53  ;;  %v578_v8 = vmul.f32 0.125, %v494_v61  ;;  %v708_v37 = vmul.f32 %v2339_v47, %v669_v21  ;;  %v2396_v53 = vmul.f32 %v1616_v57, %v2202_v23 }
 0x143   : > { %v593_v10 = vmul.f32 0.125, %v539_v41  ;;  %v1628_v33 = vpop.eup %1627  ;;  %1653 = vrsqrt.f32 %v609_v28 }
 0x144   : > { %v1630_v35 = vpop.eup %1629  ;;  %v610_v52 = vadd.f32 1e-05, %v578_v8  ;;  %v670_v45 = vmul.f32 %v1628_v33, %v1940_v26  ;;  %1655 = vrcp.f32 %v920_v12  ;;  %v747_v22 = vadd.f32 %v2368_v42, %v708_v37 }
 0x145   : > { %v625_v32 = vadd.f32 1e-05, %v593_v10  ;;  %v2383_v56 = vpop.eup %1631  ;;  %v542_v39 = vpop.xlane.xlu1 %541  ;;  %v685_v63 = vmul.f32 %v1630_v35, %v1933_v11  ;;  %1657 = vrcp.f32 %v935_v24  ;;  %v2393_v12 = vmul.f32 %v2307_v62, %v2198_v18 }
 0x146   : > { %v497_v44 = vpop.xlane.xlu0 %496  ;;  %v2387_v38 = vpop.eup %1633  ;;  %1659 = vrsqrt.f32 %v610_v52  ;;  %v594_v13 = vmul.f32 0.125, %v542_v39  ;;  %v709_v34 = vmul.f32 %v2339_v47, %v670_v45  ;;  %v1035_v10 = vmul.f32 %v2288_v58, %v747_v22 }
 0x147   : > { %v579_v40 = vmul.f32 0.125, %v497_v44  ;;  %v1636_v54 = vpop.eup %1635  ;;  %1661 = vrsqrt.f32 %v625_v32  ;;  %v724_v26 = vmul.f32 %v2339_v47, %v685_v63  ;;  %v2405_v18 = vadd.f32 1.0, %v2330_v20 }
 0x148   : > { %v1638_v11 = vpop.eup %1637  ;;  %v626_v30 = vadd.f32 1e-05, %v594_v13  ;;  %v748_v21 = vadd.f32 %v2368_v42, %v709_v34  ;;  %v686_v61 = vmul.f32 %v1636_v54, %v1943_v27  ;;  %1663 = vrcp.f32 %v936_v49 }
 0x149   : > { %v611_v28 = vadd.f32 1e-05, %v579_v40  ;;  %v2400_v41 = vpop.eup %1639  ;;  %v500_v24 = vpop.xlane.xlu1 %499  ;;  %v671_v37 = vmul.f32 %v1638_v11, %v1952_v2  ;;  %v763_v52 = vadd.f32 %v2368_v42, %v724_v26  ;;  %v2421_v40 = vmul.f32 %v2349_v59, %v2206_v50 }
 0x14a   : > { %v545_v8 = vpop.xlane.xlu0 %544  ;;  %v2407_v23 = vpop.eup %1641  ;;  %1665 = vrsqrt.f32 %v626_v30  ;;  %v580_v62 = vmul.f32 0.125, %v500_v24  ;;  %v1036_v33 = vmul.f32 %v2294_v17, %v748_v21  ;;  %v725_v35 = vmul.f32 %v2339_v47, %v686_v61 }
 0x14b   : > { %v595_v57 = vmul.f32 0.125, %v545_v8  ;;  %v1644_v27 = vpop.eup %1643  ;;  %1667 = vrsqrt.f32 %v611_v28  ;;  %v710_v58 = vmul.f32 %v2339_v47, %v671_v37  ;;  %v1051_v30 = vmul.f32 %v2298_v1, %v763_v52 }
 0x14c   : > { %v1646_v2 = vpop.eup %1645  ;;  %v612_v32 = vadd.f32 1e-05, %v580_v62  ;;  %v1067_v20 = vpack.c.bf16 %v1036_v33, %v1035_v10  ;;  %v672_v39 = vmul.f32 %v1644_v27, %v1955_v5  ;;  %v764_v17 = vadd.f32 %v2368_v42, %v725_v35 }
 0x14d   : > { %v627_v45 = vadd.f32 1e-05, %v595_v57  ;;  %v2414_v44 = vpop.eup %1647  ;;  %v548_v22 = vpop.xlane.xlu1 %547  ;;  %v749_v49 = vadd.f32 %v2368_v42, %v710_v58  ;;  %v687_v13 = vmul.f32 %v1646_v2, %v1964_v55 }
 0x14e   : > { %v503_v63 = vpop.xlane.xlu0 %502  ;;  %v2423_v34 = vpop.eup %1649  ;;  %1669 = vrsqrt.f32 %v612_v32  ;;  %v596_v54 = vmul.f32 0.125, %v548_v22  ;;  %1479 = vmatprep.mubr.msk.bf16.mxu0 %vm283_vm0, %v1067_v20  ;;  %v711_v5 = vmul.f32 %v2339_v47, %v672_v39  ;;  %v1052_v28 = vmul.f32 %v2305_v60, %v764_v17  ;;  %v2698_v20 = vld [vmem:[#allocation2_spill] sm:$0xff] }
 0x14f   : > { %v581_v26 = vmul.f32 0.125, %v503_v63  ;;  %v1652_v11 = vpop.eup %1651  ;;  %1671 = vrsqrt.f32 %v627_v45  ;;  %v726_v55 = vmul.f32 %v2339_v47, %v687_v13  ;;  %v1037_v57 = vmul.f32 %v2311_v0, %v749_v49  ;;  %v2699_v49 = vld [vmem:[#allocation3_spill] sm:$0xff] }
 0x150   : > { %v1654_v21 = vpop.eup %1653  ;;  %v628_v50 = vadd.f32 1e-05, %v596_v54  ;;  %v750_v61 = vadd.f32 %v2368_v42, %v711_v5  ;;  %v688_v24 = vmul.f32 %v1652_v11, %v1967_v9  ;;  %v1075_v62 = vpack.c.bf16 %v1052_v28, %v1051_v30 }
 0x151   : > { %v613_v59 = vadd.f32 1e-05, %v581_v26  ;;  %v2432_v8 = vpop.eup %1655  ;;  %v506_v10 = vpop.xlane.xlu1 %505  ;;  %v673_v1 = vmul.f32 %v1654_v21, %v1976_v7  ;;  %v2437_v60 = vadd.f32 1.0, %v2352_v29  ;;  %v765_v0 = vadd.f32 %v2368_v42, %v726_v55 }
 0x152   : > { %v551_v37 = vpop.xlane.xlu0 %550  ;;  %v2439_v33 = vpop.eup %1657  ;;  %1673 = vrsqrt.f32 %v628_v50  ;;  %v582_v27 = vmul.f32 0.125, %v506_v10  ;;  %v1038_v52 = vmul.f32 %v2315_v43, %v750_v61  ;;  %1495 = vmatprep.mubr.msk.bf16.mxu1 %vm283_vm0, %v1075_v62  ;;  %v727_v58 = vmul.f32 %v2339_v47, %v688_v24  ;;  %v2700_v24 = vld [vmem:[#allocation4_spill] sm:$0xff] }
 0x153   : > { %v597_v35 = vmul.f32 0.125, %v551_v37  ;;  %v1660_v9 = vpop.eup %1659  ;;  %1675 = vrsqrt.f32 %v613_v59  ;;  %v712_v7 = vmul.f32 %v2339_v47, %v673_v1  ;;  %v1053_v28 = vmul.f32 %v2319_v16, %v765_v0 }
 0x154   : > { %v1662_v2 = vpop.eup %1661  ;;  %v614_v29 = vadd.f32 1e-05, %v582_v27  ;;  %v1068_v45 = vpack.c.bf16 %v1038_v52, %v1037_v57  ;;  %v674_v39 = vmul.f32 %v1660_v9, %v2698_v20  ;;  %v766_v43 = vadd.f32 %v2368_v42, %v727_v58  ;;  %v2701_v27 = vld [vmem:[#allocation5_spill] sm:$0xff]  ;;  %v2703_v20 = vld [vmem:[#allocation6_spill] sm:$0xff] }
 0x155   : > { %v629_v32 = vadd.f32 1e-05, %v597_v35  ;;  %v554_v22 = vpop.xlane.xlu1 %553  ;;  %v751_v17 = vadd.f32 %v2368_v42, %v712_v7  ;;  %v689_v13 = vmul.f32 %v1662_v2, %v2699_v49  ;;  %1677 = vrcp.f32 %v2405_v18  ;;  %v2451_v54 = vpop.eup %1663  ;;  %v2702_v52 = vld [vmem:[#allocation25_spill] sm:$0xff] }
 0x156   : > { %v509_v63 = vpop.xlane.xlu0 %508  ;;  %1679 = vrsqrt.f32 %v614_v29  ;;  %v598_v26 = vmul.f32 0.125, %v554_v22  ;;  %1480 = vmatmul.mubr.msk.bf16.vlgmr.msra.gmra.mxu0 %vm283_vm0, %v1068_v45  ;;  %v713_v11 = vmul.f32 %v2339_v47, %v674_v39  ;;  %v1054_v55 = vmul.f32 %v2324_v19, %v766_v43 }
 0x157   : > { %v583_v5 = vmul.f32 0.125, %v509_v63  ;;  %v1666_v30 = vpop.eup %1665  ;;  %1681 = vrsqrt.f32 %v629_v32  ;;  %v728_v21 = vmul.f32 %v2339_v47, %v689_v13  ;;  %v1039_v1 = vmul.f32 %v2328_v48, %v751_v17  ;;  %v2704_v17 = vld [vmem:[#allocation7_spill] sm:$0xff] }
 0x158   : > { %v1668_v50 = vpop.eup %1667  ;;  %v630_v59 = vadd.f32 1e-05, %v598_v26  ;;  %v752_v61 = vadd.f32 %v2368_v42, %v713_v11  ;;  %v690_v10 = vmul.f32 %v1666_v30, %v2700_v24  ;;  %v1076_v57 = vpack.c.bf16 %v1054_v55, %v1053_v28 }
 0x159   : > { %v615_v18 = vadd.f32 1e-05, %v583_v5  ;;  %v512_v37 = vpop.xlane.xlu1 %511  ;;  %v675_v35 = vmul.f32 %v1668_v50, %v2701_v27  ;;  %v2464_v16 = vmul.f32 %v2362_v3, %v2702_v52  ;;  %v767_v2 = vadd.f32 %v2368_v42, %v728_v21 }
 0x15a   : > { %v557_v62 = vpop.xlane.xlu0 %556  ;;  %1683 = vrsqrt.f32 %v630_v59  ;;  %v584_v19 = vmul.f32 0.125, %v512_v37  ;;  %v1040_v58 = vmul.f32 %v2334_v46, %v752_v61  ;;  %1496 = vmatmul.mubr.msk.bf16.vlgmr.msra.gmra.mxu1 %vm283_vm0, %v1076_v57  ;;  %v729_v7 = vmul.f32 %v2339_v47, %v690_v10  ;;  %v2706_v57 = vld [vmem:[#allocation9_spill] sm:$0xff] }
 0x15b   : > { %v599_v9 = vmul.f32 0.125, %v557_v62  ;;  %v1670_v0 = vpop.eup %1669  ;;  %1685 = vrsqrt.f32 %v615_v18  ;;  %v714_v48 = vmul.f32 %v2339_v47, %v675_v35  ;;  %v1055_v30 = vmul.f32 %v2343_v36, %v767_v2  ;;  %v2705_v18 = vld [vmem:[#allocation8_spill] sm:$0xff] }
 0x15c   : > { %v1672_v29 = vpop.eup %1671  ;;  %v616_v32 = vadd.f32 1e-05, %v584_v19  ;;  %v1069_v3 = vpack.c.bf16 %v1040_v58, %v1039_v1  ;;  %v676_v39 = vmul.f32 %v1670_v0, %v2703_v20  ;;  %v768_v46 = vadd.f32 %v2368_v42, %v729_v7  ;;  %v2708_v20 = vld [vmem:[#allocation11_spill] sm:$0xff] }
 0x15d   : > { %v631_v45 = vadd.f32 1e-05, %v599_v9  ;;  %v560_v22 = vpop.xlane.xlu1 %559  ;;  %v753_v43 = vadd.f32 %v2368_v42, %v714_v48  ;;  %v691_v49 = vmul.f32 %v1672_v29, %v2704_v17  ;;  %1687 = vrcp.f32 %v2437_v60  ;;  %v2707_v48 = vld [vmem:[#allocation10_spill] sm:$0xff] }
 0x15e   : > { %v515_v63 = vpop.xlane.xlu0 %514  ;;  %1689 = vrsqrt.f32 %v616_v32  ;;  %v600_v13 = vmul.f32 0.125, %v560_v22  ;;  %1483 = vmatprep.mubr.msk.bf16.mxu0 %vm283_vm0, %v1069_v3  ;;  %v715_v5 = vmul.f32 %v2339_v47, %v676_v39  ;;  %v1056_v28 = vmul.f32 %v2347_v51, %v768_v46  ;;  %v2709_v22 = vld [vmem:[#allocation26_spill] sm:$0xff] }
 0x15f   : > { %v585_v26 = vmul.f32 0.125, %v515_v63  ;;  %v1674_v11 = vpop.eup %1673  ;;  %1691 = vrsqrt.f32 %v631_v45  ;;  %v730_v55 = vmul.f32 %v2339_v47, %v691_v49  ;;  %v1041_v62 = vmul.f32 %v2356_v31, %v753_v43 }
 0x160   : > { %v1676_v21 = vpop.eup %1675  ;;  %v632_v50 = vadd.f32 1e-05, %v600_v13  ;;  %v754_v60 = vadd.f32 %v2368_v42, %v715_v5  ;;  %v692_v61 = vmul.f32 %v1674_v11, %v2705_v18  ;;  %v1077_v37 = vpack.c.bf16 %v1056_v28, %v1055_v30 }
 0x161   : > { %v617_v59 = vadd.f32 1e-05, %v585_v26  ;;  %v518_v24 = vpop.xlane.xlu1 %517  ;;  %v677_v1 = vmul.f32 %v1676_v21, %v2706_v57  ;;  %v937_v36 = vadd.f32 1.0, %v2383_v56  ;;  %v769_v58 = vadd.f32 %v2368_v42, %v730_v55  ;;  %v2710_v55 = vld [vmem:[#allocation12_spill] sm:$0xff] }
 0x162   : > { %v563_v10 = vpop.xlane.xlu0 %562  ;;  %v2486_v27 = vpop.eup %1677  ;;  %1693 = vrsqrt.f32 %v632_v50  ;;  %v586_v51 = vmul.f32 0.125, %v518_v24  ;;  %v1042_v52 = vmul.f32 %v2360_v15, %v754_v60  ;;  %1499 = vmatprep.mubr.msk.bf16.mxu1 %vm283_vm0, %v1077_v37  ;;  %v731_v9 = vmul.f32 %v2339_v47, %v692_v61  ;;  %v2711_v61 = vld [vmem:[#allocation13_spill] sm:$0xff] }
 0x163   : > { %v601_v35 = vmul.f32 0.125, %v563_v10  ;;  %v1680_v19 = vpop.eup %1679  ;;  %1695 = vrsqrt.f32 %v617_v59  ;;  %v716_v31 = vmul.f32 %v2339_v47, %v677_v1  ;;  %v2499_v63 = vmul.f32 %v2387_v38, %v2709_v22 }
 0x164   : > { %v1682_v0 = vpop.eup %1681  ;;  %v618_v7 = vadd.f32 1e-05, %v586_v51  ;;  %v1070_v2 = vpack.c.bf16 %v1042_v52, %v1041_v62  ;;  %v678_v29 = vmul.f32 %v1680_v19, %v2707_v48  ;;  %v770_v15 = vadd.f32 %v2368_v42, %v731_v9  ;;  %v2712_v19 = vld [vmem:[#allocation14_spill] sm:$0xff] }
 0x165   : > { %v633_v56 = vadd.f32 1e-05, %v601_v35  ;;  %v566_v32 = vpop.xlane.xlu1 %565  ;;  %v755_v3 = vadd.f32 %v2368_v42, %v716_v31  ;;  %v693_v39 = vmul.f32 %v1682_v0, %v2708_v20  ;;  %v1057_v13 = vmul.f32 %v2372_v25, %v769_v58  ;;  %v2713_v0 = vld [vmem:[#allocation15_spill] sm:$0xff] }
 0x166   : > { %v521_v45 = vpop.xlane.xlu0 %520  ;;  %1697 = vrsqrt.f32 %v618_v7  ;;  %v602_v46 = vmul.f32 0.125, %v566_v32  ;;  %1484 = vmatmul.mubr.msk.bf16.gmra.mxu0 %vm283_vm0, %v1070_v2  ;;  %v717_v17 = vmul.f32 %v2339_v47, %v678_v29  ;;  %v1058_v26 = vmul.f32 %v2376_v6, %v770_v15  ;;  %v2714_v29 = vld [vmem:[#allocation27_spill] sm:$0xff] }
 0x167   : > { %v587_v43 = vmul.f32 0.125, %v521_v45  ;;  %v1684_v49 = vpop.eup %1683  ;;  %1699 = vrsqrt.f32 %v633_v56  ;;  %v732_v5 = vmul.f32 %v2339_v47, %v693_v39  ;;  %v1043_v18 = vmul.f32 %v2380_v14, %v755_v3 }
 0x168   : > { %v1686_v11 = vpop.eup %1685  ;;  %v634_v30 = vadd.f32 1e-05, %v602_v46  ;;  %v756_v38 = vadd.f32 %v2368_v42, %v717_v17  ;;  %v694_v21 = vmul.f32 %v1684_v49, %v2710_v55  ;;  %v1078_v60 = vpack.c.bf16 %v1058_v26, %v1057_v13  ;;  %v2715_v46 = vld [vmem:[#allocation16_spill] sm:$0xff]  ;;  %v2717_v26 = vld [vmem:[#allocation17_spill] sm:$0xff] }
 0x169   : > { %v619_v28 = vadd.f32 1e-05, %v587_v43  ;;  %v524_v50 = vpop.xlane.xlu1 %523  ;;  %v679_v24 = vmul.f32 %v1686_v11, %v2711_v61  ;;  %1701 = vrcp.f32 %v937_v36  ;;  %v771_v1 = vadd.f32 %v2368_v42, %v732_v5  ;;  %v2716_v17 = vld [vmem:[#allocation28_spill] sm:$0xff] }
 0x16a   : > { %v569_v59 = vpop.xlane.xlu0 %568  ;;  %v2510_v25 = vpop.eup %1687  ;;  %1703 = vrsqrt.f32 %v634_v30  ;;  %v588_v6 = vmul.f32 0.125, %v524_v50  ;;  %v1044_v37 = vmul.f32 %v2393_v12, %v756_v38  ;;  %1500 = vmatmul.mubr.msk.bf16.gmra.mxu1 %vm283_vm0, %v1078_v60  ;;  %v733_v57 = vmul.f32 %v2339_v47, %v694_v21  ;;  %v2719_v50 = vld [vmem:[#allocation29_spill] sm:$0xff]  ;;  %v2720_v60 = vld [vmem:[#allocation30_spill] sm:$0xff] }
 0x16b   : > { %v603_v10 = vmul.f32 0.125, %v569_v59  ;;  %v1690_v62 = vpop.eup %1689  ;;  %1705 = vrsqrt.f32 %v619_v28  ;;  %v718_v14 = vmul.f32 %v2339_v47, %v679_v24  ;;  %v938_v56 = vadd.f32 1.0, %v2414_v44 }
 0x16c   : > { %v1692_v51 = vpop.eup %1691  ;;  %v620_v35 = vadd.f32 1e-05, %v588_v6  ;;  %v1071_v52 = vpack.c.bf16 %v1044_v37, %v1043_v18  ;;  %v680_v9 = vmul.f32 %v1690_v62, %v2712_v19  ;;  %v772_v31 = vadd.f32 %v2368_v42, %v733_v57  ;;  %v2721_v18 = vld [vmem:[#allocation19_spill] sm:$0xff]  ;;  %v2724_v19 = vld [vmem:[#allocation32_spill] sm:$0xff] }
 0x16d   : > { %v635_v36 = vadd.f32 1e-05, %v603_v10  ;;  %v572_v58 = vpop.xlane.xlu1 %571  ;;  %v757_v12 = vadd.f32 %v2368_v42, %v718_v14  ;;  %v695_v7 = vmul.f32 %v1692_v51, %v2713_v0  ;;  %v1029_v32 = vmul.f32 %v2400_v41, %v2714_v29 }
 0x16e   : > { %1707 = vrsqrt.f32 %v620_v35  ;;  %v604_v2 = vmul.f32 0.125, %v572_v58  ;;  %1487 = vmatprep.mubr.msk.bf16.mxu0 %vm283_vm0, %v1071_v52  ;;  %v719_v48 = vmul.f32 %v2339_v47, %v680_v9  ;;  %v1059_v15 = vmul.f32 %v2396_v53, %v771_v1  ;;  %v2722_v35 = vld [vmem:[#allocation20_spill] sm:$0xff]  ;;  %v2725_v58 = vld [vmem:[#allocation21_spill] sm:$0xff] }
 0x16f   : > { %v1694_v45 = vpop.eup %1693  ;;  %1709 = vrsqrt.f32 %v635_v36  ;;  %v1060_v3 = vmul.f32 %v2421_v40, %v772_v31  ;;  %v734_v20 = vmul.f32 %v2339_v47, %v695_v7  ;;  %v1030_v49 = vmul.f32 %v2407_v23, %v2716_v17  ;;  %v2723_v36 = vld [vmem:[#allocation31_spill] sm:$0xff] }
 0x170   : > { %v1696_v39 = vpop.eup %1695  ;;  %v636_v22 = vadd.f32 1e-05, %v604_v2  ;;  %v758_v44 = vadd.f32 %v2368_v42, %v719_v48  ;;  %v696_v43 = vmul.f32 %v1694_v45, %v2715_v46  ;;  %v1045_v41 = vmul.f32 %v2464_v16, %v757_v12  ;;  %v2718_v16 = vld [vmem:[#allocation18_spill] sm:$0xff] }
 0x171   : > { %v1079_v13 = vpack.c.bf16 %v1060_v3, %v1059_v15  ;;  %v681_v5 = vmul.f32 %v1696_v39, %v2717_v26  ;;  %1711 = vrcp.f32 %v938_v56  ;;  %v773_v11 = vadd.f32 %v2368_v42, %v734_v20  ;;  %v2726_v45 = vld [vmem:[#allocation22_spill] sm:$0xff]  ;;  %v2728_v20 = vld [vmem:[#allocation33_spill] sm:$0xff] }
 0x172   : > { %1713 = vrsqrt.f32 %v636_v22  ;;  %v1046_v53 = vmul.f32 %v2499_v63, %v758_v44  ;;  %v735_v40 = vmul.f32 %v2339_v47, %v696_v43  ;;  %v1015_v59 = vmul.f32 %v2423_v34, %v2719_v50  ;;  %v2729_v22 = vld [vmem:[#allocation34_spill] sm:$0xff] }
 0x173   : > { %v1698_v30 = vpop.eup %1697  ;;  %1503 = vmatprep.mubr.msk.bf16.mxu1 %vm283_vm0, %v1079_v13  ;;  %v720_v28 = vmul.f32 %v2339_v47, %v681_v5  ;;  %v1016_v63 = vmul.f32 %v2432_v8, %v2720_v60  ;;  %v1061_v6 = vmul.f32 %v1029_v32, %v773_v11  ;;  %v1031_v52 = vmul.f32 %v2439_v33, %v2723_v36  ;;  %v2730_v5 = vld [vmem:[#allocation24_spill] sm:$0xff]  ;;  %v2731_v11 = vld [vmem:[#allocation35_spill] sm:$0xff] }
 0x174   : > { %v1700_v38 = vpop.eup %1699  ;;  %v1072_v23 = vpack.c.bf16 %v1046_v53, %v1045_v41  ;;  %v774_v55 = vadd.f32 %v2368_v42, %v735_v40  ;;  %v682_v21 = vmul.f32 %v1698_v30, %v2718_v16  ;;  %v1032_v9 = vmul.f32 %v2451_v54, %v2724_v19  ;;  %v2727_v54 = vld [vmem:[#allocation23_spill] sm:$0xff] }
 0x175   : > { %v697_v61 = vmul.f32 %v1700_v38, %v2721_v18  ;;  %v759_v62 = vadd.f32 %v2368_v42, %v720_v28  ;;  %v1017_v39 = vmul.f32 %v2486_v27, %v2728_v20  ;;  %v1018_v44 = vmul.f32 %v2510_v25, %v2729_v22 }
 0x176   : > { %v1702_v24 = vpop.eup %1701  ;;  %1488 = vmatmul.mubr.msk.bf16.gmra.mxu0 %vm283_vm0, %v1072_v23  ;;  %v1062_v10 = vmul.f32 %v1030_v49, %v774_v55  ;;  %v721_v37 = vmul.f32 %v2339_v47, %v682_v21 }
 0x177   : > { %v1704_v57 = vpop.eup %1703  ;;  %v736_v1 = vmul.f32 %v2339_v47, %v697_v61  ;;  %v1047_v12 = vmul.f32 %v1015_v59, %v759_v62  ;;  %v1033_v25 = vmul.f32 %v1702_v24, %v2731_v11 }
 0x178   : > { %v1706_v14 = vpop.eup %1705  ;;  %v1080_v51 = vpack.c.bf16 %v1062_v10, %v1061_v6  ;;  %v760_v34 = vadd.f32 %v2368_v42, %v721_v37  ;;  %v698_v8 = vmul.f32 %v1704_v57, %v2722_v35 }
 0x179   : > { %v683_v31 = vmul.f32 %v1706_v14, %v2725_v58  ;;  %v775_v56 = vadd.f32 %v2368_v42, %v736_v1 }
 0x17a   : > { %1504 = vmatmul.mubr.msk.bf16.gmra.mxu1 %vm283_vm0, %v1080_v51  ;;  %v1048_v0 = vmul.f32 %v1016_v63, %v760_v34  ;;  %v737_v7 = vmul.f32 %v2339_v47, %v698_v8 }
 0x17b   : > { %v1708_v2 = vpop.eup %1707  ;;  %v722_v48 = vmul.f32 %v2339_v47, %v683_v31  ;;  %v1063_v43 = vmul.f32 %v1031_v52, %v775_v56 }
 0x17c   : > { %v1710_v29 = vpop.eup %1709  ;;  %v1073_v32 = vpack.c.bf16 %v1048_v0, %v1047_v12  ;;  %v776_v33 = vadd.f32 %v2368_v42, %v737_v7  ;;  %v684_v15 = vmul.f32 %v1708_v2, %v2726_v45 }
 0x17d   : > { %v699_v3 = vmul.f32 %v1710_v29, %v2727_v54  ;;  %v761_v13 = vadd.f32 %v2368_v42, %v722_v48 }
 0x17e   : > { %v1712_v46 = vpop.eup %1711  ;;  %1491 = vmatprep.mubr.msk.bf16.mxu0 %vm283_vm0, %v1073_v32  ;;  %v1064_v17 = vmul.f32 %v1032_v9, %v776_v33  ;;  %v723_v49 = vmul.f32 %v2339_v47, %v684_v15 }
 0x17f   : > { %v1714_v41 = vpop.eup %1713  ;;  %v738_v26 = vmul.f32 %v2339_v47, %v699_v3  ;;  %v1034_v30 = vmul.f32 %v1712_v46, %v2301_v4  ;;  %v1049_v28 = vmul.f32 %v1017_v39, %v761_v13 }
 0x180   : > { %v700_v53 = vmul.f32 %v1714_v41, %v2730_v5  ;;  %v1081_v40 = vpack.c.bf16 %v1064_v17, %v1063_v43  ;;  %v762_v27 = vadd.f32 %v2368_v42, %v723_v49 }
 0x181   : > { %v777_v55 = vadd.f32 %v2368_v42, %v738_v26 }
 0x182   : > { %1507 = vmatprep.mubr.msk.bf16.mxu1 %vm283_vm0, %v1081_v40  ;;  %v1050_v38 = vmul.f32 %v1018_v44, %v762_v27  ;;  %v739_v23 = vmul.f32 %v2339_v47, %v700_v53 }
 0x183   : > { %v1065_v50 = vmul.f32 %v1033_v25, %v777_v55 }
 0x184   : > { %v1074_v16 = vpack.c.bf16 %v1050_v38, %v1049_v28  ;;  %v778_v21 = vadd.f32 %v2368_v42, %v739_v23 }
 0x186   : > { %1492 = vmatmul.mubr.msk.bf16.gmra.mxu0 %vm283_vm0, %v1074_v16  ;;  %v1066_v59 = vmul.f32 %v1034_v30, %v778_v21 }
 0x188   : > { %v1082_v60 = vpack.c.bf16 %v1066_v59, %v1065_v50 }
 0x18a   : > { %1508 = vmatmul.mubr.msk.bf16.gmra.mxu1 %vm283_vm0, %v1082_v60 }
 0x216   : > { %v1481_v4 = vpop.f32.mrf.mxu0 }
 0x217   : > { %1299 = vst [vmem:[%s2587_s11 + $0x10] sm:$0xff] %v1481_v4 }
 0x218   : > { %v1170_v47 = vpop.f32.mrf.mxu0 }
 0x219   : > { %1297 = vst [vmem:[%s2587_s11] sm:$0xff] %v1170_v47 }
 0x21a   : > { %v1482_v42 = vpop.f32.mrf.mxu0  ;;  %v1497_v63 = vpop.f32.mrf.mxu1 }
 0x21b   : > { %1300 = vst [vmem:[%s2587_s11 + $0x18] sm:$0xff] %v1482_v42  ;;  %1315 = vst [vmem:[%s2587_s11 + $0x90] sm:$0xff] %v1497_v63 }
 0x21c   : > { %v1173_v18 = vpop.f32.mrf.mxu0  ;;  %v1234_v61 = vpop.f32.mrf.mxu1 }
 0x21d   : > { %1298 = vst [vmem:[%s2587_s11 + $0x8] sm:$0xff] %v1173_v18  ;;  %1313 = vst [vmem:[%s2587_s11 + $0x80] sm:$0xff] %v1234_v61 }
 0x21e   : > { %v1498_v24 = vpop.f32.mrf.mxu1 }
 0x21f   : > { %1316 = vst [vmem:[%s2587_s11 + $0x98] sm:$0xff] %v1498_v24 }
 0x220   : > { %v1237_v6 = vpop.f32.mrf.mxu1 }
 0x221   : > { %1314 = vst [vmem:[%s2587_s11 + $0x88] sm:$0xff] %v1237_v6 }
 0x226   : > { %v1485_v10 = vpop.f32.mrf.mxu0 }
 0x227   : > { %1303 = vst [vmem:[%s2587_s11 + $0x30] sm:$0xff] %v1485_v10 }
 0x228   : > { %v1186_v37 = vpop.f32.mrf.mxu0 }
 0x229   : > { %1301 = vst [vmem:[%s2587_s11 + $0x20] sm:$0xff] %v1186_v37 }
 0x22a   : > { %v1486_v62 = vpop.f32.mrf.mxu0  ;;  %v1501_v57 = vpop.f32.mrf.mxu1 }
 0x22b   : > { %1304 = vst [vmem:[%s2587_s11 + $0x38] sm:$0xff] %v1486_v62  ;;  %1319 = vst [vmem:[%s2587_s11 + $0xb0] sm:$0xff] %v1501_v57 }
 0x22c   : > { %v1189_v1 = vpop.f32.mrf.mxu0  ;;  %v1250_v14 = vpop.f32.mrf.mxu1 }
 0x22d   : > { %1302 = vst [vmem:[%s2587_s11 + $0x28] sm:$0xff] %v1189_v1  ;;  %1317 = vst [vmem:[%s2587_s11 + $0xa0] sm:$0xff] %v1250_v14 }
 0x22e   : > { %v1502_v51 = vpop.f32.mrf.mxu1 }
 0x22f   : > { %1320 = vst [vmem:[%s2587_s11 + $0xb8] sm:$0xff] %v1502_v51 }
 0x230   : > { %v1253_v34 = vpop.f32.mrf.mxu1 }
 0x231   : > { %1318 = vst [vmem:[%s2587_s11 + $0xa8] sm:$0xff] %v1253_v34 }
 0x236   : > { %v1489_v35 = vpop.f32.mrf.mxu0 }
 0x237   : > { %1307 = vst [vmem:[%s2587_s11 + $0x50] sm:$0xff] %v1489_v35 }
 0x238   : > { %v1202_v8 = vpop.f32.mrf.mxu0 }
 0x239   : > { %1305 = vst [vmem:[%s2587_s11 + $0x40] sm:$0xff] %v1202_v8 }
 0x23a   : > { %v1490_v36 = vpop.f32.mrf.mxu0  ;;  %v1505_v52 = vpop.f32.mrf.mxu1 }
 0x23b   : > { %1308 = vst [vmem:[%s2587_s11 + $0x58] sm:$0xff] %v1490_v36  ;;  %1323 = vst [vmem:[%s2587_s11 + $0xd0] sm:$0xff] %v1505_v52 }
 0x23c   : > { %v1205_v19 = vpop.f32.mrf.mxu0  ;;  %v1266_v9 = vpop.f32.mrf.mxu1 }
 0x23d   : > { %1306 = vst [vmem:[%s2587_s11 + $0x48] sm:$0xff] %v1205_v19  ;;  %1321 = vst [vmem:[%s2587_s11 + $0xc0] sm:$0xff] %v1266_v9 }
 0x23e   : > { %v1506_v58 = vpop.f32.mrf.mxu1 }
 0x23f   : > { %1324 = vst [vmem:[%s2587_s11 + $0xd8] sm:$0xff] %v1506_v58 }
 0x240   : > { %v1269_v31 = vpop.f32.mrf.mxu1 }
 0x241   : > { %1322 = vst [vmem:[%s2587_s11 + $0xc8] sm:$0xff] %v1269_v31 }
 0x246   : > { %v1493_v12 = vpop.f32.mrf.mxu0 }
 0x247   : > { %1311 = vst [vmem:[%s2587_s11 + $0x70] sm:$0xff] %v1493_v12 }
 0x248   : > { %v1218_v0 = vpop.f32.mrf.mxu0 }
 0x249   : > { %1309 = vst [vmem:[%s2587_s11 + $0x60] sm:$0xff] %v1218_v0 }
 0x24a   : > { %v1494_v7 = vpop.f32.mrf.mxu0  ;;  %v1509_v56 = vpop.f32.mrf.mxu1 }
 0x24b   : > { %1312 = vst [vmem:[%s2587_s11 + $0x78] sm:$0xff] %v1494_v7  ;;  %1327 = vst [vmem:[%s2587_s11 + $0xf0] sm:$0xff] %v1509_v56 }
 0x24c   : > { %v1221_v2 = vpop.f32.mrf.mxu0  ;;  %v1282_v48 = vpop.f32.mrf.mxu1 }
 0x24d   : > { %1310 = vst [vmem:[%s2587_s11 + $0x68] sm:$0xff] %v1221_v2  ;;  %1325 = vst [vmem:[%s2587_s11 + $0xe0] sm:$0xff] %v1282_v48 }
 0x24e   : > { %v1510_v29 = vpop.f32.mrf.mxu1 }
 0x24f   : > { %1328 = vst [vmem:[%s2587_s11 + $0xf8] sm:$0xff] %v1510_v29 }
 0x250   : > { %v1285_v32 = vpop.f32.mrf.mxu1 }
 0x251   : > { %1326 = vst [vmem:[%s2587_s11 + $0xe8] sm:$0xff] %v1285_v32 }
 0x252 PF: > { %s15_s18 = sadd.s32 1, %s1721_s18  }
 0x253   : > { %p12_p4 = scmp.ge.s32.totalorder %s15_s18, 4  }
 0x255   :  { %14 = sbr.rel (!%p12_p4) target bundleno = 1 (0x1), region = 73 }

// kernel: run.24
= control target key start
LH: loop header
LB: loop body
LE: loop exit
PB: predicated region body
PF: predicated region fallthrough
CT: control target
= control target key end

     0   :  { %v505_v3 = vmov 0.0   ;;  %s507_s30 = smov 0   ;;  %s643_s0 = inlined_call_operand.vmem [shape: f32[256,128], index: 0, kind: input, shape index: {}]   ;;  %s644_s1 = inlined_call_operand.vmem [shape: f32[256,128], index: 1, kind: input, shape index: {}]   ;;  %s645_s2 = inlined_call_operand.vmem [shape: f32[1,128], index: 2, kind: input, shape index: {}]   ;;  %s646_s3 = inlined_call_operand.vmem [shape: f32[8,128], index: 3, kind: input, shape index: {}]   ;;  %s647_s4 = inlined_call_operand.vmem [shape: f32[1,128], index: 4, kind: input, shape index: {}]   ;;  %s648_s5 = inlined_call_operand.vmem [shape: f32[256,8,128], index: 5, kind: input, shape index: {}]   ;;  %s649_s6 = inlined_call_operand.vmem [shape: f32[256,8,128], index: 6, kind: input, shape index: {}]   ;;  %s650_s7 = inlined_call_operand.vmem [shape: f32[256,128], index: 7, kind: output, shape index: {}]  }
   0x1   :  { %v493_v0 = vld [vmem:[%s646_s3] sm:$0xff] }
   0x2   :  { %v498_v1 = vld [vmem:[%s645_s2] sm:$0x1] }
   0x3   :  { %v503_v2 = vld [vmem:[%s647_s4] sm:$0x1] }
   0x4 LB: > { %v70_v4 = vlaneseq  ;;  %s516_s2 = sshll.u32 %s447_s30, 3  ;;  %s390_s12 = sshll.u32 %s447_s30, 6  ;;  %v449_v55 = vmov 1966171168   ;;  %vm350_vm0 = vcmask 1040384   ;;  %vm352_vm1 = vcmask 1041408   ;;  %s447_s30 = sphi %s507_s30, %s34_s30   ;;  %v443_v3 = vphi %v505_v3, %v317_v3  }
   0x5   : > { %s39_s8 = scalar_lea.vmem %s644_s1, %s516_s2  ;;  %s37_s11 = scalar_lea.vmem %s643_s0, %s516_s2  ;;  %v134_v56 = vunpack.c.l.s4 %v449_v55  ;;  %vm354_vm2 = vcmask 1042432   ;;  %vm356_vm3 = vcmask 1043456   ;;  %vm358_vm4 = vcmask 1044480  }
   0x6   : > { %v518_v5 = vshrl.u32 %v70_v4, 7  ;;  %v40_v6 = vld [vmem:[%s39_s8] sm:$0xff]  ;;  %s555_s15 = scalar_lea.vmem %s648_s5, %s390_s12  ;;  %s575_s18 = scalar_lea.vmem %s649_s6, %s390_s12  ;;  %vm360_vm5 = vcmask 1045504   ;;  %vm362_vm6 = vcmask 1046528  }
   0x7   : > { %v60_v8 = vadd.f32 %v40_v6, %v498_v1  ;;  %v544_v41 = vld [vmem:[%s37_s11] sm:$0xff]  ;;  %v44_v4 = vld [vmem:[%s555_s15 + $0x8] sm:$0xff]  ;;  %s364_s21 = scalar_lea.vmem %s650_s7, %s516_s2  ;;  %s34_s30 = sadd.s32 1, %s447_s30  }
   0x8   : > { %v525_v7 = vsub.s32 0, %v518_v5  ;;  %v112_v28 = vsub.s32 1, %v518_v5  ;;  %v160_v29 = vsub.s32 2, %v518_v5  ;;  %v185_v31 = vsub.s32 3, %v518_v5  ;;  %v43_v54 = vld [vmem:[%s555_s15] sm:$0xff]  ;;  %p31_p0 = scmp.ge.s32.totalorder %s34_s30, 32  }
   0x9   : > { %v62_v10 = vand.u32 2147483647, %v60_v8  ;;  %v61_v21 = vmax.f32 %v60_v8, 0.0  ;;  %v210_v40 = vsub.s32 4, %v518_v5  ;;  %v249_v46 = vsub.s32 5, %v518_v5  ;;  %v52_v8 = vld [vmem:[%s575_s18] sm:$0xff] }
   0xa   : > { %v98_v9 = vrot.slane %v498_v1, %v525_v7  ;;  %v281_v51 = vsub.s32 6, %v518_v5  ;;  %v306_v60 = vsub.s32 7, %v518_v5 }
   0xb   : > { %v63_v12 = vsub.f32 0.0, %v62_v10 }
   0xc   : > { %v100_v11 = vadd.f32 %v98_v9, %v40_v6  ;;  %v135_v6 = vunpack.c.0.s8 %v134_v56 }
   0xd   : > { %v64_v14 = vmul.f32 1.442695, %v63_v12 }
   0xe   : > { %v102_v13 = vand.u32 2147483647, %v100_v11  ;;  %v101_v24 = vmax.f32 %v100_v11, 0.0 }
   0xf   : > { %409 = vpow2.f32 %v64_v14 }
  0x10   : > { %v103_v15 = vsub.f32 0.0, %v102_v13 }
  0x12   : > { %v104_v16 = vmul.f32 1.442695, %v103_v15 }
  0x14   : > { %411 = vpow2.f32 %v104_v16  ;;  %v45_v16 = vld [vmem:[%s555_s15 + $0x10] sm:$0xff] }
  0x1c   : > { %v410_v17 = vpop.eup %409 }
  0x1d   : > { %v66_v18 = vadd.f32 1.0, %v410_v17  ;;  %v585_v17 = vsub.s32 %v135_v6, %v518_v5  ;;  %v229_v6 = vcombine.high %v544_v41, %v544_v41 }
  0x1f   : > { %413 = vlog2.f32 %v66_v18 }
  0x21   : > { %v412_v19 = vpop.eup %411 }
  0x22   : > { %v106_v20 = vadd.f32 1.0, %v412_v19 }
  0x24   : > { %415 = vlog2.f32 %v106_v20  ;;  %v53_v20 = vld [vmem:[%s575_s18 + $0x8] sm:$0xff] }
  0x2c   : > { %v414_v22 = vpop.eup %413 }
  0x2d   : > { %v68_v23 = vmul.f32 0.6931472, %v414_v22 }
  0x2f   : > { %v69_v26 = vadd.f32 %v68_v23, %v61_v21 }
  0x31   : > { %v416_v25 = vpop.eup %415  ;;  %v73_v30 = vrot.slane %v69_v26, %v525_v7  ;;  %v78_v47 = vmul.f32 %v69_v26, %v544_v41 }
  0x32   : > { %v108_v27 = vmul.f32 0.6931472, %v416_v25 }
  0x33   : > { %v74_v33 = vmul.f32 %v73_v30, %v493_v0  ;;  %v82_v52 = vrot.slane %v78_v47, %v525_v7 }
  0x34   : > { %v109_v32 = vadd.f32 %v108_v27, %v101_v24  ;;  %v46_v27 = vld [vmem:[%s555_s15 + $0x18] sm:$0xff] }
  0x35   : > { %v75_v36 = vmul.f32 1.442695, %v74_v33  ;;  %v83_v61 = vmul.f32 %v82_v52, %v43_v54 }
  0x36   : > { %v113_v34 = vrot.slane %v109_v32, %v112_v28  ;;  %v161_v35 = vrot.slane %v109_v32, %v160_v29  ;;  %v186_v37 = vrot.slane %v109_v32, %v185_v31  ;;  %v211_v45 = vrot.slane %v109_v32, %v210_v40 }
  0x37   : > { %417 = vpow2.f32 %v75_v36  ;;  %v250_v50 = vrot.slane %v109_v32, %v249_v46  ;;  %v563_v53 = vmul.f32 %v109_v32, %v544_v41  ;;  %v282_v59 = vrot.slane %v109_v32, %v281_v51 }
  0x38   : > { %v114_v38 = vmul.f32 %v113_v34, %v493_v0  ;;  %v162_v39 = vmul.f32 %v161_v35, %v493_v0  ;;  %v187_v44 = vmul.f32 %v186_v37, %v493_v0  ;;  %v212_v49 = vmul.f32 %v211_v45, %v493_v0  ;;  %v54_v34 = vld [vmem:[%s575_s18 + $0x10] sm:$0xff] }
  0x39   : > { %v251_v58 = vmul.f32 %v250_v50, %v493_v0  ;;  %v122_v62 = vrot.slane %v563_v53, %v112_v28  ;;  %v283_v10 = vmul.f32 %v282_v59, %v493_v0  ;;  %v307_v11 = vrot.slane %v109_v32, %v306_v60 }
  0x3a   : > { %v115_v42 = vmul.f32 1.442695, %v114_v38  ;;  %v163_v43 = vmul.f32 1.442695, %v162_v39  ;;  %v188_v48 = vmul.f32 1.442695, %v187_v44  ;;  %v169_v15 = vrot.slane %v563_v53, %v160_v29 }
  0x3b   : > { %v213_v57 = vmul.f32 1.442695, %v212_v49  ;;  %v252_v9 = vmul.f32 1.442695, %v251_v58  ;;  %v123_v14 = vmul.f32 %v122_v62, %v44_v4  ;;  %v284_v21 = vmul.f32 1.442695, %v283_v10 }
  0x3c   : > { %419 = vpow2.f32 %v115_v42  ;;  %v308_v22 = vmul.f32 %v307_v11, %v493_v0  ;;  %v170_v25 = vmul.f32 %v169_v15, %v45_v16  ;;  %v194_v26 = vrot.slane %v563_v53, %v185_v31  ;;  %v47_v42 = vld [vmem:[%s555_s15 + $0x20] sm:$0xff]  ;;  %v48_v58 = vld [vmem:[%s555_s15 + $0x28] sm:$0xff]  ;;  %v49_v16 = vld [vmem:[%s555_s15 + $0x30] sm:$0xff] }
  0x3d   : > { %421 = vpow2.f32 %v163_v43  ;;  %v139_v28 = vrot.slane %v544_v41, %v585_v17  ;;  %v219_v31 = vrot.slane %v563_v53, %v210_v40  ;;  %v258_v40 = vrot.slane %v563_v53, %v249_v46 }
  0x3e   : > { %423 = vpow2.f32 %v188_v48  ;;  %v309_v35 = vmul.f32 1.442695, %v308_v22  ;;  %v195_v38 = vmul.f32 %v194_v26, %v46_v27  ;;  %v55_v48 = vld [vmem:[%s575_s18 + $0x18] sm:$0xff]  ;;  %v290_v15 = vrot.slane %v563_v53, %v281_v51  ;;  %v57_v26 = vld [vmem:[%s575_s18 + $0x28] sm:$0xff] }
  0x3f   : > { %425 = vpow2.f32 %v213_v57  ;;  %v140_v39 = vcombine.high %v139_v28, %v139_v28  ;;  %v147_v52 = vrot.slane %v139_v28, %v585_v17  ;;  %v220_v57 = vmul.f32 %v219_v31, %v47_v42 }
  0x40   : > { %427 = vpow2.f32 %v252_v9 }
  0x41   : > { %429 = vpow2.f32 %v284_v21  ;;  %v154_v56 = vrot.slane %v140_v39, %v585_v17  ;;  %v179_v11 = vcombine.high %v147_v52, %v147_v52  ;;  %v92_v21 = vmul.f32 %v544_v41, %v503_v2  ;;  %v50_v41 = vld [vmem:[%s555_s15 + $0x38] sm:$0xff] }
  0x42   : > { %431 = vpow2.f32 %v309_v35 }
  0x43   : > { %v181_v28 = vmul.f32 %v179_v11, %v503_v2  ;;  %v204_v51 = vcombine.high %v154_v56, %v154_v56 }
  0x44   : > { %v418_v63 = vpop.eup %417 }
  0x45   : > { %v77_v7 = vmul.f32 %v443_v3, %v418_v63 }
  0x47   : > { %v84_v13 = vadd.f32 %v83_v61, %v77_v7 }
  0x49   : > { %v420_v12 = vpop.eup %419  ;;  %v85_v18 = vmul.f32 %v84_v13, %v52_v8  ;;  %v56_v8 = vld [vmem:[%s575_s18 + $0x20] sm:$0xff] }
  0x4a   : > { %v117_v3 = vmul.f32 %v420_v12, %v84_v13  ;;  %v422_v19 = vpop.eup %421  ;;  %v156_v13 = vmul.f32 %v154_v56, %v503_v2 }
  0x4b   : > { %v86_v23 = vrot.slane %v85_v18, 4  ;;  %v424_v33 = vpop.eup %423 }
  0x4c   : > { %v124_v24 = vadd.f32 %v123_v14, %v117_v3  ;;  %v426_v49 = vpop.eup %425  ;;  %v259_v14 = vmul.f32 %v258_v40, %v48_v58 }
  0x4d   : > { %v87_v29 = vadd.f32 %v86_v23, %v85_v18  ;;  %v428_v7 = vpop.eup %427  ;;  %v236_v23 = vrot.slane %v229_v6, %v585_v17 }
  0x4e   : > { %v125_v30 = vmul.f32 %v124_v24, %v53_v20  ;;  %v165_v32 = vmul.f32 %v422_v19, %v124_v24 }
  0x4f   : > { %v88_v43 = vrot.slane %v87_v29, 2  ;;  %v268_v5 = vcombine.high %v236_v23, %v236_v23 }
  0x50   : > { %v126_v36 = vrot.slane %v125_v30, 4  ;;  %v171_v37 = vadd.f32 %v170_v25, %v165_v32  ;;  %v430_v25 = vpop.eup %429 }
  0x51   : > { %v89_v59 = vadd.f32 %v88_v43, %v87_v29  ;;  %v432_v43 = vpop.eup %431 }
  0x52   : > { %v127_v44 = vadd.f32 %v126_v36, %v125_v30  ;;  %v172_v45 = vmul.f32 %v171_v37, %v54_v34  ;;  %v190_v47 = vmul.f32 %v424_v33, %v171_v37  ;;  %v291_v33 = vmul.f32 %v290_v15, %v49_v16 }
  0x53   : > { %v90_v18 = vrot.slane %v89_v59, 1  ;;  %v315_v34 = vrot.slane %v563_v53, %v306_v60 }
  0x54   : > { %v128_v50 = vrot.slane %v127_v44, 2  ;;  %v173_v54 = vrot.slane %v172_v45, 4  ;;  %v196_v55 = vadd.f32 %v195_v38, %v190_v47  ;;  %v206_v47 = vmul.f32 %v204_v51, %v503_v2 }
  0x55   : > { %v91_v35 = vadd.f32 %v90_v18, %v89_v59 }
  0x56   : > { %v129_v61 = vadd.f32 %v128_v50, %v127_v44  ;;  %v174_v62 = vadd.f32 %v173_v54, %v172_v45  ;;  %v197_v63 = vmul.f32 %v196_v55, %v55_v48  ;;  %v215_v4 = vmul.f32 %v426_v49, %v196_v55  ;;  %v58_v44 = vld [vmem:[%s575_s18 + $0x30] sm:$0xff] }
  0x57   : > { %v243_v48 = vrot.slane %v236_v23, %v585_v17  ;;  %v316_v50 = vmul.f32 %v315_v34, %v50_v41  ;;  %v93_v52 = vadd.f32 %v92_v21, %v91_v35 }
  0x58   : > { %v130_v9 = vrot.slane %v129_v61, 1  ;;  %v175_v10 = vrot.slane %v174_v62, 2  ;;  %v198_v12 = vrot.slane %v197_v63, 4  ;;  %v221_v46 = vadd.f32 %v220_v57, %v215_v4 }
  0x59   : > { %v275_v4 = vrot.slane %v268_v5, %v585_v17  ;;  %v300_v15 = vcombine.high %v243_v48, %v243_v48 }
  0x5a   : > { %v131_v3 = vadd.f32 %v130_v9, %v129_v61  ;;  %v176_v19 = vadd.f32 %v175_v10, %v174_v62  ;;  %v199_v20 = vadd.f32 %v198_v12, %v197_v63  ;;  %v222_v22 = vmul.f32 %v221_v46, %v56_v8  ;;  %v59_v61 = vld [vmem:[%s575_s18 + $0x38] sm:$0xff] }
  0x5b   : > { %v254_v24 = vmul.f32 %v428_v7, %v221_v46  ;;  %v245_v63 = vmul.f32 %v243_v48, %v503_v2 }
  0x5c   : > { %v177_v27 = vrot.slane %v176_v19, 1  ;;  %v200_v29 = vrot.slane %v199_v20, 2  ;;  %v223_v30 = vrot.slane %v222_v22, 4  ;;  %v157_v36 = vadd.f32 %v156_v13, %v131_v3 }
  0x5d   : > { %v260_v32 = vadd.f32 %v259_v14, %v254_v24  ;;  %v277_v14 = vmul.f32 %v275_v4, %v503_v2 }
  0x5e   : > { %v178_v37 = vadd.f32 %v177_v27, %v176_v19  ;;  %v201_v38 = vadd.f32 %v200_v29, %v199_v20  ;;  %v224_v39 = vadd.f32 %v223_v30, %v222_v22  ;;  %v330_v56 = vrot.slane %v157_v36, 7 }
  0x5f   : > { %v261_v31 = vmul.f32 %v260_v32, %v57_v26  ;;  %v286_v42 = vmul.f32 %v430_v25, %v260_v32  ;;  %v302_v25 = vmul.f32 %v300_v15, %v503_v2  ;;  %v325_v26 = vcombine.high %v275_v4, %v275_v4 }
  0x60   : > { %v202_v45 = vrot.slane %v201_v38, 1  ;;  %v225_v49 = vrot.slane %v224_v39, 2  ;;  %v182_v54 = vadd.f32 %v181_v28, %v178_v37  ;;  %v351_v10 = vsel %vm350_vm0, %v93_v52, %v330_v56 }
  0x61   : > { %v262_v53 = vrot.slane %v261_v31, 4  ;;  %v292_v60 = vadd.f32 %v291_v33, %v286_v42  ;;  %v327_v37 = vmul.f32 %v325_v26, %v503_v2 }
  0x62   : > { %v203_v55 = vadd.f32 %v202_v45, %v201_v38  ;;  %v226_v57 = vadd.f32 %v225_v49, %v224_v39  ;;  %v333_v9 = vrot.slane %v182_v54, 6 }
  0x63   : > { %v263_v40 = vadd.f32 %v262_v53, %v261_v31  ;;  %v293_v58 = vmul.f32 %v292_v60, %v58_v44  ;;  %v311_v59 = vmul.f32 %v432_v43, %v292_v60 }
  0x64   : > { %v207_v62 = vadd.f32 %v206_v47, %v203_v55  ;;  %v227_v6 = vrot.slane %v226_v57, 1  ;;  %v353_v21 = vsel %vm352_vm1, %v351_v10, %v333_v9 }
  0x65   : > { %v264_v7 = vrot.slane %v263_v40, 2  ;;  %v294_v8 = vrot.slane %v293_v58, 4  ;;  %v317_v3 = vadd.f32 %v316_v50, %v311_v59  }
  0x66   : > { %v228_v11 = vadd.f32 %v227_v6, %v226_v57  ;;  %v336_v16 = vrot.slane %v207_v62, 5 }
  0x67   : > { %v265_v12 = vadd.f32 %v264_v7, %v263_v40  ;;  %v295_v13 = vadd.f32 %v294_v8, %v293_v58  ;;  %v318_v46 = vmul.f32 %v317_v3, %v59_v61 }
  0x68   : > { %v246_v18 = vadd.f32 %v245_v63, %v228_v11  ;;  %v355_v30 = vsel %vm354_vm2, %v353_v21, %v336_v16 }
  0x69   : > { %v266_v19 = vrot.slane %v265_v12, 1  ;;  %v296_v20 = vrot.slane %v295_v13, 2  ;;  %v319_v17 = vrot.slane %v318_v46, 4 }
  0x6a   : > { %v339_v27 = vrot.slane %v246_v18, 4 }
  0x6b   : > { %v267_v22 = vadd.f32 %v266_v19, %v265_v12  ;;  %v297_v23 = vadd.f32 %v296_v20, %v295_v13  ;;  %v320_v24 = vadd.f32 %v319_v17, %v318_v46 }
  0x6c   : > { %v357_v41 = vsel %vm356_vm3, %v355_v30, %v339_v27 }
  0x6d   : > { %v278_v28 = vadd.f32 %v277_v14, %v267_v22  ;;  %v298_v29 = vrot.slane %v297_v23, 1  ;;  %v321_v51 = vrot.slane %v320_v24, 2 }
  0x6f   : > { %v299_v32 = vadd.f32 %v298_v29, %v297_v23  ;;  %v322_v33 = vadd.f32 %v321_v51, %v320_v24  ;;  %v342_v34 = vrot.slane %v278_v28, 3 }
  0x71   : > { %v303_v35 = vadd.f32 %v302_v25, %v299_v32  ;;  %v323_v36 = vrot.slane %v322_v33, 1  ;;  %v359_v31 = vsel %vm358_vm4, %v357_v41, %v342_v34 }
  0x73   : > { %v324_v38 = vadd.f32 %v323_v36, %v322_v33  ;;  %v345_v39 = vrot.slane %v303_v35, 2 }
  0x75   : > { %v328_v42 = vadd.f32 %v327_v37, %v324_v38  ;;  %v361_v43 = vsel %vm360_vm5, %v359_v31, %v345_v39 }
  0x76   :  { %33 = sbr.rel (!%p31_p0) target bundleno = 4 (0x4), region = 60 }
  0x77   : > { %v348_v44 = vrot.slane %v328_v42, 1 }
  0x79   : > { %v363_v45 = vsel %vm362_vm6, %v361_v43, %v348_v44 }
  0x7a   : > { %365 = vst [vmem:[%s364_s21] sm:$0xff] %v363_v45 }

</bundles_post_ra>
